<compile_context>
chip_gen: v7x
topology: tpu7x:2x2x1
jax: 0.10.0
libtpu: 0.0.40
codegen_flags: <defaults>
</compile_context>

<pallas_src>
import jax
import jax.numpy as jnp
from jax import lax
from jax.experimental import pallas as pl
from jax.experimental.pallas import tpu as pltpu

H = 128          # lstm_size
L = 4            # num_layers
VIN = 32         # len(characters)  (synthetic vocab)
VPAD = 128       # lane-padded output width for the fc head
B_TILE = 8       # batch tile = one sublane group


def lstm_fc_kernel(x_ref, wih0_ref, wihr_ref, whh_ref, b_ref, wfc_ref, bfc_ref,
                   out_ref, proj_ref, hseq_ref):
    """Layer-major stacked-LSTM + fc head.

    x_ref   : (T, Bt, VIN)   time-major input (unpadded lanes)
    wih0_ref: (VIN, 4H)      layer-0 W_ih^T
    wihr_ref: (L-1, H, 4H)   layers 1..L-1 W_ih^T
    whh_ref : (L, H, 4H)     W_hh^T per layer
    b_ref   : (L, 1, 4H)     b_ih + b_hh per layer (folded into projections)
    wfc_ref : (H, VPAD)      fc weight^T (zero-padded cols beyond VIN)
    bfc_ref : (1, VPAD)      fc bias (zero-padded)
    out_ref : (T, Bt, VPAD)  logits
    proj_ref: (T, Bt, 4H)    scratch: per-layer full-sequence input projection
    hseq_ref: (T, Bt, H)     scratch: current layer's output sequence
    """
    T, B, _ = x_ref.shape

    # ---- layer 0: whole-sequence input projection (single MXU matmul) ----
    x_flat = x_ref[...].reshape(T * B, VIN)
    proj_ref[...] = (
        jnp.dot(x_flat, wih0_ref[...], preferred_element_type=jnp.float32)
        + b_ref[0]
    ).reshape(T, B, 4 * H)

    # ---- layers (static unroll); only h @ W_hh on the serial critical path ----
    for l in range(L):
        if l > 0:
            h_flat = hseq_ref[...].reshape(T * B, H)
            proj_ref[...] = (
                jnp.dot(h_flat, wihr_ref[l - 1], preferred_element_type=jnp.float32)
                + b_ref[l]
            ).reshape(T, B, 4 * H)

        def step(t, carry, l=l):
            h, c = carry
            gates = proj_ref[t] + jnp.dot(
                h, whh_ref[l], preferred_element_type=jnp.float32)   # (Bt, 4H)
            i_g = jax.nn.sigmoid(gates[:, 0 * H:1 * H])
            f_g = jax.nn.sigmoid(gates[:, 1 * H:2 * H])
            g_g = jnp.tanh(gates[:, 2 * H:3 * H])
            o_g = jax.nn.sigmoid(gates[:, 3 * H:4 * H])
            c = f_g * c + i_g * g_g
            h = o_g * jnp.tanh(c)
            hseq_ref[t] = h
            return h, c

        zeros = jnp.zeros((B, H), jnp.float32)
        lax.fori_loop(0, T, step, (zeros, zeros), unroll=True)

    # ---- FC head: one lane-dense matmul over the whole sequence ----
    h_all = hseq_ref[...].reshape(T * B, H)
    out_ref[...] = (
        jnp.dot(h_all, wfc_ref[...], preferred_element_type=jnp.float32)
        + bfc_ref[...]
    ).reshape(T, B, VPAD).astype(out_ref.dtype)


@jax.jit
def model_forward(x, wih0, wihr, whh, b_comb, wfc, bfc):
    """x: (B, T, VIN) batch-first float32 -> logits (B, T, VIN)."""
    B, T, vin = x.shape
    # time-major; pad batch up to a full sublane tile (multiple of 8)
    x_tm = jnp.transpose(x, (1, 0, 2))                            # (T, B, VIN)
    B_pad = ((B + B_TILE - 1) // B_TILE) * B_TILE
    if B_pad != B:
        x_tm = jnp.pad(x_tm, ((0, 0), (0, B_pad - B), (0, 0)))    # (T, B_pad, VIN)

    grid = (B_pad // B_TILE,)

    out = pl.pallas_call(
        lstm_fc_kernel,
        out_shape=jax.ShapeDtypeStruct((T, B_pad, VPAD), jnp.float32),
        grid_spec=pltpu.PrefetchScalarGridSpec(
            num_scalar_prefetch=0,
            grid=grid,
            in_specs=[
                pl.BlockSpec((T, B_TILE, VIN), lambda i: (0, i, 0)),     # x
                pl.BlockSpec((VIN, 4 * H), lambda i: (0, 0)),            # wih layer0
                pl.BlockSpec((L - 1, H, 4 * H), lambda i: (0, 0, 0)),    # wih rest
                pl.BlockSpec((L, H, 4 * H), lambda i: (0, 0, 0)),        # whh
                pl.BlockSpec((L, 1, 4 * H), lambda i: (0, 0, 0)),        # biases
                pl.BlockSpec((H, VPAD), lambda i: (0, 0)),               # fc weight
                pl.BlockSpec((1, VPAD), lambda i: (0, 0)),               # fc bias
            ],
            out_specs=pl.BlockSpec((T, B_TILE, VPAD), lambda i: (0, i, 0)),
            scratch_shapes=[
                pltpu.VMEM((T, B_TILE, 4 * H), jnp.float32),   # proj
                pltpu.VMEM((T, B_TILE, H), jnp.float32),       # hseq
            ],
        ),
        compiler_params=pltpu.CompilerParams(
            dimension_semantics=("parallel",)),
    )(x_tm, wih0, wihr, whh, b_comb, wfc, bfc)

    logits = jnp.transpose(out[:, :B, :vin], (1, 0, 2))           # (B, T, VIN)
    return logits


def init_params(key):
    """Deterministic PyTorch-style init: U(-1/sqrt(H), 1/sqrt(H))."""
    bound = 1.0 / jnp.sqrt(jnp.float32(H))
    keys = jax.random.split(key, 4 * L + 2)
    u = lambda k, shape: jax.random.uniform(k, shape, jnp.float32, -bound, bound)

    raw = {"wih": [], "whh": [], "bih": [], "bhh": []}
    wih0 = None
    wihr, whh_t, b_comb = [], [], []
    for l in range(L):
        in_sz = VIN if l == 0 else H
        w_ih = u(keys[4 * l + 0], (4 * H, in_sz))
        w_hh = u(keys[4 * l + 1], (4 * H, H))
        b_ih = u(keys[4 * l + 2], (4 * H,))
        b_hh = u(keys[4 * l + 3], (4 * H,))
        raw["wih"].append(w_ih); raw["whh"].append(w_hh)
        raw["bih"].append(b_ih); raw["bhh"].append(b_hh)
        if l == 0:
            wih0 = w_ih.T                          # (VIN, 4H)
        else:
            wihr.append(w_ih.T)                    # (H, 4H)
        whh_t.append(w_hh.T)                       # (H, 4H)
        b_comb.append((b_ih + b_hh).reshape(1, 4 * H))
    wihr = jnp.stack(wihr)                         # (L-1, H, 4H)
    whh_t = jnp.stack(whh_t)                       # (L, H, 4H)
    b_comb = jnp.stack(b_comb)                     # (L, 1, 4H)

    fc_w = u(keys[-2], (VIN, H))
    fc_b = u(keys[-1], (VIN,))
    wfc = jnp.pad(fc_w.T, ((0, 0), (0, VPAD - VIN)))              # (H, VPAD)
    bfc = jnp.pad(fc_b, (0, VPAD - VIN)).reshape(1, VPAD)         # (1, VPAD)
    raw["fc_w"], raw["fc_b"] = fc_w, fc_b
    return (wih0, wihr, whh_t, b_comb, wfc, bfc), raw


def reference_forward(x, raw):
    """Pure-JAX reference of the PyTorch module (inference, dropout off)."""
    B, T, _ = x.shape
    h = [jnp.zeros((B, H), jnp.float32) for _ in range(L)]
    c = [jnp.zeros((B, H), jnp.float32) for _ in range(L)]
    outs = []
    for t in range(T):
        inp = x[:, t, :]
        for l in range(L):
            gates = (inp @ raw["wih"][l].T + h[l] @ raw["whh"][l].T
                     + raw["bih"][l] + raw["bhh"][l])
            i_g = jax.nn.sigmoid(gates[:, 0 * H:1 * H])
            f_g = jax.nn.sigmoid(gates[:, 1 * H:2 * H])
            g_g = jnp.tanh(gates[:, 2 * H:3 * H])
            o_g = jax.nn.sigmoid(gates[:, 3 * H:4 * H])
            c[l] = f_g * c[l] + i_g * g_g
            h[l] = o_g * jnp.tanh(c[l])
            inp = h[l]
        outs.append(inp)
    out = jnp.stack(outs, axis=1)                                 # (B, T, H)
    return out @ raw["fc_w"].T + raw["fc_b"]


if __name__ == "__main__":
    key = jax.random.PRNGKey(0)
    k_param, k_x = jax.random.split(key)

    params, raw = init_params(k_param)

    B, T = 2, 8
    x = jax.random.normal(k_x, (B, T, VIN), jnp.float32)          # (batch, seq, vocab)

    logits = model_forward(x, *params)
    logits = jax.block_until_ready(logits)

    ref = reference_forward(x, raw)
    assert logits.shape == (B, T, VIN)
    assert jnp.allclose(logits, ref, rtol=2e-4, atol=2e-4), "mismatch vs reference"

    print("KERNEL_OK")
</pallas_src>

<mosaic_0001>
module attributes {stable_mosaic.version = 11 : i64} {
  func.func @lstm_fc_kernel(%arg0: i32, %arg1: memref<8x8x32xf32, #tpu.memory_space<vmem>>, %arg2: memref<32x512xf32, #tpu.memory_space<vmem>>, %arg3: memref<3x128x512xf32, #tpu.memory_space<vmem>>, %arg4: memref<4x128x512xf32, #tpu.memory_space<vmem>>, %arg5: memref<4x1x512xf32, #tpu.memory_space<vmem>>, %arg6: memref<128x128xf32, #tpu.memory_space<vmem>>, %arg7: memref<1x128xf32, #tpu.memory_space<vmem>>, %arg8: memref<8x8x128xf32, #tpu.memory_space<vmem>>, %arg9: memref<8x8x512xf32, #tpu.memory_space<vmem>>, %arg10: memref<8x8x128xf32, #tpu.memory_space<vmem>>) attributes {dimension_semantics = [#tpu.dimension_semantics<parallel>], iteration_bounds = array<i64: 1>, scalar_prefetch = 0 : i64, scratch_operands = 2 : i64, tpu.core_type = #tpu.core_type<tc>, window_params = [{transform_indices = @transform_0, window_bounds = array<i64: 8, 8, 32>}, {pipeline_mode = #tpu.pipeline_mode<synchronous>, transform_indices = @transform_1, window_bounds = array<i64: 32, 512>}, {pipeline_mode = #tpu.pipeline_mode<synchronous>, transform_indices = @transform_2, window_bounds = array<i64: 3, 128, 512>}, {pipeline_mode = #tpu.pipeline_mode<synchronous>, transform_indices = @transform_3, window_bounds = array<i64: 4, 128, 512>}, {pipeline_mode = #tpu.pipeline_mode<synchronous>, transform_indices = @transform_4, window_bounds = array<i64: 4, 1, 512>}, {pipeline_mode = #tpu.pipeline_mode<synchronous>, transform_indices = @transform_5, window_bounds = array<i64: 128, 128>}, {pipeline_mode = #tpu.pipeline_mode<synchronous>, transform_indices = @transform_6, window_bounds = array<i64: 1, 128>}, {transform_indices = @transform_7, window_bounds = array<i64: 8, 8, 128>}]} {
    %c0 = arith.constant 0 : index
    %c0_0 = arith.constant 0 : index
    %c0_1 = arith.constant 0 : index
    %0 = vector.load %arg1[%c0, %c0_0, %c0_1] : memref<8x8x32xf32, #tpu.memory_space<vmem>>, vector<8x8x32xf32>
    %1 = vector.shape_cast %0 : vector<8x8x32xf32> to vector<64x32xf32>
    %c0_2 = arith.constant 0 : index
    %c0_3 = arith.constant 0 : index
    %2 = vector.load %arg2[%c0_2, %c0_3] : memref<32x512xf32, #tpu.memory_space<vmem>>, vector<32x512xf32>
    %cst = arith.constant dense<0.000000e+00> : vector<64x512xf32>
    %3 = tpu.matmul %1, %2, %cst {dimension_numbers = #tpu.dot_dimension_numbers<[1], [0], [0], [1], [0, 0, 1, 1], [], []>} : vector<64x32xf32>, vector<32x512xf32>, vector<64x512xf32> -> vector<64x512xf32>
    %c0_4 = arith.constant 0 : index
    %c0_5 = arith.constant 0 : index
    %c0_6 = arith.constant 0 : index
    %4 = vector.load %arg5[%c0_4, %c0_5, %c0_6] : memref<4x1x512xf32, #tpu.memory_space<vmem>>, vector<1x1x512xf32>
    %5 = vector.shape_cast %4 : vector<1x1x512xf32> to vector<1x512xf32>
    %6 = vector.broadcast %5 : vector<1x512xf32> to vector<64x512xf32>
    %7 = arith.addf %3, %6 : vector<64x512xf32>
    %8 = vector.shape_cast %7 : vector<64x512xf32> to vector<8x8x512xf32>
    %c0_7 = arith.constant 0 : index
    %c0_8 = arith.constant 0 : index
    %c0_9 = arith.constant 0 : index
    %9 = vector.load %arg9[%c0_7, %c0_8, %c0_9] : memref<8x8x512xf32, #tpu.memory_space<vmem>>, vector<8x8x512xf32>
    tpu.vector_store %arg9[%c0_7, %c0_8, %c0_9], %8 {strides = array<i32>} : memref<8x8x512xf32, #tpu.memory_space<vmem>>, vector<8x8x512xf32>,
    %cst_10 = arith.constant 0.000000e+00 : f32
    %10 = vector.broadcast %cst_10 : f32 to vector<8x128xf32>
    %c0_i32 = arith.constant 0 : i32
    %11 = arith.index_cast %c0_i32 : i32 to index
    %c0_11 = arith.constant 0 : index
    %c0_12 = arith.constant 0 : index
    %12 = vector.load %arg9[%11, %c0_11, %c0_12] : memref<8x8x512xf32, #tpu.memory_space<vmem>>, vector<1x8x512xf32>
    %13 = vector.shape_cast %12 : vector<1x8x512xf32> to vector<8x512xf32>
    %c0_13 = arith.constant 0 : index
    %c0_14 = arith.constant 0 : index
    %c0_15 = arith.constant 0 : index
    %14 = vector.load %arg4[%c0_13, %c0_14, %c0_15] : memref<4x128x512xf32, #tpu.memory_space<vmem>>, vector<1x128x512xf32>
    %15 = vector.shape_cast %14 : vector<1x128x512xf32> to vector<128x512xf32>
    %cst_16 = arith.constant dense<0.000000e+00> : vector<8x512xf32>
    %16 = tpu.matmul %10, %15, %cst_16 {dimension_numbers = #tpu.dot_dimension_numbers<[1], [0], [0], [1], [0, 0, 1, 1], [], []>} : vector<8x128xf32>, vector<128x512xf32>, vector<8x512xf32> -> vector<8x512xf32>
    %17 = arith.addf %13, %16 : vector<8x512xf32>
    %18 = vector.extract_strided_slice %17 {offsets = [0, 0], sizes = [8, 128], strides = [1, 1]} : vector<8x512xf32> to vector<8x128xf32>
    %19 = arith.negf %18 : vector<8x128xf32>
    %20 = math.exp %19 : vector<8x128xf32>
    %cst_17 = arith.constant 1.000000e+00 : f32
    %21 = vector.broadcast %cst_17 : f32 to vector<8x128xf32>
    %22 = arith.addf %21, %20 : vector<8x128xf32>
    %23 = arith.divf %21, %22 : vector<8x128xf32>
    %24 = vector.extract_strided_slice %17 {offsets = [0, 128], sizes = [8, 128], strides = [1, 1]} : vector<8x512xf32> to vector<8x128xf32>
    %25 = arith.negf %24 : vector<8x128xf32>
    %26 = math.exp %25 : vector<8x128xf32>
    %cst_18 = arith.constant 1.000000e+00 : f32
    %27 = vector.broadcast %cst_18 : f32 to vector<8x128xf32>
    %28 = arith.addf %27, %26 : vector<8x128xf32>
    %29 = arith.divf %27, %28 : vector<8x128xf32>
    %30 = vector.extract_strided_slice %17 {offsets = [0, 256], sizes = [8, 128], strides = [1, 1]} : vector<8x512xf32> to vector<8x128xf32>
    %31 = math.tanh %30 : vector<8x128xf32>
    %32 = vector.extract_strided_slice %17 {offsets = [0, 384], sizes = [8, 128], strides = [1, 1]} : vector<8x512xf32> to vector<8x128xf32>
    %33 = arith.negf %32 : vector<8x128xf32>
    %34 = math.exp %33 : vector<8x128xf32>
    %cst_19 = arith.constant 1.000000e+00 : f32
    %35 = vector.broadcast %cst_19 : f32 to vector<8x128xf32>
    %36 = arith.addf %35, %34 : vector<8x128xf32>
    %37 = arith.divf %35, %36 : vector<8x128xf32>
    %38 = arith.mulf %29, %10 : vector<8x128xf32>
    %39 = arith.mulf %23, %31 : vector<8x128xf32>
    %40 = arith.addf %38, %39 : vector<8x128xf32>
    %41 = math.tanh %40 : vector<8x128xf32>
    %42 = arith.mulf %37, %41 : vector<8x128xf32>
    %43 = arith.index_cast %c0_i32 : i32 to index
    %c0_20 = arith.constant 0 : index
    %c0_21 = arith.constant 0 : index
    %44 = vector.load %arg10[%43, %c0_20, %c0_21] : memref<8x8x128xf32, #tpu.memory_space<vmem>>, vector<1x8x128xf32>
    %45 = vector.shape_cast %44 : vector<1x8x128xf32> to vector<8x128xf32>
    %46 = vector.shape_cast %42 : vector<8x128xf32> to vector<1x8x128xf32>
    tpu.vector_store %arg10[%43, %c0_20, %c0_21], %46 {strides = array<i32>} : memref<8x8x128xf32, #tpu.memory_space<vmem>>, vector<1x8x128xf32>,
    %c1_i32 = arith.constant 1 : i32
    %47 = arith.index_cast %c1_i32 : i32 to index
    %c0_22 = arith.constant 0 : index
    %c0_23 = arith.constant 0 : index
    %48 = vector.load %arg9[%47, %c0_22, %c0_23] : memref<8x8x512xf32, #tpu.memory_space<vmem>>, vector<1x8x512xf32>
    %49 = vector.shape_cast %48 : vector<1x8x512xf32> to vector<8x512xf32>
    %c0_24 = arith.constant 0 : index
    %c0_25 = arith.constant 0 : index
    %c0_26 = arith.constant 0 : index
    %50 = vector.load %arg4[%c0_24, %c0_25, %c0_26] : memref<4x128x512xf32, #tpu.memory_space<vmem>>, vector<1x128x512xf32>
    %51 = vector.shape_cast %50 : vector<1x128x512xf32> to vector<128x512xf32>
    %cst_27 = arith.constant dense<0.000000e+00> : vector<8x512xf32>
    %52 = tpu.matmul %42, %51, %cst_27 {dimension_numbers = #tpu.dot_dimension_numbers<[1], [0], [0], [1], [0, 0, 1, 1], [], []>} : vector<8x128xf32>, vector<128x512xf32>, vector<8x512xf32> -> vector<8x512xf32>
    %53 = arith.addf %49, %52 : vector<8x512xf32>
    %54 = vector.extract_strided_slice %53 {offsets = [0, 0], sizes = [8, 128], strides = [1, 1]} : vector<8x512xf32> to vector<8x128xf32>
    %55 = arith.negf %54 : vector<8x128xf32>
    %56 = math.exp %55 : vector<8x128xf32>
    %cst_28 = arith.constant 1.000000e+00 : f32
    %57 = vector.broadcast %cst_28 : f32 to vector<8x128xf32>
    %58 = arith.addf %57, %56 : vector<8x128xf32>
    %59 = arith.divf %57, %58 : vector<8x128xf32>
    %60 = vector.extract_strided_slice %53 {offsets = [0, 128], sizes = [8, 128], strides = [1, 1]} : vector<8x512xf32> to vector<8x128xf32>
    %61 = arith.negf %60 : vector<8x128xf32>
    %62 = math.exp %61 : vector<8x128xf32>
    %cst_29 = arith.constant 1.000000e+00 : f32
    %63 = vector.broadcast %cst_29 : f32 to vector<8x128xf32>
    %64 = arith.addf %63, %62 : vector<8x128xf32>
    %65 = arith.divf %63, %64 : vector<8x128xf32>
    %66 = vector.extract_strided_slice %53 {offsets = [0, 256], sizes = [8, 128], strides = [1, 1]} : vector<8x512xf32> to vector<8x128xf32>
    %67 = math.tanh %66 : vector<8x128xf32>
    %68 = vector.extract_strided_slice %53 {offsets = [0, 384], sizes = [8, 128], strides = [1, 1]} : vector<8x512xf32> to vector<8x128xf32>
    %69 = arith.negf %68 : vector<8x128xf32>
    %70 = math.exp %69 : vector<8x128xf32>
    %cst_30 = arith.constant 1.000000e+00 : f32
    %71 = vector.broadcast %cst_30 : f32 to vector<8x128xf32>
    %72 = arith.addf %71, %70 : vector<8x128xf32>
    %73 = arith.divf %71, %72 : vector<8x128xf32>
    %74 = arith.mulf %65, %40 : vector<8x128xf32>
    %75 = arith.mulf %59, %67 : vector<8x128xf32>
    %76 = arith.addf %74, %75 : vector<8x128xf32>
    %77 = math.tanh %76 : vector<8x128xf32>
    %78 = arith.mulf %73, %77 : vector<8x128xf32>
    %79 = arith.index_cast %c1_i32 : i32 to index
    %c0_31 = arith.constant 0 : index
    %c0_32 = arith.constant 0 : index
    %80 = vector.load %arg10[%79, %c0_31, %c0_32] : memref<8x8x128xf32, #tpu.memory_space<vmem>>, vector<1x8x128xf32>
    %81 = vector.shape_cast %80 : vector<1x8x128xf32> to vector<8x128xf32>
    %82 = vector.shape_cast %78 : vector<8x128xf32> to vector<1x8x128xf32>
    tpu.vector_store %arg10[%79, %c0_31, %c0_32], %82 {strides = array<i32>} : memref<8x8x128xf32, #tpu.memory_space<vmem>>, vector<1x8x128xf32>,
    %c2_i32 = arith.constant 2 : i32
    %83 = arith.index_cast %c2_i32 : i32 to index
    %c0_33 = arith.constant 0 : index
    %c0_34 = arith.constant 0 : index
    %84 = vector.load %arg9[%83, %c0_33, %c0_34] : memref<8x8x512xf32, #tpu.memory_space<vmem>>, vector<1x8x512xf32>
    %85 = vector.shape_cast %84 : vector<1x8x512xf32> to vector<8x512xf32>
    %c0_35 = arith.constant 0 : index
    %c0_36 = arith.constant 0 : index
    %c0_37 = arith.constant 0 : index
    %86 = vector.load %arg4[%c0_35, %c0_36, %c0_37] : memref<4x128x512xf32, #tpu.memory_space<vmem>>, vector<1x128x512xf32>
    %87 = vector.shape_cast %86 : vector<1x128x512xf32> to vector<128x512xf32>
    %cst_38 = arith.constant dense<0.000000e+00> : vector<8x512xf32>
    %88 = tpu.matmul %78, %87, %cst_38 {dimension_numbers = #tpu.dot_dimension_numbers<[1], [0], [0], [1], [0, 0, 1, 1], [], []>} : vector<8x128xf32>, vector<128x512xf32>, vector<8x512xf32> -> vector<8x512xf32>
    %89 = arith.addf %85, %88 : vector<8x512xf32>
    %90 = vector.extract_strided_slice %89 {offsets = [0, 0], sizes = [8, 128], strides = [1, 1]} : vector<8x512xf32> to vector<8x128xf32>
    %91 = arith.negf %90 : vector<8x128xf32>
    %92 = math.exp %91 : vector<8x128xf32>
    %cst_39 = arith.constant 1.000000e+00 : f32
    %93 = vector.broadcast %cst_39 : f32 to vector<8x128xf32>
    %94 = arith.addf %93, %92 : vector<8x128xf32>
    %95 = arith.divf %93, %94 : vector<8x128xf32>
    %96 = vector.extract_strided_slice %89 {offsets = [0, 128], sizes = [8, 128], strides = [1, 1]} : vector<8x512xf32> to vector<8x128xf32>
    %97 = arith.negf %96 : vector<8x128xf32>
    %98 = math.exp %97 : vector<8x128xf32>
    %cst_40 = arith.constant 1.000000e+00 : f32
    %99 = vector.broadcast %cst_40 : f32 to vector<8x128xf32>
    %100 = arith.addf %99, %98 : vector<8x128xf32>
    %101 = arith.divf %99, %100 : vector<8x128xf32>
    %102 = vector.extract_strided_slice %89 {offsets = [0, 256], sizes = [8, 128], strides = [1, 1]} : vector<8x512xf32> to vector<8x128xf32>
    %103 = math.tanh %102 : vector<8x128xf32>
    %104 = vector.extract_strided_slice %89 {offsets = [0, 384], sizes = [8, 128], strides = [1, 1]} : vector<8x512xf32> to vector<8x128xf32>
    %105 = arith.negf %104 : vector<8x128xf32>
    %106 = math.exp %105 : vector<8x128xf32>
    %cst_41 = arith.constant 1.000000e+00 : f32
    %107 = vector.broadcast %cst_41 : f32 to vector<8x128xf32>
    %108 = arith.addf %107, %106 : vector<8x128xf32>
    %109 = arith.divf %107, %108 : vector<8x128xf32>
    %110 = arith.mulf %101, %76 : vector<8x128xf32>
    %111 = arith.mulf %95, %103 : vector<8x128xf32>
    %112 = arith.addf %110, %111 : vector<8x128xf32>
    %113 = math.tanh %112 : vector<8x128xf32>
    %114 = arith.mulf %109, %113 : vector<8x128xf32>
    %115 = arith.index_cast %c2_i32 : i32 to index
    %c0_42 = arith.constant 0 : index
    %c0_43 = arith.constant 0 : index
    %116 = vector.load %arg10[%115, %c0_42, %c0_43] : memref<8x8x128xf32, #tpu.memory_space<vmem>>, vector<1x8x128xf32>
    %117 = vector.shape_cast %116 : vector<1x8x128xf32> to vector<8x128xf32>
    %118 = vector.shape_cast %114 : vector<8x128xf32> to vector<1x8x128xf32>
    tpu.vector_store %arg10[%115, %c0_42, %c0_43], %118 {strides = array<i32>} : memref<8x8x128xf32, #tpu.memory_space<vmem>>, vector<1x8x128xf32>,
    %c3_i32 = arith.constant 3 : i32
    %119 = arith.index_cast %c3_i32 : i32 to index
    %c0_44 = arith.constant 0 : index
    %c0_45 = arith.constant 0 : index
    %120 = vector.load %arg9[%119, %c0_44, %c0_45] : memref<8x8x512xf32, #tpu.memory_space<vmem>>, vector<1x8x512xf32>
    %121 = vector.shape_cast %120 : vector<1x8x512xf32> to vector<8x512xf32>
    %c0_46 = arith.constant 0 : index
    %c0_47 = arith.constant 0 : index
    %c0_48 = arith.constant 0 : index
    %122 = vector.load %arg4[%c0_46, %c0_47, %c0_48] : memref<4x128x512xf32, #tpu.memory_space<vmem>>, vector<1x128x512xf32>
    %123 = vector.shape_cast %122 : vector<1x128x512xf32> to vector<128x512xf32>
    %cst_49 = arith.constant dense<0.000000e+00> : vector<8x512xf32>
    %124 = tpu.matmul %114, %123, %cst_49 {dimension_numbers = #tpu.dot_dimension_numbers<[1], [0], [0], [1], [0, 0, 1, 1], [], []>} : vector<8x128xf32>, vector<128x512xf32>, vector<8x512xf32> -> vector<8x512xf32>
    %125 = arith.addf %121, %124 : vector<8x512xf32>
    %126 = vector.extract_strided_slice %125 {offsets = [0, 0], sizes = [8, 128], strides = [1, 1]} : vector<8x512xf32> to vector<8x128xf32>
    %127 = arith.negf %126 : vector<8x128xf32>
    %128 = math.exp %127 : vector<8x128xf32>
    %cst_50 = arith.constant 1.000000e+00 : f32
    %129 = vector.broadcast %cst_50 : f32 to vector<8x128xf32>
    %130 = arith.addf %129, %128 : vector<8x128xf32>
    %131 = arith.divf %129, %130 : vector<8x128xf32>
    %132 = vector.extract_strided_slice %125 {offsets = [0, 128], sizes = [8, 128], strides = [1, 1]} : vector<8x512xf32> to vector<8x128xf32>
    %133 = arith.negf %132 : vector<8x128xf32>
    %134 = math.exp %133 : vector<8x128xf32>
    %cst_51 = arith.constant 1.000000e+00 : f32
    %135 = vector.broadcast %cst_51 : f32 to vector<8x128xf32>
    %136 = arith.addf %135, %134 : vector<8x128xf32>
    %137 = arith.divf %135, %136 : vector<8x128xf32>
    %138 = vector.extract_strided_slice %125 {offsets = [0, 256], sizes = [8, 128], strides = [1, 1]} : vector<8x512xf32> to vector<8x128xf32>
    %139 = math.tanh %138 : vector<8x128xf32>
    %140 = vector.extract_strided_slice %125 {offsets = [0, 384], sizes = [8, 128], strides = [1, 1]} : vector<8x512xf32> to vector<8x128xf32>
    %141 = arith.negf %140 : vector<8x128xf32>
    %142 = math.exp %141 : vector<8x128xf32>
    %cst_52 = arith.constant 1.000000e+00 : f32
    %143 = vector.broadcast %cst_52 : f32 to vector<8x128xf32>
    %144 = arith.addf %143, %142 : vector<8x128xf32>
    %145 = arith.divf %143, %144 : vector<8x128xf32>
    %146 = arith.mulf %137, %112 : vector<8x128xf32>
    %147 = arith.mulf %131, %139 : vector<8x128xf32>
    %148 = arith.addf %146, %147 : vector<8x128xf32>
    %149 = math.tanh %148 : vector<8x128xf32>
    %150 = arith.mulf %145, %149 : vector<8x128xf32>
    %151 = arith.index_cast %c3_i32 : i32 to index
    %c0_53 = arith.constant 0 : index
    %c0_54 = arith.constant 0 : index
    %152 = vector.load %arg10[%151, %c0_53, %c0_54] : memref<8x8x128xf32, #tpu.memory_space<vmem>>, vector<1x8x128xf32>
    %153 = vector.shape_cast %152 : vector<1x8x128xf32> to vector<8x128xf32>
    %154 = vector.shape_cast %150 : vector<8x128xf32> to vector<1x8x128xf32>
    tpu.vector_store %arg10[%151, %c0_53, %c0_54], %154 {strides = array<i32>} : memref<8x8x128xf32, #tpu.memory_space<vmem>>, vector<1x8x128xf32>,
    %c4_i32 = arith.constant 4 : i32
    %155 = arith.index_cast %c4_i32 : i32 to index
    %c0_55 = arith.constant 0 : index
    %c0_56 = arith.constant 0 : index
    %156 = vector.load %arg9[%155, %c0_55, %c0_56] : memref<8x8x512xf32, #tpu.memory_space<vmem>>, vector<1x8x512xf32>
    %157 = vector.shape_cast %156 : vector<1x8x512xf32> to vector<8x512xf32>
    %c0_57 = arith.constant 0 : index
    %c0_58 = arith.constant 0 : index
    %c0_59 = arith.constant 0 : index
    %158 = vector.load %arg4[%c0_57, %c0_58, %c0_59] : memref<4x128x512xf32, #tpu.memory_space<vmem>>, vector<1x128x512xf32>
    %159 = vector.shape_cast %158 : vector<1x128x512xf32> to vector<128x512xf32>
    %cst_60 = arith.constant dense<0.000000e+00> : vector<8x512xf32>
    %160 = tpu.matmul %150, %159, %cst_60 {dimension_numbers = #tpu.dot_dimension_numbers<[1], [0], [0], [1], [0, 0, 1, 1], [], []>} : vector<8x128xf32>, vector<128x512xf32>, vector<8x512xf32> -> vector<8x512xf32>
    %161 = arith.addf %157, %160 : vector<8x512xf32>
    %162 = vector.extract_strided_slice %161 {offsets = [0, 0], sizes = [8, 128], strides = [1, 1]} : vector<8x512xf32> to vector<8x128xf32>
    %163 = arith.negf %162 : vector<8x128xf32>
    %164 = math.exp %163 : vector<8x128xf32>
    %cst_61 = arith.constant 1.000000e+00 : f32
    %165 = vector.broadcast %cst_61 : f32 to vector<8x128xf32>
    %166 = arith.addf %165, %164 : vector<8x128xf32>
    %167 = arith.divf %165, %166 : vector<8x128xf32>
    %168 = vector.extract_strided_slice %161 {offsets = [0, 128], sizes = [8, 128], strides = [1, 1]} : vector<8x512xf32> to vector<8x128xf32>
    %169 = arith.negf %168 : vector<8x128xf32>
    %170 = math.exp %169 : vector<8x128xf32>
    %cst_62 = arith.constant 1.000000e+00 : f32
    %171 = vector.broadcast %cst_62 : f32 to vector<8x128xf32>
    %172 = arith.addf %171, %170 : vector<8x128xf32>
    %173 = arith.divf %171, %172 : vector<8x128xf32>
    %174 = vector.extract_strided_slice %161 {offsets = [0, 256], sizes = [8, 128], strides = [1, 1]} : vector<8x512xf32> to vector<8x128xf32>
    %175 = math.tanh %174 : vector<8x128xf32>
    %176 = vector.extract_strided_slice %161 {offsets = [0, 384], sizes = [8, 128], strides = [1, 1]} : vector<8x512xf32> to vector<8x128xf32>
    %177 = arith.negf %176 : vector<8x128xf32>
    %178 = math.exp %177 : vector<8x128xf32>
    %cst_63 = arith.constant 1.000000e+00 : f32
    %179 = vector.broadcast %cst_63 : f32 to vector<8x128xf32>
    %180 = arith.addf %179, %178 : vector<8x128xf32>
    %181 = arith.divf %179, %180 : vector<8x128xf32>
    %182 = arith.mulf %173, %148 : vector<8x128xf32>
    %183 = arith.mulf %167, %175 : vector<8x128xf32>
    %184 = arith.addf %182, %183 : vector<8x128xf32>
    %185 = math.tanh %184 : vector<8x128xf32>
    %186 = arith.mulf %181, %185 : vector<8x128xf32>
    %187 = arith.index_cast %c4_i32 : i32 to index
    %c0_64 = arith.constant 0 : index
    %c0_65 = arith.constant 0 : index
    %188 = vector.load %arg10[%187, %c0_64, %c0_65] : memref<8x8x128xf32, #tpu.memory_space<vmem>>, vector<1x8x128xf32>
    %189 = vector.shape_cast %188 : vector<1x8x128xf32> to vector<8x128xf32>
    %190 = vector.shape_cast %186 : vector<8x128xf32> to vector<1x8x128xf32>
    tpu.vector_store %arg10[%187, %c0_64, %c0_65], %190 {strides = array<i32>} : memref<8x8x128xf32, #tpu.memory_space<vmem>>, vector<1x8x128xf32>,
    %c5_i32 = arith.constant 5 : i32
    %191 = arith.index_cast %c5_i32 : i32 to index
    %c0_66 = arith.constant 0 : index
    %c0_67 = arith.constant 0 : index
    %192 = vector.load %arg9[%191, %c0_66, %c0_67] : memref<8x8x512xf32, #tpu.memory_space<vmem>>, vector<1x8x512xf32>
    %193 = vector.shape_cast %192 : vector<1x8x512xf32> to vector<8x512xf32>
    %c0_68 = arith.constant 0 : index
    %c0_69 = arith.constant 0 : index
    %c0_70 = arith.constant 0 : index
    %194 = vector.load %arg4[%c0_68, %c0_69, %c0_70] : memref<4x128x512xf32, #tpu.memory_space<vmem>>, vector<1x128x512xf32>
    %195 = vector.shape_cast %194 : vector<1x128x512xf32> to vector<128x512xf32>
    %cst_71 = arith.constant dense<0.000000e+00> : vector<8x512xf32>
    %196 = tpu.matmul %186, %195, %cst_71 {dimension_numbers = #tpu.dot_dimension_numbers<[1], [0], [0], [1], [0, 0, 1, 1], [], []>} : vector<8x128xf32>, vector<128x512xf32>, vector<8x512xf32> -> vector<8x512xf32>
    %197 = arith.addf %193, %196 : vector<8x512xf32>
    %198 = vector.extract_strided_slice %197 {offsets = [0, 0], sizes = [8, 128], strides = [1, 1]} : vector<8x512xf32> to vector<8x128xf32>
    %199 = arith.negf %198 : vector<8x128xf32>
    %200 = math.exp %199 : vector<8x128xf32>
    %cst_72 = arith.constant 1.000000e+00 : f32
    %201 = vector.broadcast %cst_72 : f32 to vector<8x128xf32>
    %202 = arith.addf %201, %200 : vector<8x128xf32>
    %203 = arith.divf %201, %202 : vector<8x128xf32>
    %204 = vector.extract_strided_slice %197 {offsets = [0, 128], sizes = [8, 128], strides = [1, 1]} : vector<8x512xf32> to vector<8x128xf32>
    %205 = arith.negf %204 : vector<8x128xf32>
    %206 = math.exp %205 : vector<8x128xf32>
    %cst_73 = arith.constant 1.000000e+00 : f32
    %207 = vector.broadcast %cst_73 : f32 to vector<8x128xf32>
    %208 = arith.addf %207, %206 : vector<8x128xf32>
    %209 = arith.divf %207, %208 : vector<8x128xf32>
    %210 = vector.extract_strided_slice %197 {offsets = [0, 256], sizes = [8, 128], strides = [1, 1]} : vector<8x512xf32> to vector<8x128xf32>
    %211 = math.tanh %210 : vector<8x128xf32>
    %212 = vector.extract_strided_slice %197 {offsets = [0, 384], sizes = [8, 128], strides = [1, 1]} : vector<8x512xf32> to vector<8x128xf32>
    %213 = arith.negf %212 : vector<8x128xf32>
    %214 = math.exp %213 : vector<8x128xf32>
    %cst_74 = arith.constant 1.000000e+00 : f32
    %215 = vector.broadcast %cst_74 : f32 to vector<8x128xf32>
    %216 = arith.addf %215, %214 : vector<8x128xf32>
    %217 = arith.divf %215, %216 : vector<8x128xf32>
    %218 = arith.mulf %209, %184 : vector<8x128xf32>
    %219 = arith.mulf %203, %211 : vector<8x128xf32>
    %220 = arith.addf %218, %219 : vector<8x128xf32>
    %221 = math.tanh %220 : vector<8x128xf32>
    %222 = arith.mulf %217, %221 : vector<8x128xf32>
    %223 = arith.index_cast %c5_i32 : i32 to index
    %c0_75 = arith.constant 0 : index
    %c0_76 = arith.constant 0 : index
    %224 = vector.load %arg10[%223, %c0_75, %c0_76] : memref<8x8x128xf32, #tpu.memory_space<vmem>>, vector<1x8x128xf32>
    %225 = vector.shape_cast %224 : vector<1x8x128xf32> to vector<8x128xf32>
    %226 = vector.shape_cast %222 : vector<8x128xf32> to vector<1x8x128xf32>
    tpu.vector_store %arg10[%223, %c0_75, %c0_76], %226 {strides = array<i32>} : memref<8x8x128xf32, #tpu.memory_space<vmem>>, vector<1x8x128xf32>,
    %c6_i32 = arith.constant 6 : i32
    %227 = arith.index_cast %c6_i32 : i32 to index
    %c0_77 = arith.constant 0 : index
    %c0_78 = arith.constant 0 : index
    %228 = vector.load %arg9[%227, %c0_77, %c0_78] : memref<8x8x512xf32, #tpu.memory_space<vmem>>, vector<1x8x512xf32>
    %229 = vector.shape_cast %228 : vector<1x8x512xf32> to vector<8x512xf32>
    %c0_79 = arith.constant 0 : index
    %c0_80 = arith.constant 0 : index
    %c0_81 = arith.constant 0 : index
    %230 = vector.load %arg4[%c0_79, %c0_80, %c0_81] : memref<4x128x512xf32, #tpu.memory_space<vmem>>, vector<1x128x512xf32>
    %231 = vector.shape_cast %230 : vector<1x128x512xf32> to vector<128x512xf32>
    %cst_82 = arith.constant dense<0.000000e+00> : vector<8x512xf32>
    %232 = tpu.matmul %222, %231, %cst_82 {dimension_numbers = #tpu.dot_dimension_numbers<[1], [0], [0], [1], [0, 0, 1, 1], [], []>} : vector<8x128xf32>, vector<128x512xf32>, vector<8x512xf32> -> vector<8x512xf32>
    %233 = arith.addf %229, %232 : vector<8x512xf32>
    %234 = vector.extract_strided_slice %233 {offsets = [0, 0], sizes = [8, 128], strides = [1, 1]} : vector<8x512xf32> to vector<8x128xf32>
    %235 = arith.negf %234 : vector<8x128xf32>
    %236 = math.exp %235 : vector<8x128xf32>
    %cst_83 = arith.constant 1.000000e+00 : f32
    %237 = vector.broadcast %cst_83 : f32 to vector<8x128xf32>
    %238 = arith.addf %237, %236 : vector<8x128xf32>
    %239 = arith.divf %237, %238 : vector<8x128xf32>
    %240 = vector.extract_strided_slice %233 {offsets = [0, 128], sizes = [8, 128], strides = [1, 1]} : vector<8x512xf32> to vector<8x128xf32>
    %241 = arith.negf %240 : vector<8x128xf32>
    %242 = math.exp %241 : vector<8x128xf32>
    %cst_84 = arith.constant 1.000000e+00 : f32
    %243 = vector.broadcast %cst_84 : f32 to vector<8x128xf32>
    %244 = arith.addf %243, %242 : vector<8x128xf32>
    %245 = arith.divf %243, %244 : vector<8x128xf32>
    %246 = vector.extract_strided_slice %233 {offsets = [0, 256], sizes = [8, 128], strides = [1, 1]} : vector<8x512xf32> to vector<8x128xf32>
    %247 = math.tanh %246 : vector<8x128xf32>
    %248 = vector.extract_strided_slice %233 {offsets = [0, 384], sizes = [8, 128], strides = [1, 1]} : vector<8x512xf32> to vector<8x128xf32>
    %249 = arith.negf %248 : vector<8x128xf32>
    %250 = math.exp %249 : vector<8x128xf32>
    %cst_85 = arith.constant 1.000000e+00 : f32
    %251 = vector.broadcast %cst_85 : f32 to vector<8x128xf32>
    %252 = arith.addf %251, %250 : vector<8x128xf32>
    %253 = arith.divf %251, %252 : vector<8x128xf32>
    %254 = arith.mulf %245, %220 : vector<8x128xf32>
    %255 = arith.mulf %239, %247 : vector<8x128xf32>
    %256 = arith.addf %254, %255 : vector<8x128xf32>
    %257 = math.tanh %256 : vector<8x128xf32>
    %258 = arith.mulf %253, %257 : vector<8x128xf32>
    %259 = arith.index_cast %c6_i32 : i32 to index
    %c0_86 = arith.constant 0 : index
    %c0_87 = arith.constant 0 : index
    %260 = vector.load %arg10[%259, %c0_86, %c0_87] : memref<8x8x128xf32, #tpu.memory_space<vmem>>, vector<1x8x128xf32>
    %261 = vector.shape_cast %260 : vector<1x8x128xf32> to vector<8x128xf32>
    %262 = vector.shape_cast %258 : vector<8x128xf32> to vector<1x8x128xf32>
    tpu.vector_store %arg10[%259, %c0_86, %c0_87], %262 {strides = array<i32>} : memref<8x8x128xf32, #tpu.memory_space<vmem>>, vector<1x8x128xf32>,
    %c7_i32 = arith.constant 7 : i32
    %263 = arith.index_cast %c7_i32 : i32 to index
    %c0_88 = arith.constant 0 : index
    %c0_89 = arith.constant 0 : index
    %264 = vector.load %arg9[%263, %c0_88, %c0_89] : memref<8x8x512xf32, #tpu.memory_space<vmem>>, vector<1x8x512xf32>
    %265 = vector.shape_cast %264 : vector<1x8x512xf32> to vector<8x512xf32>
    %c0_90 = arith.constant 0 : index
    %c0_91 = arith.constant 0 : index
    %c0_92 = arith.constant 0 : index
    %266 = vector.load %arg4[%c0_90, %c0_91, %c0_92] : memref<4x128x512xf32, #tpu.memory_space<vmem>>, vector<1x128x512xf32>
    %267 = vector.shape_cast %266 : vector<1x128x512xf32> to vector<128x512xf32>
    %cst_93 = arith.constant dense<0.000000e+00> : vector<8x512xf32>
    %268 = tpu.matmul %258, %267, %cst_93 {dimension_numbers = #tpu.dot_dimension_numbers<[1], [0], [0], [1], [0, 0, 1, 1], [], []>} : vector<8x128xf32>, vector<128x512xf32>, vector<8x512xf32> -> vector<8x512xf32>
    %269 = arith.addf %265, %268 : vector<8x512xf32>
    %270 = vector.extract_strided_slice %269 {offsets = [0, 0], sizes = [8, 128], strides = [1, 1]} : vector<8x512xf32> to vector<8x128xf32>
    %271 = arith.negf %270 : vector<8x128xf32>
    %272 = math.exp %271 : vector<8x128xf32>
    %cst_94 = arith.constant 1.000000e+00 : f32
    %273 = vector.broadcast %cst_94 : f32 to vector<8x128xf32>
    %274 = arith.addf %273, %272 : vector<8x128xf32>
    %275 = arith.divf %273, %274 : vector<8x128xf32>
    %276 = vector.extract_strided_slice %269 {offsets = [0, 128], sizes = [8, 128], strides = [1, 1]} : vector<8x512xf32> to vector<8x128xf32>
    %277 = arith.negf %276 : vector<8x128xf32>
    %278 = math.exp %277 : vector<8x128xf32>
    %cst_95 = arith.constant 1.000000e+00 : f32
    %279 = vector.broadcast %cst_95 : f32 to vector<8x128xf32>
    %280 = arith.addf %279, %278 : vector<8x128xf32>
    %281 = arith.divf %279, %280 : vector<8x128xf32>
    %282 = vector.extract_strided_slice %269 {offsets = [0, 256], sizes = [8, 128], strides = [1, 1]} : vector<8x512xf32> to vector<8x128xf32>
    %283 = math.tanh %282 : vector<8x128xf32>
    %284 = vector.extract_strided_slice %269 {offsets = [0, 384], sizes = [8, 128], strides = [1, 1]} : vector<8x512xf32> to vector<8x128xf32>
    %285 = arith.negf %284 : vector<8x128xf32>
    %286 = math.exp %285 : vector<8x128xf32>
    %cst_96 = arith.constant 1.000000e+00 : f32
    %287 = vector.broadcast %cst_96 : f32 to vector<8x128xf32>
    %288 = arith.addf %287, %286 : vector<8x128xf32>
    %289 = arith.divf %287, %288 : vector<8x128xf32>
    %290 = arith.mulf %281, %256 : vector<8x128xf32>
    %291 = arith.mulf %275, %283 : vector<8x128xf32>
    %292 = arith.addf %290, %291 : vector<8x128xf32>
    %293 = math.tanh %292 : vector<8x128xf32>
    %294 = arith.mulf %289, %293 : vector<8x128xf32>
    %295 = arith.index_cast %c7_i32 : i32 to index
    %c0_97 = arith.constant 0 : index
    %c0_98 = arith.constant 0 : index
    %296 = vector.load %arg10[%295, %c0_97, %c0_98] : memref<8x8x128xf32, #tpu.memory_space<vmem>>, vector<1x8x128xf32>
    %297 = vector.shape_cast %296 : vector<1x8x128xf32> to vector<8x128xf32>
    %298 = vector.shape_cast %294 : vector<8x128xf32> to vector<1x8x128xf32>
    tpu.vector_store %arg10[%295, %c0_97, %c0_98], %298 {strides = array<i32>} : memref<8x8x128xf32, #tpu.memory_space<vmem>>, vector<1x8x128xf32>,
    %c8_i32 = arith.constant 8 : i32
    %c0_99 = arith.constant 0 : index
    %c0_100 = arith.constant 0 : index
    %c0_101 = arith.constant 0 : index
    %299 = vector.load %arg10[%c0_99, %c0_100, %c0_101] : memref<8x8x128xf32, #tpu.memory_space<vmem>>, vector<8x8x128xf32>
    %300 = vector.shape_cast %299 : vector<8x8x128xf32> to vector<64x128xf32>
    %c0_102 = arith.constant 0 : index
    %c0_103 = arith.constant 0 : index
    %c0_104 = arith.constant 0 : index
    %301 = vector.load %arg3[%c0_102, %c0_103, %c0_104] : memref<3x128x512xf32, #tpu.memory_space<vmem>>, vector<1x128x512xf32>
    %302 = vector.shape_cast %301 : vector<1x128x512xf32> to vector<128x512xf32>
    %cst_105 = arith.constant dense<0.000000e+00> : vector<64x512xf32>
    %303 = tpu.matmul %300, %302, %cst_105 {dimension_numbers = #tpu.dot_dimension_numbers<[1], [0], [0], [1], [0, 0, 1, 1], [], []>} : vector<64x128xf32>, vector<128x512xf32>, vector<64x512xf32> -> vector<64x512xf32>
    %c1 = arith.constant 1 : index
    %c0_106 = arith.constant 0 : index
    %c0_107 = arith.constant 0 : index
    %304 = vector.load %arg5[%c1, %c0_106, %c0_107] : memref<4x1x512xf32, #tpu.memory_space<vmem>>, vector<1x1x512xf32>
    %305 = vector.shape_cast %304 : vector<1x1x512xf32> to vector<1x512xf32>
    %306 = vector.broadcast %305 : vector<1x512xf32> to vector<64x512xf32>
    %307 = arith.addf %303, %306 : vector<64x512xf32>
    %308 = vector.shape_cast %307 : vector<64x512xf32> to vector<8x8x512xf32>
    %c0_108 = arith.constant 0 : index
    %c0_109 = arith.constant 0 : index
    %c0_110 = arith.constant 0 : index
    %309 = vector.load %arg9[%c0_108, %c0_109, %c0_110] : memref<8x8x512xf32, #tpu.memory_space<vmem>>, vector<8x8x512xf32>
    tpu.vector_store %arg9[%c0_108, %c0_109, %c0_110], %308 {strides = array<i32>} : memref<8x8x512xf32, #tpu.memory_space<vmem>>, vector<8x8x512xf32>,
    %cst_111 = arith.constant 0.000000e+00 : f32
    %310 = vector.broadcast %cst_111 : f32 to vector<8x128xf32>
    %c0_i32_112 = arith.constant 0 : i32
    %311 = arith.index_cast %c0_i32_112 : i32 to index
    %c0_113 = arith.constant 0 : index
    %c0_114 = arith.constant 0 : index
    %312 = vector.load %arg9[%311, %c0_113, %c0_114] : memref<8x8x512xf32, #tpu.memory_space<vmem>>, vector<1x8x512xf32>
    %313 = vector.shape_cast %312 : vector<1x8x512xf32> to vector<8x512xf32>
    %c1_115 = arith.constant 1 : index
    %c0_116 = arith.constant 0 : index
    %c0_117 = arith.constant 0 : index
    %314 = vector.load %arg4[%c1_115, %c0_116, %c0_117] : memref<4x128x512xf32, #tpu.memory_space<vmem>>, vector<1x128x512xf32>
    %315 = vector.shape_cast %314 : vector<1x128x512xf32> to vector<128x512xf32>
    %cst_118 = arith.constant dense<0.000000e+00> : vector<8x512xf32>
    %316 = tpu.matmul %310, %315, %cst_118 {dimension_numbers = #tpu.dot_dimension_numbers<[1], [0], [0], [1], [0, 0, 1, 1], [], []>} : vector<8x128xf32>, vector<128x512xf32>, vector<8x512xf32> -> vector<8x512xf32>
    %317 = arith.addf %313, %316 : vector<8x512xf32>
    %318 = vector.extract_strided_slice %317 {offsets = [0, 0], sizes = [8, 128], strides = [1, 1]} : vector<8x512xf32> to vector<8x128xf32>
    %319 = arith.negf %318 : vector<8x128xf32>
    %320 = math.exp %319 : vector<8x128xf32>
    %cst_119 = arith.constant 1.000000e+00 : f32
    %321 = vector.broadcast %cst_119 : f32 to vector<8x128xf32>
    %322 = arith.addf %321, %320 : vector<8x128xf32>
    %323 = arith.divf %321, %322 : vector<8x128xf32>
    %324 = vector.extract_strided_slice %317 {offsets = [0, 128], sizes = [8, 128], strides = [1, 1]} : vector<8x512xf32> to vector<8x128xf32>
    %325 = arith.negf %324 : vector<8x128xf32>
    %326 = math.exp %325 : vector<8x128xf32>
    %cst_120 = arith.constant 1.000000e+00 : f32
    %327 = vector.broadcast %cst_120 : f32 to vector<8x128xf32>
    %328 = arith.addf %327, %326 : vector<8x128xf32>
    %329 = arith.divf %327, %328 : vector<8x128xf32>
    %330 = vector.extract_strided_slice %317 {offsets = [0, 256], sizes = [8, 128], strides = [1, 1]} : vector<8x512xf32> to vector<8x128xf32>
    %331 = math.tanh %330 : vector<8x128xf32>
    %332 = vector.extract_strided_slice %317 {offsets = [0, 384], sizes = [8, 128], strides = [1, 1]} : vector<8x512xf32> to vector<8x128xf32>
    %333 = arith.negf %332 : vector<8x128xf32>
    %334 = math.exp %333 : vector<8x128xf32>
    %cst_121 = arith.constant 1.000000e+00 : f32
    %335 = vector.broadcast %cst_121 : f32 to vector<8x128xf32>
    %336 = arith.addf %335, %334 : vector<8x128xf32>
    %337 = arith.divf %335, %336 : vector<8x128xf32>
    %338 = arith.mulf %329, %310 : vector<8x128xf32>
    %339 = arith.mulf %323, %331 : vector<8x128xf32>
    %340 = arith.addf %338, %339 : vector<8x128xf32>
    %341 = math.tanh %340 : vector<8x128xf32>
    %342 = arith.mulf %337, %341 : vector<8x128xf32>
    %343 = arith.index_cast %c0_i32_112 : i32 to index
    %c0_122 = arith.constant 0 : index
    %c0_123 = arith.constant 0 : index
    %344 = vector.load %arg10[%343, %c0_122, %c0_123] : memref<8x8x128xf32, #tpu.memory_space<vmem>>, vector<1x8x128xf32>
    %345 = vector.shape_cast %344 : vector<1x8x128xf32> to vector<8x128xf32>
    %346 = vector.shape_cast %342 : vector<8x128xf32> to vector<1x8x128xf32>
    tpu.vector_store %arg10[%343, %c0_122, %c0_123], %346 {strides = array<i32>} : memref<8x8x128xf32, #tpu.memory_space<vmem>>, vector<1x8x128xf32>,
    %c1_i32_124 = arith.constant 1 : i32
    %347 = arith.index_cast %c1_i32_124 : i32 to index
    %c0_125 = arith.constant 0 : index
    %c0_126 = arith.constant 0 : index
    %348 = vector.load %arg9[%347, %c0_125, %c0_126] : memref<8x8x512xf32, #tpu.memory_space<vmem>>, vector<1x8x512xf32>
    %349 = vector.shape_cast %348 : vector<1x8x512xf32> to vector<8x512xf32>
    %c1_127 = arith.constant 1 : index
    %c0_128 = arith.constant 0 : index
    %c0_129 = arith.constant 0 : index
    %350 = vector.load %arg4[%c1_127, %c0_128, %c0_129] : memref<4x128x512xf32, #tpu.memory_space<vmem>>, vector<1x128x512xf32>
    %351 = vector.shape_cast %350 : vector<1x128x512xf32> to vector<128x512xf32>
    %cst_130 = arith.constant dense<0.000000e+00> : vector<8x512xf32>
    %352 = tpu.matmul %342, %351, %cst_130 {dimension_numbers = #tpu.dot_dimension_numbers<[1], [0], [0], [1], [0, 0, 1, 1], [], []>} : vector<8x128xf32>, vector<128x512xf32>, vector<8x512xf32> -> vector<8x512xf32>
    %353 = arith.addf %349, %352 : vector<8x512xf32>
    %354 = vector.extract_strided_slice %353 {offsets = [0, 0], sizes = [8, 128], strides = [1, 1]} : vector<8x512xf32> to vector<8x128xf32>
    %355 = arith.negf %354 : vector<8x128xf32>
    %356 = math.exp %355 : vector<8x128xf32>
    %cst_131 = arith.constant 1.000000e+00 : f32
    %357 = vector.broadcast %cst_131 : f32 to vector<8x128xf32>
    %358 = arith.addf %357, %356 : vector<8x128xf32>
    %359 = arith.divf %357, %358 : vector<8x128xf32>
    %360 = vector.extract_strided_slice %353 {offsets = [0, 128], sizes = [8, 128], strides = [1, 1]} : vector<8x512xf32> to vector<8x128xf32>
    %361 = arith.negf %360 : vector<8x128xf32>
    %362 = math.exp %361 : vector<8x128xf32>
    %cst_132 = arith.constant 1.000000e+00 : f32
    %363 = vector.broadcast %cst_132 : f32 to vector<8x128xf32>
    %364 = arith.addf %363, %362 : vector<8x128xf32>
    %365 = arith.divf %363, %364 : vector<8x128xf32>
    %366 = vector.extract_strided_slice %353 {offsets = [0, 256], sizes = [8, 128], strides = [1, 1]} : vector<8x512xf32> to vector<8x128xf32>
    %367 = math.tanh %366 : vector<8x128xf32>
    %368 = vector.extract_strided_slice %353 {offsets = [0, 384], sizes = [8, 128], strides = [1, 1]} : vector<8x512xf32> to vector<8x128xf32>
    %369 = arith.negf %368 : vector<8x128xf32>
    %370 = math.exp %369 : vector<8x128xf32>
    %cst_133 = arith.constant 1.000000e+00 : f32
    %371 = vector.broadcast %cst_133 : f32 to vector<8x128xf32>
    %372 = arith.addf %371, %370 : vector<8x128xf32>
    %373 = arith.divf %371, %372 : vector<8x128xf32>
    %374 = arith.mulf %365, %340 : vector<8x128xf32>
    %375 = arith.mulf %359, %367 : vector<8x128xf32>
    %376 = arith.addf %374, %375 : vector<8x128xf32>
    %377 = math.tanh %376 : vector<8x128xf32>
    %378 = arith.mulf %373, %377 : vector<8x128xf32>
    %379 = arith.index_cast %c1_i32_124 : i32 to index
    %c0_134 = arith.constant 0 : index
    %c0_135 = arith.constant 0 : index
    %380 = vector.load %arg10[%379, %c0_134, %c0_135] : memref<8x8x128xf32, #tpu.memory_space<vmem>>, vector<1x8x128xf32>
    %381 = vector.shape_cast %380 : vector<1x8x128xf32> to vector<8x128xf32>
    %382 = vector.shape_cast %378 : vector<8x128xf32> to vector<1x8x128xf32>
    tpu.vector_store %arg10[%379, %c0_134, %c0_135], %382 {strides = array<i32>} : memref<8x8x128xf32, #tpu.memory_space<vmem>>, vector<1x8x128xf32>,
    %c2_i32_136 = arith.constant 2 : i32
    %383 = arith.index_cast %c2_i32_136 : i32 to index
    %c0_137 = arith.constant 0 : index
    %c0_138 = arith.constant 0 : index
    %384 = vector.load %arg9[%383, %c0_137, %c0_138] : memref<8x8x512xf32, #tpu.memory_space<vmem>>, vector<1x8x512xf32>
    %385 = vector.shape_cast %384 : vector<1x8x512xf32> to vector<8x512xf32>
    %c1_139 = arith.constant 1 : index
    %c0_140 = arith.constant 0 : index
    %c0_141 = arith.constant 0 : index
    %386 = vector.load %arg4[%c1_139, %c0_140, %c0_141] : memref<4x128x512xf32, #tpu.memory_space<vmem>>, vector<1x128x512xf32>
    %387 = vector.shape_cast %386 : vector<1x128x512xf32> to vector<128x512xf32>
    %cst_142 = arith.constant dense<0.000000e+00> : vector<8x512xf32>
    %388 = tpu.matmul %378, %387, %cst_142 {dimension_numbers = #tpu.dot_dimension_numbers<[1], [0], [0], [1], [0, 0, 1, 1], [], []>} : vector<8x128xf32>, vector<128x512xf32>, vector<8x512xf32> -> vector<8x512xf32>
    %389 = arith.addf %385, %388 : vector<8x512xf32>
    %390 = vector.extract_strided_slice %389 {offsets = [0, 0], sizes = [8, 128], strides = [1, 1]} : vector<8x512xf32> to vector<8x128xf32>
    %391 = arith.negf %390 : vector<8x128xf32>
    %392 = math.exp %391 : vector<8x128xf32>
    %cst_143 = arith.constant 1.000000e+00 : f32
    %393 = vector.broadcast %cst_143 : f32 to vector<8x128xf32>
    %394 = arith.addf %393, %392 : vector<8x128xf32>
    %395 = arith.divf %393, %394 : vector<8x128xf32>
    %396 = vector.extract_strided_slice %389 {offsets = [0, 128], sizes = [8, 128], strides = [1, 1]} : vector<8x512xf32> to vector<8x128xf32>
    %397 = arith.negf %396 : vector<8x128xf32>
    %398 = math.exp %397 : vector<8x128xf32>
    %cst_144 = arith.constant 1.000000e+00 : f32
    %399 = vector.broadcast %cst_144 : f32 to vector<8x128xf32>
    %400 = arith.addf %399, %398 : vector<8x128xf32>
    %401 = arith.divf %399, %400 : vector<8x128xf32>
    %402 = vector.extract_strided_slice %389 {offsets = [0, 256], sizes = [8, 128], strides = [1, 1]} : vector<8x512xf32> to vector<8x128xf32>
    %403 = math.tanh %402 : vector<8x128xf32>
    %404 = vector.extract_strided_slice %389 {offsets = [0, 384], sizes = [8, 128], strides = [1, 1]} : vector<8x512xf32> to vector<8x128xf32>
    %405 = arith.negf %404 : vector<8x128xf32>
    %406 = math.exp %405 : vector<8x128xf32>
    %cst_145 = arith.constant 1.000000e+00 : f32
    %407 = vector.broadcast %cst_145 : f32 to vector<8x128xf32>
    %408 = arith.addf %407, %406 : vector<8x128xf32>
    %409 = arith.divf %407, %408 : vector<8x128xf32>
    %410 = arith.mulf %401, %376 : vector<8x128xf32>
    %411 = arith.mulf %395, %403 : vector<8x128xf32>
    %412 = arith.addf %410, %411 : vector<8x128xf32>
    %413 = math.tanh %412 : vector<8x128xf32>
    %414 = arith.mulf %409, %413 : vector<8x128xf32>
    %415 = arith.index_cast %c2_i32_136 : i32 to index
    %c0_146 = arith.constant 0 : index
    %c0_147 = arith.constant 0 : index
    %416 = vector.load %arg10[%415, %c0_146, %c0_147] : memref<8x8x128xf32, #tpu.memory_space<vmem>>, vector<1x8x128xf32>
    %417 = vector.shape_cast %416 : vector<1x8x128xf32> to vector<8x128xf32>
    %418 = vector.shape_cast %414 : vector<8x128xf32> to vector<1x8x128xf32>
    tpu.vector_store %arg10[%415, %c0_146, %c0_147], %418 {strides = array<i32>} : memref<8x8x128xf32, #tpu.memory_space<vmem>>, vector<1x8x128xf32>,
    %c3_i32_148 = arith.constant 3 : i32
    %419 = arith.index_cast %c3_i32_148 : i32 to index
    %c0_149 = arith.constant 0 : index
    %c0_150 = arith.constant 0 : index
    %420 = vector.load %arg9[%419, %c0_149, %c0_150] : memref<8x8x512xf32, #tpu.memory_space<vmem>>, vector<1x8x512xf32>
    %421 = vector.shape_cast %420 : vector<1x8x512xf32> to vector<8x512xf32>
    %c1_151 = arith.constant 1 : index
    %c0_152 = arith.constant 0 : index
    %c0_153 = arith.constant 0 : index
    %422 = vector.load %arg4[%c1_151, %c0_152, %c0_153] : memref<4x128x512xf32, #tpu.memory_space<vmem>>, vector<1x128x512xf32>
    %423 = vector.shape_cast %422 : vector<1x128x512xf32> to vector<128x512xf32>
    %cst_154 = arith.constant dense<0.000000e+00> : vector<8x512xf32>
    %424 = tpu.matmul %414, %423, %cst_154 {dimension_numbers = #tpu.dot_dimension_numbers<[1], [0], [0], [1], [0, 0, 1, 1], [], []>} : vector<8x128xf32>, vector<128x512xf32>, vector<8x512xf32> -> vector<8x512xf32>
    %425 = arith.addf %421, %424 : vector<8x512xf32>
    %426 = vector.extract_strided_slice %425 {offsets = [0, 0], sizes = [8, 128], strides = [1, 1]} : vector<8x512xf32> to vector<8x128xf32>
    %427 = arith.negf %426 : vector<8x128xf32>
    %428 = math.exp %427 : vector<8x128xf32>
    %cst_155 = arith.constant 1.000000e+00 : f32
    %429 = vector.broadcast %cst_155 : f32 to vector<8x128xf32>
    %430 = arith.addf %429, %428 : vector<8x128xf32>
    %431 = arith.divf %429, %430 : vector<8x128xf32>
    %432 = vector.extract_strided_slice %425 {offsets = [0, 128], sizes = [8, 128], strides = [1, 1]} : vector<8x512xf32> to vector<8x128xf32>
    %433 = arith.negf %432 : vector<8x128xf32>
    %434 = math.exp %433 : vector<8x128xf32>
    %cst_156 = arith.constant 1.000000e+00 : f32
    %435 = vector.broadcast %cst_156 : f32 to vector<8x128xf32>
    %436 = arith.addf %435, %434 : vector<8x128xf32>
    %437 = arith.divf %435, %436 : vector<8x128xf32>
    %438 = vector.extract_strided_slice %425 {offsets = [0, 256], sizes = [8, 128], strides = [1, 1]} : vector<8x512xf32> to vector<8x128xf32>
    %439 = math.tanh %438 : vector<8x128xf32>
    %440 = vector.extract_strided_slice %425 {offsets = [0, 384], sizes = [8, 128], strides = [1, 1]} : vector<8x512xf32> to vector<8x128xf32>
    %441 = arith.negf %440 : vector<8x128xf32>
    %442 = math.exp %441 : vector<8x128xf32>
    %cst_157 = arith.constant 1.000000e+00 : f32
    %443 = vector.broadcast %cst_157 : f32 to vector<8x128xf32>
    %444 = arith.addf %443, %442 : vector<8x128xf32>
    %445 = arith.divf %443, %444 : vector<8x128xf32>
    %446 = arith.mulf %437, %412 : vector<8x128xf32>
    %447 = arith.mulf %431, %439 : vector<8x128xf32>
    %448 = arith.addf %446, %447 : vector<8x128xf32>
    %449 = math.tanh %448 : vector<8x128xf32>
    %450 = arith.mulf %445, %449 : vector<8x128xf32>
    %451 = arith.index_cast %c3_i32_148 : i32 to index
    %c0_158 = arith.constant 0 : index
    %c0_159 = arith.constant 0 : index
    %452 = vector.load %arg10[%451, %c0_158, %c0_159] : memref<8x8x128xf32, #tpu.memory_space<vmem>>, vector<1x8x128xf32>
    %453 = vector.shape_cast %452 : vector<1x8x128xf32> to vector<8x128xf32>
    %454 = vector.shape_cast %450 : vector<8x128xf32> to vector<1x8x128xf32>
    tpu.vector_store %arg10[%451, %c0_158, %c0_159], %454 {strides = array<i32>} : memref<8x8x128xf32, #tpu.memory_space<vmem>>, vector<1x8x128xf32>,
    %c4_i32_160 = arith.constant 4 : i32
    %455 = arith.index_cast %c4_i32_160 : i32 to index
    %c0_161 = arith.constant 0 : index
    %c0_162 = arith.constant 0 : index
    %456 = vector.load %arg9[%455, %c0_161, %c0_162] : memref<8x8x512xf32, #tpu.memory_space<vmem>>, vector<1x8x512xf32>
    %457 = vector.shape_cast %456 : vector<1x8x512xf32> to vector<8x512xf32>
    %c1_163 = arith.constant 1 : index
    %c0_164 = arith.constant 0 : index
    %c0_165 = arith.constant 0 : index
    %458 = vector.load %arg4[%c1_163, %c0_164, %c0_165] : memref<4x128x512xf32, #tpu.memory_space<vmem>>, vector<1x128x512xf32>
    %459 = vector.shape_cast %458 : vector<1x128x512xf32> to vector<128x512xf32>
    %cst_166 = arith.constant dense<0.000000e+00> : vector<8x512xf32>
    %460 = tpu.matmul %450, %459, %cst_166 {dimension_numbers = #tpu.dot_dimension_numbers<[1], [0], [0], [1], [0, 0, 1, 1], [], []>} : vector<8x128xf32>, vector<128x512xf32>, vector<8x512xf32> -> vector<8x512xf32>
    %461 = arith.addf %457, %460 : vector<8x512xf32>
    %462 = vector.extract_strided_slice %461 {offsets = [0, 0], sizes = [8, 128], strides = [1, 1]} : vector<8x512xf32> to vector<8x128xf32>
    %463 = arith.negf %462 : vector<8x128xf32>
    %464 = math.exp %463 : vector<8x128xf32>
    %cst_167 = arith.constant 1.000000e+00 : f32
    %465 = vector.broadcast %cst_167 : f32 to vector<8x128xf32>
    %466 = arith.addf %465, %464 : vector<8x128xf32>
    %467 = arith.divf %465, %466 : vector<8x128xf32>
    %468 = vector.extract_strided_slice %461 {offsets = [0, 128], sizes = [8, 128], strides = [1, 1]} : vector<8x512xf32> to vector<8x128xf32>
    %469 = arith.negf %468 : vector<8x128xf32>
    %470 = math.exp %469 : vector<8x128xf32>
    %cst_168 = arith.constant 1.000000e+00 : f32
    %471 = vector.broadcast %cst_168 : f32 to vector<8x128xf32>
    %472 = arith.addf %471, %470 : vector<8x128xf32>
    %473 = arith.divf %471, %472 : vector<8x128xf32>
    %474 = vector.extract_strided_slice %461 {offsets = [0, 256], sizes = [8, 128], strides = [1, 1]} : vector<8x512xf32> to vector<8x128xf32>
    %475 = math.tanh %474 : vector<8x128xf32>
    %476 = vector.extract_strided_slice %461 {offsets = [0, 384], sizes = [8, 128], strides = [1, 1]} : vector<8x512xf32> to vector<8x128xf32>
    %477 = arith.negf %476 : vector<8x128xf32>
    %478 = math.exp %477 : vector<8x128xf32>
    %cst_169 = arith.constant 1.000000e+00 : f32
    %479 = vector.broadcast %cst_169 : f32 to vector<8x128xf32>
    %480 = arith.addf %479, %478 : vector<8x128xf32>
    %481 = arith.divf %479, %480 : vector<8x128xf32>
    %482 = arith.mulf %473, %448 : vector<8x128xf32>
    %483 = arith.mulf %467, %475 : vector<8x128xf32>
    %484 = arith.addf %482, %483 : vector<8x128xf32>
    %485 = math.tanh %484 : vector<8x128xf32>
    %486 = arith.mulf %481, %485 : vector<8x128xf32>
    %487 = arith.index_cast %c4_i32_160 : i32 to index
    %c0_170 = arith.constant 0 : index
    %c0_171 = arith.constant 0 : index
    %488 = vector.load %arg10[%487, %c0_170, %c0_171] : memref<8x8x128xf32, #tpu.memory_space<vmem>>, vector<1x8x128xf32>
    %489 = vector.shape_cast %488 : vector<1x8x128xf32> to vector<8x128xf32>
    %490 = vector.shape_cast %486 : vector<8x128xf32> to vector<1x8x128xf32>
    tpu.vector_store %arg10[%487, %c0_170, %c0_171], %490 {strides = array<i32>} : memref<8x8x128xf32, #tpu.memory_space<vmem>>, vector<1x8x128xf32>,
    %c5_i32_172 = arith.constant 5 : i32
    %491 = arith.index_cast %c5_i32_172 : i32 to index
    %c0_173 = arith.constant 0 : index
    %c0_174 = arith.constant 0 : index
    %492 = vector.load %arg9[%491, %c0_173, %c0_174] : memref<8x8x512xf32, #tpu.memory_space<vmem>>, vector<1x8x512xf32>
    %493 = vector.shape_cast %492 : vector<1x8x512xf32> to vector<8x512xf32>
    %c1_175 = arith.constant 1 : index
    %c0_176 = arith.constant 0 : index
    %c0_177 = arith.constant 0 : index
    %494 = vector.load %arg4[%c1_175, %c0_176, %c0_177] : memref<4x128x512xf32, #tpu.memory_space<vmem>>, vector<1x128x512xf32>
    %495 = vector.shape_cast %494 : vector<1x128x512xf32> to vector<128x512xf32>
    %cst_178 = arith.constant dense<0.000000e+00> : vector<8x512xf32>
    %496 = tpu.matmul %486, %495, %cst_178 {dimension_numbers = #tpu.dot_dimension_numbers<[1], [0], [0], [1], [0, 0, 1, 1], [], []>} : vector<8x128xf32>, vector<128x512xf32>, vector<8x512xf32> -> vector<8x512xf32>
    %497 = arith.addf %493, %496 : vector<8x512xf32>
    %498 = vector.extract_strided_slice %497 {offsets = [0, 0], sizes = [8, 128], strides = [1, 1]} : vector<8x512xf32> to vector<8x128xf32>
    %499 = arith.negf %498 : vector<8x128xf32>
    %500 = math.exp %499 : vector<8x128xf32>
    %cst_179 = arith.constant 1.000000e+00 : f32
    %501 = vector.broadcast %cst_179 : f32 to vector<8x128xf32>
    %502 = arith.addf %501, %500 : vector<8x128xf32>
    %503 = arith.divf %501, %502 : vector<8x128xf32>
    %504 = vector.extract_strided_slice %497 {offsets = [0, 128], sizes = [8, 128], strides = [1, 1]} : vector<8x512xf32> to vector<8x128xf32>
    %505 = arith.negf %504 : vector<8x128xf32>
    %506 = math.exp %505 : vector<8x128xf32>
    %cst_180 = arith.constant 1.000000e+00 : f32
    %507 = vector.broadcast %cst_180 : f32 to vector<8x128xf32>
    %508 = arith.addf %507, %506 : vector<8x128xf32>
    %509 = arith.divf %507, %508 : vector<8x128xf32>
    %510 = vector.extract_strided_slice %497 {offsets = [0, 256], sizes = [8, 128], strides = [1, 1]} : vector<8x512xf32> to vector<8x128xf32>
    %511 = math.tanh %510 : vector<8x128xf32>
    %512 = vector.extract_strided_slice %497 {offsets = [0, 384], sizes = [8, 128], strides = [1, 1]} : vector<8x512xf32> to vector<8x128xf32>
    %513 = arith.negf %512 : vector<8x128xf32>
    %514 = math.exp %513 : vector<8x128xf32>
    %cst_181 = arith.constant 1.000000e+00 : f32
    %515 = vector.broadcast %cst_181 : f32 to vector<8x128xf32>
    %516 = arith.addf %515, %514 : vector<8x128xf32>
    %517 = arith.divf %515, %516 : vector<8x128xf32>
    %518 = arith.mulf %509, %484 : vector<8x128xf32>
    %519 = arith.mulf %503, %511 : vector<8x128xf32>
    %520 = arith.addf %518, %519 : vector<8x128xf32>
    %521 = math.tanh %520 : vector<8x128xf32>
    %522 = arith.mulf %517, %521 : vector<8x128xf32>
    %523 = arith.index_cast %c5_i32_172 : i32 to index
    %c0_182 = arith.constant 0 : index
    %c0_183 = arith.constant 0 : index
    %524 = vector.load %arg10[%523, %c0_182, %c0_183] : memref<8x8x128xf32, #tpu.memory_space<vmem>>, vector<1x8x128xf32>
    %525 = vector.shape_cast %524 : vector<1x8x128xf32> to vector<8x128xf32>
    %526 = vector.shape_cast %522 : vector<8x128xf32> to vector<1x8x128xf32>
    tpu.vector_store %arg10[%523, %c0_182, %c0_183], %526 {strides = array<i32>} : memref<8x8x128xf32, #tpu.memory_space<vmem>>, vector<1x8x128xf32>,
    %c6_i32_184 = arith.constant 6 : i32
    %527 = arith.index_cast %c6_i32_184 : i32 to index
    %c0_185 = arith.constant 0 : index
    %c0_186 = arith.constant 0 : index
    %528 = vector.load %arg9[%527, %c0_185, %c0_186] : memref<8x8x512xf32, #tpu.memory_space<vmem>>, vector<1x8x512xf32>
    %529 = vector.shape_cast %528 : vector<1x8x512xf32> to vector<8x512xf32>
    %c1_187 = arith.constant 1 : index
    %c0_188 = arith.constant 0 : index
    %c0_189 = arith.constant 0 : index
    %530 = vector.load %arg4[%c1_187, %c0_188, %c0_189] : memref<4x128x512xf32, #tpu.memory_space<vmem>>, vector<1x128x512xf32>
    %531 = vector.shape_cast %530 : vector<1x128x512xf32> to vector<128x512xf32>
    %cst_190 = arith.constant dense<0.000000e+00> : vector<8x512xf32>
    %532 = tpu.matmul %522, %531, %cst_190 {dimension_numbers = #tpu.dot_dimension_numbers<[1], [0], [0], [1], [0, 0, 1, 1], [], []>} : vector<8x128xf32>, vector<128x512xf32>, vector<8x512xf32> -> vector<8x512xf32>
    %533 = arith.addf %529, %532 : vector<8x512xf32>
    %534 = vector.extract_strided_slice %533 {offsets = [0, 0], sizes = [8, 128], strides = [1, 1]} : vector<8x512xf32> to vector<8x128xf32>
    %535 = arith.negf %534 : vector<8x128xf32>
    %536 = math.exp %535 : vector<8x128xf32>
    %cst_191 = arith.constant 1.000000e+00 : f32
    %537 = vector.broadcast %cst_191 : f32 to vector<8x128xf32>
    %538 = arith.addf %537, %536 : vector<8x128xf32>
    %539 = arith.divf %537, %538 : vector<8x128xf32>
    %540 = vector.extract_strided_slice %533 {offsets = [0, 128], sizes = [8, 128], strides = [1, 1]} : vector<8x512xf32> to vector<8x128xf32>
    %541 = arith.negf %540 : vector<8x128xf32>
    %542 = math.exp %541 : vector<8x128xf32>
    %cst_192 = arith.constant 1.000000e+00 : f32
    %543 = vector.broadcast %cst_192 : f32 to vector<8x128xf32>
    %544 = arith.addf %543, %542 : vector<8x128xf32>
    %545 = arith.divf %543, %544 : vector<8x128xf32>
    %546 = vector.extract_strided_slice %533 {offsets = [0, 256], sizes = [8, 128], strides = [1, 1]} : vector<8x512xf32> to vector<8x128xf32>
    %547 = math.tanh %546 : vector<8x128xf32>
    %548 = vector.extract_strided_slice %533 {offsets = [0, 384], sizes = [8, 128], strides = [1, 1]} : vector<8x512xf32> to vector<8x128xf32>
    %549 = arith.negf %548 : vector<8x128xf32>
    %550 = math.exp %549 : vector<8x128xf32>
    %cst_193 = arith.constant 1.000000e+00 : f32
    %551 = vector.broadcast %cst_193 : f32 to vector<8x128xf32>
    %552 = arith.addf %551, %550 : vector<8x128xf32>
    %553 = arith.divf %551, %552 : vector<8x128xf32>
    %554 = arith.mulf %545, %520 : vector<8x128xf32>
    %555 = arith.mulf %539, %547 : vector<8x128xf32>
    %556 = arith.addf %554, %555 : vector<8x128xf32>
    %557 = math.tanh %556 : vector<8x128xf32>
    %558 = arith.mulf %553, %557 : vector<8x128xf32>
    %559 = arith.index_cast %c6_i32_184 : i32 to index
    %c0_194 = arith.constant 0 : index
    %c0_195 = arith.constant 0 : index
    %560 = vector.load %arg10[%559, %c0_194, %c0_195] : memref<8x8x128xf32, #tpu.memory_space<vmem>>, vector<1x8x128xf32>
    %561 = vector.shape_cast %560 : vector<1x8x128xf32> to vector<8x128xf32>
    %562 = vector.shape_cast %558 : vector<8x128xf32> to vector<1x8x128xf32>
    tpu.vector_store %arg10[%559, %c0_194, %c0_195], %562 {strides = array<i32>} : memref<8x8x128xf32, #tpu.memory_space<vmem>>, vector<1x8x128xf32>,
    %c7_i32_196 = arith.constant 7 : i32
    %563 = arith.index_cast %c7_i32_196 : i32 to index
    %c0_197 = arith.constant 0 : index
    %c0_198 = arith.constant 0 : index
    %564 = vector.load %arg9[%563, %c0_197, %c0_198] : memref<8x8x512xf32, #tpu.memory_space<vmem>>, vector<1x8x512xf32>
    %565 = vector.shape_cast %564 : vector<1x8x512xf32> to vector<8x512xf32>
    %c1_199 = arith.constant 1 : index
    %c0_200 = arith.constant 0 : index
    %c0_201 = arith.constant 0 : index
    %566 = vector.load %arg4[%c1_199, %c0_200, %c0_201] : memref<4x128x512xf32, #tpu.memory_space<vmem>>, vector<1x128x512xf32>
    %567 = vector.shape_cast %566 : vector<1x128x512xf32> to vector<128x512xf32>
    %cst_202 = arith.constant dense<0.000000e+00> : vector<8x512xf32>
    %568 = tpu.matmul %558, %567, %cst_202 {dimension_numbers = #tpu.dot_dimension_numbers<[1], [0], [0], [1], [0, 0, 1, 1], [], []>} : vector<8x128xf32>, vector<128x512xf32>, vector<8x512xf32> -> vector<8x512xf32>
    %569 = arith.addf %565, %568 : vector<8x512xf32>
    %570 = vector.extract_strided_slice %569 {offsets = [0, 0], sizes = [8, 128], strides = [1, 1]} : vector<8x512xf32> to vector<8x128xf32>
    %571 = arith.negf %570 : vector<8x128xf32>
    %572 = math.exp %571 : vector<8x128xf32>
    %cst_203 = arith.constant 1.000000e+00 : f32
    %573 = vector.broadcast %cst_203 : f32 to vector<8x128xf32>
    %574 = arith.addf %573, %572 : vector<8x128xf32>
    %575 = arith.divf %573, %574 : vector<8x128xf32>
    %576 = vector.extract_strided_slice %569 {offsets = [0, 128], sizes = [8, 128], strides = [1, 1]} : vector<8x512xf32> to vector<8x128xf32>
    %577 = arith.negf %576 : vector<8x128xf32>
    %578 = math.exp %577 : vector<8x128xf32>
    %cst_204 = arith.constant 1.000000e+00 : f32
    %579 = vector.broadcast %cst_204 : f32 to vector<8x128xf32>
    %580 = arith.addf %579, %578 : vector<8x128xf32>
    %581 = arith.divf %579, %580 : vector<8x128xf32>
    %582 = vector.extract_strided_slice %569 {offsets = [0, 256], sizes = [8, 128], strides = [1, 1]} : vector<8x512xf32> to vector<8x128xf32>
    %583 = math.tanh %582 : vector<8x128xf32>
    %584 = vector.extract_strided_slice %569 {offsets = [0, 384], sizes = [8, 128], strides = [1, 1]} : vector<8x512xf32> to vector<8x128xf32>
    %585 = arith.negf %584 : vector<8x128xf32>
    %586 = math.exp %585 : vector<8x128xf32>
    %cst_205 = arith.constant 1.000000e+00 : f32
    %587 = vector.broadcast %cst_205 : f32 to vector<8x128xf32>
    %588 = arith.addf %587, %586 : vector<8x128xf32>
    %589 = arith.divf %587, %588 : vector<8x128xf32>
    %590 = arith.mulf %581, %556 : vector<8x128xf32>
    %591 = arith.mulf %575, %583 : vector<8x128xf32>
    %592 = arith.addf %590, %591 : vector<8x128xf32>
    %593 = math.tanh %592 : vector<8x128xf32>
    %594 = arith.mulf %589, %593 : vector<8x128xf32>
    %595 = arith.index_cast %c7_i32_196 : i32 to index
    %c0_206 = arith.constant 0 : index
    %c0_207 = arith.constant 0 : index
    %596 = vector.load %arg10[%595, %c0_206, %c0_207] : memref<8x8x128xf32, #tpu.memory_space<vmem>>, vector<1x8x128xf32>
    %597 = vector.shape_cast %596 : vector<1x8x128xf32> to vector<8x128xf32>
    %598 = vector.shape_cast %594 : vector<8x128xf32> to vector<1x8x128xf32>
    tpu.vector_store %arg10[%595, %c0_206, %c0_207], %598 {strides = array<i32>} : memref<8x8x128xf32, #tpu.memory_space<vmem>>, vector<1x8x128xf32>,
    %c8_i32_208 = arith.constant 8 : i32
    %c0_209 = arith.constant 0 : index
    %c0_210 = arith.constant 0 : index
    %c0_211 = arith.constant 0 : index
    %599 = vector.load %arg10[%c0_209, %c0_210, %c0_211] : memref<8x8x128xf32, #tpu.memory_space<vmem>>, vector<8x8x128xf32>
    %600 = vector.shape_cast %599 : vector<8x8x128xf32> to vector<64x128xf32>
    %c1_212 = arith.constant 1 : index
    %c0_213 = arith.constant 0 : index
    %c0_214 = arith.constant 0 : index
    %601 = vector.load %arg3[%c1_212, %c0_213, %c0_214] : memref<3x128x512xf32, #tpu.memory_space<vmem>>, vector<1x128x512xf32>
    %602 = vector.shape_cast %601 : vector<1x128x512xf32> to vector<128x512xf32>
    %cst_215 = arith.constant dense<0.000000e+00> : vector<64x512xf32>
    %603 = tpu.matmul %600, %602, %cst_215 {dimension_numbers = #tpu.dot_dimension_numbers<[1], [0], [0], [1], [0, 0, 1, 1], [], []>} : vector<64x128xf32>, vector<128x512xf32>, vector<64x512xf32> -> vector<64x512xf32>
    %c2 = arith.constant 2 : index
    %c0_216 = arith.constant 0 : index
    %c0_217 = arith.constant 0 : index
    %604 = vector.load %arg5[%c2, %c0_216, %c0_217] : memref<4x1x512xf32, #tpu.memory_space<vmem>>, vector<1x1x512xf32>
    %605 = vector.shape_cast %604 : vector<1x1x512xf32> to vector<1x512xf32>
    %606 = vector.broadcast %605 : vector<1x512xf32> to vector<64x512xf32>
    %607 = arith.addf %603, %606 : vector<64x512xf32>
    %608 = vector.shape_cast %607 : vector<64x512xf32> to vector<8x8x512xf32>
    %c0_218 = arith.constant 0 : index
    %c0_219 = arith.constant 0 : index
    %c0_220 = arith.constant 0 : index
    %609 = vector.load %arg9[%c0_218, %c0_219, %c0_220] : memref<8x8x512xf32, #tpu.memory_space<vmem>>, vector<8x8x512xf32>
    tpu.vector_store %arg9[%c0_218, %c0_219, %c0_220], %608 {strides = array<i32>} : memref<8x8x512xf32, #tpu.memory_space<vmem>>, vector<8x8x512xf32>,
    %cst_221 = arith.constant 0.000000e+00 : f32
    %610 = vector.broadcast %cst_221 : f32 to vector<8x128xf32>
    %c0_i32_222 = arith.constant 0 : i32
    %611 = arith.index_cast %c0_i32_222 : i32 to index
    %c0_223 = arith.constant 0 : index
    %c0_224 = arith.constant 0 : index
    %612 = vector.load %arg9[%611, %c0_223, %c0_224] : memref<8x8x512xf32, #tpu.memory_space<vmem>>, vector<1x8x512xf32>
    %613 = vector.shape_cast %612 : vector<1x8x512xf32> to vector<8x512xf32>
    %c2_225 = arith.constant 2 : index
    %c0_226 = arith.constant 0 : index
    %c0_227 = arith.constant 0 : index
    %614 = vector.load %arg4[%c2_225, %c0_226, %c0_227] : memref<4x128x512xf32, #tpu.memory_space<vmem>>, vector<1x128x512xf32>
    %615 = vector.shape_cast %614 : vector<1x128x512xf32> to vector<128x512xf32>
    %cst_228 = arith.constant dense<0.000000e+00> : vector<8x512xf32>
    %616 = tpu.matmul %610, %615, %cst_228 {dimension_numbers = #tpu.dot_dimension_numbers<[1], [0], [0], [1], [0, 0, 1, 1], [], []>} : vector<8x128xf32>, vector<128x512xf32>, vector<8x512xf32> -> vector<8x512xf32>
    %617 = arith.addf %613, %616 : vector<8x512xf32>
    %618 = vector.extract_strided_slice %617 {offsets = [0, 0], sizes = [8, 128], strides = [1, 1]} : vector<8x512xf32> to vector<8x128xf32>
    %619 = arith.negf %618 : vector<8x128xf32>
    %620 = math.exp %619 : vector<8x128xf32>
    %cst_229 = arith.constant 1.000000e+00 : f32
    %621 = vector.broadcast %cst_229 : f32 to vector<8x128xf32>
    %622 = arith.addf %621, %620 : vector<8x128xf32>
    %623 = arith.divf %621, %622 : vector<8x128xf32>
    %624 = vector.extract_strided_slice %617 {offsets = [0, 128], sizes = [8, 128], strides = [1, 1]} : vector<8x512xf32> to vector<8x128xf32>
    %625 = arith.negf %624 : vector<8x128xf32>
    %626 = math.exp %625 : vector<8x128xf32>
    %cst_230 = arith.constant 1.000000e+00 : f32
    %627 = vector.broadcast %cst_230 : f32 to vector<8x128xf32>
    %628 = arith.addf %627, %626 : vector<8x128xf32>
    %629 = arith.divf %627, %628 : vector<8x128xf32>
    %630 = vector.extract_strided_slice %617 {offsets = [0, 256], sizes = [8, 128], strides = [1, 1]} : vector<8x512xf32> to vector<8x128xf32>
    %631 = math.tanh %630 : vector<8x128xf32>
    %632 = vector.extract_strided_slice %617 {offsets = [0, 384], sizes = [8, 128], strides = [1, 1]} : vector<8x512xf32> to vector<8x128xf32>
    %633 = arith.negf %632 : vector<8x128xf32>
    %634 = math.exp %633 : vector<8x128xf32>
    %cst_231 = arith.constant 1.000000e+00 : f32
    %635 = vector.broadcast %cst_231 : f32 to vector<8x128xf32>
    %636 = arith.addf %635, %634 : vector<8x128xf32>
    %637 = arith.divf %635, %636 : vector<8x128xf32>
    %638 = arith.mulf %629, %610 : vector<8x128xf32>
    %639 = arith.mulf %623, %631 : vector<8x128xf32>
    %640 = arith.addf %638, %639 : vector<8x128xf32>
    %641 = math.tanh %640 : vector<8x128xf32>
    %642 = arith.mulf %637, %641 : vector<8x128xf32>
    %643 = arith.index_cast %c0_i32_222 : i32 to index
    %c0_232 = arith.constant 0 : index
    %c0_233 = arith.constant 0 : index
    %644 = vector.load %arg10[%643, %c0_232, %c0_233] : memref<8x8x128xf32, #tpu.memory_space<vmem>>, vector<1x8x128xf32>
    %645 = vector.shape_cast %644 : vector<1x8x128xf32> to vector<8x128xf32>
    %646 = vector.shape_cast %642 : vector<8x128xf32> to vector<1x8x128xf32>
    tpu.vector_store %arg10[%643, %c0_232, %c0_233], %646 {strides = array<i32>} : memref<8x8x128xf32, #tpu.memory_space<vmem>>, vector<1x8x128xf32>,
    %c1_i32_234 = arith.constant 1 : i32
    %647 = arith.index_cast %c1_i32_234 : i32 to index
    %c0_235 = arith.constant 0 : index
    %c0_236 = arith.constant 0 : index
    %648 = vector.load %arg9[%647, %c0_235, %c0_236] : memref<8x8x512xf32, #tpu.memory_space<vmem>>, vector<1x8x512xf32>
    %649 = vector.shape_cast %648 : vector<1x8x512xf32> to vector<8x512xf32>
    %c2_237 = arith.constant 2 : index
    %c0_238 = arith.constant 0 : index
    %c0_239 = arith.constant 0 : index
    %650 = vector.load %arg4[%c2_237, %c0_238, %c0_239] : memref<4x128x512xf32, #tpu.memory_space<vmem>>, vector<1x128x512xf32>
    %651 = vector.shape_cast %650 : vector<1x128x512xf32> to vector<128x512xf32>
    %cst_240 = arith.constant dense<0.000000e+00> : vector<8x512xf32>
    %652 = tpu.matmul %642, %651, %cst_240 {dimension_numbers = #tpu.dot_dimension_numbers<[1], [0], [0], [1], [0, 0, 1, 1], [], []>} : vector<8x128xf32>, vector<128x512xf32>, vector<8x512xf32> -> vector<8x512xf32>
    %653 = arith.addf %649, %652 : vector<8x512xf32>
    %654 = vector.extract_strided_slice %653 {offsets = [0, 0], sizes = [8, 128], strides = [1, 1]} : vector<8x512xf32> to vector<8x128xf32>
    %655 = arith.negf %654 : vector<8x128xf32>
    %656 = math.exp %655 : vector<8x128xf32>
    %cst_241 = arith.constant 1.000000e+00 : f32
    %657 = vector.broadcast %cst_241 : f32 to vector<8x128xf32>
    %658 = arith.addf %657, %656 : vector<8x128xf32>
    %659 = arith.divf %657, %658 : vector<8x128xf32>
    %660 = vector.extract_strided_slice %653 {offsets = [0, 128], sizes = [8, 128], strides = [1, 1]} : vector<8x512xf32> to vector<8x128xf32>
    %661 = arith.negf %660 : vector<8x128xf32>
    %662 = math.exp %661 : vector<8x128xf32>
    %cst_242 = arith.constant 1.000000e+00 : f32
    %663 = vector.broadcast %cst_242 : f32 to vector<8x128xf32>
    %664 = arith.addf %663, %662 : vector<8x128xf32>
    %665 = arith.divf %663, %664 : vector<8x128xf32>
    %666 = vector.extract_strided_slice %653 {offsets = [0, 256], sizes = [8, 128], strides = [1, 1]} : vector<8x512xf32> to vector<8x128xf32>
    %667 = math.tanh %666 : vector<8x128xf32>
    %668 = vector.extract_strided_slice %653 {offsets = [0, 384], sizes = [8, 128], strides = [1, 1]} : vector<8x512xf32> to vector<8x128xf32>
    %669 = arith.negf %668 : vector<8x128xf32>
    %670 = math.exp %669 : vector<8x128xf32>
    %cst_243 = arith.constant 1.000000e+00 : f32
    %671 = vector.broadcast %cst_243 : f32 to vector<8x128xf32>
    %672 = arith.addf %671, %670 : vector<8x128xf32>
    %673 = arith.divf %671, %672 : vector<8x128xf32>
    %674 = arith.mulf %665, %640 : vector<8x128xf32>
    %675 = arith.mulf %659, %667 : vector<8x128xf32>
    %676 = arith.addf %674, %675 : vector<8x128xf32>
    %677 = math.tanh %676 : vector<8x128xf32>
    %678 = arith.mulf %673, %677 : vector<8x128xf32>
    %679 = arith.index_cast %c1_i32_234 : i32 to index
    %c0_244 = arith.constant 0 : index
    %c0_245 = arith.constant 0 : index
    %680 = vector.load %arg10[%679, %c0_244, %c0_245] : memref<8x8x128xf32, #tpu.memory_space<vmem>>, vector<1x8x128xf32>
    %681 = vector.shape_cast %680 : vector<1x8x128xf32> to vector<8x128xf32>
    %682 = vector.shape_cast %678 : vector<8x128xf32> to vector<1x8x128xf32>
    tpu.vector_store %arg10[%679, %c0_244, %c0_245], %682 {strides = array<i32>} : memref<8x8x128xf32, #tpu.memory_space<vmem>>, vector<1x8x128xf32>,
    %c2_i32_246 = arith.constant 2 : i32
    %683 = arith.index_cast %c2_i32_246 : i32 to index
    %c0_247 = arith.constant 0 : index
    %c0_248 = arith.constant 0 : index
    %684 = vector.load %arg9[%683, %c0_247, %c0_248] : memref<8x8x512xf32, #tpu.memory_space<vmem>>, vector<1x8x512xf32>
    %685 = vector.shape_cast %684 : vector<1x8x512xf32> to vector<8x512xf32>
    %c2_249 = arith.constant 2 : index
    %c0_250 = arith.constant 0 : index
    %c0_251 = arith.constant 0 : index
    %686 = vector.load %arg4[%c2_249, %c0_250, %c0_251] : memref<4x128x512xf32, #tpu.memory_space<vmem>>, vector<1x128x512xf32>
    %687 = vector.shape_cast %686 : vector<1x128x512xf32> to vector<128x512xf32>
    %cst_252 = arith.constant dense<0.000000e+00> : vector<8x512xf32>
    %688 = tpu.matmul %678, %687, %cst_252 {dimension_numbers = #tpu.dot_dimension_numbers<[1], [0], [0], [1], [0, 0, 1, 1], [], []>} : vector<8x128xf32>, vector<128x512xf32>, vector<8x512xf32> -> vector<8x512xf32>
    %689 = arith.addf %685, %688 : vector<8x512xf32>
    %690 = vector.extract_strided_slice %689 {offsets = [0, 0], sizes = [8, 128], strides = [1, 1]} : vector<8x512xf32> to vector<8x128xf32>
    %691 = arith.negf %690 : vector<8x128xf32>
    %692 = math.exp %691 : vector<8x128xf32>
    %cst_253 = arith.constant 1.000000e+00 : f32
    %693 = vector.broadcast %cst_253 : f32 to vector<8x128xf32>
    %694 = arith.addf %693, %692 : vector<8x128xf32>
    %695 = arith.divf %693, %694 : vector<8x128xf32>
    %696 = vector.extract_strided_slice %689 {offsets = [0, 128], sizes = [8, 128], strides = [1, 1]} : vector<8x512xf32> to vector<8x128xf32>
    %697 = arith.negf %696 : vector<8x128xf32>
    %698 = math.exp %697 : vector<8x128xf32>
    %cst_254 = arith.constant 1.000000e+00 : f32
    %699 = vector.broadcast %cst_254 : f32 to vector<8x128xf32>
    %700 = arith.addf %699, %698 : vector<8x128xf32>
    %701 = arith.divf %699, %700 : vector<8x128xf32>
    %702 = vector.extract_strided_slice %689 {offsets = [0, 256], sizes = [8, 128], strides = [1, 1]} : vector<8x512xf32> to vector<8x128xf32>
    %703 = math.tanh %702 : vector<8x128xf32>
    %704 = vector.extract_strided_slice %689 {offsets = [0, 384], sizes = [8, 128], strides = [1, 1]} : vector<8x512xf32> to vector<8x128xf32>
    %705 = arith.negf %704 : vector<8x128xf32>
    %706 = math.exp %705 : vector<8x128xf32>
    %cst_255 = arith.constant 1.000000e+00 : f32
    %707 = vector.broadcast %cst_255 : f32 to vector<8x128xf32>
    %708 = arith.addf %707, %706 : vector<8x128xf32>
    %709 = arith.divf %707, %708 : vector<8x128xf32>
    %710 = arith.mulf %701, %676 : vector<8x128xf32>
    %711 = arith.mulf %695, %703 : vector<8x128xf32>
    %712 = arith.addf %710, %711 : vector<8x128xf32>
    %713 = math.tanh %712 : vector<8x128xf32>
    %714 = arith.mulf %709, %713 : vector<8x128xf32>
    %715 = arith.index_cast %c2_i32_246 : i32 to index
    %c0_256 = arith.constant 0 : index
    %c0_257 = arith.constant 0 : index
    %716 = vector.load %arg10[%715, %c0_256, %c0_257] : memref<8x8x128xf32, #tpu.memory_space<vmem>>, vector<1x8x128xf32>
    %717 = vector.shape_cast %716 : vector<1x8x128xf32> to vector<8x128xf32>
    %718 = vector.shape_cast %714 : vector<8x128xf32> to vector<1x8x128xf32>
    tpu.vector_store %arg10[%715, %c0_256, %c0_257], %718 {strides = array<i32>} : memref<8x8x128xf32, #tpu.memory_space<vmem>>, vector<1x8x128xf32>,
    %c3_i32_258 = arith.constant 3 : i32
    %719 = arith.index_cast %c3_i32_258 : i32 to index
    %c0_259 = arith.constant 0 : index
    %c0_260 = arith.constant 0 : index
    %720 = vector.load %arg9[%719, %c0_259, %c0_260] : memref<8x8x512xf32, #tpu.memory_space<vmem>>, vector<1x8x512xf32>
    %721 = vector.shape_cast %720 : vector<1x8x512xf32> to vector<8x512xf32>
    %c2_261 = arith.constant 2 : index
    %c0_262 = arith.constant 0 : index
    %c0_263 = arith.constant 0 : index
    %722 = vector.load %arg4[%c2_261, %c0_262, %c0_263] : memref<4x128x512xf32, #tpu.memory_space<vmem>>, vector<1x128x512xf32>
    %723 = vector.shape_cast %722 : vector<1x128x512xf32> to vector<128x512xf32>
    %cst_264 = arith.constant dense<0.000000e+00> : vector<8x512xf32>
    %724 = tpu.matmul %714, %723, %cst_264 {dimension_numbers = #tpu.dot_dimension_numbers<[1], [0], [0], [1], [0, 0, 1, 1], [], []>} : vector<8x128xf32>, vector<128x512xf32>, vector<8x512xf32> -> vector<8x512xf32>
    %725 = arith.addf %721, %724 : vector<8x512xf32>
    %726 = vector.extract_strided_slice %725 {offsets = [0, 0], sizes = [8, 128], strides = [1, 1]} : vector<8x512xf32> to vector<8x128xf32>
    %727 = arith.negf %726 : vector<8x128xf32>
    %728 = math.exp %727 : vector<8x128xf32>
    %cst_265 = arith.constant 1.000000e+00 : f32
    %729 = vector.broadcast %cst_265 : f32 to vector<8x128xf32>
    %730 = arith.addf %729, %728 : vector<8x128xf32>
    %731 = arith.divf %729, %730 : vector<8x128xf32>
    %732 = vector.extract_strided_slice %725 {offsets = [0, 128], sizes = [8, 128], strides = [1, 1]} : vector<8x512xf32> to vector<8x128xf32>
    %733 = arith.negf %732 : vector<8x128xf32>
    %734 = math.exp %733 : vector<8x128xf32>
    %cst_266 = arith.constant 1.000000e+00 : f32
    %735 = vector.broadcast %cst_266 : f32 to vector<8x128xf32>
    %736 = arith.addf %735, %734 : vector<8x128xf32>
    %737 = arith.divf %735, %736 : vector<8x128xf32>
    %738 = vector.extract_strided_slice %725 {offsets = [0, 256], sizes = [8, 128], strides = [1, 1]} : vector<8x512xf32> to vector<8x128xf32>
    %739 = math.tanh %738 : vector<8x128xf32>
    %740 = vector.extract_strided_slice %725 {offsets = [0, 384], sizes = [8, 128], strides = [1, 1]} : vector<8x512xf32> to vector<8x128xf32>
    %741 = arith.negf %740 : vector<8x128xf32>
    %742 = math.exp %741 : vector<8x128xf32>
    %cst_267 = arith.constant 1.000000e+00 : f32
    %743 = vector.broadcast %cst_267 : f32 to vector<8x128xf32>
    %744 = arith.addf %743, %742 : vector<8x128xf32>
    %745 = arith.divf %743, %744 : vector<8x128xf32>
    %746 = arith.mulf %737, %712 : vector<8x128xf32>
    %747 = arith.mulf %731, %739 : vector<8x128xf32>
    %748 = arith.addf %746, %747 : vector<8x128xf32>
    %749 = math.tanh %748 : vector<8x128xf32>
    %750 = arith.mulf %745, %749 : vector<8x128xf32>
    %751 = arith.index_cast %c3_i32_258 : i32 to index
    %c0_268 = arith.constant 0 : index
    %c0_269 = arith.constant 0 : index
    %752 = vector.load %arg10[%751, %c0_268, %c0_269] : memref<8x8x128xf32, #tpu.memory_space<vmem>>, vector<1x8x128xf32>
    %753 = vector.shape_cast %752 : vector<1x8x128xf32> to vector<8x128xf32>
    %754 = vector.shape_cast %750 : vector<8x128xf32> to vector<1x8x128xf32>
    tpu.vector_store %arg10[%751, %c0_268, %c0_269], %754 {strides = array<i32>} : memref<8x8x128xf32, #tpu.memory_space<vmem>>, vector<1x8x128xf32>,
    %c4_i32_270 = arith.constant 4 : i32
    %755 = arith.index_cast %c4_i32_270 : i32 to index
    %c0_271 = arith.constant 0 : index
    %c0_272 = arith.constant 0 : index
    %756 = vector.load %arg9[%755, %c0_271, %c0_272] : memref<8x8x512xf32, #tpu.memory_space<vmem>>, vector<1x8x512xf32>
    %757 = vector.shape_cast %756 : vector<1x8x512xf32> to vector<8x512xf32>
    %c2_273 = arith.constant 2 : index
    %c0_274 = arith.constant 0 : index
    %c0_275 = arith.constant 0 : index
    %758 = vector.load %arg4[%c2_273, %c0_274, %c0_275] : memref<4x128x512xf32, #tpu.memory_space<vmem>>, vector<1x128x512xf32>
    %759 = vector.shape_cast %758 : vector<1x128x512xf32> to vector<128x512xf32>
    %cst_276 = arith.constant dense<0.000000e+00> : vector<8x512xf32>
    %760 = tpu.matmul %750, %759, %cst_276 {dimension_numbers = #tpu.dot_dimension_numbers<[1], [0], [0], [1], [0, 0, 1, 1], [], []>} : vector<8x128xf32>, vector<128x512xf32>, vector<8x512xf32> -> vector<8x512xf32>
    %761 = arith.addf %757, %760 : vector<8x512xf32>
    %762 = vector.extract_strided_slice %761 {offsets = [0, 0], sizes = [8, 128], strides = [1, 1]} : vector<8x512xf32> to vector<8x128xf32>
    %763 = arith.negf %762 : vector<8x128xf32>
    %764 = math.exp %763 : vector<8x128xf32>
    %cst_277 = arith.constant 1.000000e+00 : f32
    %765 = vector.broadcast %cst_277 : f32 to vector<8x128xf32>
    %766 = arith.addf %765, %764 : vector<8x128xf32>
    %767 = arith.divf %765, %766 : vector<8x128xf32>
    %768 = vector.extract_strided_slice %761 {offsets = [0, 128], sizes = [8, 128], strides = [1, 1]} : vector<8x512xf32> to vector<8x128xf32>
    %769 = arith.negf %768 : vector<8x128xf32>
    %770 = math.exp %769 : vector<8x128xf32>
    %cst_278 = arith.constant 1.000000e+00 : f32
    %771 = vector.broadcast %cst_278 : f32 to vector<8x128xf32>
    %772 = arith.addf %771, %770 : vector<8x128xf32>
    %773 = arith.divf %771, %772 : vector<8x128xf32>
    %774 = vector.extract_strided_slice %761 {offsets = [0, 256], sizes = [8, 128], strides = [1, 1]} : vector<8x512xf32> to vector<8x128xf32>
    %775 = math.tanh %774 : vector<8x128xf32>
    %776 = vector.extract_strided_slice %761 {offsets = [0, 384], sizes = [8, 128], strides = [1, 1]} : vector<8x512xf32> to vector<8x128xf32>
    %777 = arith.negf %776 : vector<8x128xf32>
    %778 = math.exp %777 : vector<8x128xf32>
    %cst_279 = arith.constant 1.000000e+00 : f32
    %779 = vector.broadcast %cst_279 : f32 to vector<8x128xf32>
    %780 = arith.addf %779, %778 : vector<8x128xf32>
    %781 = arith.divf %779, %780 : vector<8x128xf32>
    %782 = arith.mulf %773, %748 : vector<8x128xf32>
    %783 = arith.mulf %767, %775 : vector<8x128xf32>
    %784 = arith.addf %782, %783 : vector<8x128xf32>
    %785 = math.tanh %784 : vector<8x128xf32>
    %786 = arith.mulf %781, %785 : vector<8x128xf32>
    %787 = arith.index_cast %c4_i32_270 : i32 to index
    %c0_280 = arith.constant 0 : index
    %c0_281 = arith.constant 0 : index
    %788 = vector.load %arg10[%787, %c0_280, %c0_281] : memref<8x8x128xf32, #tpu.memory_space<vmem>>, vector<1x8x128xf32>
    %789 = vector.shape_cast %788 : vector<1x8x128xf32> to vector<8x128xf32>
    %790 = vector.shape_cast %786 : vector<8x128xf32> to vector<1x8x128xf32>
    tpu.vector_store %arg10[%787, %c0_280, %c0_281], %790 {strides = array<i32>} : memref<8x8x128xf32, #tpu.memory_space<vmem>>, vector<1x8x128xf32>,
    %c5_i32_282 = arith.constant 5 : i32
    %791 = arith.index_cast %c5_i32_282 : i32 to index
    %c0_283 = arith.constant 0 : index
    %c0_284 = arith.constant 0 : index
    %792 = vector.load %arg9[%791, %c0_283, %c0_284] : memref<8x8x512xf32, #tpu.memory_space<vmem>>, vector<1x8x512xf32>
    %793 = vector.shape_cast %792 : vector<1x8x512xf32> to vector<8x512xf32>
    %c2_285 = arith.constant 2 : index
    %c0_286 = arith.constant 0 : index
    %c0_287 = arith.constant 0 : index
    %794 = vector.load %arg4[%c2_285, %c0_286, %c0_287] : memref<4x128x512xf32, #tpu.memory_space<vmem>>, vector<1x128x512xf32>
    %795 = vector.shape_cast %794 : vector<1x128x512xf32> to vector<128x512xf32>
    %cst_288 = arith.constant dense<0.000000e+00> : vector<8x512xf32>
    %796 = tpu.matmul %786, %795, %cst_288 {dimension_numbers = #tpu.dot_dimension_numbers<[1], [0], [0], [1], [0, 0, 1, 1], [], []>} : vector<8x128xf32>, vector<128x512xf32>, vector<8x512xf32> -> vector<8x512xf32>
    %797 = arith.addf %793, %796 : vector<8x512xf32>
    %798 = vector.extract_strided_slice %797 {offsets = [0, 0], sizes = [8, 128], strides = [1, 1]} : vector<8x512xf32> to vector<8x128xf32>
    %799 = arith.negf %798 : vector<8x128xf32>
    %800 = math.exp %799 : vector<8x128xf32>
    %cst_289 = arith.constant 1.000000e+00 : f32
    %801 = vector.broadcast %cst_289 : f32 to vector<8x128xf32>
    %802 = arith.addf %801, %800 : vector<8x128xf32>
    %803 = arith.divf %801, %802 : vector<8x128xf32>
    %804 = vector.extract_strided_slice %797 {offsets = [0, 128], sizes = [8, 128], strides = [1, 1]} : vector<8x512xf32> to vector<8x128xf32>
    %805 = arith.negf %804 : vector<8x128xf32>
    %806 = math.exp %805 : vector<8x128xf32>
    %cst_290 = arith.constant 1.000000e+00 : f32
    %807 = vector.broadcast %cst_290 : f32 to vector<8x128xf32>
    %808 = arith.addf %807, %806 : vector<8x128xf32>
    %809 = arith.divf %807, %808 : vector<8x128xf32>
    %810 = vector.extract_strided_slice %797 {offsets = [0, 256], sizes = [8, 128], strides = [1, 1]} : vector<8x512xf32> to vector<8x128xf32>
    %811 = math.tanh %810 : vector<8x128xf32>
    %812 = vector.extract_strided_slice %797 {offsets = [0, 384], sizes = [8, 128], strides = [1, 1]} : vector<8x512xf32> to vector<8x128xf32>
    %813 = arith.negf %812 : vector<8x128xf32>
    %814 = math.exp %813 : vector<8x128xf32>
    %cst_291 = arith.constant 1.000000e+00 : f32
    %815 = vector.broadcast %cst_291 : f32 to vector<8x128xf32>
    %816 = arith.addf %815, %814 : vector<8x128xf32>
    %817 = arith.divf %815, %816 : vector<8x128xf32>
    %818 = arith.mulf %809, %784 : vector<8x128xf32>
    %819 = arith.mulf %803, %811 : vector<8x128xf32>
    %820 = arith.addf %818, %819 : vector<8x128xf32>
    %821 = math.tanh %820 : vector<8x128xf32>
    %822 = arith.mulf %817, %821 : vector<8x128xf32>
    %823 = arith.index_cast %c5_i32_282 : i32 to index
    %c0_292 = arith.constant 0 : index
    %c0_293 = arith.constant 0 : index
    %824 = vector.load %arg10[%823, %c0_292, %c0_293] : memref<8x8x128xf32, #tpu.memory_space<vmem>>, vector<1x8x128xf32>
    %825 = vector.shape_cast %824 : vector<1x8x128xf32> to vector<8x128xf32>
    %826 = vector.shape_cast %822 : vector<8x128xf32> to vector<1x8x128xf32>
    tpu.vector_store %arg10[%823, %c0_292, %c0_293], %826 {strides = array<i32>} : memref<8x8x128xf32, #tpu.memory_space<vmem>>, vector<1x8x128xf32>,
    %c6_i32_294 = arith.constant 6 : i32
    %827 = arith.index_cast %c6_i32_294 : i32 to index
    %c0_295 = arith.constant 0 : index
    %c0_296 = arith.constant 0 : index
    %828 = vector.load %arg9[%827, %c0_295, %c0_296] : memref<8x8x512xf32, #tpu.memory_space<vmem>>, vector<1x8x512xf32>
    %829 = vector.shape_cast %828 : vector<1x8x512xf32> to vector<8x512xf32>
    %c2_297 = arith.constant 2 : index
    %c0_298 = arith.constant 0 : index
    %c0_299 = arith.constant 0 : index
    %830 = vector.load %arg4[%c2_297, %c0_298, %c0_299] : memref<4x128x512xf32, #tpu.memory_space<vmem>>, vector<1x128x512xf32>
    %831 = vector.shape_cast %830 : vector<1x128x512xf32> to vector<128x512xf32>
    %cst_300 = arith.constant dense<0.000000e+00> : vector<8x512xf32>
    %832 = tpu.matmul %822, %831, %cst_300 {dimension_numbers = #tpu.dot_dimension_numbers<[1], [0], [0], [1], [0, 0, 1, 1], [], []>} : vector<8x128xf32>, vector<128x512xf32>, vector<8x512xf32> -> vector<8x512xf32>
    %833 = arith.addf %829, %832 : vector<8x512xf32>
    %834 = vector.extract_strided_slice %833 {offsets = [0, 0], sizes = [8, 128], strides = [1, 1]} : vector<8x512xf32> to vector<8x128xf32>
    %835 = arith.negf %834 : vector<8x128xf32>
    %836 = math.exp %835 : vector<8x128xf32>
    %cst_301 = arith.constant 1.000000e+00 : f32
    %837 = vector.broadcast %cst_301 : f32 to vector<8x128xf32>
    %838 = arith.addf %837, %836 : vector<8x128xf32>
    %839 = arith.divf %837, %838 : vector<8x128xf32>
    %840 = vector.extract_strided_slice %833 {offsets = [0, 128], sizes = [8, 128], strides = [1, 1]} : vector<8x512xf32> to vector<8x128xf32>
    %841 = arith.negf %840 : vector<8x128xf32>
    %842 = math.exp %841 : vector<8x128xf32>
    %cst_302 = arith.constant 1.000000e+00 : f32
    %843 = vector.broadcast %cst_302 : f32 to vector<8x128xf32>
    %844 = arith.addf %843, %842 : vector<8x128xf32>
    %845 = arith.divf %843, %844 : vector<8x128xf32>
    %846 = vector.extract_strided_slice %833 {offsets = [0, 256], sizes = [8, 128], strides = [1, 1]} : vector<8x512xf32> to vector<8x128xf32>
    %847 = math.tanh %846 : vector<8x128xf32>
    %848 = vector.extract_strided_slice %833 {offsets = [0, 384], sizes = [8, 128], strides = [1, 1]} : vector<8x512xf32> to vector<8x128xf32>
    %849 = arith.negf %848 : vector<8x128xf32>
    %850 = math.exp %849 : vector<8x128xf32>
    %cst_303 = arith.constant 1.000000e+00 : f32
    %851 = vector.broadcast %cst_303 : f32 to vector<8x128xf32>
    %852 = arith.addf %851, %850 : vector<8x128xf32>
    %853 = arith.divf %851, %852 : vector<8x128xf32>
    %854 = arith.mulf %845, %820 : vector<8x128xf32>
    %855 = arith.mulf %839, %847 : vector<8x128xf32>
    %856 = arith.addf %854, %855 : vector<8x128xf32>
    %857 = math.tanh %856 : vector<8x128xf32>
    %858 = arith.mulf %853, %857 : vector<8x128xf32>
    %859 = arith.index_cast %c6_i32_294 : i32 to index
    %c0_304 = arith.constant 0 : index
    %c0_305 = arith.constant 0 : index
    %860 = vector.load %arg10[%859, %c0_304, %c0_305] : memref<8x8x128xf32, #tpu.memory_space<vmem>>, vector<1x8x128xf32>
    %861 = vector.shape_cast %860 : vector<1x8x128xf32> to vector<8x128xf32>
    %862 = vector.shape_cast %858 : vector<8x128xf32> to vector<1x8x128xf32>
    tpu.vector_store %arg10[%859, %c0_304, %c0_305], %862 {strides = array<i32>} : memref<8x8x128xf32, #tpu.memory_space<vmem>>, vector<1x8x128xf32>,
    %c7_i32_306 = arith.constant 7 : i32
    %863 = arith.index_cast %c7_i32_306 : i32 to index
    %c0_307 = arith.constant 0 : index
    %c0_308 = arith.constant 0 : index
    %864 = vector.load %arg9[%863, %c0_307, %c0_308] : memref<8x8x512xf32, #tpu.memory_space<vmem>>, vector<1x8x512xf32>
    %865 = vector.shape_cast %864 : vector<1x8x512xf32> to vector<8x512xf32>
    %c2_309 = arith.constant 2 : index
    %c0_310 = arith.constant 0 : index
    %c0_311 = arith.constant 0 : index
    %866 = vector.load %arg4[%c2_309, %c0_310, %c0_311] : memref<4x128x512xf32, #tpu.memory_space<vmem>>, vector<1x128x512xf32>
    %867 = vector.shape_cast %866 : vector<1x128x512xf32> to vector<128x512xf32>
    %cst_312 = arith.constant dense<0.000000e+00> : vector<8x512xf32>
    %868 = tpu.matmul %858, %867, %cst_312 {dimension_numbers = #tpu.dot_dimension_numbers<[1], [0], [0], [1], [0, 0, 1, 1], [], []>} : vector<8x128xf32>, vector<128x512xf32>, vector<8x512xf32> -> vector<8x512xf32>
    %869 = arith.addf %865, %868 : vector<8x512xf32>
    %870 = vector.extract_strided_slice %869 {offsets = [0, 0], sizes = [8, 128], strides = [1, 1]} : vector<8x512xf32> to vector<8x128xf32>
    %871 = arith.negf %870 : vector<8x128xf32>
    %872 = math.exp %871 : vector<8x128xf32>
    %cst_313 = arith.constant 1.000000e+00 : f32
    %873 = vector.broadcast %cst_313 : f32 to vector<8x128xf32>
    %874 = arith.addf %873, %872 : vector<8x128xf32>
    %875 = arith.divf %873, %874 : vector<8x128xf32>
    %876 = vector.extract_strided_slice %869 {offsets = [0, 128], sizes = [8, 128], strides = [1, 1]} : vector<8x512xf32> to vector<8x128xf32>
    %877 = arith.negf %876 : vector<8x128xf32>
    %878 = math.exp %877 : vector<8x128xf32>
    %cst_314 = arith.constant 1.000000e+00 : f32
    %879 = vector.broadcast %cst_314 : f32 to vector<8x128xf32>
    %880 = arith.addf %879, %878 : vector<8x128xf32>
    %881 = arith.divf %879, %880 : vector<8x128xf32>
    %882 = vector.extract_strided_slice %869 {offsets = [0, 256], sizes = [8, 128], strides = [1, 1]} : vector<8x512xf32> to vector<8x128xf32>
    %883 = math.tanh %882 : vector<8x128xf32>
    %884 = vector.extract_strided_slice %869 {offsets = [0, 384], sizes = [8, 128], strides = [1, 1]} : vector<8x512xf32> to vector<8x128xf32>
    %885 = arith.negf %884 : vector<8x128xf32>
    %886 = math.exp %885 : vector<8x128xf32>
    %cst_315 = arith.constant 1.000000e+00 : f32
    %887 = vector.broadcast %cst_315 : f32 to vector<8x128xf32>
    %888 = arith.addf %887, %886 : vector<8x128xf32>
    %889 = arith.divf %887, %888 : vector<8x128xf32>
    %890 = arith.mulf %881, %856 : vector<8x128xf32>
    %891 = arith.mulf %875, %883 : vector<8x128xf32>
    %892 = arith.addf %890, %891 : vector<8x128xf32>
    %893 = math.tanh %892 : vector<8x128xf32>
    %894 = arith.mulf %889, %893 : vector<8x128xf32>
    %895 = arith.index_cast %c7_i32_306 : i32 to index
    %c0_316 = arith.constant 0 : index
    %c0_317 = arith.constant 0 : index
    %896 = vector.load %arg10[%895, %c0_316, %c0_317] : memref<8x8x128xf32, #tpu.memory_space<vmem>>, vector<1x8x128xf32>
    %897 = vector.shape_cast %896 : vector<1x8x128xf32> to vector<8x128xf32>
    %898 = vector.shape_cast %894 : vector<8x128xf32> to vector<1x8x128xf32>
    tpu.vector_store %arg10[%895, %c0_316, %c0_317], %898 {strides = array<i32>} : memref<8x8x128xf32, #tpu.memory_space<vmem>>, vector<1x8x128xf32>,
    %c8_i32_318 = arith.constant 8 : i32
    %c0_319 = arith.constant 0 : index
    %c0_320 = arith.constant 0 : index
    %c0_321 = arith.constant 0 : index
    %899 = vector.load %arg10[%c0_319, %c0_320, %c0_321] : memref<8x8x128xf32, #tpu.memory_space<vmem>>, vector<8x8x128xf32>
    %900 = vector.shape_cast %899 : vector<8x8x128xf32> to vector<64x128xf32>
    %c2_322 = arith.constant 2 : index
    %c0_323 = arith.constant 0 : index
    %c0_324 = arith.constant 0 : index
    %901 = vector.load %arg3[%c2_322, %c0_323, %c0_324] : memref<3x128x512xf32, #tpu.memory_space<vmem>>, vector<1x128x512xf32>
    %902 = vector.shape_cast %901 : vector<1x128x512xf32> to vector<128x512xf32>
    %cst_325 = arith.constant dense<0.000000e+00> : vector<64x512xf32>
    %903 = tpu.matmul %900, %902, %cst_325 {dimension_numbers = #tpu.dot_dimension_numbers<[1], [0], [0], [1], [0, 0, 1, 1], [], []>} : vector<64x128xf32>, vector<128x512xf32>, vector<64x512xf32> -> vector<64x512xf32>
    %c3 = arith.constant 3 : index
    %c0_326 = arith.constant 0 : index
    %c0_327 = arith.constant 0 : index
    %904 = vector.load %arg5[%c3, %c0_326, %c0_327] : memref<4x1x512xf32, #tpu.memory_space<vmem>>, vector<1x1x512xf32>
    %905 = vector.shape_cast %904 : vector<1x1x512xf32> to vector<1x512xf32>
    %906 = vector.broadcast %905 : vector<1x512xf32> to vector<64x512xf32>
    %907 = arith.addf %903, %906 : vector<64x512xf32>
    %908 = vector.shape_cast %907 : vector<64x512xf32> to vector<8x8x512xf32>
    %c0_328 = arith.constant 0 : index
    %c0_329 = arith.constant 0 : index
    %c0_330 = arith.constant 0 : index
    %909 = vector.load %arg9[%c0_328, %c0_329, %c0_330] : memref<8x8x512xf32, #tpu.memory_space<vmem>>, vector<8x8x512xf32>
    tpu.vector_store %arg9[%c0_328, %c0_329, %c0_330], %908 {strides = array<i32>} : memref<8x8x512xf32, #tpu.memory_space<vmem>>, vector<8x8x512xf32>,
    %cst_331 = arith.constant 0.000000e+00 : f32
    %910 = vector.broadcast %cst_331 : f32 to vector<8x128xf32>
    %c0_i32_332 = arith.constant 0 : i32
    %911 = arith.index_cast %c0_i32_332 : i32 to index
    %c0_333 = arith.constant 0 : index
    %c0_334 = arith.constant 0 : index
    %912 = vector.load %arg9[%911, %c0_333, %c0_334] : memref<8x8x512xf32, #tpu.memory_space<vmem>>, vector<1x8x512xf32>
    %913 = vector.shape_cast %912 : vector<1x8x512xf32> to vector<8x512xf32>
    %c3_335 = arith.constant 3 : index
    %c0_336 = arith.constant 0 : index
    %c0_337 = arith.constant 0 : index
    %914 = vector.load %arg4[%c3_335, %c0_336, %c0_337] : memref<4x128x512xf32, #tpu.memory_space<vmem>>, vector<1x128x512xf32>
    %915 = vector.shape_cast %914 : vector<1x128x512xf32> to vector<128x512xf32>
    %cst_338 = arith.constant dense<0.000000e+00> : vector<8x512xf32>
    %916 = tpu.matmul %910, %915, %cst_338 {dimension_numbers = #tpu.dot_dimension_numbers<[1], [0], [0], [1], [0, 0, 1, 1], [], []>} : vector<8x128xf32>, vector<128x512xf32>, vector<8x512xf32> -> vector<8x512xf32>
    %917 = arith.addf %913, %916 : vector<8x512xf32>
    %918 = vector.extract_strided_slice %917 {offsets = [0, 0], sizes = [8, 128], strides = [1, 1]} : vector<8x512xf32> to vector<8x128xf32>
    %919 = arith.negf %918 : vector<8x128xf32>
    %920 = math.exp %919 : vector<8x128xf32>
    %cst_339 = arith.constant 1.000000e+00 : f32
    %921 = vector.broadcast %cst_339 : f32 to vector<8x128xf32>
    %922 = arith.addf %921, %920 : vector<8x128xf32>
    %923 = arith.divf %921, %922 : vector<8x128xf32>
    %924 = vector.extract_strided_slice %917 {offsets = [0, 128], sizes = [8, 128], strides = [1, 1]} : vector<8x512xf32> to vector<8x128xf32>
    %925 = arith.negf %924 : vector<8x128xf32>
    %926 = math.exp %925 : vector<8x128xf32>
    %cst_340 = arith.constant 1.000000e+00 : f32
    %927 = vector.broadcast %cst_340 : f32 to vector<8x128xf32>
    %928 = arith.addf %927, %926 : vector<8x128xf32>
    %929 = arith.divf %927, %928 : vector<8x128xf32>
    %930 = vector.extract_strided_slice %917 {offsets = [0, 256], sizes = [8, 128], strides = [1, 1]} : vector<8x512xf32> to vector<8x128xf32>
    %931 = math.tanh %930 : vector<8x128xf32>
    %932 = vector.extract_strided_slice %917 {offsets = [0, 384], sizes = [8, 128], strides = [1, 1]} : vector<8x512xf32> to vector<8x128xf32>
    %933 = arith.negf %932 : vector<8x128xf32>
    %934 = math.exp %933 : vector<8x128xf32>
    %cst_341 = arith.constant 1.000000e+00 : f32
    %935 = vector.broadcast %cst_341 : f32 to vector<8x128xf32>
    %936 = arith.addf %935, %934 : vector<8x128xf32>
    %937 = arith.divf %935, %936 : vector<8x128xf32>
    %938 = arith.mulf %929, %910 : vector<8x128xf32>
    %939 = arith.mulf %923, %931 : vector<8x128xf32>
    %940 = arith.addf %938, %939 : vector<8x128xf32>
    %941 = math.tanh %940 : vector<8x128xf32>
    %942 = arith.mulf %937, %941 : vector<8x128xf32>
    %943 = arith.index_cast %c0_i32_332 : i32 to index
    %c0_342 = arith.constant 0 : index
    %c0_343 = arith.constant 0 : index
    %944 = vector.load %arg10[%943, %c0_342, %c0_343] : memref<8x8x128xf32, #tpu.memory_space<vmem>>, vector<1x8x128xf32>
    %945 = vector.shape_cast %944 : vector<1x8x128xf32> to vector<8x128xf32>
    %946 = vector.shape_cast %942 : vector<8x128xf32> to vector<1x8x128xf32>
    tpu.vector_store %arg10[%943, %c0_342, %c0_343], %946 {strides = array<i32>} : memref<8x8x128xf32, #tpu.memory_space<vmem>>, vector<1x8x128xf32>,
    %c1_i32_344 = arith.constant 1 : i32
    %947 = arith.index_cast %c1_i32_344 : i32 to index
    %c0_345 = arith.constant 0 : index
    %c0_346 = arith.constant 0 : index
    %948 = vector.load %arg9[%947, %c0_345, %c0_346] : memref<8x8x512xf32, #tpu.memory_space<vmem>>, vector<1x8x512xf32>
    %949 = vector.shape_cast %948 : vector<1x8x512xf32> to vector<8x512xf32>
    %c3_347 = arith.constant 3 : index
    %c0_348 = arith.constant 0 : index
    %c0_349 = arith.constant 0 : index
    %950 = vector.load %arg4[%c3_347, %c0_348, %c0_349] : memref<4x128x512xf32, #tpu.memory_space<vmem>>, vector<1x128x512xf32>
    %951 = vector.shape_cast %950 : vector<1x128x512xf32> to vector<128x512xf32>
    %cst_350 = arith.constant dense<0.000000e+00> : vector<8x512xf32>
    %952 = tpu.matmul %942, %951, %cst_350 {dimension_numbers = #tpu.dot_dimension_numbers<[1], [0], [0], [1], [0, 0, 1, 1], [], []>} : vector<8x128xf32>, vector<128x512xf32>, vector<8x512xf32> -> vector<8x512xf32>
    %953 = arith.addf %949, %952 : vector<8x512xf32>
    %954 = vector.extract_strided_slice %953 {offsets = [0, 0], sizes = [8, 128], strides = [1, 1]} : vector<8x512xf32> to vector<8x128xf32>
    %955 = arith.negf %954 : vector<8x128xf32>
    %956 = math.exp %955 : vector<8x128xf32>
    %cst_351 = arith.constant 1.000000e+00 : f32
    %957 = vector.broadcast %cst_351 : f32 to vector<8x128xf32>
    %958 = arith.addf %957, %956 : vector<8x128xf32>
    %959 = arith.divf %957, %958 : vector<8x128xf32>
    %960 = vector.extract_strided_slice %953 {offsets = [0, 128], sizes = [8, 128], strides = [1, 1]} : vector<8x512xf32> to vector<8x128xf32>
    %961 = arith.negf %960 : vector<8x128xf32>
    %962 = math.exp %961 : vector<8x128xf32>
    %cst_352 = arith.constant 1.000000e+00 : f32
    %963 = vector.broadcast %cst_352 : f32 to vector<8x128xf32>
    %964 = arith.addf %963, %962 : vector<8x128xf32>
    %965 = arith.divf %963, %964 : vector<8x128xf32>
    %966 = vector.extract_strided_slice %953 {offsets = [0, 256], sizes = [8, 128], strides = [1, 1]} : vector<8x512xf32> to vector<8x128xf32>
    %967 = math.tanh %966 : vector<8x128xf32>
    %968 = vector.extract_strided_slice %953 {offsets = [0, 384], sizes = [8, 128], strides = [1, 1]} : vector<8x512xf32> to vector<8x128xf32>
    %969 = arith.negf %968 : vector<8x128xf32>
    %970 = math.exp %969 : vector<8x128xf32>
    %cst_353 = arith.constant 1.000000e+00 : f32
    %971 = vector.broadcast %cst_353 : f32 to vector<8x128xf32>
    %972 = arith.addf %971, %970 : vector<8x128xf32>
    %973 = arith.divf %971, %972 : vector<8x128xf32>
    %974 = arith.mulf %965, %940 : vector<8x128xf32>
    %975 = arith.mulf %959, %967 : vector<8x128xf32>
    %976 = arith.addf %974, %975 : vector<8x128xf32>
    %977 = math.tanh %976 : vector<8x128xf32>
    %978 = arith.mulf %973, %977 : vector<8x128xf32>
    %979 = arith.index_cast %c1_i32_344 : i32 to index
    %c0_354 = arith.constant 0 : index
    %c0_355 = arith.constant 0 : index
    %980 = vector.load %arg10[%979, %c0_354, %c0_355] : memref<8x8x128xf32, #tpu.memory_space<vmem>>, vector<1x8x128xf32>
    %981 = vector.shape_cast %980 : vector<1x8x128xf32> to vector<8x128xf32>
    %982 = vector.shape_cast %978 : vector<8x128xf32> to vector<1x8x128xf32>
    tpu.vector_store %arg10[%979, %c0_354, %c0_355], %982 {strides = array<i32>} : memref<8x8x128xf32, #tpu.memory_space<vmem>>, vector<1x8x128xf32>,
    %c2_i32_356 = arith.constant 2 : i32
    %983 = arith.index_cast %c2_i32_356 : i32 to index
    %c0_357 = arith.constant 0 : index
    %c0_358 = arith.constant 0 : index
    %984 = vector.load %arg9[%983, %c0_357, %c0_358] : memref<8x8x512xf32, #tpu.memory_space<vmem>>, vector<1x8x512xf32>
    %985 = vector.shape_cast %984 : vector<1x8x512xf32> to vector<8x512xf32>
    %c3_359 = arith.constant 3 : index
    %c0_360 = arith.constant 0 : index
    %c0_361 = arith.constant 0 : index
    %986 = vector.load %arg4[%c3_359, %c0_360, %c0_361] : memref<4x128x512xf32, #tpu.memory_space<vmem>>, vector<1x128x512xf32>
    %987 = vector.shape_cast %986 : vector<1x128x512xf32> to vector<128x512xf32>
    %cst_362 = arith.constant dense<0.000000e+00> : vector<8x512xf32>
    %988 = tpu.matmul %978, %987, %cst_362 {dimension_numbers = #tpu.dot_dimension_numbers<[1], [0], [0], [1], [0, 0, 1, 1], [], []>} : vector<8x128xf32>, vector<128x512xf32>, vector<8x512xf32> -> vector<8x512xf32>
    %989 = arith.addf %985, %988 : vector<8x512xf32>
    %990 = vector.extract_strided_slice %989 {offsets = [0, 0], sizes = [8, 128], strides = [1, 1]} : vector<8x512xf32> to vector<8x128xf32>
    %991 = arith.negf %990 : vector<8x128xf32>
    %992 = math.exp %991 : vector<8x128xf32>
    %cst_363 = arith.constant 1.000000e+00 : f32
    %993 = vector.broadcast %cst_363 : f32 to vector<8x128xf32>
    %994 = arith.addf %993, %992 : vector<8x128xf32>
    %995 = arith.divf %993, %994 : vector<8x128xf32>
    %996 = vector.extract_strided_slice %989 {offsets = [0, 128], sizes = [8, 128], strides = [1, 1]} : vector<8x512xf32> to vector<8x128xf32>
    %997 = arith.negf %996 : vector<8x128xf32>
    %998 = math.exp %997 : vector<8x128xf32>
    %cst_364 = arith.constant 1.000000e+00 : f32
    %999 = vector.broadcast %cst_364 : f32 to vector<8x128xf32>
    %1000 = arith.addf %999, %998 : vector<8x128xf32>
    %1001 = arith.divf %999, %1000 : vector<8x128xf32>
    %1002 = vector.extract_strided_slice %989 {offsets = [0, 256], sizes = [8, 128], strides = [1, 1]} : vector<8x512xf32> to vector<8x128xf32>
    %1003 = math.tanh %1002 : vector<8x128xf32>
    %1004 = vector.extract_strided_slice %989 {offsets = [0, 384], sizes = [8, 128], strides = [1, 1]} : vector<8x512xf32> to vector<8x128xf32>
    %1005 = arith.negf %1004 : vector<8x128xf32>
    %1006 = math.exp %1005 : vector<8x128xf32>
    %cst_365 = arith.constant 1.000000e+00 : f32
    %1007 = vector.broadcast %cst_365 : f32 to vector<8x128xf32>
    %1008 = arith.addf %1007, %1006 : vector<8x128xf32>
    %1009 = arith.divf %1007, %1008 : vector<8x128xf32>
    %1010 = arith.mulf %1001, %976 : vector<8x128xf32>
    %1011 = arith.mulf %995, %1003 : vector<8x128xf32>
    %1012 = arith.addf %1010, %1011 : vector<8x128xf32>
    %1013 = math.tanh %1012 : vector<8x128xf32>
    %1014 = arith.mulf %1009, %1013 : vector<8x128xf32>
    %1015 = arith.index_cast %c2_i32_356 : i32 to index
    %c0_366 = arith.constant 0 : index
    %c0_367 = arith.constant 0 : index
    %1016 = vector.load %arg10[%1015, %c0_366, %c0_367] : memref<8x8x128xf32, #tpu.memory_space<vmem>>, vector<1x8x128xf32>
    %1017 = vector.shape_cast %1016 : vector<1x8x128xf32> to vector<8x128xf32>
    %1018 = vector.shape_cast %1014 : vector<8x128xf32> to vector<1x8x128xf32>
    tpu.vector_store %arg10[%1015, %c0_366, %c0_367], %1018 {strides = array<i32>} : memref<8x8x128xf32, #tpu.memory_space<vmem>>, vector<1x8x128xf32>,
    %c3_i32_368 = arith.constant 3 : i32
    %1019 = arith.index_cast %c3_i32_368 : i32 to index
    %c0_369 = arith.constant 0 : index
    %c0_370 = arith.constant 0 : index
    %1020 = vector.load %arg9[%1019, %c0_369, %c0_370] : memref<8x8x512xf32, #tpu.memory_space<vmem>>, vector<1x8x512xf32>
    %1021 = vector.shape_cast %1020 : vector<1x8x512xf32> to vector<8x512xf32>
    %c3_371 = arith.constant 3 : index
    %c0_372 = arith.constant 0 : index
    %c0_373 = arith.constant 0 : index
    %1022 = vector.load %arg4[%c3_371, %c0_372, %c0_373] : memref<4x128x512xf32, #tpu.memory_space<vmem>>, vector<1x128x512xf32>
    %1023 = vector.shape_cast %1022 : vector<1x128x512xf32> to vector<128x512xf32>
    %cst_374 = arith.constant dense<0.000000e+00> : vector<8x512xf32>
    %1024 = tpu.matmul %1014, %1023, %cst_374 {dimension_numbers = #tpu.dot_dimension_numbers<[1], [0], [0], [1], [0, 0, 1, 1], [], []>} : vector<8x128xf32>, vector<128x512xf32>, vector<8x512xf32> -> vector<8x512xf32>
    %1025 = arith.addf %1021, %1024 : vector<8x512xf32>
    %1026 = vector.extract_strided_slice %1025 {offsets = [0, 0], sizes = [8, 128], strides = [1, 1]} : vector<8x512xf32> to vector<8x128xf32>
    %1027 = arith.negf %1026 : vector<8x128xf32>
    %1028 = math.exp %1027 : vector<8x128xf32>
    %cst_375 = arith.constant 1.000000e+00 : f32
    %1029 = vector.broadcast %cst_375 : f32 to vector<8x128xf32>
    %1030 = arith.addf %1029, %1028 : vector<8x128xf32>
    %1031 = arith.divf %1029, %1030 : vector<8x128xf32>
    %1032 = vector.extract_strided_slice %1025 {offsets = [0, 128], sizes = [8, 128], strides = [1, 1]} : vector<8x512xf32> to vector<8x128xf32>
    %1033 = arith.negf %1032 : vector<8x128xf32>
    %1034 = math.exp %1033 : vector<8x128xf32>
    %cst_376 = arith.constant 1.000000e+00 : f32
    %1035 = vector.broadcast %cst_376 : f32 to vector<8x128xf32>
    %1036 = arith.addf %1035, %1034 : vector<8x128xf32>
    %1037 = arith.divf %1035, %1036 : vector<8x128xf32>
    %1038 = vector.extract_strided_slice %1025 {offsets = [0, 256], sizes = [8, 128], strides = [1, 1]} : vector<8x512xf32> to vector<8x128xf32>
    %1039 = math.tanh %1038 : vector<8x128xf32>
    %1040 = vector.extract_strided_slice %1025 {offsets = [0, 384], sizes = [8, 128], strides = [1, 1]} : vector<8x512xf32> to vector<8x128xf32>
    %1041 = arith.negf %1040 : vector<8x128xf32>
    %1042 = math.exp %1041 : vector<8x128xf32>
    %cst_377 = arith.constant 1.000000e+00 : f32
    %1043 = vector.broadcast %cst_377 : f32 to vector<8x128xf32>
    %1044 = arith.addf %1043, %1042 : vector<8x128xf32>
    %1045 = arith.divf %1043, %1044 : vector<8x128xf32>
    %1046 = arith.mulf %1037, %1012 : vector<8x128xf32>
    %1047 = arith.mulf %1031, %1039 : vector<8x128xf32>
    %1048 = arith.addf %1046, %1047 : vector<8x128xf32>
    %1049 = math.tanh %1048 : vector<8x128xf32>
    %1050 = arith.mulf %1045, %1049 : vector<8x128xf32>
    %1051 = arith.index_cast %c3_i32_368 : i32 to index
    %c0_378 = arith.constant 0 : index
    %c0_379 = arith.constant 0 : index
    %1052 = vector.load %arg10[%1051, %c0_378, %c0_379] : memref<8x8x128xf32, #tpu.memory_space<vmem>>, vector<1x8x128xf32>
    %1053 = vector.shape_cast %1052 : vector<1x8x128xf32> to vector<8x128xf32>
    %1054 = vector.shape_cast %1050 : vector<8x128xf32> to vector<1x8x128xf32>
    tpu.vector_store %arg10[%1051, %c0_378, %c0_379], %1054 {strides = array<i32>} : memref<8x8x128xf32, #tpu.memory_space<vmem>>, vector<1x8x128xf32>,
    %c4_i32_380 = arith.constant 4 : i32
    %1055 = arith.index_cast %c4_i32_380 : i32 to index
    %c0_381 = arith.constant 0 : index
    %c0_382 = arith.constant 0 : index
    %1056 = vector.load %arg9[%1055, %c0_381, %c0_382] : memref<8x8x512xf32, #tpu.memory_space<vmem>>, vector<1x8x512xf32>
    %1057 = vector.shape_cast %1056 : vector<1x8x512xf32> to vector<8x512xf32>
    %c3_383 = arith.constant 3 : index
    %c0_384 = arith.constant 0 : index
    %c0_385 = arith.constant 0 : index
    %1058 = vector.load %arg4[%c3_383, %c0_384, %c0_385] : memref<4x128x512xf32, #tpu.memory_space<vmem>>, vector<1x128x512xf32>
    %1059 = vector.shape_cast %1058 : vector<1x128x512xf32> to vector<128x512xf32>
    %cst_386 = arith.constant dense<0.000000e+00> : vector<8x512xf32>
    %1060 = tpu.matmul %1050, %1059, %cst_386 {dimension_numbers = #tpu.dot_dimension_numbers<[1], [0], [0], [1], [0, 0, 1, 1], [], []>} : vector<8x128xf32>, vector<128x512xf32>, vector<8x512xf32> -> vector<8x512xf32>
    %1061 = arith.addf %1057, %1060 : vector<8x512xf32>
    %1062 = vector.extract_strided_slice %1061 {offsets = [0, 0], sizes = [8, 128], strides = [1, 1]} : vector<8x512xf32> to vector<8x128xf32>
    %1063 = arith.negf %1062 : vector<8x128xf32>
    %1064 = math.exp %1063 : vector<8x128xf32>
    %cst_387 = arith.constant 1.000000e+00 : f32
    %1065 = vector.broadcast %cst_387 : f32 to vector<8x128xf32>
    %1066 = arith.addf %1065, %1064 : vector<8x128xf32>
    %1067 = arith.divf %1065, %1066 : vector<8x128xf32>
    %1068 = vector.extract_strided_slice %1061 {offsets = [0, 128], sizes = [8, 128], strides = [1, 1]} : vector<8x512xf32> to vector<8x128xf32>
    %1069 = arith.negf %1068 : vector<8x128xf32>
    %1070 = math.exp %1069 : vector<8x128xf32>
    %cst_388 = arith.constant 1.000000e+00 : f32
    %1071 = vector.broadcast %cst_388 : f32 to vector<8x128xf32>
    %1072 = arith.addf %1071, %1070 : vector<8x128xf32>
    %1073 = arith.divf %1071, %1072 : vector<8x128xf32>
    %1074 = vector.extract_strided_slice %1061 {offsets = [0, 256], sizes = [8, 128], strides = [1, 1]} : vector<8x512xf32> to vector<8x128xf32>
    %1075 = math.tanh %1074 : vector<8x128xf32>
    %1076 = vector.extract_strided_slice %1061 {offsets = [0, 384], sizes = [8, 128], strides = [1, 1]} : vector<8x512xf32> to vector<8x128xf32>
    %1077 = arith.negf %1076 : vector<8x128xf32>
    %1078 = math.exp %1077 : vector<8x128xf32>
    %cst_389 = arith.constant 1.000000e+00 : f32
    %1079 = vector.broadcast %cst_389 : f32 to vector<8x128xf32>
    %1080 = arith.addf %1079, %1078 : vector<8x128xf32>
    %1081 = arith.divf %1079, %1080 : vector<8x128xf32>
    %1082 = arith.mulf %1073, %1048 : vector<8x128xf32>
    %1083 = arith.mulf %1067, %1075 : vector<8x128xf32>
    %1084 = arith.addf %1082, %1083 : vector<8x128xf32>
    %1085 = math.tanh %1084 : vector<8x128xf32>
    %1086 = arith.mulf %1081, %1085 : vector<8x128xf32>
    %1087 = arith.index_cast %c4_i32_380 : i32 to index
    %c0_390 = arith.constant 0 : index
    %c0_391 = arith.constant 0 : index
    %1088 = vector.load %arg10[%1087, %c0_390, %c0_391] : memref<8x8x128xf32, #tpu.memory_space<vmem>>, vector<1x8x128xf32>
    %1089 = vector.shape_cast %1088 : vector<1x8x128xf32> to vector<8x128xf32>
    %1090 = vector.shape_cast %1086 : vector<8x128xf32> to vector<1x8x128xf32>
    tpu.vector_store %arg10[%1087, %c0_390, %c0_391], %1090 {strides = array<i32>} : memref<8x8x128xf32, #tpu.memory_space<vmem>>, vector<1x8x128xf32>,
    %c5_i32_392 = arith.constant 5 : i32
    %1091 = arith.index_cast %c5_i32_392 : i32 to index
    %c0_393 = arith.constant 0 : index
    %c0_394 = arith.constant 0 : index
    %1092 = vector.load %arg9[%1091, %c0_393, %c0_394] : memref<8x8x512xf32, #tpu.memory_space<vmem>>, vector<1x8x512xf32>
    %1093 = vector.shape_cast %1092 : vector<1x8x512xf32> to vector<8x512xf32>
    %c3_395 = arith.constant 3 : index
    %c0_396 = arith.constant 0 : index
    %c0_397 = arith.constant 0 : index
    %1094 = vector.load %arg4[%c3_395, %c0_396, %c0_397] : memref<4x128x512xf32, #tpu.memory_space<vmem>>, vector<1x128x512xf32>
    %1095 = vector.shape_cast %1094 : vector<1x128x512xf32> to vector<128x512xf32>
    %cst_398 = arith.constant dense<0.000000e+00> : vector<8x512xf32>
    %1096 = tpu.matmul %1086, %1095, %cst_398 {dimension_numbers = #tpu.dot_dimension_numbers<[1], [0], [0], [1], [0, 0, 1, 1], [], []>} : vector<8x128xf32>, vector<128x512xf32>, vector<8x512xf32> -> vector<8x512xf32>
    %1097 = arith.addf %1093, %1096 : vector<8x512xf32>
    %1098 = vector.extract_strided_slice %1097 {offsets = [0, 0], sizes = [8, 128], strides = [1, 1]} : vector<8x512xf32> to vector<8x128xf32>
    %1099 = arith.negf %1098 : vector<8x128xf32>
    %1100 = math.exp %1099 : vector<8x128xf32>
    %cst_399 = arith.constant 1.000000e+00 : f32
    %1101 = vector.broadcast %cst_399 : f32 to vector<8x128xf32>
    %1102 = arith.addf %1101, %1100 : vector<8x128xf32>
    %1103 = arith.divf %1101, %1102 : vector<8x128xf32>
    %1104 = vector.extract_strided_slice %1097 {offsets = [0, 128], sizes = [8, 128], strides = [1, 1]} : vector<8x512xf32> to vector<8x128xf32>
    %1105 = arith.negf %1104 : vector<8x128xf32>
    %1106 = math.exp %1105 : vector<8x128xf32>
    %cst_400 = arith.constant 1.000000e+00 : f32
    %1107 = vector.broadcast %cst_400 : f32 to vector<8x128xf32>
    %1108 = arith.addf %1107, %1106 : vector<8x128xf32>
    %1109 = arith.divf %1107, %1108 : vector<8x128xf32>
    %1110 = vector.extract_strided_slice %1097 {offsets = [0, 256], sizes = [8, 128], strides = [1, 1]} : vector<8x512xf32> to vector<8x128xf32>
    %1111 = math.tanh %1110 : vector<8x128xf32>
    %1112 = vector.extract_strided_slice %1097 {offsets = [0, 384], sizes = [8, 128], strides = [1, 1]} : vector<8x512xf32> to vector<8x128xf32>
    %1113 = arith.negf %1112 : vector<8x128xf32>
    %1114 = math.exp %1113 : vector<8x128xf32>
    %cst_401 = arith.constant 1.000000e+00 : f32
    %1115 = vector.broadcast %cst_401 : f32 to vector<8x128xf32>
    %1116 = arith.addf %1115, %1114 : vector<8x128xf32>
    %1117 = arith.divf %1115, %1116 : vector<8x128xf32>
    %1118 = arith.mulf %1109, %1084 : vector<8x128xf32>
    %1119 = arith.mulf %1103, %1111 : vector<8x128xf32>
    %1120 = arith.addf %1118, %1119 : vector<8x128xf32>
    %1121 = math.tanh %1120 : vector<8x128xf32>
    %1122 = arith.mulf %1117, %1121 : vector<8x128xf32>
    %1123 = arith.index_cast %c5_i32_392 : i32 to index
    %c0_402 = arith.constant 0 : index
    %c0_403 = arith.constant 0 : index
    %1124 = vector.load %arg10[%1123, %c0_402, %c0_403] : memref<8x8x128xf32, #tpu.memory_space<vmem>>, vector<1x8x128xf32>
    %1125 = vector.shape_cast %1124 : vector<1x8x128xf32> to vector<8x128xf32>
    %1126 = vector.shape_cast %1122 : vector<8x128xf32> to vector<1x8x128xf32>
    tpu.vector_store %arg10[%1123, %c0_402, %c0_403], %1126 {strides = array<i32>} : memref<8x8x128xf32, #tpu.memory_space<vmem>>, vector<1x8x128xf32>,
    %c6_i32_404 = arith.constant 6 : i32
    %1127 = arith.index_cast %c6_i32_404 : i32 to index
    %c0_405 = arith.constant 0 : index
    %c0_406 = arith.constant 0 : index
    %1128 = vector.load %arg9[%1127, %c0_405, %c0_406] : memref<8x8x512xf32, #tpu.memory_space<vmem>>, vector<1x8x512xf32>
    %1129 = vector.shape_cast %1128 : vector<1x8x512xf32> to vector<8x512xf32>
    %c3_407 = arith.constant 3 : index
    %c0_408 = arith.constant 0 : index
    %c0_409 = arith.constant 0 : index
    %1130 = vector.load %arg4[%c3_407, %c0_408, %c0_409] : memref<4x128x512xf32, #tpu.memory_space<vmem>>, vector<1x128x512xf32>
    %1131 = vector.shape_cast %1130 : vector<1x128x512xf32> to vector<128x512xf32>
    %cst_410 = arith.constant dense<0.000000e+00> : vector<8x512xf32>
    %1132 = tpu.matmul %1122, %1131, %cst_410 {dimension_numbers = #tpu.dot_dimension_numbers<[1], [0], [0], [1], [0, 0, 1, 1], [], []>} : vector<8x128xf32>, vector<128x512xf32>, vector<8x512xf32> -> vector<8x512xf32>
    %1133 = arith.addf %1129, %1132 : vector<8x512xf32>
    %1134 = vector.extract_strided_slice %1133 {offsets = [0, 0], sizes = [8, 128], strides = [1, 1]} : vector<8x512xf32> to vector<8x128xf32>
    %1135 = arith.negf %1134 : vector<8x128xf32>
    %1136 = math.exp %1135 : vector<8x128xf32>
    %cst_411 = arith.constant 1.000000e+00 : f32
    %1137 = vector.broadcast %cst_411 : f32 to vector<8x128xf32>
    %1138 = arith.addf %1137, %1136 : vector<8x128xf32>
    %1139 = arith.divf %1137, %1138 : vector<8x128xf32>
    %1140 = vector.extract_strided_slice %1133 {offsets = [0, 128], sizes = [8, 128], strides = [1, 1]} : vector<8x512xf32> to vector<8x128xf32>
    %1141 = arith.negf %1140 : vector<8x128xf32>
    %1142 = math.exp %1141 : vector<8x128xf32>
    %cst_412 = arith.constant 1.000000e+00 : f32
    %1143 = vector.broadcast %cst_412 : f32 to vector<8x128xf32>
    %1144 = arith.addf %1143, %1142 : vector<8x128xf32>
    %1145 = arith.divf %1143, %1144 : vector<8x128xf32>
    %1146 = vector.extract_strided_slice %1133 {offsets = [0, 256], sizes = [8, 128], strides = [1, 1]} : vector<8x512xf32> to vector<8x128xf32>
    %1147 = math.tanh %1146 : vector<8x128xf32>
    %1148 = vector.extract_strided_slice %1133 {offsets = [0, 384], sizes = [8, 128], strides = [1, 1]} : vector<8x512xf32> to vector<8x128xf32>
    %1149 = arith.negf %1148 : vector<8x128xf32>
    %1150 = math.exp %1149 : vector<8x128xf32>
    %cst_413 = arith.constant 1.000000e+00 : f32
    %1151 = vector.broadcast %cst_413 : f32 to vector<8x128xf32>
    %1152 = arith.addf %1151, %1150 : vector<8x128xf32>
    %1153 = arith.divf %1151, %1152 : vector<8x128xf32>
    %1154 = arith.mulf %1145, %1120 : vector<8x128xf32>
    %1155 = arith.mulf %1139, %1147 : vector<8x128xf32>
    %1156 = arith.addf %1154, %1155 : vector<8x128xf32>
    %1157 = math.tanh %1156 : vector<8x128xf32>
    %1158 = arith.mulf %1153, %1157 : vector<8x128xf32>
    %1159 = arith.index_cast %c6_i32_404 : i32 to index
    %c0_414 = arith.constant 0 : index
    %c0_415 = arith.constant 0 : index
    %1160 = vector.load %arg10[%1159, %c0_414, %c0_415] : memref<8x8x128xf32, #tpu.memory_space<vmem>>, vector<1x8x128xf32>
    %1161 = vector.shape_cast %1160 : vector<1x8x128xf32> to vector<8x128xf32>
    %1162 = vector.shape_cast %1158 : vector<8x128xf32> to vector<1x8x128xf32>
    tpu.vector_store %arg10[%1159, %c0_414, %c0_415], %1162 {strides = array<i32>} : memref<8x8x128xf32, #tpu.memory_space<vmem>>, vector<1x8x128xf32>,
    %c7_i32_416 = arith.constant 7 : i32
    %1163 = arith.index_cast %c7_i32_416 : i32 to index
    %c0_417 = arith.constant 0 : index
    %c0_418 = arith.constant 0 : index
    %1164 = vector.load %arg9[%1163, %c0_417, %c0_418] : memref<8x8x512xf32, #tpu.memory_space<vmem>>, vector<1x8x512xf32>
    %1165 = vector.shape_cast %1164 : vector<1x8x512xf32> to vector<8x512xf32>
    %c3_419 = arith.constant 3 : index
    %c0_420 = arith.constant 0 : index
    %c0_421 = arith.constant 0 : index
    %1166 = vector.load %arg4[%c3_419, %c0_420, %c0_421] : memref<4x128x512xf32, #tpu.memory_space<vmem>>, vector<1x128x512xf32>
    %1167 = vector.shape_cast %1166 : vector<1x128x512xf32> to vector<128x512xf32>
    %cst_422 = arith.constant dense<0.000000e+00> : vector<8x512xf32>
    %1168 = tpu.matmul %1158, %1167, %cst_422 {dimension_numbers = #tpu.dot_dimension_numbers<[1], [0], [0], [1], [0, 0, 1, 1], [], []>} : vector<8x128xf32>, vector<128x512xf32>, vector<8x512xf32> -> vector<8x512xf32>
    %1169 = arith.addf %1165, %1168 : vector<8x512xf32>
    %1170 = vector.extract_strided_slice %1169 {offsets = [0, 0], sizes = [8, 128], strides = [1, 1]} : vector<8x512xf32> to vector<8x128xf32>
    %1171 = arith.negf %1170 : vector<8x128xf32>
    %1172 = math.exp %1171 : vector<8x128xf32>
    %cst_423 = arith.constant 1.000000e+00 : f32
    %1173 = vector.broadcast %cst_423 : f32 to vector<8x128xf32>
    %1174 = arith.addf %1173, %1172 : vector<8x128xf32>
    %1175 = arith.divf %1173, %1174 : vector<8x128xf32>
    %1176 = vector.extract_strided_slice %1169 {offsets = [0, 128], sizes = [8, 128], strides = [1, 1]} : vector<8x512xf32> to vector<8x128xf32>
    %1177 = arith.negf %1176 : vector<8x128xf32>
    %1178 = math.exp %1177 : vector<8x128xf32>
    %cst_424 = arith.constant 1.000000e+00 : f32
    %1179 = vector.broadcast %cst_424 : f32 to vector<8x128xf32>
    %1180 = arith.addf %1179, %1178 : vector<8x128xf32>
    %1181 = arith.divf %1179, %1180 : vector<8x128xf32>
    %1182 = vector.extract_strided_slice %1169 {offsets = [0, 256], sizes = [8, 128], strides = [1, 1]} : vector<8x512xf32> to vector<8x128xf32>
    %1183 = math.tanh %1182 : vector<8x128xf32>
    %1184 = vector.extract_strided_slice %1169 {offsets = [0, 384], sizes = [8, 128], strides = [1, 1]} : vector<8x512xf32> to vector<8x128xf32>
    %1185 = arith.negf %1184 : vector<8x128xf32>
    %1186 = math.exp %1185 : vector<8x128xf32>
    %cst_425 = arith.constant 1.000000e+00 : f32
    %1187 = vector.broadcast %cst_425 : f32 to vector<8x128xf32>
    %1188 = arith.addf %1187, %1186 : vector<8x128xf32>
    %1189 = arith.divf %1187, %1188 : vector<8x128xf32>
    %1190 = arith.mulf %1181, %1156 : vector<8x128xf32>
    %1191 = arith.mulf %1175, %1183 : vector<8x128xf32>
    %1192 = arith.addf %1190, %1191 : vector<8x128xf32>
    %1193 = math.tanh %1192 : vector<8x128xf32>
    %1194 = arith.mulf %1189, %1193 : vector<8x128xf32>
    %1195 = arith.index_cast %c7_i32_416 : i32 to index
    %c0_426 = arith.constant 0 : index
    %c0_427 = arith.constant 0 : index
    %1196 = vector.load %arg10[%1195, %c0_426, %c0_427] : memref<8x8x128xf32, #tpu.memory_space<vmem>>, vector<1x8x128xf32>
    %1197 = vector.shape_cast %1196 : vector<1x8x128xf32> to vector<8x128xf32>
    %1198 = vector.shape_cast %1194 : vector<8x128xf32> to vector<1x8x128xf32>
    tpu.vector_store %arg10[%1195, %c0_426, %c0_427], %1198 {strides = array<i32>} : memref<8x8x128xf32, #tpu.memory_space<vmem>>, vector<1x8x128xf32>,
    %c8_i32_428 = arith.constant 8 : i32
    %c0_429 = arith.constant 0 : index
    %c0_430 = arith.constant 0 : index
    %c0_431 = arith.constant 0 : index
    %1199 = vector.load %arg10[%c0_429, %c0_430, %c0_431] : memref<8x8x128xf32, #tpu.memory_space<vmem>>, vector<8x8x128xf32>
    %1200 = vector.shape_cast %1199 : vector<8x8x128xf32> to vector<64x128xf32>
    %c0_432 = arith.constant 0 : index
    %c0_433 = arith.constant 0 : index
    %1201 = vector.load %arg6[%c0_432, %c0_433] : memref<128x128xf32, #tpu.memory_space<vmem>>, vector<128x128xf32>
    %cst_434 = arith.constant dense<0.000000e+00> : vector<64x128xf32>
    %1202 = tpu.matmul %1200, %1201, %cst_434 {dimension_numbers = #tpu.dot_dimension_numbers<[1], [0], [0], [1], [0, 0, 1, 1], [], []>} : vector<64x128xf32>, vector<128x128xf32>, vector<64x128xf32> -> vector<64x128xf32>
    %c0_435 = arith.constant 0 : index
    %c0_436 = arith.constant 0 : index
    %1203 = vector.load %arg7[%c0_435, %c0_436] : memref<1x128xf32, #tpu.memory_space<vmem>>, vector<1x128xf32>
    %1204 = vector.broadcast %1203 : vector<1x128xf32> to vector<64x128xf32>
    %1205 = arith.addf %1202, %1204 : vector<64x128xf32>
    %1206 = vector.shape_cast %1205 : vector<64x128xf32> to vector<8x8x128xf32>
    %c0_437 = arith.constant 0 : index
    %c0_438 = arith.constant 0 : index
    %c0_439 = arith.constant 0 : index
    %1207 = vector.load %arg8[%c0_437, %c0_438, %c0_439] : memref<8x8x128xf32, #tpu.memory_space<vmem>>, vector<8x8x128xf32>
    tpu.vector_store %arg8[%c0_437, %c0_438, %c0_439], %1206 {strides = array<i32>} : memref<8x8x128xf32, #tpu.memory_space<vmem>>, vector<8x8x128xf32>,
    return
  }
  func.func @transform_0(%arg0: i32) -> (i32, i32, i32) {
    %c0_i32 = arith.constant 0 : i32
    %c0_i32_0 = arith.constant 0 : i32
    %c0_i32_1 = arith.constant 0 : i32
    return %c0_i32, %arg0, %c0_i32_0 : i32, i32, i32
  }
  func.func @transform_1(%arg0: i32) -> (i32, i32) {
    %c0_i32 = arith.constant 0 : i32
    %c0_i32_0 = arith.constant 0 : i32
    %c0_i32_1 = arith.constant 0 : i32
    return %c0_i32, %c0_i32_0 : i32, i32
  }
  func.func @transform_2(%arg0: i32) -> (i32, i32, i32) {
    %c0_i32 = arith.constant 0 : i32
    %c0_i32_0 = arith.constant 0 : i32
    %c0_i32_1 = arith.constant 0 : i32
    %c0_i32_2 = arith.constant 0 : i32
    return %c0_i32, %c0_i32_0, %c0_i32_1 : i32, i32, i32
  }
  func.func @transform_3(%arg0: i32) -> (i32, i32, i32) {
    %c0_i32 = arith.constant 0 : i32
    %c0_i32_0 = arith.constant 0 : i32
    %c0_i32_1 = arith.constant 0 : i32
    %c0_i32_2 = arith.constant 0 : i32
    return %c0_i32, %c0_i32_0, %c0_i32_1 : i32, i32, i32
  }
  func.func @transform_4(%arg0: i32) -> (i32, i32, i32) {
    %c0_i32 = arith.constant 0 : i32
    %c0_i32_0 = arith.constant 0 : i32
    %c0_i32_1 = arith.constant 0 : i32
    %c0_i32_2 = arith.constant 0 : i32
    return %c0_i32, %c0_i32_0, %c0_i32_1 : i32, i32, i32
  }
  func.func @transform_5(%arg0: i32) -> (i32, i32) {
    %c0_i32 = arith.constant 0 : i32
    %c0_i32_0 = arith.constant 0 : i32
    %c0_i32_1 = arith.constant 0 : i32
    return %c0_i32, %c0_i32_0 : i32, i32
  }
  func.func @transform_6(%arg0: i32) -> (i32, i32) {
    %c0_i32 = arith.constant 0 : i32
    %c0_i32_0 = arith.constant 0 : i32
    %c0_i32_1 = arith.constant 0 : i32
    return %c0_i32, %c0_i32_0 : i32, i32
  }
  func.func @transform_7(%arg0: i32) -> (i32, i32, i32) {
    %c0_i32 = arith.constant 0 : i32
    %c0_i32_0 = arith.constant 0 : i32
    %c0_i32_1 = arith.constant 0 : i32
    return %c0_i32, %arg0, %c0_i32_0 : i32, i32, i32
  }
}

</mosaic_0001>

<bundles_post_ra>
// kernel: model_forward.1
= control target key start
LH: loop header
LB: loop body
LE: loop exit
PB: predicated region body
PF: predicated region fallthrough
CT: control target
= control target key end

     0   :  { %12 = vsyncpa [#allocation5], 0  ;;  %s14994_s0 = inlined_call_operand.vmem [shape: f32[8,8,32], index: 0, kind: input, shape index: {}]   ;;  %s14995_s1 = inlined_call_operand.hbm [shape: f32[32,512], index: 1, kind: input, shape index: {}]   ;;  %s14996_s2 = inlined_call_operand.hbm [shape: f32[3,128,512], index: 2, kind: input, shape index: {}]   ;;  %s14997_s3 = inlined_call_operand.hbm [shape: f32[4,128,512], index: 3, kind: input, shape index: {}]   ;;  %s14998_s4 = inlined_call_operand.hbm [shape: f32[4,1,512], index: 4, kind: input, shape index: {}]   ;;  %s14999_s5 = inlined_call_operand.vmem [shape: f32[128,128], index: 5, kind: input, shape index: {}]   ;;  %s15000_s6 = inlined_call_operand.vmem [shape: f32[1,128], index: 6, kind: input, shape index: {}]   ;;  %s15001_s7 = inlined_call_operand.vmem [shape: f32[8,8,128], index: 7, kind: output, shape index: {}]  }
   0x1   :  { %13 = vsyncpa [#allocation7], 0 }
   0x2   :  { %14 = vsyncpa [#allocation10], 0  ;;  %s12627_s24 = smov [#allocation6]   ;;  %s12628_s26 = smov [#allocation4]  }
   0x3   :  { %s34_s25 = sshll.u32 %s12627_s24, 4  ;;  %s22_s27 = sshll.u32 %s12628_s26, 4  ;;  %s35_s25 = int_to_ptr.vmem [resolvable:$true] %s34_s25  ;;  %s12676_s27 = int_to_ptr.vmem [resolvable:$true] %s22_s27 }
   0x4   :  { %s12533_s30 = scalar_lea.hbm %s14996_s2, 24576 }
   0x5   :  { %p12534_p0 = scmp.ne.s32.totalorder %s14996_s2, %s12533_s30  ;;  %p12537_p1 = scmp.lt.u32.totalorder %s12533_s30, %s14996_s2 }
   0x7   :  { %p12539_p2 = pnand %p12537_p1, %p12534_p0 }
   0x9   :  { %12542 = shalt.err (!%p12539_p2)
}
   0xa   :  { %s12543_s12 = scalar_lea.vmem %s35_s25, 24576  ;;  %p12548_p4 = scmp.lt.s32.totalorder %s35_s25, %s35_s25 }
   0xb   :  { %p12544_p3 = scmp.ne.s32.totalorder %s35_s25, %s12543_s12  ;;  %p12549_p5 = scmp.lt.s32.totalorder %s12543_s12, %s12543_s12 }
   0xd   :  { %p12550_p6 = por %p12549_p5, %p12548_p4 }
   0xf   :  { %p12551_p7 = pnand %p12550_p6, %p12544_p3 }
  0x11   :  { %12554 = shalt.err (!%p12551_p7)
}
  0x12   :  { %s12629_s13 = smov 512   ;;  %s12630_s14 = smov 32  }
  0x13   :  { %40 = dma.hbm_to_vmem [thread:$0]  %s14996_s2, 24576, %s35_s25, [#allocation7], %s12629_s13, %s12629_s13, %s12630_s14  }
  0x14   :  { %s12555_s19 = scalar_lea.hbm %s14995_s1, 2048 }
  0x15   :  { %p12556_p8 = scmp.ne.s32.totalorder %s14995_s1, %s12555_s19  ;;  %p12559_p9 = scmp.lt.u32.totalorder %s12555_s19, %s14995_s1 }
  0x17   :  { %p12561_p10 = pnand %p12559_p9, %p12556_p8 }
  0x19   :  { %12564 = shalt.err (!%p12561_p10)
}
  0x1a   :  { %s12565_s24 = scalar_lea.vmem %s12676_s27, 2048  ;;  %p12570_p12 = scmp.lt.s32.totalorder %s12676_s27, %s12676_s27 }
  0x1b   :  { %p12566_p11 = scmp.ne.s32.totalorder %s12676_s27, %s12565_s24  ;;  %p12571_p13 = scmp.lt.s32.totalorder %s12565_s24, %s12565_s24 }
  0x1d   :  { %p12572_p0 = por %p12571_p13, %p12570_p12 }
  0x1f   :  { %p12573_p1 = pnand %p12572_p0, %p12566_p11 }
  0x21   :  { %12576 = shalt.err (!%p12573_p1)
}
  0x22   :  { %28 = dma.hbm_to_vmem [thread:$0]  %s14995_s1, 2048, %s12676_s27, [#allocation5], %s12629_s13, %s12629_s13, %s12630_s14  }
  0x23   :  { %s12631_s26 = smov [#allocation8]   ;;  %s12632_s29 = smov [#allocation9]  }
  0x24   :  { %s46_s28 = sshll.u32 %s12631_s26, 4  ;;  %s58_s30 = sshll.u32 %s12632_s29, 4  ;;  %s47_s28 = int_to_ptr.vmem [resolvable:$true] %s46_s28  ;;  %s12713_s30 = int_to_ptr.vmem [resolvable:$true] %s58_s30 }
  0x25   :  { %s12577_s10 = scalar_lea.hbm %s14997_s3, 32768 }
  0x26   :  { %p12578_p2 = scmp.ne.s32.totalorder %s14997_s3, %s12577_s10  ;;  %p12581_p3 = scmp.lt.u32.totalorder %s12577_s10, %s14997_s3 }
  0x28   :  { %p12583_p4 = pnand %p12581_p3, %p12578_p2 }
  0x2a   :  { %12586 = shalt.err (!%p12583_p4)
}
  0x2b   :  { %s12587_s1 = scalar_lea.vmem %s47_s28, 32768  ;;  %p12592_p6 = scmp.lt.s32.totalorder %s47_s28, %s47_s28 }
  0x2c   :  { %p12588_p5 = scmp.ne.s32.totalorder %s47_s28, %s12587_s1  ;;  %p12593_p7 = scmp.lt.s32.totalorder %s12587_s1, %s12587_s1 }
  0x2e   :  { %p12594_p8 = por %p12593_p7, %p12592_p6 }
  0x30   :  { %p12595_p9 = pnand %p12594_p8, %p12588_p5 }
  0x32   :  { %12598 = shalt.err (!%p12595_p9)
}
  0x33   :  { %52 = dma.hbm_to_vmem [thread:$0]  %s14997_s3, 32768, %s47_s28, [#allocation7], %s12629_s13, %s12629_s13, %s12630_s14  }
  0x34   :  { %s12599_s20 = scalar_lea.hbm %s14998_s4, 256 }
  0x35   :  { %p12600_p10 = scmp.ne.s32.totalorder %s14998_s4, %s12599_s20  ;;  %p12603_p11 = scmp.lt.u32.totalorder %s12599_s20, %s14998_s4 }
  0x37   :  { %p12605_p12 = pnand %p12603_p11, %p12600_p10 }
  0x39   :  { %12608 = shalt.err (!%p12605_p12)
}
  0x3a   :  { %s12609_s2 = scalar_lea.vmem %s12713_s30, 256  ;;  %p12614_p0 = scmp.lt.s32.totalorder %s12713_s30, %s12713_s30 }
  0x3b   :  { %p12610_p13 = scmp.ne.s32.totalorder %s12713_s30, %s12609_s2  ;;  %p12615_p1 = scmp.lt.s32.totalorder %s12609_s2, %s12609_s2 }
  0x3d   :  { %p12616_p2 = por %p12615_p1, %p12614_p0 }
  0x3f   :  { %p12617_p3 = pnand %p12616_p2, %p12610_p13 }
  0x41   :  { %12620 = shalt.err (!%p12617_p3)
}
  0x42   :  { %s12633_s3 = smov 64   ;;  %s12634_s13 = smov 4  }
  0x43   :  { %64 = dma.hbm_to_vmem [thread:$0]  %s14998_s4, 256, %s12713_s30, [#allocation10], %s12633_s3, %s12633_s3, %s12634_s13  }
  0x44   :  { %12621 = dma.done.wait [#allocation5], 2048  }
  0x45   :  { %12622 = vsyncadd [#allocation5], 4294965248 }
  0x46   :  { %12623 = dma.done.wait [#allocation7], 57344  }
  0x47   :  { %12624 = vsyncadd [#allocation7], 4294909952 }
  0x48   :  { %12625 = dma.done.wait [#allocation10], 256  }
  0x49   :  { %12626 = vsyncadd [#allocation10], 4294967040  ;;  %v12635_v0 = vmov 0.0   ;;  %v92_v1 = vld [vmem:[#allocation4 + $0x18] sm:$0xff]  ;;  %v91_v3 = vld [vmem:[#allocation4 + $0x10] sm:$0xff]  ;;  %vm127_vm0 = vcmask 261120  }
  0x4a   :  { %329 = vmatprep.mubr.f32.mxu1 %v12635_v0  ;;  %216 = vmatprep.mubr.f32.mxu0 %v12635_v0  ;;  %v96_v2 = vld [vmem:[#allocation4 + $0x38] sm:$0xff]  ;;  %v95_v5 = vld [vmem:[#allocation4 + $0x30] sm:$0xff]  ;;  %v415_v12 = vld [vmem:[#allocation8 + $0x8] sm:$0xff] }
  0x4b   :  { %v9476_v4 = vpack.c.bf16 %v96_v2, %v92_v1  ;;  %v100_v6 = vld [vmem:[#allocation4 + $0x58] sm:$0xff]  ;;  %v9478_v8 = vpack.c.bf16 %v95_v5, %v91_v3  ;;  %v99_v10 = vld [vmem:[#allocation4 + $0x50] sm:$0xff]  ;;  %v419_v13 = vld [vmem:[#allocation8 + $0x28] sm:$0xff] }
  0x4c   :  { %v104_v7 = vld [vmem:[#allocation4 + $0x78] sm:$0xff]  ;;  %v103_v11 = vld [vmem:[#allocation4 + $0x70] sm:$0xff]  ;;  %v12749_v15 = vpack.c.bf16 %v419_v13, %v415_v12  ;;  %v414_v16 = vld [vmem:[#allocation8] sm:$0xff] }
  0x4d   :  { %v9480_v9 = vpack.c.bf16 %v104_v7, %v100_v6  ;;  %9477 = vmatprep.subr.bf16.mxu1 %v9476_v4  ;;  %v9482_v14 = vpack.c.bf16 %v103_v11, %v99_v10  ;;  %v418_v17 = vld [vmem:[#allocation8 + $0x20] sm:$0xff]  ;;  %v423_v18 = vld [vmem:[#allocation8 + $0x48] sm:$0xff]  ;;  %v12780_v40 = vld [vmem:[%s14994_s0 + $0x10] sm:$0xff] }
  0x4e   :  { %9479 = vmatpush1.bf16.msra.mxu1 %v9478_v8  ;;  %v427_v19 = vld [vmem:[#allocation8 + $0x68] sm:$0xff]  ;;  %v12754_v20 = vld [vmem:[%s14994_s0] sm:$0xff]  ;;  %v12756_v21 = vpack.c.bf16 %v418_v17, %v414_v16  ;;  %v12796_v53 = vld [vmem:[%s14994_s0 + $0x18] sm:$0xff] }
  0x4f   :  { %9481 = vmatprep.subr.bf16.mxu1 %v9480_v9  ;;  %v12759_v22 = vpack.c.bf16 %v427_v19, %v423_v18  ;;  %v422_v23 = vld [vmem:[#allocation8 + $0x40] sm:$0xff]  ;;  %v431_v25 = vld [vmem:[#allocation8 + $0x88] sm:$0xff]  ;;  %v87_v11 = vld [vmem:[%s14994_s0 + $0x30] sm:$0xff] }
  0x50   :  { %v426_v24 = vld [vmem:[#allocation8 + $0x60] sm:$0xff]  ;;  %v435_v26 = vld [vmem:[#allocation8 + $0xa8] sm:$0xff]  ;;  %v417_v17 = vld [vmem:[#allocation8 + $0x18] sm:$0xff] }
  0x51   :  { %v12766_v27 = vld [vmem:[%s14994_s0 + $0x8] sm:$0xff]  ;;  %v12770_v28 = vpack.c.bf16 %v426_v24, %v422_v23  ;;  %v430_v29 = vld [vmem:[#allocation8 + $0x80] sm:$0xff]  ;;  %v12773_v32 = vpack.c.bf16 %v435_v26, %v431_v25  ;;  %v421_v18 = vld [vmem:[#allocation8 + $0x38] sm:$0xff] }
  0x52   :  { %9483 = vmatpush1.bf16.msra.mxu1 %v9482_v14  ;;  %v434_v30 = vld [vmem:[#allocation8 + $0xa0] sm:$0xff]  ;;  %v90_v31 = vld [vmem:[#allocation4 + $0x8] sm:$0xff]  ;;  %v88_v19 = vld [vmem:[%s14994_s0 + $0x38] sm:$0xff]  ;;  %v12868_v23 = vpack.c.bf16 %v421_v18, %v417_v17  ;;  %v107_v18 = vlaneseq }
  0x53   :  { %9485 = vmatprep.subr.bf16.mxu1 %v12749_v15  ;;  %v94_v33 = vld [vmem:[#allocation4 + $0x28] sm:$0xff]  ;;  %v89_v34 = vld [vmem:[#allocation4] sm:$0xff]  ;;  %v12784_v42 = vpack.c.bf16 %v434_v30, %v430_v29  ;;  %v416_v24 = vld [vmem:[#allocation8 + $0x10] sm:$0xff] }
  0x54   :  { %v93_v35 = vld [vmem:[#allocation4 + $0x20] sm:$0xff]  ;;  %v439_v36 = vld [vmem:[#allocation8 + $0xc8] sm:$0xff]  ;;  %v9468_v38 = vpack.c.bf16 %v94_v33, %v90_v31  ;;  %v420_v25 = vld [vmem:[#allocation8 + $0x30] sm:$0xff] }
  0x55   :  { %9295 = vmatmul.mubr.msk.f32.vlgmr.msra.gmra.mrb[0].mxu1 %vm127_vm0, %v12754_v20  ;;  %v443_v37 = vld [vmem:[#allocation8 + $0xe8] sm:$0xff]  ;;  %v9470_v39 = vpack.c.bf16 %v93_v35, %v89_v34  ;;  %v97_v44 = vld [vmem:[#allocation4 + $0x40] sm:$0xff]  ;;  %v425_v26 = vld [vmem:[#allocation8 + $0x58] sm:$0xff]  ;;  %v12878_v29 = vpack.c.bf16 %v420_v25, %v416_v24  ;;  %v108_v25 = vshrl.u32 %v107_v18, 7 }
  0x56   :  { %9487 = vmatpush1.bf16.msra.mxu1 %v12756_v21  ;;  %335 = vmatprep.mubr.f32.mxu1 %v12635_v0  ;;  %v98_v41 = vld [vmem:[#allocation4 + $0x48] sm:$0xff]  ;;  %v101_v45 = vld [vmem:[#allocation4 + $0x60] sm:$0xff]  ;;  %v12787_v46 = vpack.c.bf16 %v443_v37, %v439_v36  ;;  %v424_v31 = vld [vmem:[#allocation8 + $0x50] sm:$0xff] }
  0x57   :  { %9489 = vmatprep.subr.bf16.mxu1 %v12759_v22  ;;  %v102_v43 = vld [vmem:[#allocation4 + $0x68] sm:$0xff]  ;;  %v438_v47 = vld [vmem:[#allocation8 + $0xc0] sm:$0xff]  ;;  %9469 = vmatprep.subr.bf16.mxu0 %v9468_v38  ;;  %v9474_v52 = vpack.c.bf16 %v101_v45, %v97_v44  ;;  %v428_v33 = vld [vmem:[#allocation8 + $0x70] sm:$0xff] }
  0x58   :  { %v442_v48 = vld [vmem:[#allocation8 + $0xe0] sm:$0xff]  ;;  %v9472_v49 = vpack.c.bf16 %v102_v43, %v98_v41  ;;  %v447_v50 = vld [vmem:[#allocation8 + $0x108] sm:$0xff]  ;;  %9471 = vmatpush1.bf16.msra.mxu0 %v9470_v39  ;;  %v433_v34 = vld [vmem:[#allocation8 + $0x98] sm:$0xff]  ;;  %v12890_v36 = vpack.c.bf16 %v428_v33, %v424_v31  ;;  %v12965_v31 = vsub.s32 1, %v108_v25 }
  0x59   :  { %9296 = vmatmul.mubr.msk.f32.gmra.mrb[2].mxu1 %vm127_vm0, %v12766_v27  ;;  %v451_v51 = vld [vmem:[#allocation8 + $0x128] sm:$0xff]  ;;  %v12798_v54 = vpack.c.bf16 %v442_v48, %v438_v47  ;;  %v446_v56 = vld [vmem:[#allocation8 + $0x100] sm:$0xff]  ;;  %v437_v35 = vld [vmem:[#allocation8 + $0xb8] sm:$0xff] }
  0x5a   :  { %9491 = vmatpush1.bf16.msra.mxu1 %v12770_v28  ;;  %341 = vmatprep.mubr.f32.mxu1 %v12635_v0  ;;  %v12801_v55 = vpack.c.bf16 %v451_v51, %v447_v50  ;;  %v450_v57 = vld [vmem:[#allocation8 + $0x120] sm:$0xff]  ;;  %v455_v58 = vld [vmem:[#allocation8 + $0x148] sm:$0xff]  ;;  %v12894_v37 = vpack.c.bf16 %v437_v35, %v433_v34  ;;  %v432_v38 = vld [vmem:[#allocation8 + $0x90] sm:$0xff] }
  0x5b   :  { %9493 = vmatprep.subr.bf16.mxu1 %v12773_v32  ;;  %9473 = vmatprep.subr.bf16.mxu0 %v9472_v49  ;;  %v459_v59 = vld [vmem:[#allocation8 + $0x168] sm:$0xff]  ;;  %v12811_v60 = vld [vmem:[%s14994_s0 + $0x20] sm:$0xff]  ;;  %v12813_v61 = vpack.c.bf16 %v450_v57, %v446_v56  ;;  %v436_v39 = vld [vmem:[#allocation8 + $0xb0] sm:$0xff] }
  0x5c   :  { %9475 = vmatpush1.bf16.msra.mxu0 %v9474_v52  ;;  %v12816_v62 = vpack.c.bf16 %v459_v59, %v455_v58  ;;  %v454_v63 = vld [vmem:[#allocation8 + $0x140] sm:$0xff]  ;;  %v463_v2 = vld [vmem:[#allocation8 + $0x188] sm:$0xff]  ;;  %v445_v41 = vld [vmem:[#allocation8 + $0xf8] sm:$0xff]  ;;  %v12902_v43 = vpack.c.bf16 %v436_v39, %v432_v38 }
  0x5d   :  { %9297 = vmatmul.mubr.msk.f32.gmra.mrb[4].mxu1 %vm127_vm0, %v12780_v40  ;;  %9549 = vmatprep.subr.bf16.mxu0 %v12749_v15  ;;  %v458_v1 = vld [vmem:[#allocation8 + $0x160] sm:$0xff]  ;;  %v467_v3 = vld [vmem:[#allocation8 + $0x1a8] sm:$0xff]  ;;  %v440_v45 = vld [vmem:[#allocation8 + $0xd0] sm:$0xff] }
  0x5e   :  { %9495 = vmatpush1.bf16.msra.mxu1 %v12784_v42  ;;  %347 = vmatprep.mubr.f32.mxu1 %v12635_v0  ;;  %v12830_v4 = vld [vmem:[%s14994_s0 + $0x28] sm:$0xff]  ;;  %v12832_v5 = vpack.c.bf16 %v458_v1, %v454_v63  ;;  %v12835_v6 = vpack.c.bf16 %v467_v3, %v463_v2  ;;  %v462_v7 = vld [vmem:[#allocation8 + $0x180] sm:$0xff]  ;;  %v444_v47 = vld [vmem:[#allocation8 + $0xf0] sm:$0xff] }
  0x5f   :  { %9497 = vmatprep.subr.bf16.mxu1 %v12787_v46  ;;  %9287 = vmatmul.mubr.msk.f32.vlgmr.msra.gmra.mrb[0].mxu0 %vm127_vm0, %v12754_v20  ;;  %v466_v8 = vld [vmem:[#allocation8 + $0x1a0] sm:$0xff]  ;;  %v471_v9 = vld [vmem:[#allocation8 + $0x1c8] sm:$0xff]  ;;  %v449_v48 = vld [vmem:[#allocation8 + $0x118] sm:$0xff]  ;;  %v12912_v50 = vpack.c.bf16 %v444_v47, %v440_v45 }
  0x60   :  { %9551 = vmatpush1.bf16.msra.mxu0 %v12756_v21  ;;  %222 = vmatprep.mubr.f32.mxu0 %v12635_v0  ;;  %v475_v10 = vld [vmem:[#allocation8 + $0x1e8] sm:$0xff]  ;;  %v12849_v12 = vpack.c.bf16 %v466_v8, %v462_v7  ;;  %v470_v14 = vld [vmem:[#allocation8 + $0x1c0] sm:$0xff]  ;;  %v453_v49 = vld [vmem:[#allocation8 + $0x138] sm:$0xff] }
  0x61   :  { %9298 = vmatmul.mubr.msk.f32.gmra.mrb[6].mxu1 %vm127_vm0, %v12796_v53  ;;  %9553 = vmatprep.subr.bf16.mxu0 %v12759_v22  ;;  %v12852_v13 = vpack.c.bf16 %v475_v10, %v471_v9  ;;  %v474_v16 = vld [vmem:[#allocation8 + $0x1e0] sm:$0xff]  ;;  %v12915_v51 = vpack.c.bf16 %v453_v49, %v449_v48  ;;  %v448_v52 = vld [vmem:[#allocation8 + $0x110] sm:$0xff]  ;;  %v457_v56 = vld [vmem:[#allocation8 + $0x158] sm:$0xff]  ;;  %v12975_v49 = vsub.s32 2, %v108_v25 }
  0x62   :  { %9499 = vmatpush1.bf16.msra.mxu1 %v12798_v54  ;;  %353 = vmatprep.mubr.f32.mxu1 %v12635_v0  ;;  %v12865_v20 = vpack.c.bf16 %v474_v16, %v470_v14  ;;  %v461_v57 = vld [vmem:[#allocation8 + $0x178] sm:$0xff]  ;;  %v460_v63 = vld [vmem:[#allocation8 + $0x170] sm:$0xff] }
  0x63   :  { %9501 = vmatprep.subr.bf16.mxu1 %v12801_v55  ;;  %9288 = vmatmul.mubr.msk.f32.gmra.mrb[2].mxu0 %vm127_vm0, %v12766_v27  ;;  %v429_v27 = vld [vmem:[#allocation8 + $0x78] sm:$0xff]  ;;  %v12925_v59 = vpack.c.bf16 %v461_v57, %v457_v56  ;;  %v468_v7 = vld [vmem:[#allocation8 + $0x1b0] sm:$0xff] }
  0x64   :  { %9555 = vmatpush1.bf16.msra.mxu0 %v12770_v28  ;;  %228 = vmatprep.mubr.f32.mxu0 %v12635_v0  ;;  %v12881_v30 = vpack.c.bf16 %v429_v27, %v425_v26  ;;  %v465_v1 = vld [vmem:[#allocation8 + $0x198] sm:$0xff]  ;;  %v472_v14 = vld [vmem:[#allocation8 + $0x1d0] sm:$0xff]  ;;  %v12963_v26 = vsub.s32 0, %v108_v25  ;;  %v105_v27 = vld [vmem:[#allocation9] sm:$0xf] }
  0x65   :  { %9299 = vmatmul.mubr.msk.f32.gmra.mrb[8].mxu1 %vm127_vm0, %v12811_v60  ;;  %9557 = vmatprep.subr.bf16.mxu0 %v12773_v32  ;;  %v469_v2 = vld [vmem:[#allocation8 + $0x1b8] sm:$0xff]  ;;  %v476_v16 = vld [vmem:[#allocation8 + $0x1f0] sm:$0xff]  ;;  %v12971_v34 = vrot.slane %v105_v27, %v12965_v31 }
  0x66   :  { %9503 = vmatpush1.bf16.msra.mxu1 %v12813_v61  ;;  %359 = vmatprep.mubr.f32.mxu1 %v12635_v0  ;;  %v473_v8 = vld [vmem:[#allocation8 + $0x1d8] sm:$0xff]  ;;  %v12940_v17 = vpack.c.bf16 %v476_v16, %v472_v14  ;;  %v12968_v33 = vrot.slane %v105_v27, %v12963_v26 }
  0x67   :  { %9505 = vmatprep.subr.bf16.mxu1 %v12816_v62  ;;  %9289 = vmatmul.mubr.msk.f32.gmra.mrb[4].mxu0 %vm127_vm0, %v12780_v40  ;;  %v441_v40 = vld [vmem:[#allocation8 + $0xd8] sm:$0xff] }
  0x68   :  { %9559 = vmatpush1.bf16.msra.mxu0 %v12784_v42  ;;  %234 = vmatprep.mubr.f32.mxu0 %v12635_v0  ;;  %v12905_v44 = vpack.c.bf16 %v445_v41, %v441_v40  ;;  %v477_v9 = vld [vmem:[#allocation8 + $0x1f8] sm:$0xff] }
  0x69   :  { %9300 = vmatmul.mubr.msk.f32.gmra.mrb[10].mxu1 %vm127_vm0, %v12830_v4  ;;  %9561 = vmatprep.subr.bf16.mxu0 %v12787_v46 }
  0x6a   :  { %9507 = vmatpush1.bf16.msra.mxu1 %v12832_v5  ;;  %365 = vmatprep.mubr.f32.mxu1 %v12635_v0 }
  0x6b   :  { %9509 = vmatprep.subr.bf16.mxu1 %v12835_v6  ;;  %9290 = vmatmul.mubr.msk.f32.gmra.mrb[6].mxu0 %vm127_vm0, %v12796_v53  ;;  %v452_v53 = vld [vmem:[#allocation8 + $0x130] sm:$0xff] }
  0x6c   :  { %9563 = vmatpush1.bf16.msra.mxu0 %v12798_v54  ;;  %240 = vmatprep.mubr.f32.mxu0 %v12635_v0  ;;  %v12922_v58 = vpack.c.bf16 %v452_v53, %v448_v52  ;;  %v12977_v53 = vsub.s32 3, %v108_v25 }
  0x6d   :  { %9301 = vmatmul.mubr.msk.f32.gmra.mrb[12].mxu1 %vm127_vm0, %v87_v11  ;;  %9565 = vmatprep.subr.bf16.mxu0 %v12801_v55 }
  0x6e   :  { %9511 = vmatpush1.bf16.msra.mxu1 %v12849_v12  ;;  %371 = vmatprep.mubr.f32.mxu1 %v12635_v0 }
  0x6f   :  { %9513 = vmatprep.subr.bf16.mxu1 %v12852_v13  ;;  %9291 = vmatmul.mubr.msk.f32.gmra.mrb[8].mxu0 %vm127_vm0, %v12811_v60  ;;  %v456_v60 = vld [vmem:[#allocation8 + $0x150] sm:$0xff] }
  0x70   :  { %9567 = vmatpush1.bf16.msra.mxu0 %v12813_v61  ;;  %246 = vmatprep.mubr.f32.mxu0 %v12635_v0  ;;  %v12928_v3 = vpack.c.bf16 %v460_v63, %v456_v60  ;;  %v12980_v60 = vrot.slane %v105_v27, %v12975_v49 }
  0x71   :  { %9302 = vmatmul.mubr.msk.f32.gmra.mrb[14].mxu1 %vm127_vm0, %v88_v19  ;;  %9569 = vmatprep.subr.bf16.mxu0 %v12816_v62 }
  0x72   :  { %9515 = vmatpush1.bf16.msra.mxu1 %v12865_v20  ;;  %542 = vmatprep.mubr.f32.mxu1 %v12635_v0 }
  0x73   :  { %9517 = vmatprep.subr.bf16.mxu1 %v12868_v23  ;;  %9292 = vmatmul.mubr.msk.f32.gmra.mrb[10].mxu0 %vm127_vm0, %v12830_v4  ;;  %v12931_v4 = vpack.c.bf16 %v469_v2, %v465_v1  ;;  %v12983_v1 = vrot.slane %v105_v27, %v12977_v53 }
  0x74   :  { %9571 = vmatpush1.bf16.msra.mxu0 %v12832_v5  ;;  %252 = vmatprep.mubr.f32.mxu0 %v12635_v0 }
  0x75   :  { %543 = vmatmul.mubr.f32.vlgmr.msra.gmra.mrb[16].mxu1 %v12635_v0  ;;  %9573 = vmatprep.subr.bf16.mxu0 %v12835_v6 }
  0x76   :  { %9519 = vmatpush1.bf16.msra.mxu1 %v12878_v29  ;;  %613 = vmatprep.mubr.f32.mxu1 %v12635_v0 }
  0x77   :  { %9521 = vmatprep.subr.bf16.mxu1 %v12881_v30  ;;  %9293 = vmatmul.mubr.msk.f32.gmra.mrb[12].mxu0 %vm127_vm0, %v87_v11  ;;  %v12937_v11 = vpack.c.bf16 %v477_v9, %v473_v8 }
  0x78   :  { %9575 = vmatpush1.bf16.msra.mxu0 %v12849_v12  ;;  %258 = vmatprep.mubr.f32.mxu0 %v12635_v0 }
  0x79   :  { %9577 = vmatprep.subr.bf16.mxu0 %v12852_v13 }
  0x7a   :  { %9523 = vmatpush1.bf16.msra.mxu1 %v12890_v36 }
  0x7b   :  { %9525 = vmatprep.subr.bf16.mxu1 %v12894_v37  ;;  %9294 = vmatmul.mubr.msk.f32.gmra.mrb[14].mxu0 %vm127_vm0, %v88_v19 }
  0x7c   :  { %9579 = vmatpush1.bf16.msra.mxu0 %v12865_v20  ;;  %782 = vmatprep.mubr.f32.mxu0 %v12635_v0 }
  0x7d   :  { %9613 = vmatprep.subr.bf16.mxu0 %v12749_v15  ;;  %v464_v15 = vld [vmem:[#allocation8 + $0x190] sm:$0xff] }
  0x7e   :  { %9527 = vmatpush1.bf16.msra.mxu1 %v12902_v43  ;;  %v12934_v10 = vpack.c.bf16 %v468_v7, %v464_v15 }
  0x7f   :  { %9529 = vmatprep.subr.bf16.mxu1 %v12905_v44 }
  0x82   :  { %9531 = vmatpush1.bf16.msra.mxu1 %v12912_v50 }
  0x83   :  { %9533 = vmatprep.subr.bf16.mxu1 %v12915_v51 }
  0x86   :  { %9535 = vmatpush1.bf16.msra.mxu1 %v12922_v58 }
  0x87   :  { %9537 = vmatprep.subr.bf16.mxu1 %v12925_v59 }
  0x8a   :  { %9539 = vmatpush1.bf16.msra.mxu1 %v12928_v3 }
  0x8b   :  { %9541 = vmatprep.subr.bf16.mxu1 %v12931_v4 }
  0x8e   :  { %9543 = vmatpush1.bf16.msra.mxu1 %v12934_v10 }
  0x8f   :  { %9545 = vmatprep.subr.bf16.mxu1 %v12937_v11 }
  0x92   :  { %9547 = vmatpush1.bf16.msra.mxu1 %v12940_v17 }
  0x93   :  { %9581 = vmatprep.subr.bf16.mxu1 %v12868_v23 }
  0x95   :  { %614 = vmatmul.mubr.f32.vlgmr.msra.gmra.mrb[0].mxu1 %v12635_v0 }
  0x96   :  { %9583 = vmatpush1.bf16.msra.mxu1 %v12878_v29  ;;  %853 = vmatprep.mubr.f32.mxu1 %v12635_v0 }
  0x97   :  { %9585 = vmatprep.subr.bf16.mxu1 %v12881_v30 }
  0x9a   :  { %9587 = vmatpush1.bf16.msra.mxu1 %v12890_v36 }
  0x9b   :  { %9589 = vmatprep.subr.bf16.mxu1 %v12894_v37 }
  0x9e   :  { %9591 = vmatpush1.bf16.msra.mxu1 %v12902_v43 }
  0x9f   :  { %9593 = vmatprep.subr.bf16.mxu1 %v12905_v44 }
  0xa2   :  { %9595 = vmatpush1.bf16.msra.mxu1 %v12912_v50 }
  0xa3   :  { %9597 = vmatprep.subr.bf16.mxu1 %v12915_v51 }
  0xa6   :  { %9599 = vmatpush1.bf16.msra.mxu1 %v12922_v58 }
  0xa7   :  { %9601 = vmatprep.subr.bf16.mxu1 %v12925_v59 }
  0xaa   :  { %9603 = vmatpush1.bf16.msra.mxu1 %v12928_v3 }
  0xab   :  { %9605 = vmatprep.subr.bf16.mxu1 %v12931_v4 }
  0xae   :  { %9607 = vmatpush1.bf16.msra.mxu1 %v12934_v10 }
  0xaf   :  { %9609 = vmatprep.subr.bf16.mxu1 %v12937_v11 }
  0xb2   :  { %9611 = vmatpush1.bf16.msra.mxu1 %v12940_v17 }
  0xb3   :  { %9645 = vmatprep.subr.bf16.mxu1 %v12868_v23 }
 0x132   :  { %v218_v19 = vpop.f32.mrb[0].mxu0 }
 0x133   :  { %v220_v24 = vpop.f32.mrb[1].mxu0  ;;  %v219_v35 = vadd.f32 %v218_v19, %v12968_v33 }
 0x134   :  { %v221_v38 = vadd.f32 %v220_v24, %v12971_v34 }
 0x148   :  { %v544_v39 = vpop.f32.mrb[16].mxu1 }
 0x149   :  { %v620_v40 = vadd.f32 %v544_v39, %v219_v35  ;;  %v546_v41 = vpop.f32.mrb[17].mxu1 }
 0x14a   :  { %v621_v45 = vadd.f32 %v546_v41, %v221_v38 }
 0x14b   :  { %v9303_v48 = vmul.f32 -1.442695, %v620_v40 }
 0x14c   :  { %v9304_v47 = vmul.f32 -1.442695, %v621_v45 }
 0x14e   :  { %12021 = vpow2.f32 %v9304_v47 }
 0x14f   :  { %12023 = vpow2.f32 %v9303_v48 }
 0x158   :  { %v12022_v52 = vpop.eup %12021 }
 0x159   :  { %v12024_v56 = vpop.eup %12023  ;;  %v633_v57 = vadd.f32 1.0, %v12022_v52 }
 0x15a   :  { %v627_v63 = vadd.f32 1.0, %v12024_v56 }
 0x15b   :  { %12025 = vrcp.f32 %v633_v57 }
 0x15c   :  { %12027 = vrcp.f32 %v627_v63 }
 0x165   :  { %v12026_v14 = vpop.eup %12025 }
 0x166   :  { %v12028_v16 = vpop.eup %12027  ;;  %v643_v19 = vmul.f32 0.0, %v12026_v14  ;;  %v1161_v14 = vld [vmem:[#allocation8 + $0xc8] sm:$0xff] }
 0x168   :  { %v615_v2 = vpop.f32.mrb[0].mxu1 }
 0x169   :  { %v11774_v15 = vadd.f32 %v615_v2, %v12980_v60  ;;  %v617_v7 = vpop.f32.mrb[1].mxu1 }
 0x16a   :  { %v11775_v8 = vadd.f32 %v617_v7, %v12983_v1  ;;  %v1152_v7 = vld [vmem:[#allocation8 + $0x80] sm:$0xff] }
 0x16b   :  { %12029 = vtanh.f32 %v11774_v15 }
 0x16c   :  { %v9305_v9 = vmul.f32 -1.442695, %v11775_v8  ;;  %v1156_v8 = vld [vmem:[#allocation8 + $0xa0] sm:$0xff] }
 0x16e   :  { %12031 = vpow2.f32 %v9305_v9  ;;  %v13070_v9 = vpack.c.bf16 %v1156_v8, %v1152_v7 }
 0x175   :  { %v12030_v18 = vpop.eup %12029 }
 0x176   :  { %v644_v24 = vmul.f32 %v12030_v18, %v12028_v16  ;;  %v1165_v16 = vld [vmem:[#allocation8 + $0xe8] sm:$0xff] }
 0x177   :  { %v13074_v18 = vpack.c.bf16 %v1165_v16, %v1161_v14 }
 0x178   :  { %v12032_v25 = vpop.eup %12031  ;;  %v12987_v35 = vadd.f32 %v644_v24, %v643_v19  ;;  %v1160_v19 = vld [vmem:[#allocation8 + $0xc0] sm:$0xff] }
 0x179   :  { %v640_v27 = vadd.f32 1.0, %v12032_v25  ;;  %v1164_v24 = vld [vmem:[#allocation8 + $0xe0] sm:$0xff] }
 0x17a   :  { %12033 = vtanh.f32 %v12987_v35  ;;  %v13076_v25 = vpack.c.bf16 %v1164_v24, %v1160_v19 }
 0x17b   :  { %12035 = vrcp.f32 %v640_v27  ;;  %v1173_v27 = vld [vmem:[#allocation8 + $0x128] sm:$0xff] }
 0x184   :  { %v12034_v38 = vpop.eup %12033 }
 0x185   :  { %v12036_v39 = vpop.eup %12035 }
 0x186   :  { %v12990_v40 = vmul.f32 %v12036_v39, %v12034_v38  ;;  %v1168_v39 = vld [vmem:[#allocation8 + $0x100] sm:$0xff] }
 0x188   :  { %783 = vmatmul.mubr.f32.vlgmr.msra.gmra.mrb[2].mxu0 %v12990_v40  ;;  %854 = vmatmul.mubr.f32.vlgmr.msra.gmra.mrb[2].mxu1 %v12990_v40 }
 0x189   :  { %9615 = vmatpush1.bf16.msra.mxu0 %v12756_v21  ;;  %9647 = vmatpush1.bf16.msra.mxu1 %v12878_v29 }
 0x18a   :  { %9617 = vmatprep.subr.bf16.mxu0 %v12759_v22  ;;  %9649 = vmatprep.subr.bf16.mxu1 %v12881_v30 }
 0x18b   :  { %1023 = vmatprep.mubr.f32.mxu0 %v12635_v0  ;;  %1094 = vmatprep.mubr.f32.mxu1 %v12635_v0 }
 0x18d   :  { %9619 = vmatpush1.bf16.msra.mxu0 %v12770_v28  ;;  %9651 = vmatpush1.bf16.msra.mxu1 %v12890_v36 }
 0x18e   :  { %9621 = vmatprep.subr.bf16.mxu0 %v12773_v32  ;;  %9653 = vmatprep.subr.bf16.mxu1 %v12894_v37 }
 0x191   :  { %9623 = vmatpush1.bf16.msra.mxu0 %v12784_v42  ;;  %9655 = vmatpush1.bf16.msra.mxu1 %v12902_v43 }
 0x192   :  { %9625 = vmatprep.subr.bf16.mxu0 %v12787_v46  ;;  %9657 = vmatprep.subr.bf16.mxu1 %v12905_v44 }
 0x195   :  { %9627 = vmatpush1.bf16.msra.mxu0 %v12798_v54  ;;  %9659 = vmatpush1.bf16.msra.mxu1 %v12912_v50 }
 0x196   :  { %9629 = vmatprep.subr.bf16.mxu0 %v12801_v55  ;;  %9661 = vmatprep.subr.bf16.mxu1 %v12915_v51 }
 0x199   :  { %9631 = vmatpush1.bf16.msra.mxu0 %v12813_v61  ;;  %9663 = vmatpush1.bf16.msra.mxu1 %v12922_v58 }
 0x19a   :  { %9633 = vmatprep.subr.bf16.mxu0 %v12816_v62  ;;  %9665 = vmatprep.subr.bf16.mxu1 %v12925_v59 }
 0x19d   :  { %9635 = vmatpush1.bf16.msra.mxu0 %v12832_v5  ;;  %9667 = vmatpush1.bf16.msra.mxu1 %v12928_v3 }
 0x19e   :  { %9637 = vmatprep.subr.bf16.mxu0 %v12835_v6  ;;  %9669 = vmatprep.subr.bf16.mxu1 %v12931_v4 }
 0x1a1   :  { %9639 = vmatpush1.bf16.msra.mxu0 %v12849_v12  ;;  %9671 = vmatpush1.bf16.msra.mxu1 %v12934_v10 }
 0x1a2   :  { %9641 = vmatprep.subr.bf16.mxu0 %v12852_v13  ;;  %9673 = vmatprep.subr.bf16.mxu1 %v12937_v11 }
 0x1a5   :  { %9643 = vmatpush1.bf16.msra.mxu0 %v12865_v20  ;;  %9675 = vmatpush1.bf16.msra.mxu1 %v12940_v17 }
 0x1a6   :  { %9709 = vmatprep.subr.bf16.mxu1 %v12868_v23 }
 0x25b   :  { %v784_v21 = vpop.f32.mrb[2].mxu0  ;;  %v855_v22 = vpop.f32.mrb[2].mxu1 }
 0x25c   :  { %v11760_v28 = vadd.f32 %v784_v21, %v12968_v33  ;;  %v786_v32 = vpop.f32.mrb[3].mxu0  ;;  %v857_v42 = vpop.f32.mrb[3].mxu1  ;;  %v11776_v5 = vadd.f32 %v855_v22, %v12980_v60  ;;  %v1172_v21 = vld [vmem:[#allocation8 + $0x120] sm:$0xff] }
 0x25d   :  { %v11761_v46 = vadd.f32 %v786_v32, %v12971_v34  ;;  %v11777_v61 = vadd.f32 %v857_v42, %v12983_v1  ;;  %v13082_v22 = vpack.c.bf16 %v1172_v21, %v1168_v39  ;;  %v1181_v32 = vld [vmem:[#allocation8 + $0x168] sm:$0xff]  ;;  %v1176_v42 = vld [vmem:[#allocation8 + $0x140] sm:$0xff] }
 0x25e   :  { %v9306_v54 = vmul.f32 -1.442695, %v11760_v28  ;;  %v1177_v28 = vld [vmem:[#allocation8 + $0x148] sm:$0xff] }
 0x25f   :  { %v9307_v55 = vmul.f32 -1.442695, %v11761_v46  ;;  %v9308_v62 = vmul.f32 -1.442695, %v11777_v61  ;;  %v13086_v46 = vpack.c.bf16 %v1181_v32, %v1177_v28  ;;  %v1189_v61 = vld [vmem:[#allocation8 + $0x1a8] sm:$0xff] }
 0x260   :  { %12037 = vpow2.f32 %v9306_v54  ;;  %v1180_v54 = vld [vmem:[#allocation8 + $0x160] sm:$0xff] }
 0x261   :  { %12039 = vpow2.f32 %v9307_v55  ;;  %v1185_v55 = vld [vmem:[#allocation8 + $0x188] sm:$0xff] }
 0x262   :  { %12041 = vpow2.f32 %v9308_v62  ;;  %v13088_v62 = vpack.c.bf16 %v1180_v54, %v1176_v42  ;;  %v1384_v42 = vld [vmem:[#allocation8 + $0x38] sm:$0xff] }
 0x263   :  { %12043 = vtanh.f32 %v11776_v5  ;;  %v13090_v5 = vpack.c.bf16 %v1189_v61, %v1185_v55  ;;  %v1379_v55 = vld [vmem:[#allocation8 + $0x10] sm:$0xff] }
 0x264   :  { %v1383_v61 = vld [vmem:[#allocation8 + $0x30] sm:$0xff] }
 0x26a   :  { %v12038_v6 = vpop.eup %12037 }
 0x26b   :  { %v12040_v12 = vpop.eup %12039  ;;  %v867_v13 = vadd.f32 1.0, %v12038_v6  ;;  %v1184_v6 = vld [vmem:[#allocation8 + $0x180] sm:$0xff] }
 0x26c   :  { %v873_v20 = vadd.f32 1.0, %v12040_v12  ;;  %v12042_v23 = vpop.eup %12041  ;;  %v1188_v12 = vld [vmem:[#allocation8 + $0x1a0] sm:$0xff] }
 0x26d   :  { %12045 = vrcp.f32 %v867_v13  ;;  %v12044_v41 = vpop.eup %12043  ;;  %v880_v52 = vadd.f32 1.0, %v12042_v23  ;;  %v1193_v13 = vld [vmem:[#allocation8 + $0x1c8] sm:$0xff]  ;;  %v13094_v23 = vpack.c.bf16 %v1188_v12, %v1184_v6  ;;  %v13137_v6 = vpack.c.bf16 %v1383_v61, %v1379_v55  ;;  %v1388_v12 = vld [vmem:[#allocation8 + $0x58] sm:$0xff] }
 0x26e   :  { %12047 = vrcp.f32 %v873_v20  ;;  %v1197_v20 = vld [vmem:[#allocation8 + $0x1e8] sm:$0xff] }
 0x26f   :  { %12049 = vrcp.f32 %v880_v52 }
 0x277   :  { %v12046_v45 = vpop.eup %12045 }
 0x278   :  { %v12048_v47 = vpop.eup %12047  ;;  %v884_v48 = vmul.f32 %v12046_v45, %v12044_v41  ;;  %v13097_v41 = vpack.c.bf16 %v1197_v20, %v1193_v13  ;;  %v1192_v45 = vld [vmem:[#allocation8 + $0x1c0] sm:$0xff]  ;;  %v1392_v13 = vld [vmem:[#allocation8 + $0x78] sm:$0xff] }
 0x279   :  { %v883_v56 = vmul.f32 %v12048_v47, %v12987_v35  ;;  %v12050_v63 = vpop.eup %12049  ;;  %v1169_v35 = vld [vmem:[#allocation8 + $0x108] sm:$0xff]  ;;  %v1196_v47 = vld [vmem:[#allocation8 + $0x1e0] sm:$0xff]  ;;  %v13141_v20 = vpack.c.bf16 %v1392_v13, %v1388_v12  ;;  %v1427_v12 = vld [vmem:[#allocation8 + $0x190] sm:$0xff] }
 0x27a   :  { %v13080_v38 = vpack.c.bf16 %v1173_v27, %v1169_v35  ;;  %v1431_v13 = vld [vmem:[#allocation8 + $0x1b0] sm:$0xff] }
 0x27b   :  { %v13032_v57 = vadd.f32 %v884_v48, %v883_v56  ;;  %v13100_v48 = vpack.c.bf16 %v1196_v47, %v1192_v45  ;;  %v1387_v45 = vld [vmem:[#allocation8 + $0x50] sm:$0xff] }
 0x27c   :  { %v1391_v47 = vld [vmem:[#allocation8 + $0x70] sm:$0xff] }
 0x27d   :  { %12051 = vtanh.f32 %v13032_v57 }
 0x287   :  { %v12052_v2 = vpop.eup %12051 }
 0x288   :  { %v13035_v15 = vmul.f32 %v12052_v2, %v12050_v63 }
 0x28a   :  { %1024 = vmatmul.mubr.f32.vlgmr.msra.gmra.mrb[4].mxu0 %v13035_v15  ;;  %1095 = vmatmul.mubr.f32.vlgmr.msra.gmra.mrb[4].mxu1 %v13035_v15 }
 0x28b   :  { %9711 = vmatpush1.bf16.msra.mxu1 %v12878_v29  ;;  %1264 = vmatprep.mubr.f32.mxu0 %v12635_v0  ;;  %v1137_v29 = vld [vmem:[#allocation8 + $0x8] sm:$0xff] }
 0x28c   :  { %9713 = vmatprep.subr.bf16.mxu1 %v12881_v30  ;;  %1335 = vmatprep.mubr.f32.mxu1 %v12635_v0  ;;  %v1141_v30 = vld [vmem:[#allocation8 + $0x28] sm:$0xff] }
 0x28f   :  { %9715 = vmatpush1.bf16.msra.mxu1 %v12890_v36  ;;  %v13056_v36 = vpack.c.bf16 %v1141_v30, %v1137_v29 }
 0x290   :  { %9717 = vmatprep.subr.bf16.mxu1 %v12894_v37  ;;  %v1136_v37 = vld [vmem:[#allocation8] sm:$0xff] }
 0x291   :  { %9677 = vmatprep.subr.bf16.mxu0 %v13056_v36 }
 0x293   :  { %9719 = vmatpush1.bf16.msra.mxu1 %v12902_v43  ;;  %v1140_v43 = vld [vmem:[#allocation8 + $0x20] sm:$0xff] }
 0x294   :  { %9721 = vmatprep.subr.bf16.mxu1 %v12905_v44  ;;  %v13058_v44 = vpack.c.bf16 %v1140_v43, %v1136_v37 }
 0x296   :  { %9679 = vmatpush1.bf16.msra.mxu0 %v13058_v44 }
 0x297   :  { %9723 = vmatpush1.bf16.msra.mxu1 %v12912_v50  ;;  %v1145_v50 = vld [vmem:[#allocation8 + $0x48] sm:$0xff] }
 0x298   :  { %9725 = vmatprep.subr.bf16.mxu1 %v12915_v51  ;;  %v1149_v51 = vld [vmem:[#allocation8 + $0x68] sm:$0xff] }
 0x29b   :  { %9727 = vmatpush1.bf16.msra.mxu1 %v12922_v58  ;;  %v13062_v58 = vpack.c.bf16 %v1149_v51, %v1145_v50 }
 0x29c   :  { %9729 = vmatprep.subr.bf16.mxu1 %v12925_v59  ;;  %v1144_v59 = vld [vmem:[#allocation8 + $0x40] sm:$0xff] }
 0x29d   :  { %9681 = vmatprep.subr.bf16.mxu0 %v13062_v58 }
 0x29f   :  { %9731 = vmatpush1.bf16.msra.mxu1 %v12928_v3  ;;  %v1148_v3 = vld [vmem:[#allocation8 + $0x60] sm:$0xff] }
 0x2a0   :  { %9733 = vmatprep.subr.bf16.mxu1 %v12931_v4  ;;  %v13064_v4 = vpack.c.bf16 %v1148_v3, %v1144_v59 }
 0x2a2   :  { %9683 = vmatpush1.bf16.msra.mxu0 %v13064_v4 }
 0x2a3   :  { %9735 = vmatpush1.bf16.msra.mxu1 %v12934_v10  ;;  %v1153_v10 = vld [vmem:[#allocation8 + $0x88] sm:$0xff] }
 0x2a4   :  { %9737 = vmatprep.subr.bf16.mxu1 %v12937_v11  ;;  %v1157_v11 = vld [vmem:[#allocation8 + $0xa8] sm:$0xff] }
 0x2a7   :  { %9739 = vmatpush1.bf16.msra.mxu1 %v12940_v17  ;;  %v13068_v17 = vpack.c.bf16 %v1157_v11, %v1153_v10 }
 0x2a9   :  { %9685 = vmatprep.subr.bf16.mxu0 %v13068_v17 }
 0x2aa   :  { %9687 = vmatpush1.bf16.msra.mxu0 %v13070_v9 }
 0x2ab   :  { %9689 = vmatprep.subr.bf16.mxu0 %v13074_v18 }
 0x2ae   :  { %9691 = vmatpush1.bf16.msra.mxu0 %v13076_v25 }
 0x2af   :  { %9693 = vmatprep.subr.bf16.mxu0 %v13080_v38 }
 0x2b2   :  { %9695 = vmatpush1.bf16.msra.mxu0 %v13082_v22 }
 0x2b3   :  { %9697 = vmatprep.subr.bf16.mxu0 %v13086_v46 }
 0x2b6   :  { %9699 = vmatpush1.bf16.msra.mxu0 %v13088_v62 }
 0x2b7   :  { %9701 = vmatprep.subr.bf16.mxu0 %v13090_v5 }
 0x2ba   :  { %9703 = vmatpush1.bf16.msra.mxu0 %v13094_v23 }
 0x2bb   :  { %9705 = vmatprep.subr.bf16.mxu0 %v13097_v41 }
 0x2be   :  { %9707 = vmatpush1.bf16.msra.mxu0 %v13100_v48 }
 0x2bf   :  { %9741 = vmatprep.subr.bf16.mxu0 %v13056_v36 }
 0x35d   :  { %v1025_v52 = vpop.f32.mrb[4].mxu0  ;;  %v1096_v56 = vpop.f32.mrb[4].mxu1 }
 0x35e   :  { %v11762_v63 = vadd.f32 %v1025_v52, %v12968_v33  ;;  %v1027_v2 = vpop.f32.mrb[5].mxu0  ;;  %v1098_v29 = vpop.f32.mrb[5].mxu1  ;;  %v11778_v59 = vadd.f32 %v1096_v56, %v12980_v60  ;;  %v13143_v52 = vpack.c.bf16 %v1391_v47, %v1387_v45  ;;  %v1396_v56 = vld [vmem:[#allocation8 + $0x98] sm:$0xff] }
 0x35f   :  { %v11763_v30 = vadd.f32 %v1027_v2, %v12971_v34  ;;  %v11779_v50 = vadd.f32 %v1098_v29, %v12983_v1  ;;  %v1395_v29 = vld [vmem:[#allocation8 + $0x90] sm:$0xff]  ;;  %v1436_v45 = vld [vmem:[#allocation8 + $0x1d8] sm:$0xff] }
 0x360   :  { %v9309_v37 = vmul.f32 -1.442695, %v11762_v63  ;;  %v1400_v63 = vld [vmem:[#allocation8 + $0xb8] sm:$0xff] }
 0x361   :  { %v9310_v43 = vmul.f32 -1.442695, %v11763_v30  ;;  %v9311_v51 = vmul.f32 -1.442695, %v11779_v50  ;;  %v13147_v2 = vpack.c.bf16 %v1400_v63, %v1396_v56  ;;  %v1399_v30 = vld [vmem:[#allocation8 + $0xb0] sm:$0xff]  ;;  %v1408_v50 = vld [vmem:[#allocation8 + $0xf8] sm:$0xff]  ;;  %v13173_v56 = vpack.c.bf16 %v1431_v13, %v1427_v12 }
 0x362   :  { %12053 = vpow2.f32 %v9309_v37  ;;  %v13149_v37 = vpack.c.bf16 %v1399_v30, %v1395_v29  ;;  %v1440_v47 = vld [vmem:[#allocation8 + $0x1f8] sm:$0xff]  ;;  %v1435_v29 = vld [vmem:[#allocation8 + $0x1d0] sm:$0xff] }
 0x363   :  { %12055 = vpow2.f32 %v9310_v43  ;;  %v1404_v43 = vld [vmem:[#allocation8 + $0xd8] sm:$0xff]  ;;  %v13176_v63 = vpack.c.bf16 %v1440_v47, %v1436_v45  ;;  %v1439_v30 = vld [vmem:[#allocation8 + $0x1f0] sm:$0xff] }
 0x364   :  { %12057 = vpow2.f32 %v9311_v51  ;;  %v13153_v51 = vpack.c.bf16 %v1408_v50, %v1404_v43  ;;  %v13179_v43 = vpack.c.bf16 %v1439_v30, %v1435_v29 }
 0x365   :  { %12059 = vtanh.f32 %v11778_v59  ;;  %v1403_v59 = vld [vmem:[#allocation8 + $0xd0] sm:$0xff] }
 0x36c   :  { %v12054_v3 = vpop.eup %12053 }
 0x36d   :  { %v12056_v10 = vpop.eup %12055  ;;  %v1108_v11 = vadd.f32 1.0, %v12054_v3  ;;  %v1407_v3 = vld [vmem:[#allocation8 + $0xf0] sm:$0xff] }
 0x36e   :  { %v1114_v7 = vadd.f32 1.0, %v12056_v10  ;;  %v12058_v8 = vpop.eup %12057  ;;  %v13155_v10 = vpack.c.bf16 %v1407_v3, %v1403_v59 }
 0x36f   :  { %12061 = vrcp.f32 %v1108_v11  ;;  %v12060_v14 = vpop.eup %12059  ;;  %v1121_v35 = vadd.f32 1.0, %v12058_v8  ;;  %v1412_v11 = vld [vmem:[#allocation8 + $0x118] sm:$0xff] }
 0x370   :  { %12063 = vrcp.f32 %v1114_v7  ;;  %v1416_v7 = vld [vmem:[#allocation8 + $0x138] sm:$0xff] }
 0x371   :  { %12065 = vrcp.f32 %v1121_v35  ;;  %v13159_v8 = vpack.c.bf16 %v1416_v7, %v1412_v11  ;;  %v1424_v35 = vld [vmem:[#allocation8 + $0x178] sm:$0xff] }
 0x379   :  { %v12062_v16 = vpop.eup %12061 }
 0x37a   :  { %v12064_v19 = vpop.eup %12063  ;;  %v1125_v24 = vmul.f32 %v12062_v16, %v12060_v14  ;;  %v1411_v14 = vld [vmem:[#allocation8 + $0x110] sm:$0xff] }
 0x37b   :  { %v1124_v27 = vmul.f32 %v12064_v19, %v13032_v57  ;;  %v12066_v21 = vpop.eup %12065  ;;  %v1380_v57 = vld [vmem:[#allocation8 + $0x18] sm:$0xff]  ;;  %v1415_v16 = vld [vmem:[#allocation8 + $0x130] sm:$0xff] }
 0x37c   :  { %v13135_v54 = vpack.c.bf16 %v1384_v42, %v1380_v57  ;;  %v13161_v19 = vpack.c.bf16 %v1415_v16, %v1411_v14  ;;  %v1428_v57 = vld [vmem:[#allocation8 + $0x198] sm:$0xff] }
 0x37d   :  { %v13110_v39 = vadd.f32 %v1125_v24, %v1124_v27  ;;  %v1420_v24 = vld [vmem:[#allocation8 + $0x158] sm:$0xff]  ;;  %v1419_v27 = vld [vmem:[#allocation8 + $0x150] sm:$0xff] }
 0x37e   :  { %9773 = vmatprep.subr.bf16.mxu1 %v13135_v54  ;;  %v1432_v42 = vld [vmem:[#allocation8 + $0x1b8] sm:$0xff] }
 0x37f   :  { %12067 = vtanh.f32 %v13110_v39  ;;  %v13169_v61 = vpack.c.bf16 %v1432_v42, %v1428_v57 }
 0x389   :  { %v12068_v28 = vpop.eup %12067 }
 0x38a   :  { %v13113_v32 = vmul.f32 %v12068_v28, %v12066_v21  ;;  %v13165_v21 = vpack.c.bf16 %v1424_v35, %v1420_v24  ;;  %v1423_v28 = vld [vmem:[#allocation8 + $0x170] sm:$0xff] }
 0x38b   :  { %v13167_v55 = vpack.c.bf16 %v1423_v28, %v1419_v27 }
 0x38c   :  { %1265 = vmatmul.mubr.f32.vlgmr.msra.gmra.mrb[6].mxu0 %v13113_v32  ;;  %1336 = vmatmul.mubr.f32.vlgmr.msra.gmra.mrb[6].mxu1 %v13113_v32 }
 0x38d   :  { %9743 = vmatpush1.bf16.msra.mxu0 %v13058_v44  ;;  %1505 = vmatprep.mubr.f32.mxu0 %v12635_v0 }
 0x38e   :  { %9745 = vmatprep.subr.bf16.mxu0 %v13062_v58  ;;  %1576 = vmatprep.mubr.f32.mxu1 %v12635_v0 }
 0x38f   :  { %9775 = vmatpush1.bf16.msra.mxu1 %v13137_v6 }
 0x390   :  { %9777 = vmatprep.subr.bf16.mxu1 %v13141_v20 }
 0x391   :  { %9747 = vmatpush1.bf16.msra.mxu0 %v13064_v4 }
 0x392   :  { %9749 = vmatprep.subr.bf16.mxu0 %v13068_v17 }
 0x393   :  { %9779 = vmatpush1.bf16.msra.mxu1 %v13143_v52 }
 0x394   :  { %9781 = vmatprep.subr.bf16.mxu1 %v13147_v2 }
 0x395   :  { %9751 = vmatpush1.bf16.msra.mxu0 %v13070_v9 }
 0x396   :  { %9753 = vmatprep.subr.bf16.mxu0 %v13074_v18 }
 0x397   :  { %9783 = vmatpush1.bf16.msra.mxu1 %v13149_v37 }
 0x398   :  { %9785 = vmatprep.subr.bf16.mxu1 %v13153_v51 }
 0x399   :  { %9755 = vmatpush1.bf16.msra.mxu0 %v13076_v25 }
 0x39a   :  { %9757 = vmatprep.subr.bf16.mxu0 %v13080_v38 }
 0x39b   :  { %9787 = vmatpush1.bf16.msra.mxu1 %v13155_v10 }
 0x39c   :  { %9789 = vmatprep.subr.bf16.mxu1 %v13159_v8 }
 0x39d   :  { %9759 = vmatpush1.bf16.msra.mxu0 %v13082_v22 }
 0x39e   :  { %9761 = vmatprep.subr.bf16.mxu0 %v13086_v46 }
 0x39f   :  { %9791 = vmatpush1.bf16.msra.mxu1 %v13161_v19 }
 0x3a0   :  { %9793 = vmatprep.subr.bf16.mxu1 %v13165_v21 }
 0x3a1   :  { %9763 = vmatpush1.bf16.msra.mxu0 %v13088_v62 }
 0x3a2   :  { %9765 = vmatprep.subr.bf16.mxu0 %v13090_v5 }
 0x3a3   :  { %9795 = vmatpush1.bf16.msra.mxu1 %v13167_v55 }
 0x3a4   :  { %9797 = vmatprep.subr.bf16.mxu1 %v13169_v61 }
 0x3a5   :  { %9767 = vmatpush1.bf16.msra.mxu0 %v13094_v23 }
 0x3a6   :  { %9769 = vmatprep.subr.bf16.mxu0 %v13097_v41 }
 0x3a7   :  { %9799 = vmatpush1.bf16.msra.mxu1 %v13173_v56 }
 0x3a8   :  { %9801 = vmatprep.subr.bf16.mxu1 %v13176_v63 }
 0x3a9   :  { %9771 = vmatpush1.bf16.msra.mxu0 %v13100_v48 }
 0x3aa   :  { %9805 = vmatprep.subr.bf16.mxu0 %v13056_v36 }
 0x3ab   :  { %9803 = vmatpush1.bf16.msra.mxu1 %v13179_v43 }
 0x3ac   :  { %9837 = vmatprep.subr.bf16.mxu1 %v13135_v54 }
 0x45f   :  { %v1266_v50 = vpop.f32.mrb[6].mxu0  ;;  %v1337_v59 = vpop.f32.mrb[6].mxu1 }
 0x460   :  { %v11764_v3 = vadd.f32 %v1266_v50, %v12968_v33  ;;  %v1268_v11 = vpop.f32.mrb[7].mxu0  ;;  %v1339_v7 = vpop.f32.mrb[7].mxu1  ;;  %v11780_v28 = vadd.f32 %v1337_v59, %v12980_v60 }
 0x461   :  { %v11765_v14 = vadd.f32 %v1268_v11, %v12971_v34  ;;  %v11781_v35 = vadd.f32 %v1339_v7, %v12983_v1 }
 0x462   :  { %v9312_v16 = vmul.f32 -1.442695, %v11764_v3 }
 0x463   :  { %v9313_v24 = vmul.f32 -1.442695, %v11765_v14  ;;  %v9314_v27 = vmul.f32 -1.442695, %v11781_v35 }
 0x464   :  { %12069 = vpow2.f32 %v9312_v16 }
 0x465   :  { %12071 = vpow2.f32 %v9313_v24 }
 0x466   :  { %12073 = vpow2.f32 %v9314_v27 }
 0x467   :  { %12075 = vtanh.f32 %v11780_v28 }
 0x46e   :  { %v12070_v57 = vpop.eup %12069 }
 0x46f   :  { %v12072_v42 = vpop.eup %12071  ;;  %v1349_v12 = vadd.f32 1.0, %v12070_v57 }
 0x470   :  { %v1355_v13 = vadd.f32 1.0, %v12072_v42  ;;  %v12074_v45 = vpop.eup %12073 }
 0x471   :  { %12077 = vrcp.f32 %v1349_v12  ;;  %v12076_v47 = vpop.eup %12075  ;;  %v1362_v3 = vadd.f32 1.0, %v12074_v45 }
 0x472   :  { %12079 = vrcp.f32 %v1355_v13 }
 0x473   :  { %12081 = vrcp.f32 %v1362_v3 }
 0x47b   :  { %v12078_v29 = vpop.eup %12077 }
 0x47c   :  { %v12080_v30 = vpop.eup %12079  ;;  %v1366_v50 = vmul.f32 %v12078_v29, %v12076_v47 }
 0x47d   :  { %v1365_v11 = vmul.f32 %v12080_v30, %v13110_v39  ;;  %v12082_v59 = vpop.eup %12081 }
 0x47f   :  { %v13189_v7 = vadd.f32 %v1366_v50, %v1365_v11 }
 0x481   :  { %12083 = vtanh.f32 %v13189_v7 }
 0x48b   :  { %v12084_v14 = vpop.eup %12083 }
 0x48c   :  { %v13192_v16 = vmul.f32 %v12084_v14, %v12082_v59 }
 0x48e   :  { %1506 = vmatmul.mubr.f32.vlgmr.msra.gmra.mrb[8].mxu0 %v13192_v16  ;;  %1577 = vmatmul.mubr.f32.vlgmr.msra.gmra.mrb[8].mxu1 %v13192_v16 }
 0x48f   :  { %9807 = vmatpush1.bf16.msra.mxu0 %v13058_v44  ;;  %9839 = vmatpush1.bf16.msra.mxu1 %v13137_v6 }
 0x490   :  { %9809 = vmatprep.subr.bf16.mxu0 %v13062_v58  ;;  %9841 = vmatprep.subr.bf16.mxu1 %v13141_v20 }
 0x491   :  { %1746 = vmatprep.mubr.f32.mxu0 %v12635_v0  ;;  %1817 = vmatprep.mubr.f32.mxu1 %v12635_v0 }
 0x493   :  { %9811 = vmatpush1.bf16.msra.mxu0 %v13064_v4  ;;  %9843 = vmatpush1.bf16.msra.mxu1 %v13143_v52 }
 0x494   :  { %9813 = vmatprep.subr.bf16.mxu0 %v13068_v17  ;;  %9845 = vmatprep.subr.bf16.mxu1 %v13147_v2 }
 0x497   :  { %9815 = vmatpush1.bf16.msra.mxu0 %v13070_v9  ;;  %9847 = vmatpush1.bf16.msra.mxu1 %v13149_v37 }
 0x498   :  { %9817 = vmatprep.subr.bf16.mxu0 %v13074_v18  ;;  %9849 = vmatprep.subr.bf16.mxu1 %v13153_v51 }
 0x49b   :  { %9819 = vmatpush1.bf16.msra.mxu0 %v13076_v25  ;;  %9851 = vmatpush1.bf16.msra.mxu1 %v13155_v10 }
 0x49c   :  { %9821 = vmatprep.subr.bf16.mxu0 %v13080_v38  ;;  %9853 = vmatprep.subr.bf16.mxu1 %v13159_v8 }
 0x49f   :  { %9823 = vmatpush1.bf16.msra.mxu0 %v13082_v22  ;;  %9855 = vmatpush1.bf16.msra.mxu1 %v13161_v19 }
 0x4a0   :  { %9825 = vmatprep.subr.bf16.mxu0 %v13086_v46  ;;  %9857 = vmatprep.subr.bf16.mxu1 %v13165_v21 }
 0x4a3   :  { %9827 = vmatpush1.bf16.msra.mxu0 %v13088_v62  ;;  %9859 = vmatpush1.bf16.msra.mxu1 %v13167_v55 }
 0x4a4   :  { %9829 = vmatprep.subr.bf16.mxu0 %v13090_v5  ;;  %9861 = vmatprep.subr.bf16.mxu1 %v13169_v61 }
 0x4a7   :  { %9831 = vmatpush1.bf16.msra.mxu0 %v13094_v23  ;;  %9863 = vmatpush1.bf16.msra.mxu1 %v13173_v56 }
 0x4a8   :  { %9833 = vmatprep.subr.bf16.mxu0 %v13097_v41  ;;  %9865 = vmatprep.subr.bf16.mxu1 %v13176_v63 }
 0x4ab   :  { %9835 = vmatpush1.bf16.msra.mxu0 %v13100_v48  ;;  %9867 = vmatpush1.bf16.msra.mxu1 %v13179_v43 }
 0x4ac   :  { %9869 = vmatprep.subr.bf16.mxu0 %v13056_v36  ;;  %9901 = vmatprep.subr.bf16.mxu1 %v13135_v54 }
 0x561   :  { %v1507_v39 = vpop.f32.mrb[8].mxu0  ;;  %v1578_v24 = vpop.f32.mrb[8].mxu1 }
 0x562   :  { %v11766_v35 = vadd.f32 %v1507_v39, %v12968_v33  ;;  %v1509_v27 = vpop.f32.mrb[9].mxu0  ;;  %v1580_v28 = vpop.f32.mrb[9].mxu1  ;;  %v11782_v47 = vadd.f32 %v1578_v24, %v12980_v60 }
 0x563   :  { %v11767_v57 = vadd.f32 %v1509_v27, %v12971_v34  ;;  %v11783_v13 = vadd.f32 %v1580_v28, %v12983_v1 }
 0x564   :  { %v9315_v42 = vmul.f32 -1.442695, %v11766_v35 }
 0x565   :  { %v9316_v12 = vmul.f32 -1.442695, %v11767_v57  ;;  %v9317_v45 = vmul.f32 -1.442695, %v11783_v13 }
 0x566   :  { %12085 = vpow2.f32 %v9315_v42 }
 0x567   :  { %12087 = vpow2.f32 %v9316_v12 }
 0x568   :  { %12089 = vpow2.f32 %v9317_v45 }
 0x569   :  { %12091 = vtanh.f32 %v11782_v47 }
 0x570   :  { %v12086_v36 = vpop.eup %12085 }
 0x571   :  { %v12088_v29 = vpop.eup %12087  ;;  %v1590_v30 = vadd.f32 1.0, %v12086_v36 }
 0x572   :  { %v1596_v50 = vadd.f32 1.0, %v12088_v29  ;;  %v12090_v3 = vpop.eup %12089 }
 0x573   :  { %12093 = vrcp.f32 %v1590_v30  ;;  %v12092_v11 = vpop.eup %12091  ;;  %v1603_v35 = vadd.f32 1.0, %v12090_v3 }
 0x574   :  { %12095 = vrcp.f32 %v1596_v50 }
 0x575   :  { %12097 = vrcp.f32 %v1603_v35  ;;  %v2129_v35 = vld [vmem:[#allocation8 + $0xe8] sm:$0xff] }
 0x57d   :  { %v12094_v59 = vpop.eup %12093 }
 0x57e   :  { %v12096_v14 = vpop.eup %12095  ;;  %v1607_v39 = vmul.f32 %v12094_v59, %v12092_v11  ;;  %v2120_v59 = vld [vmem:[#allocation8 + $0xa0] sm:$0xff] }
 0x57f   :  { %v1606_v27 = vmul.f32 %v12096_v14, %v13189_v7  ;;  %v12098_v24 = vpop.eup %12097 }
 0x581   :  { %v13235_v28 = vadd.f32 %v1607_v39, %v1606_v27  ;;  %v2125_v39 = vld [vmem:[#allocation8 + $0xc8] sm:$0xff] }
 0x582   :  { %v9944_v27 = vpack.c.bf16 %v2129_v35, %v2125_v39 }
 0x583   :  { %12099 = vtanh.f32 %v13235_v28 }
 0x58d   :  { %v12100_v57 = vpop.eup %12099 }
 0x58e   :  { %v13238_v42 = vmul.f32 %v12100_v57, %v12098_v24  ;;  %v2128_v24 = vld [vmem:[#allocation8 + $0xe0] sm:$0xff] }
 0x590   :  { %1747 = vmatmul.mubr.f32.vlgmr.msra.gmra.mrb[10].mxu0 %v13238_v42  ;;  %1818 = vmatmul.mubr.f32.vlgmr.msra.gmra.mrb[10].mxu1 %v13238_v42 }
 0x591   :  { %9871 = vmatpush1.bf16.msra.mxu0 %v13058_v44  ;;  %9903 = vmatpush1.bf16.msra.mxu1 %v13137_v6 }
 0x592   :  { %9873 = vmatprep.subr.bf16.mxu0 %v13062_v58  ;;  %9905 = vmatprep.subr.bf16.mxu1 %v13141_v20 }
 0x593   :  { %1987 = vmatprep.mubr.f32.mxu0 %v12635_v0  ;;  %2058 = vmatprep.mubr.f32.mxu1 %v12635_v0 }
 0x595   :  { %9875 = vmatpush1.bf16.msra.mxu0 %v13064_v4  ;;  %9907 = vmatpush1.bf16.msra.mxu1 %v13143_v52 }
 0x596   :  { %9877 = vmatprep.subr.bf16.mxu0 %v13068_v17  ;;  %9909 = vmatprep.subr.bf16.mxu1 %v13147_v2 }
 0x599   :  { %9879 = vmatpush1.bf16.msra.mxu0 %v13070_v9  ;;  %9911 = vmatpush1.bf16.msra.mxu1 %v13149_v37 }
 0x59a   :  { %9881 = vmatprep.subr.bf16.mxu0 %v13074_v18  ;;  %9913 = vmatprep.subr.bf16.mxu1 %v13153_v51 }
 0x59d   :  { %9883 = vmatpush1.bf16.msra.mxu0 %v13076_v25  ;;  %9915 = vmatpush1.bf16.msra.mxu1 %v13155_v10 }
 0x59e   :  { %9885 = vmatprep.subr.bf16.mxu0 %v13080_v38  ;;  %9917 = vmatprep.subr.bf16.mxu1 %v13159_v8 }
 0x5a1   :  { %9887 = vmatpush1.bf16.msra.mxu0 %v13082_v22  ;;  %9919 = vmatpush1.bf16.msra.mxu1 %v13161_v19 }
 0x5a2   :  { %9889 = vmatprep.subr.bf16.mxu0 %v13086_v46  ;;  %9921 = vmatprep.subr.bf16.mxu1 %v13165_v21 }
 0x5a5   :  { %9891 = vmatpush1.bf16.msra.mxu0 %v13088_v62  ;;  %9923 = vmatpush1.bf16.msra.mxu1 %v13167_v55 }
 0x5a6   :  { %9893 = vmatprep.subr.bf16.mxu0 %v13090_v5  ;;  %9925 = vmatprep.subr.bf16.mxu1 %v13169_v61 }
 0x5a9   :  { %9895 = vmatpush1.bf16.msra.mxu0 %v13094_v23  ;;  %9927 = vmatpush1.bf16.msra.mxu1 %v13173_v56 }
 0x5aa   :  { %9897 = vmatprep.subr.bf16.mxu0 %v13097_v41  ;;  %9929 = vmatprep.subr.bf16.mxu1 %v13176_v63 }
 0x5ad   :  { %9899 = vmatpush1.bf16.msra.mxu0 %v13100_v48  ;;  %9931 = vmatpush1.bf16.msra.mxu1 %v13179_v43 }
 0x5ae   :  { %9965 = vmatprep.subr.bf16.mxu1 %v13135_v54 }
 0x663   :  { %v1748_v44 = vpop.f32.mrb[10].mxu0  ;;  %v1819_v58 = vpop.f32.mrb[10].mxu1 }
 0x664   :  { %v11768_v4 = vadd.f32 %v1748_v44, %v12968_v33  ;;  %v1750_v17 = vpop.f32.mrb[11].mxu0  ;;  %v1821_v9 = vpop.f32.mrb[11].mxu1  ;;  %v11784_v62 = vadd.f32 %v1819_v58, %v12980_v60  ;;  %v2133_v44 = vld [vmem:[#allocation8 + $0x108] sm:$0xff] }
 0x665   :  { %v11769_v18 = vadd.f32 %v1750_v17, %v12971_v34  ;;  %v11785_v22 = vadd.f32 %v1821_v9, %v12983_v1  ;;  %v2137_v58 = vld [vmem:[#allocation8 + $0x128] sm:$0xff]  ;;  %v2132_v17 = vld [vmem:[#allocation8 + $0x100] sm:$0xff] }
 0x666   :  { %v9318_v25 = vmul.f32 -1.442695, %v11768_v4  ;;  %v9948_v4 = vpack.c.bf16 %v2137_v58, %v2133_v44  ;;  %v2136_v9 = vld [vmem:[#allocation8 + $0x120] sm:$0xff] }
 0x667   :  { %v9319_v38 = vmul.f32 -1.442695, %v11769_v18  ;;  %v9320_v46 = vmul.f32 -1.442695, %v11785_v22  ;;  %v9950_v18 = vpack.c.bf16 %v2136_v9, %v2132_v17  ;;  %v2140_v22 = vld [vmem:[#allocation8 + $0x140] sm:$0xff] }
 0x668   :  { %12101 = vpow2.f32 %v9318_v25  ;;  %v2141_v25 = vld [vmem:[#allocation8 + $0x148] sm:$0xff] }
 0x669   :  { %12103 = vpow2.f32 %v9319_v38  ;;  %v2145_v38 = vld [vmem:[#allocation8 + $0x168] sm:$0xff] }
 0x66a   :  { %12105 = vpow2.f32 %v9320_v46  ;;  %v9952_v46 = vpack.c.bf16 %v2145_v38, %v2141_v25  ;;  %v2348_v25 = vld [vmem:[#allocation6 + $0x20] sm:$0xff]  ;;  %v2346_v38 = vld [vmem:[#allocation6 + $0x10] sm:$0xff] }
 0x66b   :  { %12107 = vtanh.f32 %v11784_v62  ;;  %v2144_v62 = vld [vmem:[#allocation8 + $0x160] sm:$0xff] }
 0x672   :  { %v12102_v5 = vpop.eup %12101 }
 0x673   :  { %v12104_v23 = vpop.eup %12103  ;;  %v1831_v41 = vadd.f32 1.0, %v12102_v5  ;;  %v2149_v5 = vld [vmem:[#allocation8 + $0x188] sm:$0xff] }
 0x674   :  { %v1837_v48 = vadd.f32 1.0, %v12104_v23  ;;  %v12106_v54 = vpop.eup %12105  ;;  %v2153_v23 = vld [vmem:[#allocation8 + $0x1a8] sm:$0xff] }
 0x675   :  { %12109 = vrcp.f32 %v1831_v41  ;;  %v12108_v7 = vpop.eup %12107  ;;  %v1844_v47 = vadd.f32 1.0, %v12106_v54  ;;  %v9954_v41 = vpack.c.bf16 %v2144_v62, %v2140_v22  ;;  %v2148_v54 = vld [vmem:[#allocation8 + $0x180] sm:$0xff]  ;;  %v2350_v22 = vld [vmem:[#allocation6 + $0x30] sm:$0xff]  ;;  %v2357_v62 = vld [vmem:[#allocation6 + $0x68] sm:$0xff] }
 0x676   :  { %12111 = vrcp.f32 %v1837_v48  ;;  %v9956_v48 = vpack.c.bf16 %v2153_v23, %v2149_v5  ;;  %v2355_v5 = vld [vmem:[#allocation6 + $0x58] sm:$0xff] }
 0x677   :  { %12113 = vrcp.f32 %v1844_v47  ;;  %v2347_v47 = vld [vmem:[#allocation6 + $0x18] sm:$0xff] }
 0x678   :  { %v2359_v23 = vld [vmem:[#allocation6 + $0x78] sm:$0xff] }
 0x67f   :  { %v12110_v12 = vpop.eup %12109 }
 0x680   :  { %v12112_v13 = vpop.eup %12111  ;;  %v1848_v45 = vmul.f32 %v12110_v12, %v12108_v7  ;;  %v2152_v7 = vld [vmem:[#allocation8 + $0x1a0] sm:$0xff]  ;;  %v2157_v12 = vld [vmem:[#allocation8 + $0x1c8] sm:$0xff] }
 0x681   :  { %v1847_v36 = vmul.f32 %v12112_v13, %v13235_v28  ;;  %v12114_v30 = vpop.eup %12113  ;;  %v2124_v28 = vld [vmem:[#allocation8 + $0xc0] sm:$0xff]  ;;  %v2161_v13 = vld [vmem:[#allocation8 + $0x1e8] sm:$0xff] }
 0x682   :  { %v9946_v57 = vpack.c.bf16 %v2128_v24, %v2124_v28 }
 0x683   :  { %v13280_v29 = vadd.f32 %v1848_v45, %v1847_v36  ;;  %v9958_v45 = vpack.c.bf16 %v2152_v7, %v2148_v54  ;;  %v9960_v36 = vpack.c.bf16 %v2161_v13, %v2157_v12  ;;  %v10030_v7 = vpack.c.bf16 %v2350_v22, %v2346_v38  ;;  %v2352_v12 = vld [vmem:[#allocation6 + $0x40] sm:$0xff] }
 0x684   :  { %v2356_v13 = vld [vmem:[#allocation6 + $0x60] sm:$0xff] }
 0x685   :  { %12115 = vtanh.f32 %v13280_v29  ;;  %v2380_v38 = vld [vmem:[#allocation6 + $0x120] sm:$0xff] }
 0x68f   :  { %v12116_v50 = vpop.eup %12115 }
 0x690   :  { %v13283_v3 = vmul.f32 %v12116_v50, %v12114_v30  ;;  %v2156_v30 = vld [vmem:[#allocation8 + $0x1c0] sm:$0xff] }
 0x691   :  { %v2160_v50 = vld [vmem:[#allocation8 + $0x1e0] sm:$0xff] }
 0x692   :  { %1988 = vmatmul.mubr.f32.vlgmr.msra.gmra.mrb[12].mxu0 %v13283_v3  ;;  %2059 = vmatmul.mubr.f32.vlgmr.msra.gmra.mrb[12].mxu1 %v13283_v3 }
 0x693   :  { %9967 = vmatpush1.bf16.msra.mxu1 %v13137_v6  ;;  %2228 = vmatprep.mubr.f32.mxu0 %v12635_v0  ;;  %v2101_v6 = vld [vmem:[#allocation8 + $0x8] sm:$0xff] }
 0x694   :  { %9969 = vmatprep.subr.bf16.mxu1 %v13141_v20  ;;  %2299 = vmatprep.mubr.f32.mxu1 %v12635_v0  ;;  %v2105_v20 = vld [vmem:[#allocation8 + $0x28] sm:$0xff] }
 0x697   :  { %9971 = vmatpush1.bf16.msra.mxu1 %v13143_v52  ;;  %v9932_v52 = vpack.c.bf16 %v2105_v20, %v2101_v6  ;;  %v2351_v6 = vld [vmem:[#allocation6 + $0x38] sm:$0xff]  ;;  %v2345_v20 = vld [vmem:[#allocation6 + $0x8] sm:$0xff] }
 0x698   :  { %9973 = vmatprep.subr.bf16.mxu1 %v13147_v2  ;;  %v2100_v2 = vld [vmem:[#allocation8] sm:$0xff] }
 0x699   :  { %9933 = vmatprep.subr.bf16.mxu0 %v9932_v52  ;;  %v2349_v52 = vld [vmem:[#allocation6 + $0x28] sm:$0xff] }
 0x69b   :  { %9975 = vmatpush1.bf16.msra.mxu1 %v13149_v37  ;;  %v2104_v37 = vld [vmem:[#allocation8 + $0x20] sm:$0xff] }
 0x69c   :  { %9977 = vmatprep.subr.bf16.mxu1 %v13153_v51  ;;  %v9934_v51 = vpack.c.bf16 %v2104_v37, %v2100_v2  ;;  %v10028_v2 = vpack.c.bf16 %v2351_v6, %v2347_v47  ;;  %v9962_v37 = vpack.c.bf16 %v2160_v50, %v2156_v30  ;;  %v10032_v47 = vpack.c.bf16 %v2359_v23, %v2355_v5  ;;  %v2358_v30 = vld [vmem:[#allocation6 + $0x70] sm:$0xff]  ;;  %v2361_v50 = vld [vmem:[#allocation6 + $0x88] sm:$0xff] }
 0x69d   :  { %v2365_v6 = vld [vmem:[#allocation6 + $0xa8] sm:$0xff]  ;;  %v2382_v5 = vld [vmem:[#allocation6 + $0x130] sm:$0xff] }
 0x69e   :  { %9935 = vmatpush1.bf16.msra.mxu0 %v9934_v51  ;;  %v9996_v51 = vpack.c.bf16 %v2349_v52, %v2345_v20  ;;  %v2363_v20 = vld [vmem:[#allocation6 + $0x98] sm:$0xff]  ;;  %v2385_v23 = vld [vmem:[#allocation6 + $0x148] sm:$0xff] }
 0x69f   :  { %9979 = vmatpush1.bf16.msra.mxu1 %v13155_v10  ;;  %v2109_v10 = vld [vmem:[#allocation8 + $0x48] sm:$0xff]  ;;  %v2367_v52 = vld [vmem:[#allocation6 + $0xb8] sm:$0xff] }
 0x6a0   :  { %9981 = vmatprep.subr.bf16.mxu1 %v13159_v8  ;;  %v2113_v8 = vld [vmem:[#allocation8 + $0x68] sm:$0xff] }
 0x6a3   :  { %9983 = vmatpush1.bf16.msra.mxu1 %v13161_v19  ;;  %v9936_v19 = vpack.c.bf16 %v2113_v8, %v2109_v10 }
 0x6a4   :  { %9985 = vmatprep.subr.bf16.mxu1 %v13165_v21  ;;  %v2108_v21 = vld [vmem:[#allocation8 + $0x40] sm:$0xff] }
 0x6a5   :  { %9937 = vmatprep.subr.bf16.mxu0 %v9936_v19 }
 0x6a7   :  { %9987 = vmatpush1.bf16.msra.mxu1 %v13167_v55  ;;  %v2112_v55 = vld [vmem:[#allocation8 + $0x60] sm:$0xff] }
 0x6a8   :  { %9989 = vmatprep.subr.bf16.mxu1 %v13169_v61  ;;  %v9938_v61 = vpack.c.bf16 %v2112_v55, %v2108_v21 }
 0x6aa   :  { %9939 = vmatpush1.bf16.msra.mxu0 %v9938_v61 }
 0x6ab   :  { %9991 = vmatpush1.bf16.msra.mxu1 %v13173_v56  ;;  %v2117_v56 = vld [vmem:[#allocation8 + $0x88] sm:$0xff] }
 0x6ac   :  { %9993 = vmatprep.subr.bf16.mxu1 %v13176_v63  ;;  %v2121_v63 = vld [vmem:[#allocation8 + $0xa8] sm:$0xff] }
 0x6ad   :  { %v9940_v11 = vpack.c.bf16 %v2121_v63, %v2117_v56 }
 0x6af   :  { %9995 = vmatpush1.bf16.msra.mxu1 %v13179_v43  ;;  %v2116_v43 = vld [vmem:[#allocation8 + $0x80] sm:$0xff]  ;;  %9941 = vmatprep.subr.bf16.mxu0 %v9940_v11 }
 0x6b0   :  { %v9942_v14 = vpack.c.bf16 %v2120_v59, %v2116_v43  ;;  %10029 = vmatprep.subr.bf16.mxu1 %v10028_v2  ;;  %v10002_v2 = vpack.c.bf16 %v2356_v13, %v2352_v12  ;;  %v2384_v13 = vld [vmem:[#allocation6 + $0x140] sm:$0xff] }
 0x6b2   :  { %9943 = vmatpush1.bf16.msra.mxu0 %v9942_v14 }
 0x6b3   :  { %9945 = vmatprep.subr.bf16.mxu0 %v9944_v27 }
 0x6b6   :  { %9947 = vmatpush1.bf16.msra.mxu0 %v9946_v57 }
 0x6b7   :  { %9949 = vmatprep.subr.bf16.mxu0 %v9948_v4 }
 0x6ba   :  { %9951 = vmatpush1.bf16.msra.mxu0 %v9950_v18  ;;  %v2344_v18 = vld [vmem:[#allocation6] sm:$0xff] }
 0x6bb   :  { %9953 = vmatprep.subr.bf16.mxu0 %v9952_v46  ;;  %v2353_v46 = vld [vmem:[#allocation6 + $0x48] sm:$0xff]  ;;  %v9998_v54 = vpack.c.bf16 %v2348_v25, %v2344_v18  ;;  %v2376_v25 = vld [vmem:[#allocation6 + $0x100] sm:$0xff] }
 0x6be   :  { %9955 = vmatpush1.bf16.msra.mxu0 %v9954_v41 }
 0x6bf   :  { %9957 = vmatprep.subr.bf16.mxu0 %v9956_v48 }
 0x6c2   :  { %9959 = vmatpush1.bf16.msra.mxu0 %v9958_v45  ;;  %v10000_v45 = vpack.c.bf16 %v2357_v62, %v2353_v46  ;;  %v2378_v62 = vld [vmem:[#allocation6 + $0x110] sm:$0xff] }
 0x6c3   :  { %9961 = vmatprep.subr.bf16.mxu0 %v9960_v36  ;;  %v2354_v36 = vld [vmem:[#allocation6 + $0x50] sm:$0xff]  ;;  %v10046_v12 = vpack.c.bf16 %v2382_v5, %v2378_v62  ;;  %v2705_v62 = vld [vmem:[#allocation8 + $0x258] sm:$0xff] }
 0x6c6   :  { %9963 = vmatpush1.bf16.msra.mxu0 %v9962_v37  ;;  %v10034_v37 = vpack.c.bf16 %v2358_v30, %v2354_v36  ;;  %v2386_v30 = vld [vmem:[#allocation6 + $0x150] sm:$0xff] }
 0x6c7   :  { %9997 = vmatprep.subr.bf16.mxu0 %v9996_v51  ;;  %v2360_v51 = vld [vmem:[#allocation6 + $0x80] sm:$0xff] }
 0x765   :  { %v1989_v10 = vpop.f32.mrb[12].mxu0  ;;  %v2060_v8 = vpop.f32.mrb[12].mxu1 }
 0x766   :  { %v11770_v19 = vadd.f32 %v1989_v10, %v12968_v33  ;;  %v1991_v21 = vpop.f32.mrb[13].mxu0  ;;  %v2062_v55 = vpop.f32.mrb[13].mxu1  ;;  %v11786_v59 = vadd.f32 %v2060_v8, %v12980_v60  ;;  %v2364_v10 = vld [vmem:[#allocation6 + $0xa0] sm:$0xff]  ;;  %v10004_v8 = vpack.c.bf16 %v2365_v6, %v2361_v50  ;;  %v2390_v50 = vld [vmem:[#allocation6 + $0x170] sm:$0xff]  ;;  %v2393_v6 = vld [vmem:[#allocation6 + $0x188] sm:$0xff] }
 0x767   :  { %v11771_v61 = vadd.f32 %v1991_v21, %v12971_v34  ;;  %v11787_v11 = vadd.f32 %v2062_v55, %v12983_v1  ;;  %v2362_v21 = vld [vmem:[#allocation6 + $0x90] sm:$0xff] }
 0x768   :  { %v9321_v56 = vmul.f32 -1.442695, %v11770_v19  ;;  %v10036_v19 = vpack.c.bf16 %v2367_v52, %v2363_v20  ;;  %v2366_v55 = vld [vmem:[#allocation6 + $0xb0] sm:$0xff]  ;;  %v2397_v20 = vld [vmem:[#allocation6 + $0x1a8] sm:$0xff]  ;;  %v2395_v52 = vld [vmem:[#allocation6 + $0x198] sm:$0xff] }
 0x769   :  { %v9322_v63 = vmul.f32 -1.442695, %v11771_v61  ;;  %v9323_v43 = vmul.f32 -1.442695, %v11787_v11  ;;  %v2369_v61 = vld [vmem:[#allocation6 + $0xc8] sm:$0xff]  ;;  %v2375_v11 = vld [vmem:[#allocation6 + $0xf8] sm:$0xff] }
 0x76a   :  { %12117 = vpow2.f32 %v9321_v56  ;;  %v2373_v56 = vld [vmem:[#allocation6 + $0xe8] sm:$0xff] }
 0x76b   :  { %12119 = vpow2.f32 %v9322_v63  ;;  %v2371_v63 = vld [vmem:[#allocation6 + $0xd8] sm:$0xff] }
 0x76c   :  { %12121 = vpow2.f32 %v9323_v43  ;;  %v10006_v43 = vpack.c.bf16 %v2364_v10, %v2360_v51  ;;  %v10050_v51 = vpack.c.bf16 %v2390_v50, %v2386_v30  ;;  %v2392_v10 = vld [vmem:[#allocation6 + $0x180] sm:$0xff]  ;;  %v2713_v30 = vld [vmem:[#allocation8 + $0x298] sm:$0xff] }
 0x76d   :  { %12123 = vtanh.f32 %v11786_v59  ;;  %v10038_v59 = vpack.c.bf16 %v2366_v55, %v2362_v21  ;;  %v2394_v55 = vld [vmem:[#allocation6 + $0x190] sm:$0xff] }
 0x774   :  { %v12118_v14 = vpop.eup %12117 }
 0x775   :  { %v12120_v39 = vpop.eup %12119  ;;  %v2072_v35 = vadd.f32 1.0, %v12118_v14  ;;  %v2368_v14 = vld [vmem:[#allocation6 + $0xc0] sm:$0xff] }
 0x776   :  { %v2078_v27 = vadd.f32 1.0, %v12120_v39  ;;  %v12122_v28 = vpop.eup %12121  ;;  %v2372_v39 = vld [vmem:[#allocation6 + $0xe0] sm:$0xff] }
 0x777   :  { %12125 = vrcp.f32 %v2072_v35  ;;  %v12124_v24 = vpop.eup %12123  ;;  %v2085_v4 = vadd.f32 1.0, %v12122_v28  ;;  %v10008_v35 = vpack.c.bf16 %v2373_v56, %v2369_v61  ;;  %v2370_v28 = vld [vmem:[#allocation6 + $0xd0] sm:$0xff]  ;;  %v2401_v56 = vld [vmem:[#allocation6 + $0x1c8] sm:$0xff] }
 0x778   :  { %12127 = vrcp.f32 %v2078_v27  ;;  %v10040_v27 = vpack.c.bf16 %v2375_v11, %v2371_v63  ;;  %v2398_v61 = vld [vmem:[#allocation6 + $0x1b0] sm:$0xff]  ;;  %v2405_v63 = vld [vmem:[#allocation6 + $0x1e8] sm:$0xff]  ;;  %v2403_v11 = vld [vmem:[#allocation6 + $0x1d8] sm:$0xff] }
 0x779   :  { %12129 = vrcp.f32 %v2085_v4  ;;  %v2383_v4 = vld [vmem:[#allocation6 + $0x138] sm:$0xff] }
 0x781   :  { %v12126_v57 = vpop.eup %12125 }
 0x782   :  { %v12128_v44 = vpop.eup %12127  ;;  %v2089_v58 = vmul.f32 %v12126_v57, %v12124_v24  ;;  %v2374_v24 = vld [vmem:[#allocation6 + $0xf0] sm:$0xff]  ;;  %v2377_v57 = vld [vmem:[#allocation6 + $0x108] sm:$0xff] }
 0x783   :  { %v2088_v17 = vmul.f32 %v12128_v44, %v13280_v29  ;;  %v12130_v41 = vpop.eup %12129  ;;  %v2381_v44 = vld [vmem:[#allocation6 + $0x128] sm:$0xff]  ;;  %v10042_v18 = vpack.c.bf16 %v2374_v24, %v2370_v28  ;;  %v2404_v28 = vld [vmem:[#allocation6 + $0x1e0] sm:$0xff]  ;;  %v2402_v24 = vld [vmem:[#allocation6 + $0x1d0] sm:$0xff] }
 0x784   :  { %v10012_v22 = vpack.c.bf16 %v2381_v44, %v2377_v57  ;;  %v2406_v57 = vld [vmem:[#allocation6 + $0x1f0] sm:$0xff] }
 0x785   :  { %v13309_v9 = vadd.f32 %v2089_v58, %v2088_v17  ;;  %v2379_v58 = vld [vmem:[#allocation6 + $0x118] sm:$0xff]  ;;  %v10010_v17 = vpack.c.bf16 %v2372_v39, %v2368_v14  ;;  %v10054_v14 = vpack.c.bf16 %v2398_v61, %v2394_v55  ;;  %v2400_v39 = vld [vmem:[#allocation6 + $0x1c0] sm:$0xff] }
 0x786   :  { %v10044_v46 = vpack.c.bf16 %v2383_v4, %v2379_v58  ;;  %v10026_v44 = vpack.c.bf16 %v2404_v28, %v2400_v39  ;;  %v10058_v58 = vpack.c.bf16 %v2406_v57, %v2402_v24  ;;  %v2698_v4 = vld [vmem:[#allocation8 + $0x220] sm:$0xff]  ;;  %v2721_v55 = vld [vmem:[#allocation8 + $0x2d8] sm:$0xff]  ;;  %v2724_v39 = vld [vmem:[#allocation8 + $0x2f0] sm:$0xff] }
 0x787   :  { %12131 = vtanh.f32 %v13309_v9  ;;  %v2731_v28 = vld [vmem:[#allocation8 + $0x328] sm:$0xff]  ;;  %v2726_v24 = vld [vmem:[#allocation8 + $0x300] sm:$0xff] }
 0x788   :  { %v2730_v57 = vld [vmem:[#allocation8 + $0x320] sm:$0xff] }
 0x791   :  { %v12132_v48 = vpop.eup %12131 }
 0x792   :  { %v13312_v29 = vmul.f32 %v12132_v48, %v12130_v41  ;;  %v2389_v41 = vld [vmem:[#allocation6 + $0x168] sm:$0xff]  ;;  %v2387_v48 = vld [vmem:[#allocation6 + $0x158] sm:$0xff] }
 0x794   :  { %2229 = vmatmul.mubr.f32.vlgmr.msra.gmra.mrb[14].mxu0 %v13312_v29  ;;  %2300 = vmatmul.mubr.f32.vlgmr.msra.gmra.mrb[14].mxu1 %v13312_v29 }
 0x795   :  { %9999 = vmatpush1.bf16.msra.mxu0 %v9998_v54  ;;  %10031 = vmatpush1.bf16.msra.mxu1 %v10030_v7  ;;  %v2391_v54 = vld [vmem:[#allocation6 + $0x178] sm:$0xff]  ;;  %v10014_v7 = vpack.c.bf16 %v2380_v38, %v2376_v25  ;;  %v2696_v25 = vld [vmem:[#allocation8 + $0x210] sm:$0xff] }
 0x796   :  { %10001 = vmatprep.subr.bf16.mxu0 %v10000_v45  ;;  %10033 = vmatprep.subr.bf16.mxu1 %v10032_v47  ;;  %v2388_v45 = vld [vmem:[#allocation6 + $0x160] sm:$0xff]  ;;  %v10016_v47 = vpack.c.bf16 %v2389_v41, %v2385_v23  ;;  %v10048_v36 = vpack.c.bf16 %v2391_v54, %v2387_v48  ;;  %v2700_v38 = vld [vmem:[#allocation8 + $0x230] sm:$0xff]  ;;  %v2709_v48 = vld [vmem:[#allocation8 + $0x278] sm:$0xff] }
 0x797   :  { %2495 = vmatprep.mubr.f32.mxu0 %v12635_v0  ;;  %2608 = vmatprep.mubr.f32.mxu1 %v12635_v0  ;;  %v2702_v23 = vld [vmem:[#allocation8 + $0x240] sm:$0xff] }
 0x798   :  { %v2706_v41 = vld [vmem:[#allocation8 + $0x260] sm:$0xff] }
 0x799   :  { %10003 = vmatpush1.bf16.msra.mxu0 %v10002_v2  ;;  %10035 = vmatpush1.bf16.msra.mxu1 %v10034_v37  ;;  %v2399_v2 = vld [vmem:[#allocation6 + $0x1b8] sm:$0xff]  ;;  %v10018_v37 = vpack.c.bf16 %v2388_v45, %v2384_v13  ;;  %v13360_v54 = vpack.c.bf16 %v2706_v41, %v2702_v23  ;;  %v2708_v13 = vld [vmem:[#allocation8 + $0x270] sm:$0xff] }
 0x79a   :  { %10005 = vmatprep.subr.bf16.mxu0 %v10004_v8  ;;  %10037 = vmatprep.subr.bf16.mxu1 %v10036_v19  ;;  %v2396_v8 = vld [vmem:[#allocation6 + $0x1a0] sm:$0xff]  ;;  %v10020_v19 = vpack.c.bf16 %v2397_v20, %v2393_v6  ;;  %v10052_v21 = vpack.c.bf16 %v2399_v2, %v2395_v52  ;;  %v2717_v52 = vld [vmem:[#allocation8 + $0x2b8] sm:$0xff] }
 0x79b   :  { %v2710_v6 = vld [vmem:[#allocation8 + $0x280] sm:$0xff]  ;;  %v2737_v23 = vld [vmem:[#allocation8 + $0x358] sm:$0xff] }
 0x79c   :  { %v2714_v20 = vld [vmem:[#allocation8 + $0x2a0] sm:$0xff]  ;;  %v2741_v41 = vld [vmem:[#allocation8 + $0x378] sm:$0xff] }
 0x79d   :  { %10007 = vmatpush1.bf16.msra.mxu0 %v10006_v43  ;;  %10039 = vmatpush1.bf16.msra.mxu1 %v10038_v59  ;;  %v2407_v43 = vld [vmem:[#allocation6 + $0x1f8] sm:$0xff]  ;;  %v10022_v59 = vpack.c.bf16 %v2396_v8, %v2392_v10  ;;  %v13372_v2 = vpack.c.bf16 %v2714_v20, %v2710_v6  ;;  %v2716_v10 = vld [vmem:[#allocation8 + $0x2b0] sm:$0xff]  ;;  %v2742_v6 = vld [vmem:[#allocation8 + $0x380] sm:$0xff] }
 0x79e   :  { %10009 = vmatprep.subr.bf16.mxu0 %v10008_v35  ;;  %10041 = vmatprep.subr.bf16.mxu1 %v10040_v27  ;;  %v10024_v35 = vpack.c.bf16 %v2405_v63, %v2401_v56  ;;  %v10056_v27 = vpack.c.bf16 %v2407_v43, %v2403_v11  ;;  %v2718_v56 = vld [vmem:[#allocation8 + $0x2c0] sm:$0xff]  ;;  %v2725_v11 = vld [vmem:[#allocation8 + $0x2f8] sm:$0xff] }
 0x79f   :  { %v2722_v63 = vld [vmem:[#allocation8 + $0x2e0] sm:$0xff] }
 0x7a0   :  { %v13384_v43 = vpack.c.bf16 %v2722_v63, %v2718_v56  ;;  %v2748_v56 = vld [vmem:[#allocation8 + $0x3b0] sm:$0xff]  ;;  %v2751_v63 = vld [vmem:[#allocation8 + $0x3c8] sm:$0xff] }
 0x7a1   :  { %10011 = vmatpush1.bf16.msra.mxu0 %v10010_v17  ;;  %10043 = vmatpush1.bf16.msra.mxu1 %v10042_v18 }
 0x7a2   :  { %10013 = vmatprep.subr.bf16.mxu0 %v10012_v22  ;;  %10045 = vmatprep.subr.bf16.mxu1 %v10044_v46  ;;  %v2703_v22 = vld [vmem:[#allocation8 + $0x248] sm:$0xff] }
 0x7a3   :  { %v2707_v46 = vld [vmem:[#allocation8 + $0x268] sm:$0xff] }
 0x7a4   :  { %v13358_v5 = vpack.c.bf16 %v2707_v46, %v2703_v22  ;;  %v2734_v46 = vld [vmem:[#allocation8 + $0x340] sm:$0xff] }
 0x7a5   :  { %10015 = vmatpush1.bf16.msra.mxu0 %v10014_v7  ;;  %10047 = vmatpush1.bf16.msra.mxu1 %v10046_v12  ;;  %v13362_v7 = vpack.c.bf16 %v2709_v48, %v2705_v62  ;;  %v2704_v12 = vld [vmem:[#allocation8 + $0x250] sm:$0xff]  ;;  %v2738_v62 = vld [vmem:[#allocation8 + $0x360] sm:$0xff] }
 0x7a6   :  { %10017 = vmatprep.subr.bf16.mxu0 %v10016_v47  ;;  %10049 = vmatprep.subr.bf16.mxu1 %v10048_v36  ;;  %v13365_v45 = vpack.c.bf16 %v2708_v13, %v2704_v12  ;;  %v2711_v47 = vld [vmem:[#allocation8 + $0x288] sm:$0xff]  ;;  %v2736_v48 = vld [vmem:[#allocation8 + $0x350] sm:$0xff]  ;;  %v13407_v13 = vpack.c.bf16 %v2738_v62, %v2734_v46 }
 0x7a7   :  { %v2715_v36 = vld [vmem:[#allocation8 + $0x2a8] sm:$0xff]  ;;  %v2740_v12 = vld [vmem:[#allocation8 + $0x370] sm:$0xff] }
 0x7a8   :  { %v13370_v50 = vpack.c.bf16 %v2715_v36, %v2711_v47  ;;  %v13409_v47 = vpack.c.bf16 %v2741_v41, %v2737_v23  ;;  %v2743_v36 = vld [vmem:[#allocation8 + $0x388] sm:$0xff]  ;;  %v13413_v20 = vpack.c.bf16 %v2740_v12, %v2736_v48 }
 0x7a9   :  { %10019 = vmatpush1.bf16.msra.mxu0 %v10018_v37  ;;  %10051 = vmatpush1.bf16.msra.mxu1 %v10050_v51  ;;  %v13374_v37 = vpack.c.bf16 %v2717_v52, %v2713_v30  ;;  %v2712_v51 = vld [vmem:[#allocation8 + $0x290] sm:$0xff]  ;;  %v2747_v30 = vld [vmem:[#allocation8 + $0x3a8] sm:$0xff] }
 0x7aa   :  { %10021 = vmatprep.subr.bf16.mxu0 %v10020_v19  ;;  %10053 = vmatprep.subr.bf16.mxu1 %v10052_v21  ;;  %v13377_v8 = vpack.c.bf16 %v2716_v10, %v2712_v51  ;;  %v2719_v19 = vld [vmem:[#allocation8 + $0x2c8] sm:$0xff]  ;;  %v13415_v52 = vpack.c.bf16 %v2747_v30, %v2743_v36  ;;  %v2746_v51 = vld [vmem:[#allocation8 + $0x3a0] sm:$0xff]  ;;  %v2745_v10 = vld [vmem:[#allocation8 + $0x398] sm:$0xff] }
 0x7ab   :  { %v2723_v21 = vld [vmem:[#allocation8 + $0x2e8] sm:$0xff] }
 0x7ac   :  { %v13382_v61 = vpack.c.bf16 %v2723_v21, %v2719_v19  ;;  %v2749_v19 = vld [vmem:[#allocation8 + $0x3b8] sm:$0xff] }
 0x7ad   :  { %10023 = vmatpush1.bf16.msra.mxu0 %v10022_v59  ;;  %10055 = vmatpush1.bf16.msra.mxu1 %v10054_v14  ;;  %v13386_v59 = vpack.c.bf16 %v2725_v11, %v2721_v55  ;;  %v2720_v14 = vld [vmem:[#allocation8 + $0x2d0] sm:$0xff]  ;;  %v13418_v21 = vpack.c.bf16 %v2749_v19, %v2745_v10  ;;  %v2755_v11 = vld [vmem:[#allocation8 + $0x3e8] sm:$0xff] }
 0x7ae   :  { %10025 = vmatprep.subr.bf16.mxu0 %v10024_v35  ;;  %10057 = vmatprep.subr.bf16.mxu1 %v10056_v27  ;;  %v2727_v35 = vld [vmem:[#allocation8 + $0x308] sm:$0xff]  ;;  %v13389_v27 = vpack.c.bf16 %v2724_v39, %v2720_v14  ;;  %v2744_v55 = vld [vmem:[#allocation8 + $0x390] sm:$0xff]  ;;  %v13421_v14 = vpack.c.bf16 %v2746_v51, %v2742_v6 }
 0x7af   :  { %v13425_v39 = vpack.c.bf16 %v2748_v56, %v2744_v55 }
 0x7b1   :  { %10027 = vmatpush1.bf16.msra.mxu0 %v10026_v44  ;;  %10059 = vmatpush1.bf16.msra.mxu1 %v10058_v58  ;;  %v13393_v44 = vpack.c.bf16 %v2731_v28, %v2727_v35  ;;  %v13395_v58 = vpack.c.bf16 %v2730_v57, %v2726_v24  ;;  %v13427_v35 = vpack.c.bf16 %v2755_v11, %v2751_v63  ;;  %v2753_v28 = vld [vmem:[#allocation8 + $0x3d8] sm:$0xff]  ;;  %v2750_v57 = vld [vmem:[#allocation8 + $0x3c0] sm:$0xff] }
 0x7b2   :  { %v2757_v24 = vld [vmem:[#allocation8 + $0x3f8] sm:$0xff] }
 0x7b4   :  { %2496 = vmatmul.mubr.f32.vlgmr.msra.gmra.mrb[16].mxu0 %v12990_v40  ;;  %2609 = vmatmul.mubr.f32.vlgmr.msra.gmra.mrb[18].mxu1 %v12990_v40  ;;  %v2695_v40 = vld [vmem:[#allocation8 + $0x208] sm:$0xff] }
 0x7b5   :  { %2501 = vmatprep.mubr.f32.mxu0 %v12635_v0  ;;  %2614 = vmatprep.mubr.f32.mxu1 %v12635_v0 }
 0x7b8   :  { %2502 = vmatmul.mubr.f32.gmra.mrb[18].mxu0 %v13035_v15  ;;  %2615 = vmatmul.mubr.f32.gmra.mrb[20].mxu1 %v13035_v15  ;;  %v2699_v15 = vld [vmem:[#allocation8 + $0x228] sm:$0xff] }
 0x7b9   :  { %2507 = vmatprep.mubr.f32.mxu0 %v12635_v0  ;;  %2620 = vmatprep.mubr.f32.mxu1 %v12635_v0 }
 0x7bc   :  { %2508 = vmatmul.mubr.f32.gmra.mrb[20].mxu0 %v13113_v32  ;;  %2621 = vmatmul.mubr.f32.gmra.mrb[22].mxu1 %v13113_v32  ;;  %v2697_v32 = vld [vmem:[#allocation8 + $0x218] sm:$0xff] }
 0x7bd   :  { %2513 = vmatprep.mubr.f32.mxu0 %v12635_v0  ;;  %2626 = vmatprep.mubr.f32.mxu1 %v12635_v0 }
 0x7c0   :  { %2514 = vmatmul.mubr.f32.gmra.mrb[22].mxu0 %v13192_v16  ;;  %2627 = vmatmul.mubr.f32.gmra.mrb[24].mxu1 %v13192_v16  ;;  %v13346_v16 = vpack.c.bf16 %v2699_v15, %v2695_v40  ;;  %v2729_v40 = vld [vmem:[#allocation8 + $0x318] sm:$0xff] }
 0x7c1   :  { %2519 = vmatprep.mubr.f32.mxu0 %v12635_v0  ;;  %2632 = vmatprep.mubr.f32.mxu1 %v12635_v0  ;;  %v2733_v15 = vld [vmem:[#allocation8 + $0x338] sm:$0xff] }
 0x7c2   :  { %10061 = vmatprep.subr.bf16.mxu0 %v13346_v16 }
 0x7c4   :  { %2520 = vmatmul.mubr.f32.gmra.mrb[24].mxu0 %v13238_v42  ;;  %2633 = vmatmul.mubr.f32.gmra.mrb[26].mxu1 %v13238_v42  ;;  %v2694_v42 = vld [vmem:[#allocation8 + $0x200] sm:$0xff] }
 0x7c5   :  { %2525 = vmatprep.mubr.f32.mxu0 %v12635_v0  ;;  %2638 = vmatprep.mubr.f32.mxu1 %v12635_v0  ;;  %v13348_v17 = vpack.c.bf16 %v2698_v4, %v2694_v42  ;;  %v13398_v42 = vpack.c.bf16 %v2733_v15, %v2729_v40  ;;  %v2732_v4 = vld [vmem:[#allocation8 + $0x330] sm:$0xff]  ;;  %v2754_v40 = vld [vmem:[#allocation8 + $0x3e0] sm:$0xff]  ;;  %v13433_v15 = vpack.c.bf16 %v2757_v24, %v2753_v28 }
 0x7c7   :  { %10063 = vmatpush1.bf16.msra.mxu0 %v13348_v17 }
 0x7c8   :  { %2526 = vmatmul.mubr.f32.gmra.mrb[26].mxu0 %v13283_v3  ;;  %2639 = vmatmul.mubr.f32.gmra.mrb[28].mxu1 %v13283_v3  ;;  %v2701_v3 = vld [vmem:[#allocation8 + $0x238] sm:$0xff] }
 0x7c9   :  { %2531 = vmatprep.mubr.f32.mxu0 %v12635_v0  ;;  %2644 = vmatprep.mubr.f32.mxu1 %v12635_v0  ;;  %v13350_v18 = vpack.c.bf16 %v2701_v3, %v2697_v32  ;;  %v2728_v32 = vld [vmem:[#allocation8 + $0x310] sm:$0xff]  ;;  %v2735_v3 = vld [vmem:[#allocation8 + $0x348] sm:$0xff] }
 0x7ca   :  { %10065 = vmatprep.subr.bf16.mxu0 %v13358_v5 }
 0x7cb   :  { %10093 = vmatprep.subr.bf16.mxu1 %v13350_v18  ;;  %10067 = vmatpush1.bf16.msra.mxu0 %v13360_v54 }
 0x7cc   :  { %2532 = vmatmul.mubr.f32.gmra.mrb[28].mxu0 %v13312_v29  ;;  %2645 = vmatmul.mubr.f32.gmra.mrb[30].mxu1 %v13312_v29  ;;  %v13353_v29 = vpack.c.bf16 %v2700_v38, %v2696_v25  ;;  %v2739_v25 = vld [vmem:[#allocation8 + $0x368] sm:$0xff]  ;;  %v13401_v38 = vpack.c.bf16 %v2732_v4, %v2728_v32  ;;  %v2752_v32 = vld [vmem:[#allocation8 + $0x3d0] sm:$0xff]  ;;  %v13435_v4 = vpack.c.bf16 %v2754_v40, %v2750_v57 }
 0x7cd   :  { %2537 = vmatprep.mubr.f32.mxu0 %v12635_v0  ;;  %2650 = vmatprep.mubr.f32.mxu1 %v12635_v0  ;;  %v13403_v22 = vpack.c.bf16 %v2739_v25, %v2735_v3  ;;  %v2756_v3 = vld [vmem:[#allocation8 + $0x3f0] sm:$0xff] }
 0x7ce   :  { %10095 = vmatpush1.bf16.msra.mxu1 %v13353_v29  ;;  %10069 = vmatprep.subr.bf16.mxu0 %v13370_v50  ;;  %v13438_v25 = vpack.c.bf16 %v2756_v3, %v2752_v32 }
 0x7cf   :  { %10097 = vmatprep.subr.bf16.mxu1 %v13362_v7  ;;  %10071 = vmatpush1.bf16.msra.mxu0 %v13372_v2 }
 0x7d0   :  { %10073 = vmatprep.subr.bf16.mxu0 %v13382_v61 }
 0x7d2   :  { %10099 = vmatpush1.bf16.msra.mxu1 %v13365_v45 }
 0x7d3   :  { %10101 = vmatprep.subr.bf16.mxu1 %v13374_v37  ;;  %10075 = vmatpush1.bf16.msra.mxu0 %v13384_v43 }
 0x7d4   :  { %10077 = vmatprep.subr.bf16.mxu0 %v13393_v44 }
 0x7d6   :  { %10103 = vmatpush1.bf16.msra.mxu1 %v13377_v8 }
 0x7d7   :  { %10105 = vmatprep.subr.bf16.mxu1 %v13386_v59  ;;  %10079 = vmatpush1.bf16.msra.mxu0 %v13395_v58 }
 0x7d8   :  { %10081 = vmatprep.subr.bf16.mxu0 %v13403_v22 }
 0x7da   :  { %10107 = vmatpush1.bf16.msra.mxu1 %v13389_v27 }
 0x7db   :  { %10109 = vmatprep.subr.bf16.mxu1 %v13398_v42  ;;  %10083 = vmatpush1.bf16.msra.mxu0 %v13407_v13 }
 0x7dc   :  { %10085 = vmatprep.subr.bf16.mxu0 %v13415_v52 }
 0x7de   :  { %10111 = vmatpush1.bf16.msra.mxu1 %v13401_v38 }
 0x7df   :  { %10113 = vmatprep.subr.bf16.mxu1 %v13409_v47  ;;  %10087 = vmatpush1.bf16.msra.mxu0 %v13421_v14 }
 0x7e0   :  { %10089 = vmatprep.subr.bf16.mxu0 %v13427_v35 }
 0x7e2   :  { %10115 = vmatpush1.bf16.msra.mxu1 %v13413_v20 }
 0x7e3   :  { %10117 = vmatprep.subr.bf16.mxu1 %v13418_v21  ;;  %10091 = vmatpush1.bf16.msra.mxu0 %v13435_v4 }
 0x7e4   :  { %10125 = vmatprep.subr.bf16.mxu0 %v13346_v16 }
 0x7e6   :  { %10119 = vmatpush1.bf16.msra.mxu1 %v13425_v39 }
 0x7e7   :  { %10121 = vmatprep.subr.bf16.mxu1 %v13433_v15 }
 0x7ea   :  { %10123 = vmatpush1.bf16.msra.mxu1 %v13438_v25 }
 0x7eb   :  { %10157 = vmatprep.subr.bf16.mxu1 %v13350_v18 }
 0x867   :  { %v2230_v46 = vpop.f32.mrb[14].mxu0  ;;  %v2301_v62 = vpop.f32.mrb[14].mxu1 }
 0x868   :  { %v11772_v23 = vadd.f32 %v2230_v46, %v12968_v33  ;;  %v2232_v41 = vpop.f32.mrb[15].mxu0  ;;  %v2303_v48 = vpop.f32.mrb[15].mxu1  ;;  %v11788_v10 = vadd.f32 %v2301_v62, %v12980_v60 }
 0x869   :  { %v11773_v12 = vadd.f32 %v2232_v41, %v12971_v34  ;;  %v11789_v6 = vadd.f32 %v2303_v48, %v12983_v1 }
 0x86a   :  { %v9324_v36 = vmul.f32 -1.442695, %v11772_v23 }
 0x86b   :  { %v9325_v30 = vmul.f32 -1.442695, %v11773_v12  ;;  %v9326_v51 = vmul.f32 -1.442695, %v11789_v6 }
 0x86c   :  { %12133 = vpow2.f32 %v9324_v36 }
 0x86d   :  { %12135 = vpow2.f32 %v9325_v30 }
 0x86e   :  { %12137 = vpow2.f32 %v9326_v51 }
 0x86f   :  { %12139 = vtanh.f32 %v11788_v10 }
 0x876   :  { %v12134_v19 = vpop.eup %12133 }
 0x877   :  { %v12136_v55 = vpop.eup %12135  ;;  %v2313_v56 = vadd.f32 1.0, %v12134_v19 }
 0x878   :  { %v2319_v63 = vadd.f32 1.0, %v12136_v55  ;;  %v12138_v33 = vpop.eup %12137 }
 0x879   :  { %12141 = vrcp.f32 %v2313_v56  ;;  %v12140_v11 = vpop.eup %12139  ;;  %v2326_v57 = vadd.f32 1.0, %v12138_v33 }
 0x87a   :  { %12143 = vrcp.f32 %v2319_v63 }
 0x87b   :  { %12145 = vrcp.f32 %v2326_v57 }
 0x883   :  { %v12142_v34 = vpop.eup %12141 }
 0x884   :  { %v12144_v28 = vpop.eup %12143  ;;  %v2330_v24 = vmul.f32 %v12142_v34, %v12140_v11 }
 0x885   :  { %v2329_v40 = vmul.f32 %v12144_v28, %v13309_v9  ;;  %v12146_v60 = vpop.eup %12145  ;;  %v2409_v9 = vld [vmem:[#allocation9 + $0x4] sm:$0xf] }
 0x886   :  { %v13488_v46 = vrot.slane %v2409_v9, %v12963_v26  ;;  %v13491_v62 = vrot.slane %v2409_v9, %v12965_v31  ;;  %v13496_v10 = vrot.slane %v2409_v9, %v12977_v53  ;;  %v13500_v55 = vrot.slane %v2409_v9, %v12975_v49 }
 0x887   :  { %v2331_v1 = vadd.f32 %v2330_v24, %v2329_v40 }
 0x889   :  { %12147 = vtanh.f32 %v2331_v1 }
 0x893   :  { %v12148_v32 = vpop.eup %12147 }
 0x894   :  { %v2333_v3 = vmul.f32 %v12148_v32, %v12146_v60 }
 0x896   :  { %2538 = vmatmul.mubr.f32.gmra.mrb[30].mxu0 %v2333_v3  ;;  %2651 = vmatmul.mubr.f32.gmra.mrb[32].mxu1 %v2333_v3 }
 0x897   :  { %2822 = vmatprep.mubr.f32.mxu0 %v12635_v0  ;;  %2893 = vmatprep.mubr.f32.mxu1 %v12635_v0 }
 0x89a   :  { %2823 = vmatmul.mubr.f32.vlgmr.msra.gmra.mrb[16].mxu0 %v12635_v0  ;;  %2894 = vmatmul.mubr.f32.vlgmr.msra.gmra.mrb[18].mxu1 %v12635_v0 }
 0x89b   :  { %10127 = vmatpush1.bf16.msra.mxu0 %v13348_v17  ;;  %10159 = vmatpush1.bf16.msra.mxu1 %v13353_v29 }
 0x89c   :  { %10129 = vmatprep.subr.bf16.mxu0 %v13358_v5  ;;  %10161 = vmatprep.subr.bf16.mxu1 %v13362_v7 }
 0x89d   :  { %3061 = vmatprep.mubr.f32.mxu0 %v12635_v0  ;;  %3132 = vmatprep.mubr.f32.mxu1 %v12635_v0 }
 0x89f   :  { %10131 = vmatpush1.bf16.msra.mxu0 %v13360_v54  ;;  %10163 = vmatpush1.bf16.msra.mxu1 %v13365_v45 }
 0x8a0   :  { %10133 = vmatprep.subr.bf16.mxu0 %v13370_v50  ;;  %10165 = vmatprep.subr.bf16.mxu1 %v13374_v37 }
 0x8a3   :  { %10135 = vmatpush1.bf16.msra.mxu0 %v13372_v2  ;;  %10167 = vmatpush1.bf16.msra.mxu1 %v13377_v8 }
 0x8a4   :  { %10137 = vmatprep.subr.bf16.mxu0 %v13382_v61  ;;  %10169 = vmatprep.subr.bf16.mxu1 %v13386_v59 }
 0x8a7   :  { %10139 = vmatpush1.bf16.msra.mxu0 %v13384_v43  ;;  %10171 = vmatpush1.bf16.msra.mxu1 %v13389_v27 }
 0x8a8   :  { %10141 = vmatprep.subr.bf16.mxu0 %v13393_v44  ;;  %10173 = vmatprep.subr.bf16.mxu1 %v13398_v42 }
 0x8ab   :  { %10143 = vmatpush1.bf16.msra.mxu0 %v13395_v58  ;;  %10175 = vmatpush1.bf16.msra.mxu1 %v13401_v38 }
 0x8ac   :  { %10145 = vmatprep.subr.bf16.mxu0 %v13403_v22  ;;  %10177 = vmatprep.subr.bf16.mxu1 %v13409_v47 }
 0x8af   :  { %10147 = vmatpush1.bf16.msra.mxu0 %v13407_v13  ;;  %10179 = vmatpush1.bf16.msra.mxu1 %v13413_v20 }
 0x8b0   :  { %10149 = vmatprep.subr.bf16.mxu0 %v13415_v52  ;;  %10181 = vmatprep.subr.bf16.mxu1 %v13418_v21 }
 0x8b3   :  { %10151 = vmatpush1.bf16.msra.mxu0 %v13421_v14  ;;  %10183 = vmatpush1.bf16.msra.mxu1 %v13425_v39 }
 0x8b4   :  { %10153 = vmatprep.subr.bf16.mxu0 %v13427_v35  ;;  %10185 = vmatprep.subr.bf16.mxu1 %v13433_v15 }
 0x8b7   :  { %10155 = vmatpush1.bf16.msra.mxu0 %v13435_v4  ;;  %10187 = vmatpush1.bf16.msra.mxu1 %v13438_v25 }
 0x8b8   :  { %10189 = vmatprep.subr.bf16.mxu0 %v13346_v16  ;;  %10221 = vmatprep.subr.bf16.mxu1 %v13350_v18 }
 0x96d   :  { %v2824_v23 = vpop.f32.mrb[16].mxu0  ;;  %v2895_v41 = vpop.f32.mrb[18].mxu1 }
 0x96e   :  { %v11790_v48 = vadd.f32 %v2824_v23, %v13488_v46  ;;  %v2826_v12 = vpop.f32.mrb[17].mxu0  ;;  %v2897_v36 = vpop.f32.mrb[19].mxu1  ;;  %v11806_v63 = vadd.f32 %v2895_v41, %v13500_v55 }
 0x96f   :  { %v11791_v30 = vadd.f32 %v2826_v12, %v13491_v62  ;;  %v11807_v19 = vadd.f32 %v2897_v36, %v13496_v10 }
 0x970   :  { %v9327_v6 = vmul.f32 -1.442695, %v11790_v48 }
 0x971   :  { %v9328_v51 = vmul.f32 -1.442695, %v11791_v30  ;;  %v9329_v56 = vmul.f32 -1.442695, %v11807_v19 }
 0x972   :  { %12149 = vpow2.f32 %v9327_v6 }
 0x973   :  { %12151 = vpow2.f32 %v9328_v51 }
 0x974   :  { %12153 = vpow2.f32 %v9329_v56 }
 0x975   :  { %12155 = vtanh.f32 %v11806_v63 }
 0x97c   :  { %v12150_v33 = vpop.eup %12149 }
 0x97d   :  { %v12152_v11 = vpop.eup %12151  ;;  %v2907_v34 = vadd.f32 1.0, %v12150_v33 }
 0x97e   :  { %v2913_v28 = vadd.f32 1.0, %v12152_v11  ;;  %v12154_v24 = vpop.eup %12153 }
 0x97f   :  { %12157 = vrcp.f32 %v2907_v34  ;;  %v12156_v57 = vpop.eup %12155  ;;  %v2920_v32 = vadd.f32 1.0, %v12154_v24 }
 0x980   :  { %12159 = vrcp.f32 %v2913_v28 }
 0x981   :  { %12161 = vrcp.f32 %v2920_v32 }
 0x989   :  { %v12158_v40 = vpop.eup %12157 }
 0x98a   :  { %v12160_v1 = vpop.eup %12159  ;;  %v2924_v60 = vmul.f32 %v12158_v40, %v12156_v57 }
 0x98b   :  { %v2923_v3 = vmul.f32 0.0, %v12160_v1  ;;  %v12162_v23 = vpop.eup %12161 }
 0x98d   :  { %v13503_v9 = vadd.f32 %v2924_v60, %v2923_v3 }
 0x98f   :  { %12163 = vtanh.f32 %v13503_v9 }
 0x999   :  { %v12164_v41 = vpop.eup %12163 }
 0x99a   :  { %v13506_v48 = vmul.f32 %v12164_v41, %v12162_v23 }
 0x99c   :  { %3062 = vmatmul.mubr.f32.vlgmr.msra.gmra.mrb[18].mxu0 %v13506_v48  ;;  %3133 = vmatmul.mubr.f32.vlgmr.msra.gmra.mrb[20].mxu1 %v13506_v48 }
 0x99d   :  { %10191 = vmatpush1.bf16.msra.mxu0 %v13348_v17  ;;  %10223 = vmatpush1.bf16.msra.mxu1 %v13353_v29 }
 0x99e   :  { %10193 = vmatprep.subr.bf16.mxu0 %v13358_v5  ;;  %10225 = vmatprep.subr.bf16.mxu1 %v13362_v7 }
 0x99f   :  { %3300 = vmatprep.mubr.f32.mxu0 %v12635_v0  ;;  %3371 = vmatprep.mubr.f32.mxu1 %v12635_v0 }
 0x9a1   :  { %10195 = vmatpush1.bf16.msra.mxu0 %v13360_v54  ;;  %10227 = vmatpush1.bf16.msra.mxu1 %v13365_v45 }
 0x9a2   :  { %10197 = vmatprep.subr.bf16.mxu0 %v13370_v50  ;;  %10229 = vmatprep.subr.bf16.mxu1 %v13374_v37 }
 0x9a5   :  { %10199 = vmatpush1.bf16.msra.mxu0 %v13372_v2  ;;  %10231 = vmatpush1.bf16.msra.mxu1 %v13377_v8 }
 0x9a6   :  { %10201 = vmatprep.subr.bf16.mxu0 %v13382_v61  ;;  %10233 = vmatprep.subr.bf16.mxu1 %v13386_v59 }
 0x9a9   :  { %10203 = vmatpush1.bf16.msra.mxu0 %v13384_v43  ;;  %10235 = vmatpush1.bf16.msra.mxu1 %v13389_v27 }
 0x9aa   :  { %10205 = vmatprep.subr.bf16.mxu0 %v13393_v44  ;;  %10237 = vmatprep.subr.bf16.mxu1 %v13398_v42 }
 0x9ad   :  { %10207 = vmatpush1.bf16.msra.mxu0 %v13395_v58  ;;  %10239 = vmatpush1.bf16.msra.mxu1 %v13401_v38 }
 0x9ae   :  { %10209 = vmatprep.subr.bf16.mxu0 %v13403_v22  ;;  %10241 = vmatprep.subr.bf16.mxu1 %v13409_v47 }
 0x9b1   :  { %10211 = vmatpush1.bf16.msra.mxu0 %v13407_v13  ;;  %10243 = vmatpush1.bf16.msra.mxu1 %v13413_v20 }
 0x9b2   :  { %10213 = vmatprep.subr.bf16.mxu0 %v13415_v52  ;;  %10245 = vmatprep.subr.bf16.mxu1 %v13418_v21 }
 0x9b5   :  { %10215 = vmatpush1.bf16.msra.mxu0 %v13421_v14  ;;  %10247 = vmatpush1.bf16.msra.mxu1 %v13425_v39 }
 0x9b6   :  { %10217 = vmatprep.subr.bf16.mxu0 %v13427_v35  ;;  %10249 = vmatprep.subr.bf16.mxu1 %v13433_v15 }
 0x9b9   :  { %10219 = vmatpush1.bf16.msra.mxu0 %v13435_v4  ;;  %10251 = vmatpush1.bf16.msra.mxu1 %v13438_v25 }
 0x9ba   :  { %10253 = vmatprep.subr.bf16.mxu0 %v13346_v16  ;;  %10285 = vmatprep.subr.bf16.mxu1 %v13350_v18 }
 0xa6f   :  { %v3063_v12 = vpop.f32.mrb[18].mxu0  ;;  %v3134_v36 = vpop.f32.mrb[20].mxu1 }
 0xa70   :  { %v11792_v30 = vadd.f32 %v3063_v12, %v13488_v46  ;;  %v3065_v6 = vpop.f32.mrb[19].mxu0  ;;  %v3136_v51 = vpop.f32.mrb[21].mxu1  ;;  %v11808_v34 = vadd.f32 %v3134_v36, %v13500_v55 }
 0xa71   :  { %v11793_v19 = vadd.f32 %v3065_v6, %v13491_v62  ;;  %v11809_v33 = vadd.f32 %v3136_v51, %v13496_v10  ;;  %v3650_v6 = vld [vmem:[#allocation8 + $0x200] sm:$0xff] }
 0xa72   :  { %v9330_v56 = vmul.f32 -1.442695, %v11792_v30  ;;  %v3654_v51 = vld [vmem:[#allocation8 + $0x220] sm:$0xff] }
 0xa73   :  { %v9331_v63 = vmul.f32 -1.442695, %v11793_v19  ;;  %v9332_v11 = vmul.f32 -1.442695, %v11809_v33  ;;  %v3656_v33 = vld [vmem:[#allocation8 + $0x230] sm:$0xff] }
 0xa74   :  { %12165 = vpow2.f32 %v9330_v56  ;;  %v13606_v56 = vpack.c.bf16 %v3654_v51, %v3650_v6 }
 0xa75   :  { %12167 = vpow2.f32 %v9331_v63  ;;  %v3652_v63 = vld [vmem:[#allocation8 + $0x210] sm:$0xff] }
 0xa76   :  { %12169 = vpow2.f32 %v9332_v11  ;;  %v13609_v11 = vpack.c.bf16 %v3656_v33, %v3652_v63  ;;  %v3684_v63 = vld [vmem:[#allocation8 + $0x310] sm:$0xff] }
 0xa77   :  { %12171 = vtanh.f32 %v11808_v34  ;;  %v3659_v34 = vld [vmem:[#allocation8 + $0x248] sm:$0xff]  ;;  %v3688_v33 = vld [vmem:[#allocation8 + $0x330] sm:$0xff] }
 0xa7e   :  { %v12166_v16 = vpop.eup %12165 }
 0xa7f   :  { %v12168_v28 = vpop.eup %12167  ;;  %v3146_v18 = vadd.f32 1.0, %v12166_v16  ;;  %v3663_v16 = vld [vmem:[#allocation8 + $0x268] sm:$0xff] }
 0xa80   :  { %v3152_v24 = vadd.f32 1.0, %v12168_v28  ;;  %v12170_v57 = vpop.eup %12169  ;;  %v3661_v28 = vld [vmem:[#allocation8 + $0x258] sm:$0xff] }
 0xa81   :  { %12173 = vrcp.f32 %v3146_v18  ;;  %v12172_v40 = vpop.eup %12171  ;;  %v3159_v3 = vadd.f32 1.0, %v12170_v57  ;;  %v13614_v18 = vpack.c.bf16 %v3663_v16, %v3659_v34  ;;  %v3658_v57 = vld [vmem:[#allocation8 + $0x240] sm:$0xff]  ;;  %v13657_v34 = vpack.c.bf16 %v3688_v33, %v3684_v63  ;;  %v3691_v16 = vld [vmem:[#allocation8 + $0x348] sm:$0xff] }
 0xa82   :  { %12175 = vrcp.f32 %v3152_v24  ;;  %v3665_v24 = vld [vmem:[#allocation8 + $0x278] sm:$0xff]  ;;  %v3706_v63 = vld [vmem:[#allocation8 + $0x3c0] sm:$0xff] }
 0xa83   :  { %12177 = vrcp.f32 %v3159_v3  ;;  %v3664_v3 = vld [vmem:[#allocation8 + $0x270] sm:$0xff] }
 0xa8b   :  { %v12174_v1 = vpop.eup %12173 }
 0xa8c   :  { %v12176_v60 = vpop.eup %12175  ;;  %v3163_v32 = vmul.f32 %v12174_v1, %v12172_v40  ;;  %v3662_v40 = vld [vmem:[#allocation8 + $0x260] sm:$0xff]  ;;  %v13616_v1 = vpack.c.bf16 %v3665_v24, %v3661_v28  ;;  %v3695_v28 = vld [vmem:[#allocation8 + $0x368] sm:$0xff]  ;;  %v3693_v24 = vld [vmem:[#allocation8 + $0x358] sm:$0xff] }
 0xa8d   :  { %v3162_v23 = vmul.f32 %v12176_v60, %v13503_v9  ;;  %v12178_v12 = vpop.eup %12177  ;;  %v3657_v9 = vld [vmem:[#allocation8 + $0x238] sm:$0xff]  ;;  %v13618_v60 = vpack.c.bf16 %v3662_v40, %v3658_v57  ;;  %v13661_v57 = vpack.c.bf16 %v3695_v28, %v3691_v16  ;;  %v3710_v16 = vld [vmem:[#allocation8 + $0x3e0] sm:$0xff]  ;;  %v3708_v28 = vld [vmem:[#allocation8 + $0x3d0] sm:$0xff] }
 0xa8e   :  { %v3697_v40 = vld [vmem:[#allocation8 + $0x378] sm:$0xff] }
 0xa8f   :  { %v13549_v41 = vadd.f32 %v3163_v32, %v3162_v23  ;;  %v3660_v32 = vld [vmem:[#allocation8 + $0x250] sm:$0xff] }
 0xa90   :  { %v13621_v23 = vpack.c.bf16 %v3664_v3, %v3660_v32  ;;  %v3690_v32 = vld [vmem:[#allocation8 + $0x340] sm:$0xff] }
 0xa91   :  { %12179 = vtanh.f32 %v13549_v41  ;;  %v3694_v3 = vld [vmem:[#allocation8 + $0x360] sm:$0xff] }
 0xa9b   :  { %v12180_v36 = vpop.eup %12179 }
 0xa9c   :  { %v13552_v30 = vmul.f32 %v12180_v36, %v12178_v12  ;;  %v3671_v12 = vld [vmem:[#allocation8 + $0x2a8] sm:$0xff]  ;;  %v3669_v36 = vld [vmem:[#allocation8 + $0x298] sm:$0xff] }
 0xa9e   :  { %3301 = vmatmul.mubr.f32.vlgmr.msra.gmra.mrb[20].mxu0 %v13552_v30  ;;  %3372 = vmatmul.mubr.f32.vlgmr.msra.gmra.mrb[22].mxu1 %v13552_v30 }
 0xa9f   :  { %10255 = vmatpush1.bf16.msra.mxu0 %v13348_v17  ;;  %10287 = vmatpush1.bf16.msra.mxu1 %v13353_v29 }
 0xaa0   :  { %10257 = vmatprep.subr.bf16.mxu0 %v13358_v5  ;;  %10289 = vmatprep.subr.bf16.mxu1 %v13362_v7 }
 0xaa1   :  { %3539 = vmatprep.mubr.f32.mxu0 %v12635_v0  ;;  %3610 = vmatprep.mubr.f32.mxu1 %v12635_v0 }
 0xaa3   :  { %10259 = vmatpush1.bf16.msra.mxu0 %v13360_v54  ;;  %10291 = vmatpush1.bf16.msra.mxu1 %v13365_v45 }
 0xaa4   :  { %10261 = vmatprep.subr.bf16.mxu0 %v13370_v50  ;;  %10293 = vmatprep.subr.bf16.mxu1 %v13374_v37 }
 0xaa7   :  { %10263 = vmatpush1.bf16.msra.mxu0 %v13372_v2  ;;  %10295 = vmatpush1.bf16.msra.mxu1 %v13377_v8 }
 0xaa8   :  { %10265 = vmatprep.subr.bf16.mxu0 %v13382_v61  ;;  %10297 = vmatprep.subr.bf16.mxu1 %v13386_v59 }
 0xaab   :  { %10267 = vmatpush1.bf16.msra.mxu0 %v13384_v43  ;;  %10299 = vmatpush1.bf16.msra.mxu1 %v13389_v27 }
 0xaac   :  { %10269 = vmatprep.subr.bf16.mxu0 %v13393_v44  ;;  %10301 = vmatprep.subr.bf16.mxu1 %v13398_v42 }
 0xaaf   :  { %10271 = vmatpush1.bf16.msra.mxu0 %v13395_v58  ;;  %10303 = vmatpush1.bf16.msra.mxu1 %v13401_v38 }
 0xab0   :  { %10273 = vmatprep.subr.bf16.mxu0 %v13403_v22  ;;  %10305 = vmatprep.subr.bf16.mxu1 %v13409_v47 }
 0xab3   :  { %10275 = vmatpush1.bf16.msra.mxu0 %v13407_v13  ;;  %10307 = vmatpush1.bf16.msra.mxu1 %v13413_v20 }
 0xab4   :  { %10277 = vmatprep.subr.bf16.mxu0 %v13415_v52  ;;  %10309 = vmatprep.subr.bf16.mxu1 %v13418_v21 }
 0xab7   :  { %10279 = vmatpush1.bf16.msra.mxu0 %v13421_v14  ;;  %10311 = vmatpush1.bf16.msra.mxu1 %v13425_v39 }
 0xab8   :  { %10281 = vmatprep.subr.bf16.mxu0 %v13427_v35  ;;  %10313 = vmatprep.subr.bf16.mxu1 %v13433_v15  ;;  %v3651_v35 = vld [vmem:[#allocation8 + $0x208] sm:$0xff] }
 0xab9   :  { %v3655_v15 = vld [vmem:[#allocation8 + $0x228] sm:$0xff] }
 0xabb   :  { %10283 = vmatpush1.bf16.msra.mxu0 %v13435_v4  ;;  %10315 = vmatpush1.bf16.msra.mxu1 %v13438_v25  ;;  %v3653_v4 = vld [vmem:[#allocation8 + $0x218] sm:$0xff]  ;;  %v13602_v25 = vpack.c.bf16 %v3655_v15, %v3651_v35 }
 0xabc   :  { %v13604_v19 = vpack.c.bf16 %v3657_v9, %v3653_v4  ;;  %v3689_v15 = vld [vmem:[#allocation8 + $0x338] sm:$0xff]  ;;  %v3682_v4 = vld [vmem:[#allocation8 + $0x300] sm:$0xff] }
 0xabd   :  { %10317 = vmatprep.subr.bf16.mxu0 %v13602_v25  ;;  %v3686_v9 = vld [vmem:[#allocation8 + $0x320] sm:$0xff] }
 0xabe   :  { %10349 = vmatprep.subr.bf16.mxu1 %v13604_v19  ;;  %v13654_v51 = vpack.c.bf16 %v3686_v9, %v3682_v4  ;;  %v3709_v4 = vld [vmem:[#allocation8 + $0x3d8] sm:$0xff] }
 0xabf   :  { %v3713_v9 = vld [vmem:[#allocation8 + $0x3f8] sm:$0xff] }
 0xac0   :  { %v13686_v33 = vpack.c.bf16 %v3713_v9, %v3709_v4 }
 0xb71   :  { %v3302_v17 = vpop.f32.mrb[20].mxu0  ;;  %v3373_v29 = vpop.f32.mrb[22].mxu1 }
 0xb72   :  { %v11794_v5 = vadd.f32 %v3302_v17, %v13488_v46  ;;  %v3304_v54 = vpop.f32.mrb[21].mxu0  ;;  %v3375_v7 = vpop.f32.mrb[23].mxu1  ;;  %v11810_v61 = vadd.f32 %v3373_v29, %v13500_v55  ;;  %v3673_v29 = vld [vmem:[#allocation8 + $0x2b8] sm:$0xff] }
 0xb73   :  { %v11795_v45 = vadd.f32 %v3304_v54, %v13491_v62  ;;  %v11811_v37 = vadd.f32 %v3375_v7, %v13496_v10  ;;  %v3670_v54 = vld [vmem:[#allocation8 + $0x2a0] sm:$0xff]  ;;  %v13628_v7 = vpack.c.bf16 %v3673_v29, %v3669_v36  ;;  %v3692_v36 = vld [vmem:[#allocation8 + $0x350] sm:$0xff] }
 0xb74   :  { %v9333_v50 = vmul.f32 -1.442695, %v11794_v5  ;;  %v3666_v5 = vld [vmem:[#allocation8 + $0x280] sm:$0xff]  ;;  %v3696_v29 = vld [vmem:[#allocation8 + $0x370] sm:$0xff] }
 0xb75   :  { %v9334_v2 = vmul.f32 -1.442695, %v11795_v45  ;;  %v9335_v8 = vmul.f32 -1.442695, %v11811_v37  ;;  %v13630_v45 = vpack.c.bf16 %v3670_v54, %v3666_v5  ;;  %v3699_v5 = vld [vmem:[#allocation8 + $0x388] sm:$0xff]  ;;  %v13669_v54 = vpack.c.bf16 %v3696_v29, %v3692_v36 }
 0xb76   :  { %12181 = vpow2.f32 %v9333_v50  ;;  %v3668_v50 = vld [vmem:[#allocation8 + $0x290] sm:$0xff] }
 0xb77   :  { %12183 = vpow2.f32 %v9334_v2  ;;  %v3672_v2 = vld [vmem:[#allocation8 + $0x2b0] sm:$0xff] }
 0xb78   :  { %12185 = vpow2.f32 %v9335_v8  ;;  %v13633_v37 = vpack.c.bf16 %v3672_v2, %v3668_v50  ;;  %v3675_v8 = vld [vmem:[#allocation8 + $0x2c8] sm:$0xff]  ;;  %v3701_v2 = vld [vmem:[#allocation8 + $0x398] sm:$0xff] }
 0xb79   :  { %12187 = vtanh.f32 %v11810_v61  ;;  %v3679_v61 = vld [vmem:[#allocation8 + $0x2e8] sm:$0xff] }
 0xb7a   :  { %v3703_v50 = vld [vmem:[#allocation8 + $0x3a8] sm:$0xff] }
 0xb80   :  { %v12182_v43 = vpop.eup %12181 }
 0xb81   :  { %v12184_v59 = vpop.eup %12183  ;;  %v3385_v27 = vadd.f32 1.0, %v12182_v43  ;;  %v3677_v43 = vld [vmem:[#allocation8 + $0x2d8] sm:$0xff] }
 0xb82   :  { %v3391_v44 = vadd.f32 1.0, %v12184_v59  ;;  %v12186_v58 = vpop.eup %12185  ;;  %v13638_v59 = vpack.c.bf16 %v3679_v61, %v3675_v8  ;;  %v3705_v8 = vld [vmem:[#allocation8 + $0x3b8] sm:$0xff]  ;;  %v13672_v61 = vpack.c.bf16 %v3703_v50, %v3699_v5 }
 0xb83   :  { %12189 = vrcp.f32 %v3385_v27  ;;  %v12188_v42 = vpop.eup %12187  ;;  %v3398_v47 = vadd.f32 1.0, %v12186_v58  ;;  %v3681_v27 = vld [vmem:[#allocation8 + $0x2f8] sm:$0xff]  ;;  %v3678_v58 = vld [vmem:[#allocation8 + $0x2e0] sm:$0xff] }
 0xb84   :  { %12191 = vrcp.f32 %v3391_v44  ;;  %v3674_v44 = vld [vmem:[#allocation8 + $0x2c0] sm:$0xff] }
 0xb85   :  { %12193 = vrcp.f32 %v3398_v47 }
 0xb8d   :  { %v12190_v38 = vpop.eup %12189 }
 0xb8e   :  { %v12192_v22 = vpop.eup %12191  ;;  %v3402_v13 = vmul.f32 %v12190_v38, %v12188_v42  ;;  %v13640_v42 = vpack.c.bf16 %v3681_v27, %v3677_v43  ;;  %v13642_v38 = vpack.c.bf16 %v3678_v58, %v3674_v44  ;;  %v13674_v43 = vpack.c.bf16 %v3705_v8, %v3701_v2  ;;  %v3698_v27 = vld [vmem:[#allocation8 + $0x380] sm:$0xff]  ;;  %v3700_v58 = vld [vmem:[#allocation8 + $0x390] sm:$0xff] }
 0xb8f   :  { %v3401_v20 = vmul.f32 %v12192_v22, %v13549_v41  ;;  %v12194_v21 = vpop.eup %12193  ;;  %v3667_v41 = vld [vmem:[#allocation8 + $0x288] sm:$0xff]  ;;  %v3676_v22 = vld [vmem:[#allocation8 + $0x2d0] sm:$0xff]  ;;  %v3702_v44 = vld [vmem:[#allocation8 + $0x3a0] sm:$0xff] }
 0xb90   :  { %v13626_v17 = vpack.c.bf16 %v3671_v12, %v3667_v41  ;;  %v13664_v41 = vpack.c.bf16 %v3697_v40, %v3693_v24  ;;  %v13666_v12 = vpack.c.bf16 %v3694_v3, %v3690_v32  ;;  %v3712_v24 = vld [vmem:[#allocation8 + $0x3f0] sm:$0xff]  ;;  %v13689_v40 = vpack.c.bf16 %v3710_v16, %v3706_v63 }
 0xb91   :  { %v13593_v52 = vadd.f32 %v3402_v13, %v3401_v20  ;;  %v3680_v13 = vld [vmem:[#allocation8 + $0x2f0] sm:$0xff]  ;;  %v3683_v20 = vld [vmem:[#allocation8 + $0x308] sm:$0xff]  ;;  %v13693_v32 = vpack.c.bf16 %v3712_v24, %v3708_v28 }
 0xb92   :  { %v13645_v47 = vpack.c.bf16 %v3680_v13, %v3676_v22  ;;  %v13677_v22 = vpack.c.bf16 %v3702_v44, %v3698_v27  ;;  %v3704_v13 = vld [vmem:[#allocation8 + $0x3b0] sm:$0xff] }
 0xb93   :  { %12195 = vtanh.f32 %v13593_v52 }
 0xb9d   :  { %v12196_v14 = vpop.eup %12195 }
 0xb9e   :  { %v13596_v39 = vmul.f32 %v12196_v14, %v12194_v21  ;;  %v3687_v21 = vld [vmem:[#allocation8 + $0x328] sm:$0xff]  ;;  %v3685_v14 = vld [vmem:[#allocation8 + $0x318] sm:$0xff] }
 0xb9f   :  { %v13650_v35 = vpack.c.bf16 %v3687_v21, %v3683_v20  ;;  %v13652_v6 = vpack.c.bf16 %v3689_v15, %v3685_v14  ;;  %v3707_v20 = vld [vmem:[#allocation8 + $0x3c8] sm:$0xff]  ;;  %v13681_v14 = vpack.c.bf16 %v3704_v13, %v3700_v58 }
 0xba0   :  { %3540 = vmatmul.mubr.f32.vlgmr.msra.gmra.mrb[22].mxu0 %v13596_v39  ;;  %3611 = vmatmul.mubr.f32.vlgmr.msra.gmra.mrb[24].mxu1 %v13596_v39  ;;  %v3711_v21 = vld [vmem:[#allocation8 + $0x3e8] sm:$0xff] }
 0xba1   :  { %3778 = vmatprep.mubr.f32.mxu0 %v12635_v0  ;;  %3849 = vmatprep.mubr.f32.mxu1 %v12635_v0  ;;  %v13683_v15 = vpack.c.bf16 %v3711_v21, %v3707_v20 }
 0xba2   :  { %10319 = vmatpush1.bf16.msra.mxu0 %v13606_v56  ;;  %10351 = vmatpush1.bf16.msra.mxu1 %v13609_v11 }
 0xba3   :  { %10321 = vmatprep.subr.bf16.mxu0 %v13614_v18  ;;  %10353 = vmatprep.subr.bf16.mxu1 %v13616_v1 }
 0xba6   :  { %10323 = vmatpush1.bf16.msra.mxu0 %v13618_v60  ;;  %10355 = vmatpush1.bf16.msra.mxu1 %v13621_v23 }
 0xba7   :  { %10325 = vmatprep.subr.bf16.mxu0 %v13626_v17  ;;  %10357 = vmatprep.subr.bf16.mxu1 %v13628_v7 }
 0xbaa   :  { %10327 = vmatpush1.bf16.msra.mxu0 %v13630_v45  ;;  %10359 = vmatpush1.bf16.msra.mxu1 %v13633_v37 }
 0xbab   :  { %10329 = vmatprep.subr.bf16.mxu0 %v13638_v59  ;;  %10361 = vmatprep.subr.bf16.mxu1 %v13640_v42 }
 0xbae   :  { %10331 = vmatpush1.bf16.msra.mxu0 %v13642_v38  ;;  %10363 = vmatpush1.bf16.msra.mxu1 %v13645_v47 }
 0xbaf   :  { %10333 = vmatprep.subr.bf16.mxu0 %v13650_v35  ;;  %10365 = vmatprep.subr.bf16.mxu1 %v13652_v6 }
 0xbb2   :  { %10335 = vmatpush1.bf16.msra.mxu0 %v13654_v51  ;;  %10367 = vmatpush1.bf16.msra.mxu1 %v13657_v34 }
 0xbb3   :  { %10337 = vmatprep.subr.bf16.mxu0 %v13661_v57  ;;  %10369 = vmatprep.subr.bf16.mxu1 %v13664_v41 }
 0xbb6   :  { %10339 = vmatpush1.bf16.msra.mxu0 %v13666_v12  ;;  %10371 = vmatpush1.bf16.msra.mxu1 %v13669_v54 }
 0xbb7   :  { %10341 = vmatprep.subr.bf16.mxu0 %v13672_v61  ;;  %10373 = vmatprep.subr.bf16.mxu1 %v13674_v43 }
 0xbba   :  { %10343 = vmatpush1.bf16.msra.mxu0 %v13677_v22  ;;  %10375 = vmatpush1.bf16.msra.mxu1 %v13681_v14 }
 0xbbb   :  { %10345 = vmatprep.subr.bf16.mxu0 %v13683_v15  ;;  %10377 = vmatprep.subr.bf16.mxu1 %v13686_v33 }
 0xbbe   :  { %10347 = vmatpush1.bf16.msra.mxu0 %v13689_v40  ;;  %10379 = vmatpush1.bf16.msra.mxu1 %v13693_v32 }
 0xbbf   :  { %10381 = vmatprep.subr.bf16.mxu0 %v13602_v25  ;;  %10413 = vmatprep.subr.bf16.mxu1 %v13604_v19 }
 0xc73   :  { %v3541_v3 = vpop.f32.mrb[22].mxu0  ;;  %v3612_v36 = vpop.f32.mrb[24].mxu1 }
 0xc74   :  { %v11796_v29 = vadd.f32 %v3541_v3, %v13488_v46  ;;  %v3543_v5 = vpop.f32.mrb[23].mxu0  ;;  %v3614_v50 = vpop.f32.mrb[25].mxu1  ;;  %v11812_v13 = vadd.f32 %v3612_v36, %v13500_v55 }
 0xc75   :  { %v11797_v2 = vadd.f32 %v3543_v5, %v13491_v62  ;;  %v11813_v44 = vadd.f32 %v3614_v50, %v13496_v10 }
 0xc76   :  { %v9336_v8 = vmul.f32 -1.442695, %v11796_v29 }
 0xc77   :  { %v9337_v27 = vmul.f32 -1.442695, %v11797_v2  ;;  %v9338_v58 = vmul.f32 -1.442695, %v11813_v44 }
 0xc78   :  { %12197 = vpow2.f32 %v9336_v8 }
 0xc79   :  { %12199 = vpow2.f32 %v9337_v27 }
 0xc7a   :  { %12201 = vpow2.f32 %v9338_v58 }
 0xc7b   :  { %12203 = vtanh.f32 %v11812_v13 }
 0xc82   :  { %v12198_v20 = vpop.eup %12197 }
 0xc83   :  { %v12200_v21 = vpop.eup %12199  ;;  %v3624_v4 = vadd.f32 1.0, %v12198_v20 }
 0xc84   :  { %v3630_v9 = vadd.f32 1.0, %v12200_v21  ;;  %v12202_v63 = vpop.eup %12201 }
 0xc85   :  { %12205 = vrcp.f32 %v3624_v4  ;;  %v12204_v16 = vpop.eup %12203  ;;  %v3637_v29 = vadd.f32 1.0, %v12202_v63 }
 0xc86   :  { %12207 = vrcp.f32 %v3630_v9 }
 0xc87   :  { %12209 = vrcp.f32 %v3637_v29 }
 0xc8f   :  { %v12206_v28 = vpop.eup %12205 }
 0xc90   :  { %v12208_v24 = vpop.eup %12207  ;;  %v3641_v3 = vmul.f32 %v12206_v28, %v12204_v16 }
 0xc91   :  { %v3640_v5 = vmul.f32 %v12208_v24, %v13593_v52  ;;  %v12210_v36 = vpop.eup %12209 }
 0xc93   :  { %v13705_v50 = vadd.f32 %v3641_v3, %v3640_v5 }
 0xc95   :  { %12211 = vtanh.f32 %v13705_v50 }
 0xc9f   :  { %v12212_v2 = vpop.eup %12211 }
 0xca0   :  { %v13708_v8 = vmul.f32 %v12212_v2, %v12210_v36 }
 0xca2   :  { %3779 = vmatmul.mubr.f32.vlgmr.msra.gmra.mrb[24].mxu0 %v13708_v8  ;;  %3850 = vmatmul.mubr.f32.vlgmr.msra.gmra.mrb[26].mxu1 %v13708_v8 }
 0xca3   :  { %10383 = vmatpush1.bf16.msra.mxu0 %v13606_v56  ;;  %10415 = vmatpush1.bf16.msra.mxu1 %v13609_v11 }
 0xca4   :  { %10385 = vmatprep.subr.bf16.mxu0 %v13614_v18  ;;  %10417 = vmatprep.subr.bf16.mxu1 %v13616_v1 }
 0xca5   :  { %4017 = vmatprep.mubr.f32.mxu0 %v12635_v0  ;;  %4088 = vmatprep.mubr.f32.mxu1 %v12635_v0 }
 0xca7   :  { %10387 = vmatpush1.bf16.msra.mxu0 %v13618_v60  ;;  %10419 = vmatpush1.bf16.msra.mxu1 %v13621_v23 }
 0xca8   :  { %10389 = vmatprep.subr.bf16.mxu0 %v13626_v17  ;;  %10421 = vmatprep.subr.bf16.mxu1 %v13628_v7 }
 0xcab   :  { %10391 = vmatpush1.bf16.msra.mxu0 %v13630_v45  ;;  %10423 = vmatpush1.bf16.msra.mxu1 %v13633_v37 }
 0xcac   :  { %10393 = vmatprep.subr.bf16.mxu0 %v13638_v59  ;;  %10425 = vmatprep.subr.bf16.mxu1 %v13640_v42 }
 0xcaf   :  { %10395 = vmatpush1.bf16.msra.mxu0 %v13642_v38  ;;  %10427 = vmatpush1.bf16.msra.mxu1 %v13645_v47 }
 0xcb0   :  { %10397 = vmatprep.subr.bf16.mxu0 %v13650_v35  ;;  %10429 = vmatprep.subr.bf16.mxu1 %v13652_v6 }
 0xcb3   :  { %10399 = vmatpush1.bf16.msra.mxu0 %v13654_v51  ;;  %10431 = vmatpush1.bf16.msra.mxu1 %v13657_v34 }
 0xcb4   :  { %10401 = vmatprep.subr.bf16.mxu0 %v13661_v57  ;;  %10433 = vmatprep.subr.bf16.mxu1 %v13664_v41 }
 0xcb7   :  { %10403 = vmatpush1.bf16.msra.mxu0 %v13666_v12  ;;  %10435 = vmatpush1.bf16.msra.mxu1 %v13669_v54 }
 0xcb8   :  { %10405 = vmatprep.subr.bf16.mxu0 %v13672_v61  ;;  %10437 = vmatprep.subr.bf16.mxu1 %v13674_v43 }
 0xcbb   :  { %10407 = vmatpush1.bf16.msra.mxu0 %v13677_v22  ;;  %10439 = vmatpush1.bf16.msra.mxu1 %v13681_v14 }
 0xcbc   :  { %10409 = vmatprep.subr.bf16.mxu0 %v13683_v15  ;;  %10441 = vmatprep.subr.bf16.mxu1 %v13686_v33 }
 0xcbf   :  { %10411 = vmatpush1.bf16.msra.mxu0 %v13689_v40  ;;  %10443 = vmatpush1.bf16.msra.mxu1 %v13693_v32 }
 0xcc0   :  { %10445 = vmatprep.subr.bf16.mxu0 %v13602_v25  ;;  %10477 = vmatprep.subr.bf16.mxu1 %v13604_v19 }
 0xd75   :  { %v3780_v52 = vpop.f32.mrb[24].mxu0  ;;  %v3851_v27 = vpop.f32.mrb[26].mxu1 }
 0xd76   :  { %v11798_v44 = vadd.f32 %v3780_v52, %v13488_v46  ;;  %v3782_v58 = vpop.f32.mrb[25].mxu0  ;;  %v3853_v13 = vpop.f32.mrb[27].mxu1  ;;  %v11814_v16 = vadd.f32 %v3851_v27, %v13500_v55 }
 0xd77   :  { %v11799_v20 = vadd.f32 %v3782_v58, %v13491_v62  ;;  %v11815_v9 = vadd.f32 %v3853_v13, %v13496_v10 }
 0xd78   :  { %v9339_v21 = vmul.f32 -1.442695, %v11798_v44 }
 0xd79   :  { %v9340_v4 = vmul.f32 -1.442695, %v11799_v20  ;;  %v9341_v63 = vmul.f32 -1.442695, %v11815_v9 }
 0xd7a   :  { %12213 = vpow2.f32 %v9339_v21 }
 0xd7b   :  { %12215 = vpow2.f32 %v9340_v4 }
 0xd7c   :  { %12217 = vpow2.f32 %v9341_v63 }
 0xd7d   :  { %12219 = vtanh.f32 %v11814_v16 }
 0xd84   :  { %v12214_v28 = vpop.eup %12213 }
 0xd85   :  { %v12216_v24 = vpop.eup %12215  ;;  %v3863_v3 = vadd.f32 1.0, %v12214_v28 }
 0xd86   :  { %v3869_v29 = vadd.f32 1.0, %v12216_v24  ;;  %v12218_v5 = vpop.eup %12217 }
 0xd87   :  { %12221 = vrcp.f32 %v3863_v3  ;;  %v12220_v36 = vpop.eup %12219  ;;  %v3876_v58 = vadd.f32 1.0, %v12218_v5 }
 0xd88   :  { %12223 = vrcp.f32 %v3869_v29 }
 0xd89   :  { %12225 = vrcp.f32 %v3876_v58 }
 0xd91   :  { %v12222_v2 = vpop.eup %12221 }
 0xd92   :  { %v12224_v52 = vpop.eup %12223  ;;  %v3880_v44 = vmul.f32 %v12222_v2, %v12220_v36 }
 0xd93   :  { %v3879_v20 = vmul.f32 %v12224_v52, %v13705_v50  ;;  %v12226_v27 = vpop.eup %12225 }
 0xd95   :  { %v13751_v13 = vadd.f32 %v3880_v44, %v3879_v20 }
 0xd97   :  { %12227 = vtanh.f32 %v13751_v13 }
 0xda1   :  { %v12228_v21 = vpop.eup %12227 }
 0xda2   :  { %v13754_v4 = vmul.f32 %v12228_v21, %v12226_v27 }
 0xda4   :  { %4018 = vmatmul.mubr.f32.vlgmr.msra.gmra.mrb[26].mxu0 %v13754_v4  ;;  %4089 = vmatmul.mubr.f32.vlgmr.msra.gmra.mrb[28].mxu1 %v13754_v4 }
 0xda5   :  { %10447 = vmatpush1.bf16.msra.mxu0 %v13606_v56  ;;  %10479 = vmatpush1.bf16.msra.mxu1 %v13609_v11 }
 0xda6   :  { %10449 = vmatprep.subr.bf16.mxu0 %v13614_v18  ;;  %10481 = vmatprep.subr.bf16.mxu1 %v13616_v1 }
 0xda7   :  { %4256 = vmatprep.mubr.f32.mxu0 %v12635_v0  ;;  %4327 = vmatprep.mubr.f32.mxu1 %v12635_v0 }
 0xda9   :  { %10451 = vmatpush1.bf16.msra.mxu0 %v13618_v60  ;;  %10483 = vmatpush1.bf16.msra.mxu1 %v13621_v23 }
 0xdaa   :  { %10453 = vmatprep.subr.bf16.mxu0 %v13626_v17  ;;  %10485 = vmatprep.subr.bf16.mxu1 %v13628_v7 }
 0xdad   :  { %10455 = vmatpush1.bf16.msra.mxu0 %v13630_v45  ;;  %10487 = vmatpush1.bf16.msra.mxu1 %v13633_v37 }
 0xdae   :  { %10457 = vmatprep.subr.bf16.mxu0 %v13638_v59  ;;  %10489 = vmatprep.subr.bf16.mxu1 %v13640_v42 }
 0xdb1   :  { %10459 = vmatpush1.bf16.msra.mxu0 %v13642_v38  ;;  %10491 = vmatpush1.bf16.msra.mxu1 %v13645_v47 }
 0xdb2   :  { %10461 = vmatprep.subr.bf16.mxu0 %v13650_v35  ;;  %10493 = vmatprep.subr.bf16.mxu1 %v13652_v6 }
 0xdb5   :  { %10463 = vmatpush1.bf16.msra.mxu0 %v13654_v51  ;;  %10495 = vmatpush1.bf16.msra.mxu1 %v13657_v34 }
 0xdb6   :  { %10465 = vmatprep.subr.bf16.mxu0 %v13661_v57  ;;  %10497 = vmatprep.subr.bf16.mxu1 %v13664_v41 }
 0xdb9   :  { %10467 = vmatpush1.bf16.msra.mxu0 %v13666_v12  ;;  %10499 = vmatpush1.bf16.msra.mxu1 %v13669_v54 }
 0xdba   :  { %10469 = vmatprep.subr.bf16.mxu0 %v13672_v61  ;;  %10501 = vmatprep.subr.bf16.mxu1 %v13674_v43 }
 0xdbd   :  { %10471 = vmatpush1.bf16.msra.mxu0 %v13677_v22  ;;  %10503 = vmatpush1.bf16.msra.mxu1 %v13681_v14 }
 0xdbe   :  { %10473 = vmatprep.subr.bf16.mxu0 %v13683_v15  ;;  %10505 = vmatprep.subr.bf16.mxu1 %v13686_v33 }
 0xdc1   :  { %10475 = vmatpush1.bf16.msra.mxu0 %v13689_v40  ;;  %10507 = vmatpush1.bf16.msra.mxu1 %v13693_v32 }
 0xdc2   :  { %10509 = vmatprep.subr.bf16.mxu0 %v13602_v25  ;;  %10541 = vmatprep.subr.bf16.mxu1 %v13604_v19 }
 0xe77   :  { %v4019_v50 = vpop.f32.mrb[26].mxu0  ;;  %v4090_v9 = vpop.f32.mrb[28].mxu1 }
 0xe78   :  { %v11800_v63 = vadd.f32 %v4019_v50, %v13488_v46  ;;  %v4021_v16 = vpop.f32.mrb[27].mxu0  ;;  %v4092_v28 = vpop.f32.mrb[29].mxu1  ;;  %v11816_v2 = vadd.f32 %v4090_v9, %v13500_v55 }
 0xe79   :  { %v11801_v24 = vadd.f32 %v4021_v16, %v13491_v62  ;;  %v11817_v5 = vadd.f32 %v4092_v28, %v13496_v10 }
 0xe7a   :  { %v9342_v3 = vmul.f32 -1.442695, %v11800_v63 }
 0xe7b   :  { %v9343_v29 = vmul.f32 -1.442695, %v11801_v24  ;;  %v9344_v36 = vmul.f32 -1.442695, %v11817_v5  ;;  %v4617_v5 = vld [vmem:[#allocation6 + $0x230] sm:$0xff] }
 0xe7c   :  { %12229 = vpow2.f32 %v9342_v3 }
 0xe7d   :  { %12231 = vpow2.f32 %v9343_v29  ;;  %v4613_v29 = vld [vmem:[#allocation6 + $0x210] sm:$0xff] }
 0xe7e   :  { %12233 = vpow2.f32 %v9344_v36  ;;  %v4620_v36 = vld [vmem:[#allocation6 + $0x248] sm:$0xff] }
 0xe7f   :  { %12235 = vtanh.f32 %v11816_v2  ;;  %v4624_v2 = vld [vmem:[#allocation6 + $0x268] sm:$0xff] }
 0xe86   :  { %v12230_v25 = vpop.eup %12229 }
 0xe87   :  { %v12232_v52 = vpop.eup %12231  ;;  %v4102_v19 = vadd.f32 1.0, %v12230_v25  ;;  %v4622_v25 = vld [vmem:[#allocation6 + $0x258] sm:$0xff] }
 0xe88   :  { %v4108_v44 = vadd.f32 1.0, %v12232_v52  ;;  %v12234_v58 = vpop.eup %12233  ;;  %v4626_v52 = vld [vmem:[#allocation6 + $0x278] sm:$0xff] }
 0xe89   :  { %12237 = vrcp.f32 %v4102_v19  ;;  %v12236_v20 = vpop.eup %12235  ;;  %v4115_v63 = vadd.f32 1.0, %v12234_v58 }
 0xe8a   :  { %12239 = vrcp.f32 %v4108_v44 }
 0xe8b   :  { %12241 = vrcp.f32 %v4115_v63  ;;  %v10576_v63 = vpack.c.bf16 %v4624_v2, %v4620_v36  ;;  %v4645_v2 = vld [vmem:[#allocation6 + $0x310] sm:$0xff] }
 0xe93   :  { %v12238_v27 = vpop.eup %12237 }
 0xe94   :  { %v12240_v21 = vpop.eup %12239  ;;  %v4119_v50 = vmul.f32 %v12238_v27, %v12236_v20  ;;  %v10606_v20 = vpack.c.bf16 %v4617_v5, %v4613_v29  ;;  %v4619_v27 = vld [vmem:[#allocation6 + $0x240] sm:$0xff] }
 0xe95   :  { %v4118_v16 = vmul.f32 %v12240_v21, %v13751_v13  ;;  %v12242_v9 = vpop.eup %12241  ;;  %v4615_v13 = vld [vmem:[#allocation6 + $0x220] sm:$0xff] }
 0xe96   :  { %v4623_v21 = vld [vmem:[#allocation6 + $0x260] sm:$0xff] }
 0xe97   :  { %v13797_v28 = vadd.f32 %v4119_v50, %v4118_v16  ;;  %v10608_v16 = vpack.c.bf16 %v4626_v52, %v4622_v25  ;;  %v4647_v29 = vld [vmem:[#allocation6 + $0x320] sm:$0xff]  ;;  %v4649_v25 = vld [vmem:[#allocation6 + $0x330] sm:$0xff]  ;;  %v4652_v52 = vld [vmem:[#allocation6 + $0x348] sm:$0xff] }
 0xe99   :  { %12243 = vtanh.f32 %v13797_v28 }
 0xea3   :  { %v12244_v24 = vpop.eup %12243 }
 0xea4   :  { %v13800_v3 = vmul.f32 %v12244_v24, %v12242_v9  ;;  %v4625_v9 = vld [vmem:[#allocation6 + $0x270] sm:$0xff]  ;;  %v4628_v24 = vld [vmem:[#allocation6 + $0x288] sm:$0xff] }
 0xea6   :  { %4257 = vmatmul.mubr.f32.vlgmr.msra.gmra.mrb[28].mxu0 %v13800_v3  ;;  %4328 = vmatmul.mubr.f32.vlgmr.msra.gmra.mrb[30].mxu1 %v13800_v3 }
 0xea7   :  { %10511 = vmatpush1.bf16.msra.mxu0 %v13606_v56  ;;  %10543 = vmatpush1.bf16.msra.mxu1 %v13609_v11  ;;  %v4612_v56 = vld [vmem:[#allocation6 + $0x208] sm:$0xff] }
 0xea8   :  { %10513 = vmatprep.subr.bf16.mxu0 %v13614_v18  ;;  %10545 = vmatprep.subr.bf16.mxu1 %v13616_v1  ;;  %v4616_v11 = vld [vmem:[#allocation6 + $0x228] sm:$0xff]  ;;  %v4614_v18 = vld [vmem:[#allocation6 + $0x218] sm:$0xff] }
 0xea9   :  { %4495 = vmatprep.mubr.f32.mxu0 %v12635_v0  ;;  %4566 = vmatprep.mubr.f32.mxu1 %v12635_v0  ;;  %v10572_v1 = vpack.c.bf16 %v4616_v11, %v4612_v56  ;;  %v4632_v56 = vld [vmem:[#allocation6 + $0x2a8] sm:$0xff]  ;;  %v4630_v11 = vld [vmem:[#allocation6 + $0x298] sm:$0xff] }
 0xeab   :  { %10515 = vmatpush1.bf16.msra.mxu0 %v13618_v60  ;;  %10547 = vmatpush1.bf16.msra.mxu1 %v13621_v23  ;;  %v4618_v60 = vld [vmem:[#allocation6 + $0x238] sm:$0xff] }
 0xeac   :  { %10517 = vmatprep.subr.bf16.mxu0 %v13626_v17  ;;  %10549 = vmatprep.subr.bf16.mxu1 %v13628_v7  ;;  %v10604_v23 = vpack.c.bf16 %v4618_v60, %v4614_v18  ;;  %v4634_v18 = vld [vmem:[#allocation6 + $0x2b8] sm:$0xff] }
 0xeaf   :  { %10519 = vmatpush1.bf16.msra.mxu0 %v13630_v45  ;;  %10551 = vmatpush1.bf16.msra.mxu1 %v13633_v37 }
 0xeb0   :  { %10521 = vmatprep.subr.bf16.mxu0 %v13638_v59  ;;  %10553 = vmatprep.subr.bf16.mxu1 %v13640_v42 }
 0xeb3   :  { %10523 = vmatpush1.bf16.msra.mxu0 %v13642_v38  ;;  %10555 = vmatpush1.bf16.msra.mxu1 %v13645_v47 }
 0xeb4   :  { %10525 = vmatprep.subr.bf16.mxu0 %v13650_v35  ;;  %10557 = vmatprep.subr.bf16.mxu1 %v13652_v6 }
 0xeb7   :  { %10527 = vmatpush1.bf16.msra.mxu0 %v13654_v51  ;;  %10559 = vmatpush1.bf16.msra.mxu1 %v13657_v34 }
 0xeb8   :  { %10529 = vmatprep.subr.bf16.mxu0 %v13661_v57  ;;  %10561 = vmatprep.subr.bf16.mxu1 %v13664_v41 }
 0xebb   :  { %10531 = vmatpush1.bf16.msra.mxu0 %v13666_v12  ;;  %10563 = vmatpush1.bf16.msra.mxu1 %v13669_v54 }
 0xebc   :  { %10533 = vmatprep.subr.bf16.mxu0 %v13672_v61  ;;  %10565 = vmatprep.subr.bf16.mxu1 %v13674_v43 }
 0xebf   :  { %10535 = vmatpush1.bf16.msra.mxu0 %v13677_v22  ;;  %10567 = vmatpush1.bf16.msra.mxu1 %v13681_v14 }
 0xec0   :  { %10537 = vmatprep.subr.bf16.mxu0 %v13683_v15  ;;  %10569 = vmatprep.subr.bf16.mxu1 %v13686_v33 }
 0xec3   :  { %10539 = vmatpush1.bf16.msra.mxu0 %v13689_v40  ;;  %10571 = vmatpush1.bf16.msra.mxu1 %v13693_v32  ;;  %v4611_v32 = vld [vmem:[#allocation6 + $0x200] sm:$0xff] }
 0xec4   :  { %10573 = vmatprep.subr.bf16.mxu0 %v10572_v1  ;;  %10605 = vmatprep.subr.bf16.mxu1 %v10604_v23  ;;  %v10574_v58 = vpack.c.bf16 %v4615_v13, %v4611_v32  ;;  %v10578_v1 = vpack.c.bf16 %v4623_v21, %v4619_v27  ;;  %v4627_v23 = vld [vmem:[#allocation6 + $0x280] sm:$0xff]  ;;  %v10622_v27 = vpack.c.bf16 %v4649_v25, %v4645_v2  ;;  %v4972_v2 = vld [vmem:[#allocation8 + $0x458] sm:$0xff] }
 0xec5   :  { %v4643_v13 = vld [vmem:[#allocation6 + $0x300] sm:$0xff] }
 0xec6   :  { %v4651_v21 = vld [vmem:[#allocation6 + $0x340] sm:$0xff] }
 0xf79   :  { %v4258_v17 = vpop.f32.mrb[28].mxu0  ;;  %v4329_v7 = vpop.f32.mrb[30].mxu1 }
 0xf7a   :  { %v11802_v45 = vadd.f32 %v4258_v17, %v13488_v46  ;;  %v4260_v37 = vpop.f32.mrb[29].mxu0  ;;  %v4331_v59 = vpop.f32.mrb[31].mxu1  ;;  %v11818_v51 = vadd.f32 %v4329_v7, %v13500_v55  ;;  %v4631_v17 = vld [vmem:[#allocation6 + $0x2a0] sm:$0xff]  ;;  %v10580_v7 = vpack.c.bf16 %v4632_v56, %v4628_v24  ;;  %v4657_v24 = vld [vmem:[#allocation6 + $0x370] sm:$0xff]  ;;  %v4660_v56 = vld [vmem:[#allocation6 + $0x388] sm:$0xff] }
 0xf7b   :  { %v11803_v42 = vadd.f32 %v4260_v37, %v13491_v62  ;;  %v11819_v35 = vadd.f32 %v4331_v59, %v13496_v10  ;;  %v4629_v37 = vld [vmem:[#allocation6 + $0x290] sm:$0xff] }
 0xf7c   :  { %v9345_v38 = vmul.f32 -1.442695, %v11802_v45  ;;  %v10612_v45 = vpack.c.bf16 %v4634_v18, %v4630_v11  ;;  %v4633_v59 = vld [vmem:[#allocation6 + $0x2b0] sm:$0xff]  ;;  %v4664_v11 = vld [vmem:[#allocation6 + $0x3a8] sm:$0xff]  ;;  %v4662_v18 = vld [vmem:[#allocation6 + $0x398] sm:$0xff] }
 0xf7d   :  { %v9346_v47 = vmul.f32 -1.442695, %v11803_v42  ;;  %v9347_v6 = vmul.f32 -1.442695, %v11819_v35  ;;  %v4636_v42 = vld [vmem:[#allocation6 + $0x2c8] sm:$0xff]  ;;  %v4642_v35 = vld [vmem:[#allocation6 + $0x2f8] sm:$0xff] }
 0xf7e   :  { %12245 = vpow2.f32 %v9345_v38  ;;  %v4640_v38 = vld [vmem:[#allocation6 + $0x2e8] sm:$0xff] }
 0xf7f   :  { %12247 = vpow2.f32 %v9346_v47  ;;  %v4638_v47 = vld [vmem:[#allocation6 + $0x2d8] sm:$0xff] }
 0xf80   :  { %12249 = vpow2.f32 %v9347_v6  ;;  %v10582_v6 = vpack.c.bf16 %v4631_v17, %v4627_v23  ;;  %v4659_v17 = vld [vmem:[#allocation6 + $0x380] sm:$0xff] }
 0xf81   :  { %12251 = vtanh.f32 %v11818_v51  ;;  %v10614_v51 = vpack.c.bf16 %v4633_v59, %v4629_v37  ;;  %v4661_v59 = vld [vmem:[#allocation6 + $0x390] sm:$0xff] }
 0xf88   :  { %v12246_v34 = vpop.eup %12245 }
 0xf89   :  { %v12248_v57 = vpop.eup %12247  ;;  %v4341_v41 = vadd.f32 1.0, %v12246_v34  ;;  %v4635_v34 = vld [vmem:[#allocation6 + $0x2c0] sm:$0xff] }
 0xf8a   :  { %v4347_v12 = vadd.f32 1.0, %v12248_v57  ;;  %v12250_v54 = vpop.eup %12249  ;;  %v4639_v57 = vld [vmem:[#allocation6 + $0x2e0] sm:$0xff] }
 0xf8b   :  { %12253 = vrcp.f32 %v4341_v41  ;;  %v12252_v61 = vpop.eup %12251  ;;  %v4354_v15 = vadd.f32 1.0, %v12250_v54  ;;  %v10584_v41 = vpack.c.bf16 %v4640_v38, %v4636_v42  ;;  %v4637_v54 = vld [vmem:[#allocation6 + $0x2d0] sm:$0xff]  ;;  %v4668_v38 = vld [vmem:[#allocation6 + $0x3c8] sm:$0xff] }
 0xf8c   :  { %12255 = vrcp.f32 %v4347_v12  ;;  %v10616_v12 = vpack.c.bf16 %v4642_v35, %v4638_v47  ;;  %v4665_v42 = vld [vmem:[#allocation6 + $0x3b0] sm:$0xff]  ;;  %v4672_v47 = vld [vmem:[#allocation6 + $0x3e8] sm:$0xff]  ;;  %v4670_v35 = vld [vmem:[#allocation6 + $0x3d8] sm:$0xff] }
 0xf8d   :  { %12257 = vrcp.f32 %v4354_v15  ;;  %v4650_v15 = vld [vmem:[#allocation6 + $0x338] sm:$0xff] }
 0xf95   :  { %v12254_v43 = vpop.eup %12253 }
 0xf96   :  { %v12256_v22 = vpop.eup %12255  ;;  %v4358_v14 = vmul.f32 %v12254_v43, %v12252_v61  ;;  %v4641_v61 = vld [vmem:[#allocation6 + $0x2f0] sm:$0xff]  ;;  %v4644_v43 = vld [vmem:[#allocation6 + $0x308] sm:$0xff] }
 0xf97   :  { %v4357_v33 = vmul.f32 %v12256_v22, %v13797_v28  ;;  %v12258_v19 = vpop.eup %12257  ;;  %v4621_v28 = vld [vmem:[#allocation6 + $0x250] sm:$0xff]  ;;  %v4648_v22 = vld [vmem:[#allocation6 + $0x328] sm:$0xff]  ;;  %v10618_v32 = vpack.c.bf16 %v4641_v61, %v4637_v54  ;;  %v4671_v54 = vld [vmem:[#allocation6 + $0x3e0] sm:$0xff] }
 0xf98   :  { %v10610_v60 = vpack.c.bf16 %v4625_v9, %v4621_v28  ;;  %v10588_v5 = vpack.c.bf16 %v4648_v22, %v4644_v43  ;;  %v4653_v9 = vld [vmem:[#allocation6 + $0x350] sm:$0xff] }
 0xf99   :  { %v13841_v40 = vadd.f32 %v4358_v14, %v4357_v33  ;;  %v4646_v14 = vld [vmem:[#allocation6 + $0x318] sm:$0xff]  ;;  %v10586_v33 = vpack.c.bf16 %v4639_v57, %v4635_v34  ;;  %v10626_v23 = vpack.c.bf16 %v4657_v24, %v4653_v9  ;;  %v10630_v34 = vpack.c.bf16 %v4665_v42, %v4661_v59  ;;  %v4667_v57 = vld [vmem:[#allocation6 + $0x3c0] sm:$0xff]  ;;  %v4669_v61 = vld [vmem:[#allocation6 + $0x3d0] sm:$0xff] }
 0xf9a   :  { %v10620_v36 = vpack.c.bf16 %v4650_v15, %v4646_v14  ;;  %v4673_v43 = vld [vmem:[#allocation6 + $0x3f0] sm:$0xff]  ;;  %v10602_v22 = vpack.c.bf16 %v4671_v54, %v4667_v57  ;;  %v4965_v15 = vld [vmem:[#allocation8 + $0x420] sm:$0xff]  ;;  %v4980_v9 = vld [vmem:[#allocation8 + $0x498] sm:$0xff] }
 0xf9b   :  { %12259 = vtanh.f32 %v13841_v40  ;;  %v10634_v14 = vpack.c.bf16 %v4673_v43, %v4669_v61  ;;  %v4988_v59 = vld [vmem:[#allocation8 + $0x4d8] sm:$0xff]  ;;  %v4991_v57 = vld [vmem:[#allocation8 + $0x4f0] sm:$0xff]  ;;  %v4998_v54 = vld [vmem:[#allocation8 + $0x528] sm:$0xff] }
 0xf9c   :  { %v4993_v61 = vld [vmem:[#allocation8 + $0x500] sm:$0xff] }
 0xf9d   :  { %v4997_v43 = vld [vmem:[#allocation8 + $0x520] sm:$0xff] }
 0xfa5   :  { %v12260_v44 = vpop.eup %12259 }
 0xfa6   :  { %v13844_v50 = vmul.f32 %v12260_v44, %v12258_v19  ;;  %v4656_v19 = vld [vmem:[#allocation6 + $0x368] sm:$0xff]  ;;  %v4654_v44 = vld [vmem:[#allocation6 + $0x358] sm:$0xff] }
 0xfa8   :  { %4496 = vmatmul.mubr.f32.vlgmr.msra.gmra.mrb[30].mxu0 %v13844_v50  ;;  %4567 = vmatmul.mubr.f32.vlgmr.msra.gmra.mrb[32].mxu1 %v13844_v50 }
 0xfa9   :  { %10575 = vmatpush1.bf16.msra.mxu0 %v10574_v58  ;;  %10607 = vmatpush1.bf16.msra.mxu1 %v10606_v20  ;;  %v4658_v58 = vld [vmem:[#allocation6 + $0x378] sm:$0xff]  ;;  %v10590_v20 = vpack.c.bf16 %v4647_v29, %v4643_v13  ;;  %v4963_v13 = vld [vmem:[#allocation8 + $0x410] sm:$0xff] }
 0xfaa   :  { %10577 = vmatprep.subr.bf16.mxu0 %v10576_v63  ;;  %10609 = vmatprep.subr.bf16.mxu1 %v10608_v16  ;;  %v4655_v63 = vld [vmem:[#allocation6 + $0x360] sm:$0xff]  ;;  %v10592_v16 = vpack.c.bf16 %v4656_v19, %v4652_v52  ;;  %v10624_v28 = vpack.c.bf16 %v4658_v58, %v4654_v44  ;;  %v4967_v29 = vld [vmem:[#allocation8 + $0x430] sm:$0xff]  ;;  %v4976_v44 = vld [vmem:[#allocation8 + $0x478] sm:$0xff] }
 0xfab   :  { %4762 = vmatprep.mubr.f32.mxu0 %v12635_v0  ;;  %4875 = vmatprep.mubr.f32.mxu1 %v12635_v0  ;;  %v4969_v52 = vld [vmem:[#allocation8 + $0x440] sm:$0xff] }
 0xfac   :  { %v4973_v19 = vld [vmem:[#allocation8 + $0x460] sm:$0xff] }
 0xfad   :  { %10579 = vmatpush1.bf16.msra.mxu0 %v10578_v1  ;;  %10611 = vmatpush1.bf16.msra.mxu1 %v10610_v60  ;;  %v4666_v1 = vld [vmem:[#allocation6 + $0x3b8] sm:$0xff]  ;;  %v10594_v60 = vpack.c.bf16 %v4655_v63, %v4651_v21  ;;  %v13892_v58 = vpack.c.bf16 %v4973_v19, %v4969_v52  ;;  %v4975_v21 = vld [vmem:[#allocation8 + $0x470] sm:$0xff] }
 0xfae   :  { %10581 = vmatprep.subr.bf16.mxu0 %v10580_v7  ;;  %10613 = vmatprep.subr.bf16.mxu1 %v10612_v45  ;;  %v4663_v7 = vld [vmem:[#allocation6 + $0x3a0] sm:$0xff]  ;;  %v10596_v45 = vpack.c.bf16 %v4664_v11, %v4660_v56  ;;  %v10628_v37 = vpack.c.bf16 %v4666_v1, %v4662_v18  ;;  %v4984_v18 = vld [vmem:[#allocation8 + $0x4b8] sm:$0xff] }
 0xfaf   :  { %v4977_v56 = vld [vmem:[#allocation8 + $0x480] sm:$0xff]  ;;  %v5004_v52 = vld [vmem:[#allocation8 + $0x558] sm:$0xff] }
 0xfb0   :  { %v4981_v11 = vld [vmem:[#allocation8 + $0x4a0] sm:$0xff]  ;;  %v5008_v19 = vld [vmem:[#allocation8 + $0x578] sm:$0xff] }
 0xfb1   :  { %10583 = vmatpush1.bf16.msra.mxu0 %v10582_v6  ;;  %10615 = vmatpush1.bf16.msra.mxu1 %v10614_v51  ;;  %v4674_v6 = vld [vmem:[#allocation6 + $0x3f8] sm:$0xff]  ;;  %v10598_v51 = vpack.c.bf16 %v4663_v7, %v4659_v17  ;;  %v13904_v1 = vpack.c.bf16 %v4981_v11, %v4977_v56  ;;  %v4983_v17 = vld [vmem:[#allocation8 + $0x4b0] sm:$0xff]  ;;  %v5009_v56 = vld [vmem:[#allocation8 + $0x580] sm:$0xff] }
 0xfb2   :  { %10585 = vmatprep.subr.bf16.mxu0 %v10584_v41  ;;  %10617 = vmatprep.subr.bf16.mxu1 %v10616_v12  ;;  %v10600_v41 = vpack.c.bf16 %v4672_v47, %v4668_v38  ;;  %v10632_v12 = vpack.c.bf16 %v4674_v6, %v4670_v35  ;;  %v4985_v38 = vld [vmem:[#allocation8 + $0x4c0] sm:$0xff]  ;;  %v4992_v35 = vld [vmem:[#allocation8 + $0x4f8] sm:$0xff] }
 0xfb3   :  { %v4989_v47 = vld [vmem:[#allocation8 + $0x4e0] sm:$0xff] }
 0xfb4   :  { %v13916_v6 = vpack.c.bf16 %v4989_v47, %v4985_v38  ;;  %v5015_v38 = vld [vmem:[#allocation8 + $0x5b0] sm:$0xff]  ;;  %v5018_v47 = vld [vmem:[#allocation8 + $0x5c8] sm:$0xff] }
 0xfb5   :  { %10587 = vmatpush1.bf16.msra.mxu0 %v10586_v33  ;;  %10619 = vmatpush1.bf16.msra.mxu1 %v10618_v32 }
 0xfb6   :  { %10589 = vmatprep.subr.bf16.mxu0 %v10588_v5  ;;  %10621 = vmatprep.subr.bf16.mxu1 %v10620_v36  ;;  %v4970_v5 = vld [vmem:[#allocation8 + $0x448] sm:$0xff] }
 0xfb7   :  { %v4974_v36 = vld [vmem:[#allocation8 + $0x468] sm:$0xff] }
 0xfb8   :  { %v13890_v25 = vpack.c.bf16 %v4974_v36, %v4970_v5  ;;  %v5001_v36 = vld [vmem:[#allocation8 + $0x540] sm:$0xff] }
 0xfb9   :  { %10591 = vmatpush1.bf16.msra.mxu0 %v10590_v20  ;;  %10623 = vmatpush1.bf16.msra.mxu1 %v10622_v27  ;;  %v13894_v20 = vpack.c.bf16 %v4976_v44, %v4972_v2  ;;  %v4971_v27 = vld [vmem:[#allocation8 + $0x450] sm:$0xff]  ;;  %v5005_v2 = vld [vmem:[#allocation8 + $0x560] sm:$0xff] }
 0xfba   :  { %10593 = vmatprep.subr.bf16.mxu0 %v10592_v16  ;;  %10625 = vmatprep.subr.bf16.mxu1 %v10624_v28  ;;  %v13897_v63 = vpack.c.bf16 %v4975_v21, %v4971_v27  ;;  %v4978_v16 = vld [vmem:[#allocation8 + $0x488] sm:$0xff]  ;;  %v5003_v44 = vld [vmem:[#allocation8 + $0x550] sm:$0xff]  ;;  %v13939_v21 = vpack.c.bf16 %v5005_v2, %v5001_v36 }
 0xfbb   :  { %v4982_v28 = vld [vmem:[#allocation8 + $0x4a8] sm:$0xff]  ;;  %v5007_v27 = vld [vmem:[#allocation8 + $0x570] sm:$0xff] }
 0xfbc   :  { %v13902_v24 = vpack.c.bf16 %v4982_v28, %v4978_v16  ;;  %v13941_v16 = vpack.c.bf16 %v5008_v19, %v5004_v52  ;;  %v5010_v28 = vld [vmem:[#allocation8 + $0x588] sm:$0xff]  ;;  %v13945_v11 = vpack.c.bf16 %v5007_v27, %v5003_v44 }
 0xfbd   :  { %10595 = vmatpush1.bf16.msra.mxu0 %v10594_v60  ;;  %10627 = vmatpush1.bf16.msra.mxu1 %v10626_v23  ;;  %v13906_v60 = vpack.c.bf16 %v4984_v18, %v4980_v9  ;;  %v4979_v23 = vld [vmem:[#allocation8 + $0x490] sm:$0xff]  ;;  %v5014_v9 = vld [vmem:[#allocation8 + $0x5a8] sm:$0xff] }
 0xfbe   :  { %10597 = vmatprep.subr.bf16.mxu0 %v10596_v45  ;;  %10629 = vmatprep.subr.bf16.mxu1 %v10628_v37  ;;  %v13909_v7 = vpack.c.bf16 %v4983_v17, %v4979_v23  ;;  %v4986_v45 = vld [vmem:[#allocation8 + $0x4c8] sm:$0xff]  ;;  %v13947_v18 = vpack.c.bf16 %v5014_v9, %v5010_v28  ;;  %v5013_v23 = vld [vmem:[#allocation8 + $0x5a0] sm:$0xff]  ;;  %v5012_v17 = vld [vmem:[#allocation8 + $0x598] sm:$0xff] }
 0xfbf   :  { %v4990_v37 = vld [vmem:[#allocation8 + $0x4e8] sm:$0xff] }
 0xfc0   :  { %v13914_v42 = vpack.c.bf16 %v4990_v37, %v4986_v45  ;;  %v5016_v45 = vld [vmem:[#allocation8 + $0x5b8] sm:$0xff] }
 0xfc1   :  { %10599 = vmatpush1.bf16.msra.mxu0 %v10598_v51  ;;  %10631 = vmatpush1.bf16.msra.mxu1 %v10630_v34  ;;  %v13918_v51 = vpack.c.bf16 %v4992_v35, %v4988_v59  ;;  %v4987_v34 = vld [vmem:[#allocation8 + $0x4d0] sm:$0xff]  ;;  %v13950_v37 = vpack.c.bf16 %v5016_v45, %v5012_v17  ;;  %v5022_v35 = vld [vmem:[#allocation8 + $0x5e8] sm:$0xff] }
 0xfc2   :  { %10601 = vmatprep.subr.bf16.mxu0 %v10600_v41  ;;  %10633 = vmatprep.subr.bf16.mxu1 %v10632_v12  ;;  %v4994_v41 = vld [vmem:[#allocation8 + $0x508] sm:$0xff]  ;;  %v13921_v12 = vpack.c.bf16 %v4991_v57, %v4987_v34  ;;  %v5011_v59 = vld [vmem:[#allocation8 + $0x590] sm:$0xff]  ;;  %v13953_v34 = vpack.c.bf16 %v5013_v23, %v5009_v56 }
 0xfc3   :  { %v13957_v57 = vpack.c.bf16 %v5015_v38, %v5011_v59 }
 0xfc5   :  { %10603 = vmatpush1.bf16.msra.mxu0 %v10602_v22  ;;  %10635 = vmatpush1.bf16.msra.mxu1 %v10634_v14  ;;  %v13925_v22 = vpack.c.bf16 %v4998_v54, %v4994_v41  ;;  %v13927_v14 = vpack.c.bf16 %v4997_v43, %v4993_v61  ;;  %v13959_v41 = vpack.c.bf16 %v5022_v35, %v5018_v47  ;;  %v5020_v54 = vld [vmem:[#allocation8 + $0x5d8] sm:$0xff]  ;;  %v5017_v43 = vld [vmem:[#allocation8 + $0x5c0] sm:$0xff] }
 0xfc6   :  { %v5024_v61 = vld [vmem:[#allocation8 + $0x5f8] sm:$0xff] }
 0xfc8   :  { %4763 = vmatmul.mubr.f32.vlgmr.msra.gmra.mrb[32].mxu0 %v13506_v48  ;;  %4876 = vmatmul.mubr.f32.vlgmr.msra.gmra.mrb[34].mxu1 %v13506_v48  ;;  %v4962_v48 = vld [vmem:[#allocation8 + $0x408] sm:$0xff] }
 0xfc9   :  { %4768 = vmatprep.mubr.f32.mxu0 %v12635_v0  ;;  %4881 = vmatprep.mubr.f32.mxu1 %v12635_v0 }
 0xfcc   :  { %4769 = vmatmul.mubr.f32.gmra.mrb[34].mxu0 %v13552_v30  ;;  %4882 = vmatmul.mubr.f32.gmra.mrb[36].mxu1 %v13552_v30  ;;  %v4966_v30 = vld [vmem:[#allocation8 + $0x428] sm:$0xff] }
 0xfcd   :  { %4774 = vmatprep.mubr.f32.mxu0 %v12635_v0  ;;  %4887 = vmatprep.mubr.f32.mxu1 %v12635_v0 }
 0xfd0   :  { %4775 = vmatmul.mubr.f32.gmra.mrb[36].mxu0 %v13596_v39  ;;  %4888 = vmatmul.mubr.f32.gmra.mrb[38].mxu1 %v13596_v39  ;;  %v4964_v39 = vld [vmem:[#allocation8 + $0x418] sm:$0xff] }
 0xfd1   :  { %4780 = vmatprep.mubr.f32.mxu0 %v12635_v0  ;;  %4893 = vmatprep.mubr.f32.mxu1 %v12635_v0 }
 0xfd4   :  { %4781 = vmatmul.mubr.f32.gmra.mrb[38].mxu0 %v13708_v8  ;;  %4894 = vmatmul.mubr.f32.gmra.mrb[40].mxu1 %v13708_v8  ;;  %v13878_v8 = vpack.c.bf16 %v4966_v30, %v4962_v48  ;;  %v4996_v48 = vld [vmem:[#allocation8 + $0x518] sm:$0xff] }
 0xfd5   :  { %4786 = vmatprep.mubr.f32.mxu0 %v12635_v0  ;;  %4899 = vmatprep.mubr.f32.mxu1 %v12635_v0  ;;  %v5000_v30 = vld [vmem:[#allocation8 + $0x538] sm:$0xff] }
 0xfd6   :  { %10637 = vmatprep.subr.bf16.mxu0 %v13878_v8 }
 0xfd8   :  { %4787 = vmatmul.mubr.f32.gmra.mrb[40].mxu0 %v13754_v4  ;;  %4900 = vmatmul.mubr.f32.gmra.mrb[42].mxu1 %v13754_v4  ;;  %v4961_v4 = vld [vmem:[#allocation8 + $0x400] sm:$0xff] }
 0xfd9   :  { %4792 = vmatprep.mubr.f32.mxu0 %v12635_v0  ;;  %4905 = vmatprep.mubr.f32.mxu1 %v12635_v0  ;;  %v13880_v33 = vpack.c.bf16 %v4965_v15, %v4961_v4  ;;  %v13930_v4 = vpack.c.bf16 %v5000_v30, %v4996_v48  ;;  %v4999_v15 = vld [vmem:[#allocation8 + $0x530] sm:$0xff]  ;;  %v5021_v48 = vld [vmem:[#allocation8 + $0x5e0] sm:$0xff]  ;;  %v13965_v30 = vpack.c.bf16 %v5024_v61, %v5020_v54 }
 0xfdb   :  { %10639 = vmatpush1.bf16.msra.mxu0 %v13880_v33 }
 0xfdc   :  { %4793 = vmatmul.mubr.f32.gmra.mrb[42].mxu0 %v13800_v3  ;;  %4906 = vmatmul.mubr.f32.gmra.mrb[44].mxu1 %v13800_v3  ;;  %v4968_v3 = vld [vmem:[#allocation8 + $0x438] sm:$0xff] }
 0xfdd   :  { %4798 = vmatprep.mubr.f32.mxu0 %v12635_v0  ;;  %4911 = vmatprep.mubr.f32.mxu1 %v12635_v0  ;;  %v13882_v32 = vpack.c.bf16 %v4968_v3, %v4964_v39  ;;  %v4995_v39 = vld [vmem:[#allocation8 + $0x510] sm:$0xff]  ;;  %v5002_v3 = vld [vmem:[#allocation8 + $0x548] sm:$0xff] }
 0xfde   :  { %10641 = vmatprep.subr.bf16.mxu0 %v13890_v25 }
 0xfdf   :  { %10669 = vmatprep.subr.bf16.mxu1 %v13882_v32  ;;  %10643 = vmatpush1.bf16.msra.mxu0 %v13892_v58 }
 0xfe0   :  { %4799 = vmatmul.mubr.f32.gmra.mrb[44].mxu0 %v13844_v50  ;;  %4912 = vmatmul.mubr.f32.gmra.mrb[46].mxu1 %v13844_v50  ;;  %v13885_v50 = vpack.c.bf16 %v4967_v29, %v4963_v13  ;;  %v5006_v13 = vld [vmem:[#allocation8 + $0x568] sm:$0xff]  ;;  %v13933_v29 = vpack.c.bf16 %v4999_v15, %v4995_v39  ;;  %v5019_v39 = vld [vmem:[#allocation8 + $0x5d0] sm:$0xff]  ;;  %v13967_v15 = vpack.c.bf16 %v5021_v48, %v5017_v43 }
 0xfe1   :  { %4804 = vmatprep.mubr.f32.mxu0 %v12635_v0  ;;  %4917 = vmatprep.mubr.f32.mxu1 %v12635_v0  ;;  %v13935_v5 = vpack.c.bf16 %v5006_v13, %v5002_v3  ;;  %v5023_v3 = vld [vmem:[#allocation8 + $0x5f0] sm:$0xff] }
 0xfe2   :  { %10671 = vmatpush1.bf16.msra.mxu1 %v13885_v50  ;;  %10645 = vmatprep.subr.bf16.mxu0 %v13902_v24  ;;  %v13970_v13 = vpack.c.bf16 %v5023_v3, %v5019_v39 }
 0xfe3   :  { %10673 = vmatprep.subr.bf16.mxu1 %v13894_v20  ;;  %10647 = vmatpush1.bf16.msra.mxu0 %v13904_v1 }
 0xfe4   :  { %10649 = vmatprep.subr.bf16.mxu0 %v13914_v42 }
 0xfe6   :  { %10675 = vmatpush1.bf16.msra.mxu1 %v13897_v63 }
 0xfe7   :  { %10677 = vmatprep.subr.bf16.mxu1 %v13906_v60  ;;  %10651 = vmatpush1.bf16.msra.mxu0 %v13916_v6 }
 0xfe8   :  { %10653 = vmatprep.subr.bf16.mxu0 %v13925_v22 }
 0xfea   :  { %10679 = vmatpush1.bf16.msra.mxu1 %v13909_v7 }
 0xfeb   :  { %10681 = vmatprep.subr.bf16.mxu1 %v13918_v51  ;;  %10655 = vmatpush1.bf16.msra.mxu0 %v13927_v14 }
 0xfec   :  { %10657 = vmatprep.subr.bf16.mxu0 %v13935_v5 }
 0xfee   :  { %10683 = vmatpush1.bf16.msra.mxu1 %v13921_v12 }
 0xfef   :  { %10685 = vmatprep.subr.bf16.mxu1 %v13930_v4  ;;  %10659 = vmatpush1.bf16.msra.mxu0 %v13939_v21 }
 0xff0   :  { %10661 = vmatprep.subr.bf16.mxu0 %v13947_v18 }
 0xff2   :  { %10687 = vmatpush1.bf16.msra.mxu1 %v13933_v29 }
 0xff3   :  { %10689 = vmatprep.subr.bf16.mxu1 %v13941_v16  ;;  %10663 = vmatpush1.bf16.msra.mxu0 %v13953_v34 }
 0xff4   :  { %10665 = vmatprep.subr.bf16.mxu0 %v13959_v41 }
 0xff6   :  { %10691 = vmatpush1.bf16.msra.mxu1 %v13945_v11 }
 0xff7   :  { %10693 = vmatprep.subr.bf16.mxu1 %v13950_v37  ;;  %10667 = vmatpush1.bf16.msra.mxu0 %v13967_v15 }
 0xff8   :  { %10701 = vmatprep.subr.bf16.mxu0 %v13878_v8 }
 0xffa   :  { %10695 = vmatpush1.bf16.msra.mxu1 %v13957_v57 }
 0xffb   :  { %10697 = vmatprep.subr.bf16.mxu1 %v13965_v30 }
 0xffe   :  { %10699 = vmatpush1.bf16.msra.mxu1 %v13970_v13 }
 0xfff   :  { %10733 = vmatprep.subr.bf16.mxu1 %v13882_v32 }
0x107b   :  { %v4497_v36 = vpop.f32.mrb[30].mxu0  ;;  %v4568_v2 = vpop.f32.mrb[32].mxu1 }
0x107c   :  { %v11804_v52 = vadd.f32 %v4497_v36, %v13488_v46  ;;  %v4499_v19 = vpop.f32.mrb[31].mxu0  ;;  %v4570_v44 = vpop.f32.mrb[33].mxu1  ;;  %v11820_v17 = vadd.f32 %v4568_v2, %v13500_v55 }
0x107d   :  { %v11805_v27 = vadd.f32 %v4499_v19, %v13491_v62  ;;  %v11821_v56 = vadd.f32 %v4570_v44, %v13496_v10 }
0x107e   :  { %v9348_v28 = vmul.f32 -1.442695, %v11804_v52 }
0x107f   :  { %v9349_v9 = vmul.f32 -1.442695, %v11805_v27  ;;  %v9350_v23 = vmul.f32 -1.442695, %v11821_v56 }
0x1080   :  { %12261 = vpow2.f32 %v9348_v28 }
0x1081   :  { %12263 = vpow2.f32 %v9349_v9 }
0x1082   :  { %12265 = vpow2.f32 %v9350_v23 }
0x1083   :  { %12267 = vtanh.f32 %v11820_v17 }
0x108a   :  { %v12262_v45 = vpop.eup %12261 }
0x108b   :  { %v12264_v59 = vpop.eup %12263  ;;  %v4580_v38 = vadd.f32 1.0, %v12262_v45 }
0x108c   :  { %v4586_v47 = vadd.f32 1.0, %v12264_v59  ;;  %v12266_v46 = vpop.eup %12265 }
0x108d   :  { %12269 = vrcp.f32 %v4580_v38  ;;  %v12268_v35 = vpop.eup %12267  ;;  %v4593_v43 = vadd.f32 1.0, %v12266_v46 }
0x108e   :  { %12271 = vrcp.f32 %v4586_v47 }
0x108f   :  { %12273 = vrcp.f32 %v4593_v43 }
0x1097   :  { %v12270_v62 = vpop.eup %12269 }
0x1098   :  { %v12272_v54 = vpop.eup %12271  ;;  %v4597_v61 = vmul.f32 %v12270_v62, %v12268_v35 }
0x1099   :  { %v4596_v48 = vmul.f32 %v12272_v54, %v13841_v40  ;;  %v12274_v55 = vpop.eup %12273  ;;  %v4676_v40 = vld [vmem:[#allocation9 + $0x8] sm:$0xf] }
0x109a   :  { %v14020_v36 = vrot.slane %v4676_v40, %v12963_v26  ;;  %v14023_v2 = vrot.slane %v4676_v40, %v12965_v31  ;;  %v14028_v17 = vrot.slane %v4676_v40, %v12977_v53  ;;  %v14032_v59 = vrot.slane %v4676_v40, %v12975_v49 }
0x109b   :  { %v4598_v10 = vadd.f32 %v4597_v61, %v4596_v48 }
0x109d   :  { %12275 = vtanh.f32 %v4598_v10 }
0x10a7   :  { %v12276_v39 = vpop.eup %12275 }
0x10a8   :  { %v4600_v3 = vmul.f32 %v12276_v39, %v12274_v55 }
0x10aa   :  { %4805 = vmatmul.mubr.f32.gmra.mrb[46].mxu0 %v4600_v3  ;;  %4918 = vmatmul.mubr.f32.gmra.mrb[48].mxu1 %v4600_v3 }
0x10ab   :  { %5089 = vmatprep.mubr.f32.mxu0 %v12635_v0  ;;  %5160 = vmatprep.mubr.f32.mxu1 %v12635_v0 }
0x10ae   :  { %5090 = vmatmul.mubr.f32.vlgmr.msra.gmra.mrb[32].mxu0 %v12635_v0  ;;  %5161 = vmatmul.mubr.f32.vlgmr.msra.gmra.mrb[34].mxu1 %v12635_v0 }
0x10af   :  { %10703 = vmatpush1.bf16.msra.mxu0 %v13880_v33  ;;  %10735 = vmatpush1.bf16.msra.mxu1 %v13885_v50 }
0x10b0   :  { %10705 = vmatprep.subr.bf16.mxu0 %v13890_v25  ;;  %10737 = vmatprep.subr.bf16.mxu1 %v13894_v20 }
0x10b1   :  { %5328 = vmatprep.mubr.f32.mxu0 %v12635_v0  ;;  %5399 = vmatprep.mubr.f32.mxu1 %v12635_v0 }
0x10b3   :  { %10707 = vmatpush1.bf16.msra.mxu0 %v13892_v58  ;;  %10739 = vmatpush1.bf16.msra.mxu1 %v13897_v63 }
0x10b4   :  { %10709 = vmatprep.subr.bf16.mxu0 %v13902_v24  ;;  %10741 = vmatprep.subr.bf16.mxu1 %v13906_v60 }
0x10b7   :  { %10711 = vmatpush1.bf16.msra.mxu0 %v13904_v1  ;;  %10743 = vmatpush1.bf16.msra.mxu1 %v13909_v7 }
0x10b8   :  { %10713 = vmatprep.subr.bf16.mxu0 %v13914_v42  ;;  %10745 = vmatprep.subr.bf16.mxu1 %v13918_v51 }
0x10bb   :  { %10715 = vmatpush1.bf16.msra.mxu0 %v13916_v6  ;;  %10747 = vmatpush1.bf16.msra.mxu1 %v13921_v12 }
0x10bc   :  { %10717 = vmatprep.subr.bf16.mxu0 %v13925_v22  ;;  %10749 = vmatprep.subr.bf16.mxu1 %v13930_v4 }
0x10bf   :  { %10719 = vmatpush1.bf16.msra.mxu0 %v13927_v14  ;;  %10751 = vmatpush1.bf16.msra.mxu1 %v13933_v29 }
0x10c0   :  { %10721 = vmatprep.subr.bf16.mxu0 %v13935_v5  ;;  %10753 = vmatprep.subr.bf16.mxu1 %v13941_v16 }
0x10c3   :  { %10723 = vmatpush1.bf16.msra.mxu0 %v13939_v21  ;;  %10755 = vmatpush1.bf16.msra.mxu1 %v13945_v11 }
0x10c4   :  { %10725 = vmatprep.subr.bf16.mxu0 %v13947_v18  ;;  %10757 = vmatprep.subr.bf16.mxu1 %v13950_v37 }
0x10c7   :  { %10727 = vmatpush1.bf16.msra.mxu0 %v13953_v34  ;;  %10759 = vmatpush1.bf16.msra.mxu1 %v13957_v57 }
0x10c8   :  { %10729 = vmatprep.subr.bf16.mxu0 %v13959_v41  ;;  %10761 = vmatprep.subr.bf16.mxu1 %v13965_v30 }
0x10cb   :  { %10731 = vmatpush1.bf16.msra.mxu0 %v13967_v15  ;;  %10763 = vmatpush1.bf16.msra.mxu1 %v13970_v13 }
0x10cc   :  { %10765 = vmatprep.subr.bf16.mxu0 %v13878_v8  ;;  %10797 = vmatprep.subr.bf16.mxu1 %v13882_v32 }
0x1181   :  { %v5091_v52 = vpop.f32.mrb[32].mxu0  ;;  %v5162_v19 = vpop.f32.mrb[34].mxu1 }
0x1182   :  { %v11822_v44 = vadd.f32 %v5091_v52, %v14020_v36  ;;  %v5093_v27 = vpop.f32.mrb[33].mxu0  ;;  %v5164_v28 = vpop.f32.mrb[35].mxu1  ;;  %v11838_v47 = vadd.f32 %v5162_v19, %v14032_v59 }
0x1183   :  { %v11823_v9 = vadd.f32 %v5093_v27, %v14023_v2  ;;  %v11839_v45 = vadd.f32 %v5164_v28, %v14028_v17 }
0x1184   :  { %v9351_v56 = vmul.f32 -1.442695, %v11822_v44 }
0x1185   :  { %v9352_v23 = vmul.f32 -1.442695, %v11823_v9  ;;  %v9353_v38 = vmul.f32 -1.442695, %v11839_v45 }
0x1186   :  { %12277 = vpow2.f32 %v9351_v56 }
0x1187   :  { %12279 = vpow2.f32 %v9352_v23 }
0x1188   :  { %12281 = vpow2.f32 %v9353_v38 }
0x1189   :  { %12283 = vtanh.f32 %v11838_v47 }
0x1190   :  { %v12278_v46 = vpop.eup %12277 }
0x1191   :  { %v12280_v35 = vpop.eup %12279  ;;  %v5174_v62 = vadd.f32 1.0, %v12278_v46 }
0x1192   :  { %v5180_v54 = vadd.f32 1.0, %v12280_v35  ;;  %v12282_v61 = vpop.eup %12281 }
0x1193   :  { %12285 = vrcp.f32 %v5174_v62  ;;  %v12284_v43 = vpop.eup %12283  ;;  %v5187_v39 = vadd.f32 1.0, %v12282_v61 }
0x1194   :  { %12287 = vrcp.f32 %v5180_v54 }
0x1195   :  { %12289 = vrcp.f32 %v5187_v39 }
0x119d   :  { %v12286_v48 = vpop.eup %12285 }
0x119e   :  { %v12288_v10 = vpop.eup %12287  ;;  %v5191_v55 = vmul.f32 %v12286_v48, %v12284_v43 }
0x119f   :  { %v5190_v3 = vmul.f32 0.0, %v12288_v10  ;;  %v12290_v52 = vpop.eup %12289 }
0x11a1   :  { %v14035_v40 = vadd.f32 %v5191_v55, %v5190_v3 }
0x11a3   :  { %12291 = vtanh.f32 %v14035_v40 }
0x11ad   :  { %v12292_v19 = vpop.eup %12291 }
0x11ae   :  { %v14038_v44 = vmul.f32 %v12292_v19, %v12290_v52 }
0x11b0   :  { %5329 = vmatmul.mubr.f32.vlgmr.msra.gmra.mrb[34].mxu0 %v14038_v44  ;;  %5400 = vmatmul.mubr.f32.vlgmr.msra.gmra.mrb[36].mxu1 %v14038_v44 }
0x11b1   :  { %10767 = vmatpush1.bf16.msra.mxu0 %v13880_v33  ;;  %10799 = vmatpush1.bf16.msra.mxu1 %v13885_v50 }
0x11b2   :  { %10769 = vmatprep.subr.bf16.mxu0 %v13890_v25  ;;  %10801 = vmatprep.subr.bf16.mxu1 %v13894_v20 }
0x11b3   :  { %5567 = vmatprep.mubr.f32.mxu0 %v12635_v0  ;;  %5638 = vmatprep.mubr.f32.mxu1 %v12635_v0 }
0x11b5   :  { %10771 = vmatpush1.bf16.msra.mxu0 %v13892_v58  ;;  %10803 = vmatpush1.bf16.msra.mxu1 %v13897_v63 }
0x11b6   :  { %10773 = vmatprep.subr.bf16.mxu0 %v13902_v24  ;;  %10805 = vmatprep.subr.bf16.mxu1 %v13906_v60 }
0x11b9   :  { %10775 = vmatpush1.bf16.msra.mxu0 %v13904_v1  ;;  %10807 = vmatpush1.bf16.msra.mxu1 %v13909_v7 }
0x11ba   :  { %10777 = vmatprep.subr.bf16.mxu0 %v13914_v42  ;;  %10809 = vmatprep.subr.bf16.mxu1 %v13918_v51 }
0x11bd   :  { %10779 = vmatpush1.bf16.msra.mxu0 %v13916_v6  ;;  %10811 = vmatpush1.bf16.msra.mxu1 %v13921_v12 }
0x11be   :  { %10781 = vmatprep.subr.bf16.mxu0 %v13925_v22  ;;  %10813 = vmatprep.subr.bf16.mxu1 %v13930_v4 }
0x11c1   :  { %10783 = vmatpush1.bf16.msra.mxu0 %v13927_v14  ;;  %10815 = vmatpush1.bf16.msra.mxu1 %v13933_v29 }
0x11c2   :  { %10785 = vmatprep.subr.bf16.mxu0 %v13935_v5  ;;  %10817 = vmatprep.subr.bf16.mxu1 %v13941_v16 }
0x11c5   :  { %10787 = vmatpush1.bf16.msra.mxu0 %v13939_v21  ;;  %10819 = vmatpush1.bf16.msra.mxu1 %v13945_v11 }
0x11c6   :  { %10789 = vmatprep.subr.bf16.mxu0 %v13947_v18  ;;  %10821 = vmatprep.subr.bf16.mxu1 %v13950_v37 }
0x11c9   :  { %10791 = vmatpush1.bf16.msra.mxu0 %v13953_v34  ;;  %10823 = vmatpush1.bf16.msra.mxu1 %v13957_v57 }
0x11ca   :  { %10793 = vmatprep.subr.bf16.mxu0 %v13959_v41  ;;  %10825 = vmatprep.subr.bf16.mxu1 %v13965_v30 }
0x11cd   :  { %10795 = vmatpush1.bf16.msra.mxu0 %v13967_v15  ;;  %10827 = vmatpush1.bf16.msra.mxu1 %v13970_v13 }
0x11ce   :  { %10829 = vmatprep.subr.bf16.mxu0 %v13878_v8  ;;  %10861 = vmatprep.subr.bf16.mxu1 %v13882_v32 }
0x1283   :  { %v5330_v27 = vpop.f32.mrb[34].mxu0  ;;  %v5401_v28 = vpop.f32.mrb[36].mxu1 }
0x1284   :  { %v11824_v9 = vadd.f32 %v5330_v27, %v14020_v36  ;;  %v5332_v56 = vpop.f32.mrb[35].mxu0  ;;  %v5403_v23 = vpop.f32.mrb[37].mxu1  ;;  %v11840_v62 = vadd.f32 %v5401_v28, %v14032_v59 }
0x1285   :  { %v11825_v45 = vadd.f32 %v5332_v56, %v14023_v2  ;;  %v11841_v46 = vadd.f32 %v5403_v23, %v14028_v17  ;;  %v5917_v56 = vld [vmem:[#allocation8 + $0x400] sm:$0xff] }
0x1286   :  { %v9354_v38 = vmul.f32 -1.442695, %v11824_v9  ;;  %v5921_v23 = vld [vmem:[#allocation8 + $0x420] sm:$0xff] }
0x1287   :  { %v9355_v47 = vmul.f32 -1.442695, %v11825_v45  ;;  %v9356_v35 = vmul.f32 -1.442695, %v11841_v46  ;;  %v5923_v46 = vld [vmem:[#allocation8 + $0x430] sm:$0xff] }
0x1288   :  { %12293 = vpow2.f32 %v9354_v38  ;;  %v14138_v38 = vpack.c.bf16 %v5921_v23, %v5917_v56 }
0x1289   :  { %12295 = vpow2.f32 %v9355_v47  ;;  %v5919_v47 = vld [vmem:[#allocation8 + $0x410] sm:$0xff] }
0x128a   :  { %12297 = vpow2.f32 %v9356_v35  ;;  %v14141_v35 = vpack.c.bf16 %v5923_v46, %v5919_v47  ;;  %v5951_v47 = vld [vmem:[#allocation8 + $0x510] sm:$0xff] }
0x128b   :  { %12299 = vtanh.f32 %v11840_v62  ;;  %v5926_v62 = vld [vmem:[#allocation8 + $0x448] sm:$0xff]  ;;  %v5955_v46 = vld [vmem:[#allocation8 + $0x530] sm:$0xff] }
0x1292   :  { %v12294_v8 = vpop.eup %12293 }
0x1293   :  { %v12296_v54 = vpop.eup %12295  ;;  %v5413_v32 = vadd.f32 1.0, %v12294_v8  ;;  %v5930_v8 = vld [vmem:[#allocation8 + $0x468] sm:$0xff] }
0x1294   :  { %v5419_v61 = vadd.f32 1.0, %v12296_v54  ;;  %v12298_v43 = vpop.eup %12297  ;;  %v5928_v54 = vld [vmem:[#allocation8 + $0x458] sm:$0xff] }
0x1295   :  { %12301 = vrcp.f32 %v5413_v32  ;;  %v12300_v48 = vpop.eup %12299  ;;  %v5426_v3 = vadd.f32 1.0, %v12298_v43  ;;  %v14146_v32 = vpack.c.bf16 %v5930_v8, %v5926_v62  ;;  %v5925_v43 = vld [vmem:[#allocation8 + $0x440] sm:$0xff]  ;;  %v14189_v62 = vpack.c.bf16 %v5955_v46, %v5951_v47  ;;  %v5958_v8 = vld [vmem:[#allocation8 + $0x548] sm:$0xff] }
0x1296   :  { %12303 = vrcp.f32 %v5419_v61  ;;  %v5932_v61 = vld [vmem:[#allocation8 + $0x478] sm:$0xff]  ;;  %v5973_v47 = vld [vmem:[#allocation8 + $0x5c0] sm:$0xff] }
0x1297   :  { %12305 = vrcp.f32 %v5426_v3  ;;  %v5931_v3 = vld [vmem:[#allocation8 + $0x470] sm:$0xff] }
0x129f   :  { %v12302_v10 = vpop.eup %12301 }
0x12a0   :  { %v12304_v55 = vpop.eup %12303  ;;  %v5430_v39 = vmul.f32 %v12302_v10, %v12300_v48  ;;  %v5929_v48 = vld [vmem:[#allocation8 + $0x460] sm:$0xff]  ;;  %v14148_v10 = vpack.c.bf16 %v5932_v61, %v5928_v54  ;;  %v5962_v54 = vld [vmem:[#allocation8 + $0x568] sm:$0xff]  ;;  %v5960_v61 = vld [vmem:[#allocation8 + $0x558] sm:$0xff] }
0x12a1   :  { %v5429_v52 = vmul.f32 %v12304_v55, %v14035_v40  ;;  %v12306_v27 = vpop.eup %12305  ;;  %v5924_v40 = vld [vmem:[#allocation8 + $0x438] sm:$0xff]  ;;  %v14150_v55 = vpack.c.bf16 %v5929_v48, %v5925_v43  ;;  %v14193_v43 = vpack.c.bf16 %v5962_v54, %v5958_v8  ;;  %v5977_v8 = vld [vmem:[#allocation8 + $0x5e0] sm:$0xff]  ;;  %v5975_v54 = vld [vmem:[#allocation8 + $0x5d0] sm:$0xff] }
0x12a2   :  { %v5964_v48 = vld [vmem:[#allocation8 + $0x578] sm:$0xff] }
0x12a3   :  { %v14081_v19 = vadd.f32 %v5430_v39, %v5429_v52  ;;  %v5927_v39 = vld [vmem:[#allocation8 + $0x450] sm:$0xff] }
0x12a4   :  { %v14153_v52 = vpack.c.bf16 %v5931_v3, %v5927_v39  ;;  %v5957_v39 = vld [vmem:[#allocation8 + $0x540] sm:$0xff] }
0x12a5   :  { %12307 = vtanh.f32 %v14081_v19  ;;  %v5961_v3 = vld [vmem:[#allocation8 + $0x560] sm:$0xff] }
0x12af   :  { %v12308_v28 = vpop.eup %12307 }
0x12b0   :  { %v14084_v9 = vmul.f32 %v12308_v28, %v12306_v27  ;;  %v5938_v27 = vld [vmem:[#allocation8 + $0x4a8] sm:$0xff]  ;;  %v5936_v28 = vld [vmem:[#allocation8 + $0x498] sm:$0xff] }
0x12b2   :  { %5568 = vmatmul.mubr.f32.vlgmr.msra.gmra.mrb[36].mxu0 %v14084_v9  ;;  %5639 = vmatmul.mubr.f32.vlgmr.msra.gmra.mrb[38].mxu1 %v14084_v9 }
0x12b3   :  { %10831 = vmatpush1.bf16.msra.mxu0 %v13880_v33  ;;  %10863 = vmatpush1.bf16.msra.mxu1 %v13885_v50 }
0x12b4   :  { %10833 = vmatprep.subr.bf16.mxu0 %v13890_v25  ;;  %10865 = vmatprep.subr.bf16.mxu1 %v13894_v20 }
0x12b5   :  { %5806 = vmatprep.mubr.f32.mxu0 %v12635_v0  ;;  %5877 = vmatprep.mubr.f32.mxu1 %v12635_v0 }
0x12b7   :  { %10835 = vmatpush1.bf16.msra.mxu0 %v13892_v58  ;;  %10867 = vmatpush1.bf16.msra.mxu1 %v13897_v63 }
0x12b8   :  { %10837 = vmatprep.subr.bf16.mxu0 %v13902_v24  ;;  %10869 = vmatprep.subr.bf16.mxu1 %v13906_v60 }
0x12bb   :  { %10839 = vmatpush1.bf16.msra.mxu0 %v13904_v1  ;;  %10871 = vmatpush1.bf16.msra.mxu1 %v13909_v7 }
0x12bc   :  { %10841 = vmatprep.subr.bf16.mxu0 %v13914_v42  ;;  %10873 = vmatprep.subr.bf16.mxu1 %v13918_v51 }
0x12bf   :  { %10843 = vmatpush1.bf16.msra.mxu0 %v13916_v6  ;;  %10875 = vmatpush1.bf16.msra.mxu1 %v13921_v12 }
0x12c0   :  { %10845 = vmatprep.subr.bf16.mxu0 %v13925_v22  ;;  %10877 = vmatprep.subr.bf16.mxu1 %v13930_v4 }
0x12c3   :  { %10847 = vmatpush1.bf16.msra.mxu0 %v13927_v14  ;;  %10879 = vmatpush1.bf16.msra.mxu1 %v13933_v29 }
0x12c4   :  { %10849 = vmatprep.subr.bf16.mxu0 %v13935_v5  ;;  %10881 = vmatprep.subr.bf16.mxu1 %v13941_v16 }
0x12c7   :  { %10851 = vmatpush1.bf16.msra.mxu0 %v13939_v21  ;;  %10883 = vmatpush1.bf16.msra.mxu1 %v13945_v11 }
0x12c8   :  { %10853 = vmatprep.subr.bf16.mxu0 %v13947_v18  ;;  %10885 = vmatprep.subr.bf16.mxu1 %v13950_v37 }
0x12cb   :  { %10855 = vmatpush1.bf16.msra.mxu0 %v13953_v34  ;;  %10887 = vmatpush1.bf16.msra.mxu1 %v13957_v57 }
0x12cc   :  { %10857 = vmatprep.subr.bf16.mxu0 %v13959_v41  ;;  %10889 = vmatprep.subr.bf16.mxu1 %v13965_v30  ;;  %v5918_v41 = vld [vmem:[#allocation8 + $0x408] sm:$0xff] }
0x12cd   :  { %v5922_v30 = vld [vmem:[#allocation8 + $0x428] sm:$0xff] }
0x12cf   :  { %10859 = vmatpush1.bf16.msra.mxu0 %v13967_v15  ;;  %10891 = vmatpush1.bf16.msra.mxu1 %v13970_v13  ;;  %v5920_v15 = vld [vmem:[#allocation8 + $0x418] sm:$0xff]  ;;  %v14134_v13 = vpack.c.bf16 %v5922_v30, %v5918_v41 }
0x12d0   :  { %v14136_v45 = vpack.c.bf16 %v5924_v40, %v5920_v15  ;;  %v5956_v30 = vld [vmem:[#allocation8 + $0x538] sm:$0xff]  ;;  %v5949_v15 = vld [vmem:[#allocation8 + $0x500] sm:$0xff] }
0x12d1   :  { %10893 = vmatprep.subr.bf16.mxu0 %v14134_v13  ;;  %v5953_v40 = vld [vmem:[#allocation8 + $0x520] sm:$0xff] }
0x12d2   :  { %10925 = vmatprep.subr.bf16.mxu1 %v14136_v45  ;;  %v14186_v23 = vpack.c.bf16 %v5953_v40, %v5949_v15  ;;  %v5976_v15 = vld [vmem:[#allocation8 + $0x5d8] sm:$0xff] }
0x12d3   :  { %v5980_v40 = vld [vmem:[#allocation8 + $0x5f8] sm:$0xff] }
0x12d4   :  { %v14218_v46 = vpack.c.bf16 %v5980_v40, %v5976_v15 }
0x1385   :  { %v5569_v33 = vpop.f32.mrb[36].mxu0  ;;  %v5640_v50 = vpop.f32.mrb[38].mxu1 }
0x1386   :  { %v11826_v25 = vadd.f32 %v5569_v33, %v14020_v36  ;;  %v5571_v58 = vpop.f32.mrb[37].mxu0  ;;  %v5642_v20 = vpop.f32.mrb[39].mxu1  ;;  %v11842_v42 = vadd.f32 %v5640_v50, %v14032_v59  ;;  %v5940_v50 = vld [vmem:[#allocation8 + $0x4b8] sm:$0xff] }
0x1387   :  { %v11827_v63 = vadd.f32 %v5571_v58, %v14023_v2  ;;  %v11843_v60 = vadd.f32 %v5642_v20, %v14028_v17  ;;  %v5937_v58 = vld [vmem:[#allocation8 + $0x4a0] sm:$0xff]  ;;  %v14160_v20 = vpack.c.bf16 %v5940_v50, %v5936_v28  ;;  %v5959_v28 = vld [vmem:[#allocation8 + $0x550] sm:$0xff] }
0x1388   :  { %v9357_v24 = vmul.f32 -1.442695, %v11826_v25  ;;  %v5933_v25 = vld [vmem:[#allocation8 + $0x480] sm:$0xff]  ;;  %v5963_v50 = vld [vmem:[#allocation8 + $0x570] sm:$0xff] }
0x1389   :  { %v9358_v1 = vmul.f32 -1.442695, %v11827_v63  ;;  %v9359_v7 = vmul.f32 -1.442695, %v11843_v60  ;;  %v14162_v63 = vpack.c.bf16 %v5937_v58, %v5933_v25  ;;  %v5966_v25 = vld [vmem:[#allocation8 + $0x588] sm:$0xff]  ;;  %v14201_v58 = vpack.c.bf16 %v5963_v50, %v5959_v28 }
0x138a   :  { %12309 = vpow2.f32 %v9357_v24  ;;  %v5935_v24 = vld [vmem:[#allocation8 + $0x490] sm:$0xff] }
0x138b   :  { %12311 = vpow2.f32 %v9358_v1  ;;  %v5939_v1 = vld [vmem:[#allocation8 + $0x4b0] sm:$0xff] }
0x138c   :  { %12313 = vpow2.f32 %v9359_v7  ;;  %v14165_v60 = vpack.c.bf16 %v5939_v1, %v5935_v24  ;;  %v5942_v7 = vld [vmem:[#allocation8 + $0x4c8] sm:$0xff]  ;;  %v5968_v1 = vld [vmem:[#allocation8 + $0x598] sm:$0xff] }
0x138d   :  { %12315 = vtanh.f32 %v11842_v42  ;;  %v5946_v42 = vld [vmem:[#allocation8 + $0x4e8] sm:$0xff] }
0x138e   :  { %v5970_v24 = vld [vmem:[#allocation8 + $0x5a8] sm:$0xff] }
0x1394   :  { %v12310_v6 = vpop.eup %12309 }
0x1395   :  { %v12312_v51 = vpop.eup %12311  ;;  %v5652_v12 = vadd.f32 1.0, %v12310_v6  ;;  %v5944_v6 = vld [vmem:[#allocation8 + $0x4d8] sm:$0xff] }
0x1396   :  { %v5658_v22 = vadd.f32 1.0, %v12312_v51  ;;  %v12314_v14 = vpop.eup %12313  ;;  %v14170_v51 = vpack.c.bf16 %v5946_v42, %v5942_v7  ;;  %v5972_v7 = vld [vmem:[#allocation8 + $0x5b8] sm:$0xff]  ;;  %v14204_v42 = vpack.c.bf16 %v5970_v24, %v5966_v25 }
0x1397   :  { %12317 = vrcp.f32 %v5652_v12  ;;  %v12316_v4 = vpop.eup %12315  ;;  %v5665_v16 = vadd.f32 1.0, %v12314_v14  ;;  %v5948_v12 = vld [vmem:[#allocation8 + $0x4f8] sm:$0xff]  ;;  %v5945_v14 = vld [vmem:[#allocation8 + $0x4e0] sm:$0xff] }
0x1398   :  { %12319 = vrcp.f32 %v5658_v22  ;;  %v5941_v22 = vld [vmem:[#allocation8 + $0x4c0] sm:$0xff] }
0x1399   :  { %12321 = vrcp.f32 %v5665_v16 }
0x13a1   :  { %v12318_v29 = vpop.eup %12317 }
0x13a2   :  { %v12320_v5 = vpop.eup %12319  ;;  %v5669_v21 = vmul.f32 %v12318_v29, %v12316_v4  ;;  %v14172_v4 = vpack.c.bf16 %v5948_v12, %v5944_v6  ;;  %v14174_v29 = vpack.c.bf16 %v5945_v14, %v5941_v22  ;;  %v14206_v6 = vpack.c.bf16 %v5972_v7, %v5968_v1  ;;  %v5965_v12 = vld [vmem:[#allocation8 + $0x580] sm:$0xff]  ;;  %v5967_v14 = vld [vmem:[#allocation8 + $0x590] sm:$0xff] }
0x13a3   :  { %v5668_v11 = vmul.f32 %v12320_v5, %v14081_v19  ;;  %v12322_v37 = vpop.eup %12321  ;;  %v5934_v19 = vld [vmem:[#allocation8 + $0x488] sm:$0xff]  ;;  %v5943_v5 = vld [vmem:[#allocation8 + $0x4d0] sm:$0xff]  ;;  %v5969_v22 = vld [vmem:[#allocation8 + $0x5a0] sm:$0xff] }
0x13a4   :  { %v14158_v33 = vpack.c.bf16 %v5938_v27, %v5934_v19  ;;  %v14196_v19 = vpack.c.bf16 %v5964_v48, %v5960_v61  ;;  %v14198_v27 = vpack.c.bf16 %v5961_v3, %v5957_v39  ;;  %v5979_v61 = vld [vmem:[#allocation8 + $0x5f0] sm:$0xff]  ;;  %v14221_v48 = vpack.c.bf16 %v5977_v8, %v5973_v47 }
0x13a5   :  { %v14125_v18 = vadd.f32 %v5669_v21, %v5668_v11  ;;  %v5947_v21 = vld [vmem:[#allocation8 + $0x4f0] sm:$0xff]  ;;  %v5950_v11 = vld [vmem:[#allocation8 + $0x508] sm:$0xff]  ;;  %v14225_v39 = vpack.c.bf16 %v5979_v61, %v5975_v54 }
0x13a6   :  { %v14177_v16 = vpack.c.bf16 %v5947_v21, %v5943_v5  ;;  %v14209_v5 = vpack.c.bf16 %v5969_v22, %v5965_v12  ;;  %v5971_v21 = vld [vmem:[#allocation8 + $0x5b0] sm:$0xff] }
0x13a7   :  { %12323 = vtanh.f32 %v14125_v18 }
0x13b1   :  { %v12324_v34 = vpop.eup %12323 }
0x13b2   :  { %v14128_v57 = vmul.f32 %v12324_v34, %v12322_v37  ;;  %v5954_v37 = vld [vmem:[#allocation8 + $0x528] sm:$0xff]  ;;  %v5952_v34 = vld [vmem:[#allocation8 + $0x518] sm:$0xff] }
0x13b3   :  { %v14182_v41 = vpack.c.bf16 %v5954_v37, %v5950_v11  ;;  %v14184_v56 = vpack.c.bf16 %v5956_v30, %v5952_v34  ;;  %v5974_v11 = vld [vmem:[#allocation8 + $0x5c8] sm:$0xff]  ;;  %v14213_v34 = vpack.c.bf16 %v5971_v21, %v5967_v14 }
0x13b4   :  { %5807 = vmatmul.mubr.f32.vlgmr.msra.gmra.mrb[38].mxu0 %v14128_v57  ;;  %5878 = vmatmul.mubr.f32.vlgmr.msra.gmra.mrb[40].mxu1 %v14128_v57  ;;  %v5978_v37 = vld [vmem:[#allocation8 + $0x5e8] sm:$0xff] }
0x13b5   :  { %6045 = vmatprep.mubr.f32.mxu0 %v12635_v0  ;;  %6116 = vmatprep.mubr.f32.mxu1 %v12635_v0  ;;  %v14215_v30 = vpack.c.bf16 %v5978_v37, %v5974_v11 }
0x13b6   :  { %10895 = vmatpush1.bf16.msra.mxu0 %v14138_v38  ;;  %10927 = vmatpush1.bf16.msra.mxu1 %v14141_v35 }
0x13b7   :  { %10897 = vmatprep.subr.bf16.mxu0 %v14146_v32  ;;  %10929 = vmatprep.subr.bf16.mxu1 %v14148_v10 }
0x13ba   :  { %10899 = vmatpush1.bf16.msra.mxu0 %v14150_v55  ;;  %10931 = vmatpush1.bf16.msra.mxu1 %v14153_v52 }
0x13bb   :  { %10901 = vmatprep.subr.bf16.mxu0 %v14158_v33  ;;  %10933 = vmatprep.subr.bf16.mxu1 %v14160_v20 }
0x13be   :  { %10903 = vmatpush1.bf16.msra.mxu0 %v14162_v63  ;;  %10935 = vmatpush1.bf16.msra.mxu1 %v14165_v60 }
0x13bf   :  { %10905 = vmatprep.subr.bf16.mxu0 %v14170_v51  ;;  %10937 = vmatprep.subr.bf16.mxu1 %v14172_v4 }
0x13c2   :  { %10907 = vmatpush1.bf16.msra.mxu0 %v14174_v29  ;;  %10939 = vmatpush1.bf16.msra.mxu1 %v14177_v16 }
0x13c3   :  { %10909 = vmatprep.subr.bf16.mxu0 %v14182_v41  ;;  %10941 = vmatprep.subr.bf16.mxu1 %v14184_v56 }
0x13c6   :  { %10911 = vmatpush1.bf16.msra.mxu0 %v14186_v23  ;;  %10943 = vmatpush1.bf16.msra.mxu1 %v14189_v62 }
0x13c7   :  { %10913 = vmatprep.subr.bf16.mxu0 %v14193_v43  ;;  %10945 = vmatprep.subr.bf16.mxu1 %v14196_v19 }
0x13ca   :  { %10915 = vmatpush1.bf16.msra.mxu0 %v14198_v27  ;;  %10947 = vmatpush1.bf16.msra.mxu1 %v14201_v58 }
0x13cb   :  { %10917 = vmatprep.subr.bf16.mxu0 %v14204_v42  ;;  %10949 = vmatprep.subr.bf16.mxu1 %v14206_v6 }
0x13ce   :  { %10919 = vmatpush1.bf16.msra.mxu0 %v14209_v5  ;;  %10951 = vmatpush1.bf16.msra.mxu1 %v14213_v34 }
0x13cf   :  { %10921 = vmatprep.subr.bf16.mxu0 %v14215_v30  ;;  %10953 = vmatprep.subr.bf16.mxu1 %v14218_v46 }
0x13d2   :  { %10923 = vmatpush1.bf16.msra.mxu0 %v14221_v48  ;;  %10955 = vmatpush1.bf16.msra.mxu1 %v14225_v39 }
0x13d3   :  { %10957 = vmatprep.subr.bf16.mxu0 %v14134_v13  ;;  %10989 = vmatprep.subr.bf16.mxu1 %v14136_v45 }
0x1487   :  { %v5808_v3 = vpop.f32.mrb[38].mxu0  ;;  %v5879_v28 = vpop.f32.mrb[40].mxu1 }
0x1488   :  { %v11828_v50 = vadd.f32 %v5808_v3, %v14020_v36  ;;  %v5810_v25 = vpop.f32.mrb[39].mxu0  ;;  %v5881_v24 = vpop.f32.mrb[41].mxu1  ;;  %v11844_v21 = vadd.f32 %v5879_v28, %v14032_v59 }
0x1489   :  { %v11829_v1 = vadd.f32 %v5810_v25, %v14023_v2  ;;  %v11845_v22 = vadd.f32 %v5881_v24, %v14028_v17 }
0x148a   :  { %v9360_v7 = vmul.f32 -1.442695, %v11828_v50 }
0x148b   :  { %v9361_v12 = vmul.f32 -1.442695, %v11829_v1  ;;  %v9362_v14 = vmul.f32 -1.442695, %v11845_v22 }
0x148c   :  { %12325 = vpow2.f32 %v9360_v7 }
0x148d   :  { %12327 = vpow2.f32 %v9361_v12 }
0x148e   :  { %12329 = vpow2.f32 %v9362_v14 }
0x148f   :  { %12331 = vtanh.f32 %v11844_v21 }
0x1496   :  { %v12326_v11 = vpop.eup %12325 }
0x1497   :  { %v12328_v37 = vpop.eup %12327  ;;  %v5891_v15 = vadd.f32 1.0, %v12326_v11 }
0x1498   :  { %v5897_v40 = vadd.f32 1.0, %v12328_v37  ;;  %v12330_v47 = vpop.eup %12329 }
0x1499   :  { %12333 = vrcp.f32 %v5891_v15  ;;  %v12332_v8 = vpop.eup %12331  ;;  %v5904_v50 = vadd.f32 1.0, %v12330_v47 }
0x149a   :  { %12335 = vrcp.f32 %v5897_v40 }
0x149b   :  { %12337 = vrcp.f32 %v5904_v50 }
0x14a3   :  { %v12334_v54 = vpop.eup %12333 }
0x14a4   :  { %v12336_v61 = vpop.eup %12335  ;;  %v5908_v3 = vmul.f32 %v12334_v54, %v12332_v8 }
0x14a5   :  { %v5907_v25 = vmul.f32 %v12336_v61, %v14125_v18  ;;  %v12338_v28 = vpop.eup %12337 }
0x14a7   :  { %v14237_v24 = vadd.f32 %v5908_v3, %v5907_v25 }
0x14a9   :  { %12339 = vtanh.f32 %v14237_v24 }
0x14b3   :  { %v12340_v1 = vpop.eup %12339 }
0x14b4   :  { %v14240_v7 = vmul.f32 %v12340_v1, %v12338_v28 }
0x14b6   :  { %6046 = vmatmul.mubr.f32.vlgmr.msra.gmra.mrb[40].mxu0 %v14240_v7  ;;  %6117 = vmatmul.mubr.f32.vlgmr.msra.gmra.mrb[42].mxu1 %v14240_v7 }
0x14b7   :  { %10959 = vmatpush1.bf16.msra.mxu0 %v14138_v38  ;;  %10991 = vmatpush1.bf16.msra.mxu1 %v14141_v35 }
0x14b8   :  { %10961 = vmatprep.subr.bf16.mxu0 %v14146_v32  ;;  %10993 = vmatprep.subr.bf16.mxu1 %v14148_v10 }
0x14b9   :  { %6284 = vmatprep.mubr.f32.mxu0 %v12635_v0  ;;  %6355 = vmatprep.mubr.f32.mxu1 %v12635_v0 }
0x14bb   :  { %10963 = vmatpush1.bf16.msra.mxu0 %v14150_v55  ;;  %10995 = vmatpush1.bf16.msra.mxu1 %v14153_v52 }
0x14bc   :  { %10965 = vmatprep.subr.bf16.mxu0 %v14158_v33  ;;  %10997 = vmatprep.subr.bf16.mxu1 %v14160_v20 }
0x14bf   :  { %10967 = vmatpush1.bf16.msra.mxu0 %v14162_v63  ;;  %10999 = vmatpush1.bf16.msra.mxu1 %v14165_v60 }
0x14c0   :  { %10969 = vmatprep.subr.bf16.mxu0 %v14170_v51  ;;  %11001 = vmatprep.subr.bf16.mxu1 %v14172_v4 }
0x14c3   :  { %10971 = vmatpush1.bf16.msra.mxu0 %v14174_v29  ;;  %11003 = vmatpush1.bf16.msra.mxu1 %v14177_v16 }
0x14c4   :  { %10973 = vmatprep.subr.bf16.mxu0 %v14182_v41  ;;  %11005 = vmatprep.subr.bf16.mxu1 %v14184_v56 }
0x14c7   :  { %10975 = vmatpush1.bf16.msra.mxu0 %v14186_v23  ;;  %11007 = vmatpush1.bf16.msra.mxu1 %v14189_v62 }
0x14c8   :  { %10977 = vmatprep.subr.bf16.mxu0 %v14193_v43  ;;  %11009 = vmatprep.subr.bf16.mxu1 %v14196_v19 }
0x14cb   :  { %10979 = vmatpush1.bf16.msra.mxu0 %v14198_v27  ;;  %11011 = vmatpush1.bf16.msra.mxu1 %v14201_v58 }
0x14cc   :  { %10981 = vmatprep.subr.bf16.mxu0 %v14204_v42  ;;  %11013 = vmatprep.subr.bf16.mxu1 %v14206_v6 }
0x14cf   :  { %10983 = vmatpush1.bf16.msra.mxu0 %v14209_v5  ;;  %11015 = vmatpush1.bf16.msra.mxu1 %v14213_v34 }
0x14d0   :  { %10985 = vmatprep.subr.bf16.mxu0 %v14215_v30  ;;  %11017 = vmatprep.subr.bf16.mxu1 %v14218_v46 }
0x14d3   :  { %10987 = vmatpush1.bf16.msra.mxu0 %v14221_v48  ;;  %11019 = vmatpush1.bf16.msra.mxu1 %v14225_v39 }
0x14d4   :  { %11021 = vmatprep.subr.bf16.mxu0 %v14134_v13  ;;  %11053 = vmatprep.subr.bf16.mxu1 %v14136_v45 }
0x1589   :  { %v6047_v18 = vpop.f32.mrb[40].mxu0  ;;  %v6118_v12 = vpop.f32.mrb[42].mxu1 }
0x158a   :  { %v11830_v22 = vadd.f32 %v6047_v18, %v14020_v36  ;;  %v6049_v14 = vpop.f32.mrb[41].mxu0  ;;  %v6120_v21 = vpop.f32.mrb[43].mxu1  ;;  %v11846_v8 = vadd.f32 %v6118_v12, %v14032_v59 }
0x158b   :  { %v11831_v11 = vadd.f32 %v6049_v14, %v14023_v2  ;;  %v11847_v40 = vadd.f32 %v6120_v21, %v14028_v17 }
0x158c   :  { %v9363_v37 = vmul.f32 -1.442695, %v11830_v22 }
0x158d   :  { %v9364_v15 = vmul.f32 -1.442695, %v11831_v11  ;;  %v9365_v47 = vmul.f32 -1.442695, %v11847_v40 }
0x158e   :  { %12341 = vpow2.f32 %v9363_v37 }
0x158f   :  { %12343 = vpow2.f32 %v9364_v15 }
0x1590   :  { %12345 = vpow2.f32 %v9365_v47 }
0x1591   :  { %12347 = vtanh.f32 %v11846_v8 }
0x1598   :  { %v12342_v54 = vpop.eup %12341 }
0x1599   :  { %v12344_v61 = vpop.eup %12343  ;;  %v6130_v3 = vadd.f32 1.0, %v12342_v54 }
0x159a   :  { %v6136_v50 = vadd.f32 1.0, %v12344_v61  ;;  %v12346_v25 = vpop.eup %12345 }
0x159b   :  { %12349 = vrcp.f32 %v6130_v3  ;;  %v12348_v28 = vpop.eup %12347  ;;  %v6143_v14 = vadd.f32 1.0, %v12346_v25 }
0x159c   :  { %12351 = vrcp.f32 %v6136_v50 }
0x159d   :  { %12353 = vrcp.f32 %v6143_v14 }
0x15a5   :  { %v12350_v1 = vpop.eup %12349 }
0x15a6   :  { %v12352_v18 = vpop.eup %12351  ;;  %v6147_v22 = vmul.f32 %v12350_v1, %v12348_v28 }
0x15a7   :  { %v6146_v11 = vmul.f32 %v12352_v18, %v14237_v24  ;;  %v12354_v12 = vpop.eup %12353 }
0x15a9   :  { %v14283_v21 = vadd.f32 %v6147_v22, %v6146_v11 }
0x15ab   :  { %12355 = vtanh.f32 %v14283_v21 }
0x15b5   :  { %v12356_v37 = vpop.eup %12355 }
0x15b6   :  { %v14286_v15 = vmul.f32 %v12356_v37, %v12354_v12 }
0x15b8   :  { %6285 = vmatmul.mubr.f32.vlgmr.msra.gmra.mrb[42].mxu0 %v14286_v15  ;;  %6356 = vmatmul.mubr.f32.vlgmr.msra.gmra.mrb[44].mxu1 %v14286_v15 }
0x15b9   :  { %11023 = vmatpush1.bf16.msra.mxu0 %v14138_v38  ;;  %11055 = vmatpush1.bf16.msra.mxu1 %v14141_v35 }
0x15ba   :  { %11025 = vmatprep.subr.bf16.mxu0 %v14146_v32  ;;  %11057 = vmatprep.subr.bf16.mxu1 %v14148_v10 }
0x15bb   :  { %6523 = vmatprep.mubr.f32.mxu0 %v12635_v0  ;;  %6594 = vmatprep.mubr.f32.mxu1 %v12635_v0 }
0x15bd   :  { %11027 = vmatpush1.bf16.msra.mxu0 %v14150_v55  ;;  %11059 = vmatpush1.bf16.msra.mxu1 %v14153_v52 }
0x15be   :  { %11029 = vmatprep.subr.bf16.mxu0 %v14158_v33  ;;  %11061 = vmatprep.subr.bf16.mxu1 %v14160_v20 }
0x15c1   :  { %11031 = vmatpush1.bf16.msra.mxu0 %v14162_v63  ;;  %11063 = vmatpush1.bf16.msra.mxu1 %v14165_v60 }
0x15c2   :  { %11033 = vmatprep.subr.bf16.mxu0 %v14170_v51  ;;  %11065 = vmatprep.subr.bf16.mxu1 %v14172_v4 }
0x15c5   :  { %11035 = vmatpush1.bf16.msra.mxu0 %v14174_v29  ;;  %11067 = vmatpush1.bf16.msra.mxu1 %v14177_v16 }
0x15c6   :  { %11037 = vmatprep.subr.bf16.mxu0 %v14182_v41  ;;  %11069 = vmatprep.subr.bf16.mxu1 %v14184_v56 }
0x15c9   :  { %11039 = vmatpush1.bf16.msra.mxu0 %v14186_v23  ;;  %11071 = vmatpush1.bf16.msra.mxu1 %v14189_v62 }
0x15ca   :  { %11041 = vmatprep.subr.bf16.mxu0 %v14193_v43  ;;  %11073 = vmatprep.subr.bf16.mxu1 %v14196_v19 }
0x15cd   :  { %11043 = vmatpush1.bf16.msra.mxu0 %v14198_v27  ;;  %11075 = vmatpush1.bf16.msra.mxu1 %v14201_v58 }
0x15ce   :  { %11045 = vmatprep.subr.bf16.mxu0 %v14204_v42  ;;  %11077 = vmatprep.subr.bf16.mxu1 %v14206_v6 }
0x15d1   :  { %11047 = vmatpush1.bf16.msra.mxu0 %v14209_v5  ;;  %11079 = vmatpush1.bf16.msra.mxu1 %v14213_v34 }
0x15d2   :  { %11049 = vmatprep.subr.bf16.mxu0 %v14215_v30  ;;  %11081 = vmatprep.subr.bf16.mxu1 %v14218_v46 }
0x15d5   :  { %11051 = vmatpush1.bf16.msra.mxu0 %v14221_v48  ;;  %11083 = vmatpush1.bf16.msra.mxu1 %v14225_v39 }
0x15d6   :  { %11085 = vmatprep.subr.bf16.mxu0 %v14134_v13  ;;  %11117 = vmatprep.subr.bf16.mxu1 %v14136_v45 }
0x168b   :  { %v6286_v24 = vpop.f32.mrb[42].mxu0  ;;  %v6357_v40 = vpop.f32.mrb[44].mxu1 }
0x168c   :  { %v11832_v47 = vadd.f32 %v6286_v24, %v14020_v36  ;;  %v6288_v8 = vpop.f32.mrb[43].mxu0  ;;  %v6359_v54 = vpop.f32.mrb[45].mxu1  ;;  %v11848_v1 = vadd.f32 %v6357_v40, %v14032_v59 }
0x168d   :  { %v11833_v61 = vadd.f32 %v6288_v8, %v14023_v2  ;;  %v11849_v25 = vadd.f32 %v6359_v54, %v14028_v17 }
0x168e   :  { %v9366_v3 = vmul.f32 -1.442695, %v11832_v47 }
0x168f   :  { %v9367_v50 = vmul.f32 -1.442695, %v11833_v61  ;;  %v9368_v28 = vmul.f32 -1.442695, %v11849_v25  ;;  %v6884_v25 = vld [vmem:[#allocation6 + $0x430] sm:$0xff] }
0x1690   :  { %12357 = vpow2.f32 %v9366_v3 }
0x1691   :  { %12359 = vpow2.f32 %v9367_v50  ;;  %v6880_v50 = vld [vmem:[#allocation6 + $0x410] sm:$0xff] }
0x1692   :  { %12361 = vpow2.f32 %v9368_v28  ;;  %v6887_v28 = vld [vmem:[#allocation6 + $0x448] sm:$0xff] }
0x1693   :  { %12363 = vtanh.f32 %v11848_v1  ;;  %v6891_v1 = vld [vmem:[#allocation6 + $0x468] sm:$0xff] }
0x169a   :  { %v12358_v13 = vpop.eup %12357 }
0x169b   :  { %v12360_v18 = vpop.eup %12359  ;;  %v6369_v45 = vadd.f32 1.0, %v12358_v13  ;;  %v6889_v13 = vld [vmem:[#allocation6 + $0x458] sm:$0xff] }
0x169c   :  { %v6375_v22 = vadd.f32 1.0, %v12360_v18  ;;  %v12362_v14 = vpop.eup %12361  ;;  %v6893_v18 = vld [vmem:[#allocation6 + $0x478] sm:$0xff] }
0x169d   :  { %12365 = vrcp.f32 %v6369_v45  ;;  %v12364_v11 = vpop.eup %12363  ;;  %v6382_v47 = vadd.f32 1.0, %v12362_v14 }
0x169e   :  { %12367 = vrcp.f32 %v6375_v22 }
0x169f   :  { %12369 = vrcp.f32 %v6382_v47  ;;  %v11152_v47 = vpack.c.bf16 %v6891_v1, %v6887_v28  ;;  %v6912_v1 = vld [vmem:[#allocation6 + $0x510] sm:$0xff] }
0x16a7   :  { %v12366_v12 = vpop.eup %12365 }
0x16a8   :  { %v12368_v37 = vpop.eup %12367  ;;  %v6386_v24 = vmul.f32 %v12366_v12, %v12364_v11  ;;  %v11182_v11 = vpack.c.bf16 %v6884_v25, %v6880_v50  ;;  %v6886_v12 = vld [vmem:[#allocation6 + $0x440] sm:$0xff] }
0x16a9   :  { %v6385_v8 = vmul.f32 %v12368_v37, %v14283_v21  ;;  %v12370_v40 = vpop.eup %12369  ;;  %v6882_v21 = vld [vmem:[#allocation6 + $0x420] sm:$0xff] }
0x16aa   :  { %v6890_v37 = vld [vmem:[#allocation6 + $0x460] sm:$0xff] }
0x16ab   :  { %v14329_v54 = vadd.f32 %v6386_v24, %v6385_v8  ;;  %v11184_v8 = vpack.c.bf16 %v6893_v18, %v6889_v13  ;;  %v6914_v50 = vld [vmem:[#allocation6 + $0x520] sm:$0xff]  ;;  %v6916_v13 = vld [vmem:[#allocation6 + $0x530] sm:$0xff]  ;;  %v6919_v18 = vld [vmem:[#allocation6 + $0x548] sm:$0xff] }
0x16ad   :  { %12371 = vtanh.f32 %v14329_v54 }
0x16b7   :  { %v12372_v61 = vpop.eup %12371 }
0x16b8   :  { %v14332_v3 = vmul.f32 %v12372_v61, %v12370_v40  ;;  %v6892_v40 = vld [vmem:[#allocation6 + $0x470] sm:$0xff]  ;;  %v6895_v61 = vld [vmem:[#allocation6 + $0x488] sm:$0xff] }
0x16ba   :  { %6524 = vmatmul.mubr.f32.vlgmr.msra.gmra.mrb[44].mxu0 %v14332_v3  ;;  %6595 = vmatmul.mubr.f32.vlgmr.msra.gmra.mrb[46].mxu1 %v14332_v3 }
0x16bb   :  { %11087 = vmatpush1.bf16.msra.mxu0 %v14138_v38  ;;  %11119 = vmatpush1.bf16.msra.mxu1 %v14141_v35  ;;  %v6879_v38 = vld [vmem:[#allocation6 + $0x408] sm:$0xff] }
0x16bc   :  { %11089 = vmatprep.subr.bf16.mxu0 %v14146_v32  ;;  %11121 = vmatprep.subr.bf16.mxu1 %v14148_v10  ;;  %v6883_v35 = vld [vmem:[#allocation6 + $0x428] sm:$0xff]  ;;  %v6881_v32 = vld [vmem:[#allocation6 + $0x418] sm:$0xff] }
0x16bd   :  { %6762 = vmatprep.mubr.f32.mxu0 %v12635_v0  ;;  %6833 = vmatprep.mubr.f32.mxu1 %v12635_v0  ;;  %v11148_v10 = vpack.c.bf16 %v6883_v35, %v6879_v38  ;;  %v6899_v38 = vld [vmem:[#allocation6 + $0x4a8] sm:$0xff]  ;;  %v6897_v35 = vld [vmem:[#allocation6 + $0x498] sm:$0xff] }
0x16bf   :  { %11091 = vmatpush1.bf16.msra.mxu0 %v14150_v55  ;;  %11123 = vmatpush1.bf16.msra.mxu1 %v14153_v52  ;;  %v6885_v55 = vld [vmem:[#allocation6 + $0x438] sm:$0xff] }
0x16c0   :  { %11093 = vmatprep.subr.bf16.mxu0 %v14158_v33  ;;  %11125 = vmatprep.subr.bf16.mxu1 %v14160_v20  ;;  %v11180_v52 = vpack.c.bf16 %v6885_v55, %v6881_v32  ;;  %v6901_v32 = vld [vmem:[#allocation6 + $0x4b8] sm:$0xff] }
0x16c3   :  { %11095 = vmatpush1.bf16.msra.mxu0 %v14162_v63  ;;  %11127 = vmatpush1.bf16.msra.mxu1 %v14165_v60 }
0x16c4   :  { %11097 = vmatprep.subr.bf16.mxu0 %v14170_v51  ;;  %11129 = vmatprep.subr.bf16.mxu1 %v14172_v4 }
0x16c7   :  { %11099 = vmatpush1.bf16.msra.mxu0 %v14174_v29  ;;  %11131 = vmatpush1.bf16.msra.mxu1 %v14177_v16 }
0x16c8   :  { %11101 = vmatprep.subr.bf16.mxu0 %v14182_v41  ;;  %11133 = vmatprep.subr.bf16.mxu1 %v14184_v56 }
0x16cb   :  { %11103 = vmatpush1.bf16.msra.mxu0 %v14186_v23  ;;  %11135 = vmatpush1.bf16.msra.mxu1 %v14189_v62 }
0x16cc   :  { %11105 = vmatprep.subr.bf16.mxu0 %v14193_v43  ;;  %11137 = vmatprep.subr.bf16.mxu1 %v14196_v19 }
0x16cf   :  { %11107 = vmatpush1.bf16.msra.mxu0 %v14198_v27  ;;  %11139 = vmatpush1.bf16.msra.mxu1 %v14201_v58 }
0x16d0   :  { %11109 = vmatprep.subr.bf16.mxu0 %v14204_v42  ;;  %11141 = vmatprep.subr.bf16.mxu1 %v14206_v6 }
0x16d3   :  { %11111 = vmatpush1.bf16.msra.mxu0 %v14209_v5  ;;  %11143 = vmatpush1.bf16.msra.mxu1 %v14213_v34 }
0x16d4   :  { %11113 = vmatprep.subr.bf16.mxu0 %v14215_v30  ;;  %11145 = vmatprep.subr.bf16.mxu1 %v14218_v46 }
0x16d7   :  { %11115 = vmatpush1.bf16.msra.mxu0 %v14221_v48  ;;  %11147 = vmatpush1.bf16.msra.mxu1 %v14225_v39  ;;  %v6878_v39 = vld [vmem:[#allocation6 + $0x400] sm:$0xff] }
0x16d8   :  { %11149 = vmatprep.subr.bf16.mxu0 %v11148_v10  ;;  %11181 = vmatprep.subr.bf16.mxu1 %v11180_v52  ;;  %v11150_v14 = vpack.c.bf16 %v6882_v21, %v6878_v39  ;;  %v11154_v10 = vpack.c.bf16 %v6890_v37, %v6886_v12  ;;  %v6894_v52 = vld [vmem:[#allocation6 + $0x480] sm:$0xff]  ;;  %v11198_v12 = vpack.c.bf16 %v6916_v13, %v6912_v1  ;;  %v7239_v1 = vld [vmem:[#allocation8 + $0x658] sm:$0xff] }
0x16d9   :  { %v6910_v21 = vld [vmem:[#allocation6 + $0x500] sm:$0xff] }
0x16da   :  { %v6918_v37 = vld [vmem:[#allocation6 + $0x540] sm:$0xff] }
0x178d   :  { %v6525_v33 = vpop.f32.mrb[44].mxu0  ;;  %v6596_v20 = vpop.f32.mrb[46].mxu1 }
0x178e   :  { %v11834_v63 = vadd.f32 %v6525_v33, %v14020_v36  ;;  %v6527_v60 = vpop.f32.mrb[45].mxu0  ;;  %v6598_v51 = vpop.f32.mrb[47].mxu1  ;;  %v11850_v23 = vadd.f32 %v6596_v20, %v14032_v59  ;;  %v6898_v33 = vld [vmem:[#allocation6 + $0x4a0] sm:$0xff]  ;;  %v11156_v20 = vpack.c.bf16 %v6899_v38, %v6895_v61  ;;  %v6924_v61 = vld [vmem:[#allocation6 + $0x570] sm:$0xff]  ;;  %v6927_v38 = vld [vmem:[#allocation6 + $0x588] sm:$0xff] }
0x178f   :  { %v11835_v4 = vadd.f32 %v6527_v60, %v14023_v2  ;;  %v11851_v41 = vadd.f32 %v6598_v51, %v14028_v17  ;;  %v6896_v60 = vld [vmem:[#allocation6 + $0x490] sm:$0xff] }
0x1790   :  { %v9369_v29 = vmul.f32 -1.442695, %v11834_v63  ;;  %v11188_v63 = vpack.c.bf16 %v6901_v32, %v6897_v35  ;;  %v6900_v51 = vld [vmem:[#allocation6 + $0x4b0] sm:$0xff]  ;;  %v6931_v35 = vld [vmem:[#allocation6 + $0x5a8] sm:$0xff]  ;;  %v6929_v32 = vld [vmem:[#allocation6 + $0x598] sm:$0xff] }
0x1791   :  { %v9370_v16 = vmul.f32 -1.442695, %v11835_v4  ;;  %v9371_v56 = vmul.f32 -1.442695, %v11851_v41  ;;  %v6903_v4 = vld [vmem:[#allocation6 + $0x4c8] sm:$0xff]  ;;  %v6909_v41 = vld [vmem:[#allocation6 + $0x4f8] sm:$0xff] }
0x1792   :  { %12373 = vpow2.f32 %v9369_v29  ;;  %v6907_v29 = vld [vmem:[#allocation6 + $0x4e8] sm:$0xff] }
0x1793   :  { %12375 = vpow2.f32 %v9370_v16  ;;  %v6905_v16 = vld [vmem:[#allocation6 + $0x4d8] sm:$0xff] }
0x1794   :  { %12377 = vpow2.f32 %v9371_v56  ;;  %v11158_v56 = vpack.c.bf16 %v6898_v33, %v6894_v52  ;;  %v6926_v33 = vld [vmem:[#allocation6 + $0x580] sm:$0xff] }
0x1795   :  { %12379 = vtanh.f32 %v11850_v23  ;;  %v11190_v23 = vpack.c.bf16 %v6900_v51, %v6896_v60  ;;  %v6928_v51 = vld [vmem:[#allocation6 + $0x590] sm:$0xff] }
0x179c   :  { %v12374_v62 = vpop.eup %12373 }
0x179d   :  { %v12376_v43 = vpop.eup %12375  ;;  %v6608_v19 = vadd.f32 1.0, %v12374_v62  ;;  %v6902_v62 = vld [vmem:[#allocation6 + $0x4c0] sm:$0xff] }
0x179e   :  { %v6614_v27 = vadd.f32 1.0, %v12376_v43  ;;  %v12378_v58 = vpop.eup %12377  ;;  %v6906_v43 = vld [vmem:[#allocation6 + $0x4e0] sm:$0xff] }
0x179f   :  { %12381 = vrcp.f32 %v6608_v19  ;;  %v12380_v42 = vpop.eup %12379  ;;  %v6621_v30 = vadd.f32 1.0, %v12378_v58  ;;  %v11160_v19 = vpack.c.bf16 %v6907_v29, %v6903_v4  ;;  %v6904_v58 = vld [vmem:[#allocation6 + $0x4d0] sm:$0xff]  ;;  %v6935_v29 = vld [vmem:[#allocation6 + $0x5c8] sm:$0xff] }
0x17a0   :  { %12383 = vrcp.f32 %v6614_v27  ;;  %v11192_v27 = vpack.c.bf16 %v6909_v41, %v6905_v16  ;;  %v6932_v4 = vld [vmem:[#allocation6 + $0x5b0] sm:$0xff]  ;;  %v6939_v16 = vld [vmem:[#allocation6 + $0x5e8] sm:$0xff]  ;;  %v6937_v41 = vld [vmem:[#allocation6 + $0x5d8] sm:$0xff] }
0x17a1   :  { %12385 = vrcp.f32 %v6621_v30  ;;  %v6917_v30 = vld [vmem:[#allocation6 + $0x538] sm:$0xff] }
0x17a9   :  { %v12382_v6 = vpop.eup %12381 }
0x17aa   :  { %v12384_v5 = vpop.eup %12383  ;;  %v6625_v34 = vmul.f32 %v12382_v6, %v12380_v42  ;;  %v6908_v42 = vld [vmem:[#allocation6 + $0x4f0] sm:$0xff]  ;;  %v6911_v6 = vld [vmem:[#allocation6 + $0x508] sm:$0xff] }
0x17ab   :  { %v6624_v46 = vmul.f32 %v12384_v5, %v14329_v54  ;;  %v12386_v45 = vpop.eup %12385  ;;  %v6888_v54 = vld [vmem:[#allocation6 + $0x450] sm:$0xff]  ;;  %v6915_v5 = vld [vmem:[#allocation6 + $0x528] sm:$0xff]  ;;  %v11194_v39 = vpack.c.bf16 %v6908_v42, %v6904_v58  ;;  %v6938_v58 = vld [vmem:[#allocation6 + $0x5e0] sm:$0xff] }
0x17ac   :  { %v11186_v55 = vpack.c.bf16 %v6892_v40, %v6888_v54  ;;  %v11164_v25 = vpack.c.bf16 %v6915_v5, %v6911_v6  ;;  %v6920_v40 = vld [vmem:[#allocation6 + $0x550] sm:$0xff] }
0x17ad   :  { %v14373_v48 = vadd.f32 %v6625_v34, %v6624_v46  ;;  %v6913_v34 = vld [vmem:[#allocation6 + $0x518] sm:$0xff]  ;;  %v11162_v46 = vpack.c.bf16 %v6906_v43, %v6902_v62  ;;  %v11202_v52 = vpack.c.bf16 %v6924_v61, %v6920_v40  ;;  %v11206_v62 = vpack.c.bf16 %v6932_v4, %v6928_v51  ;;  %v6934_v43 = vld [vmem:[#allocation6 + $0x5c0] sm:$0xff]  ;;  %v6936_v42 = vld [vmem:[#allocation6 + $0x5d0] sm:$0xff] }
0x17ae   :  { %v11196_v28 = vpack.c.bf16 %v6917_v30, %v6913_v34  ;;  %v6940_v6 = vld [vmem:[#allocation6 + $0x5f0] sm:$0xff]  ;;  %v11178_v5 = vpack.c.bf16 %v6938_v58, %v6934_v43  ;;  %v7232_v30 = vld [vmem:[#allocation8 + $0x620] sm:$0xff]  ;;  %v7247_v40 = vld [vmem:[#allocation8 + $0x698] sm:$0xff] }
0x17af   :  { %12387 = vtanh.f32 %v14373_v48  ;;  %v11210_v34 = vpack.c.bf16 %v6940_v6, %v6936_v42  ;;  %v7255_v51 = vld [vmem:[#allocation8 + $0x6d8] sm:$0xff]  ;;  %v7258_v43 = vld [vmem:[#allocation8 + $0x6f0] sm:$0xff]  ;;  %v7265_v58 = vld [vmem:[#allocation8 + $0x728] sm:$0xff] }
0x17b0   :  { %v7260_v42 = vld [vmem:[#allocation8 + $0x700] sm:$0xff] }
0x17b1   :  { %v7264_v6 = vld [vmem:[#allocation8 + $0x720] sm:$0xff] }
0x17b9   :  { %v12388_v22 = vpop.eup %12387 }
0x17ba   :  { %v14376_v24 = vmul.f32 %v12388_v22, %v12386_v45  ;;  %v6923_v45 = vld [vmem:[#allocation6 + $0x568] sm:$0xff]  ;;  %v6921_v22 = vld [vmem:[#allocation6 + $0x558] sm:$0xff] }
0x17bc   :  { %6763 = vmatmul.mubr.f32.vlgmr.msra.gmra.mrb[46].mxu0 %v14376_v24  ;;  %6834 = vmatmul.mubr.f32.vlgmr.msra.gmra.mrb[48].mxu1 %v14376_v24 }
0x17bd   :  { %11151 = vmatpush1.bf16.msra.mxu0 %v11150_v14  ;;  %11183 = vmatpush1.bf16.msra.mxu1 %v11182_v11  ;;  %v6925_v14 = vld [vmem:[#allocation6 + $0x578] sm:$0xff]  ;;  %v11166_v11 = vpack.c.bf16 %v6914_v50, %v6910_v21  ;;  %v7230_v21 = vld [vmem:[#allocation8 + $0x610] sm:$0xff] }
0x17be   :  { %11153 = vmatprep.subr.bf16.mxu0 %v11152_v47  ;;  %11185 = vmatprep.subr.bf16.mxu1 %v11184_v8  ;;  %v6922_v47 = vld [vmem:[#allocation6 + $0x560] sm:$0xff]  ;;  %v11168_v8 = vpack.c.bf16 %v6923_v45, %v6919_v18  ;;  %v11200_v54 = vpack.c.bf16 %v6925_v14, %v6921_v22  ;;  %v7234_v50 = vld [vmem:[#allocation8 + $0x630] sm:$0xff]  ;;  %v7243_v22 = vld [vmem:[#allocation8 + $0x678] sm:$0xff] }
0x17bf   :  { %7029 = vmatprep.mubr.f32.mxu0 %v12635_v0  ;;  %7142 = vmatprep.mubr.f32.mxu1 %v12635_v0  ;;  %v7236_v18 = vld [vmem:[#allocation8 + $0x640] sm:$0xff] }
0x17c0   :  { %v7240_v45 = vld [vmem:[#allocation8 + $0x660] sm:$0xff] }
0x17c1   :  { %11155 = vmatpush1.bf16.msra.mxu0 %v11154_v10  ;;  %11187 = vmatpush1.bf16.msra.mxu1 %v11186_v55  ;;  %v6933_v10 = vld [vmem:[#allocation6 + $0x5b8] sm:$0xff]  ;;  %v11170_v55 = vpack.c.bf16 %v6922_v47, %v6918_v37  ;;  %v14424_v14 = vpack.c.bf16 %v7240_v45, %v7236_v18  ;;  %v7242_v37 = vld [vmem:[#allocation8 + $0x670] sm:$0xff] }
0x17c2   :  { %11157 = vmatprep.subr.bf16.mxu0 %v11156_v20  ;;  %11189 = vmatprep.subr.bf16.mxu1 %v11188_v63  ;;  %v6930_v20 = vld [vmem:[#allocation6 + $0x5a0] sm:$0xff]  ;;  %v11172_v63 = vpack.c.bf16 %v6931_v35, %v6927_v38  ;;  %v11204_v60 = vpack.c.bf16 %v6933_v10, %v6929_v32  ;;  %v7251_v32 = vld [vmem:[#allocation8 + $0x6b8] sm:$0xff] }
0x17c3   :  { %v7244_v38 = vld [vmem:[#allocation8 + $0x680] sm:$0xff]  ;;  %v7271_v18 = vld [vmem:[#allocation8 + $0x758] sm:$0xff] }
0x17c4   :  { %v7248_v35 = vld [vmem:[#allocation8 + $0x6a0] sm:$0xff]  ;;  %v7275_v45 = vld [vmem:[#allocation8 + $0x778] sm:$0xff] }
0x17c5   :  { %11159 = vmatpush1.bf16.msra.mxu0 %v11158_v56  ;;  %11191 = vmatpush1.bf16.msra.mxu1 %v11190_v23  ;;  %v6941_v56 = vld [vmem:[#allocation6 + $0x5f8] sm:$0xff]  ;;  %v11174_v23 = vpack.c.bf16 %v6930_v20, %v6926_v33  ;;  %v14436_v10 = vpack.c.bf16 %v7248_v35, %v7244_v38  ;;  %v7250_v33 = vld [vmem:[#allocation8 + $0x6b0] sm:$0xff]  ;;  %v7276_v38 = vld [vmem:[#allocation8 + $0x780] sm:$0xff] }
0x17c6   :  { %11161 = vmatprep.subr.bf16.mxu0 %v11160_v19  ;;  %11193 = vmatprep.subr.bf16.mxu1 %v11192_v27  ;;  %v11176_v19 = vpack.c.bf16 %v6939_v16, %v6935_v29  ;;  %v11208_v27 = vpack.c.bf16 %v6941_v56, %v6937_v41  ;;  %v7252_v29 = vld [vmem:[#allocation8 + $0x6c0] sm:$0xff]  ;;  %v7259_v41 = vld [vmem:[#allocation8 + $0x6f8] sm:$0xff] }
0x17c7   :  { %v7256_v16 = vld [vmem:[#allocation8 + $0x6e0] sm:$0xff] }
0x17c8   :  { %v14448_v56 = vpack.c.bf16 %v7256_v16, %v7252_v29  ;;  %v7282_v29 = vld [vmem:[#allocation8 + $0x7b0] sm:$0xff]  ;;  %v7285_v16 = vld [vmem:[#allocation8 + $0x7c8] sm:$0xff] }
0x17c9   :  { %11163 = vmatpush1.bf16.msra.mxu0 %v11162_v46  ;;  %11195 = vmatpush1.bf16.msra.mxu1 %v11194_v39 }
0x17ca   :  { %11165 = vmatprep.subr.bf16.mxu0 %v11164_v25  ;;  %11197 = vmatprep.subr.bf16.mxu1 %v11196_v28  ;;  %v7237_v25 = vld [vmem:[#allocation8 + $0x648] sm:$0xff] }
0x17cb   :  { %v7241_v28 = vld [vmem:[#allocation8 + $0x668] sm:$0xff] }
0x17cc   :  { %v14422_v13 = vpack.c.bf16 %v7241_v28, %v7237_v25  ;;  %v7268_v28 = vld [vmem:[#allocation8 + $0x740] sm:$0xff] }
0x17cd   :  { %11167 = vmatpush1.bf16.msra.mxu0 %v11166_v11  ;;  %11199 = vmatpush1.bf16.msra.mxu1 %v11198_v12  ;;  %v14426_v11 = vpack.c.bf16 %v7243_v22, %v7239_v1  ;;  %v7238_v12 = vld [vmem:[#allocation8 + $0x650] sm:$0xff]  ;;  %v7272_v1 = vld [vmem:[#allocation8 + $0x760] sm:$0xff] }
0x17ce   :  { %11169 = vmatprep.subr.bf16.mxu0 %v11168_v8  ;;  %11201 = vmatprep.subr.bf16.mxu1 %v11200_v54  ;;  %v14429_v47 = vpack.c.bf16 %v7242_v37, %v7238_v12  ;;  %v7245_v8 = vld [vmem:[#allocation8 + $0x688] sm:$0xff]  ;;  %v7270_v22 = vld [vmem:[#allocation8 + $0x750] sm:$0xff]  ;;  %v14471_v37 = vpack.c.bf16 %v7272_v1, %v7268_v28 }
0x17cf   :  { %v7249_v54 = vld [vmem:[#allocation8 + $0x6a8] sm:$0xff]  ;;  %v7274_v12 = vld [vmem:[#allocation8 + $0x770] sm:$0xff] }
0x17d0   :  { %v14434_v61 = vpack.c.bf16 %v7249_v54, %v7245_v8  ;;  %v14473_v8 = vpack.c.bf16 %v7275_v45, %v7271_v18  ;;  %v7277_v54 = vld [vmem:[#allocation8 + $0x788] sm:$0xff]  ;;  %v14477_v35 = vpack.c.bf16 %v7274_v12, %v7270_v22 }
0x17d1   :  { %11171 = vmatpush1.bf16.msra.mxu0 %v11170_v55  ;;  %11203 = vmatpush1.bf16.msra.mxu1 %v11202_v52  ;;  %v14438_v55 = vpack.c.bf16 %v7251_v32, %v7247_v40  ;;  %v7246_v52 = vld [vmem:[#allocation8 + $0x690] sm:$0xff]  ;;  %v7281_v40 = vld [vmem:[#allocation8 + $0x7a8] sm:$0xff] }
0x17d2   :  { %11173 = vmatprep.subr.bf16.mxu0 %v11172_v63  ;;  %11205 = vmatprep.subr.bf16.mxu1 %v11204_v60  ;;  %v14441_v20 = vpack.c.bf16 %v7250_v33, %v7246_v52  ;;  %v7253_v63 = vld [vmem:[#allocation8 + $0x6c8] sm:$0xff]  ;;  %v14479_v32 = vpack.c.bf16 %v7281_v40, %v7277_v54  ;;  %v7280_v52 = vld [vmem:[#allocation8 + $0x7a0] sm:$0xff]  ;;  %v7279_v33 = vld [vmem:[#allocation8 + $0x798] sm:$0xff] }
0x17d3   :  { %v7257_v60 = vld [vmem:[#allocation8 + $0x6e8] sm:$0xff] }
0x17d4   :  { %v14446_v4 = vpack.c.bf16 %v7257_v60, %v7253_v63  ;;  %v7283_v63 = vld [vmem:[#allocation8 + $0x7b8] sm:$0xff] }
0x17d5   :  { %11175 = vmatpush1.bf16.msra.mxu0 %v11174_v23  ;;  %11207 = vmatpush1.bf16.msra.mxu1 %v11206_v62  ;;  %v14450_v23 = vpack.c.bf16 %v7259_v41, %v7255_v51  ;;  %v7254_v62 = vld [vmem:[#allocation8 + $0x6d0] sm:$0xff]  ;;  %v14482_v60 = vpack.c.bf16 %v7283_v63, %v7279_v33  ;;  %v7289_v41 = vld [vmem:[#allocation8 + $0x7e8] sm:$0xff] }
0x17d6   :  { %11177 = vmatprep.subr.bf16.mxu0 %v11176_v19  ;;  %11209 = vmatprep.subr.bf16.mxu1 %v11208_v27  ;;  %v7261_v19 = vld [vmem:[#allocation8 + $0x708] sm:$0xff]  ;;  %v14453_v27 = vpack.c.bf16 %v7258_v43, %v7254_v62  ;;  %v7278_v51 = vld [vmem:[#allocation8 + $0x790] sm:$0xff]  ;;  %v14485_v62 = vpack.c.bf16 %v7280_v52, %v7276_v38 }
0x17d7   :  { %v14489_v43 = vpack.c.bf16 %v7282_v29, %v7278_v51 }
0x17d9   :  { %11179 = vmatpush1.bf16.msra.mxu0 %v11178_v5  ;;  %11211 = vmatpush1.bf16.msra.mxu1 %v11210_v34  ;;  %v14457_v5 = vpack.c.bf16 %v7265_v58, %v7261_v19  ;;  %v14459_v34 = vpack.c.bf16 %v7264_v6, %v7260_v42  ;;  %v14491_v19 = vpack.c.bf16 %v7289_v41, %v7285_v16  ;;  %v7287_v58 = vld [vmem:[#allocation8 + $0x7d8] sm:$0xff]  ;;  %v7284_v6 = vld [vmem:[#allocation8 + $0x7c0] sm:$0xff] }
0x17da   :  { %v7291_v42 = vld [vmem:[#allocation8 + $0x7f8] sm:$0xff] }
0x17dc   :  { %7030 = vmatmul.mubr.f32.vlgmr.msra.gmra.mrb[48].mxu0 %v14038_v44  ;;  %7143 = vmatmul.mubr.f32.vlgmr.msra.gmra.mrb[50].mxu1 %v14038_v44  ;;  %v7229_v44 = vld [vmem:[#allocation8 + $0x608] sm:$0xff] }
0x17dd   :  { %7035 = vmatprep.mubr.f32.mxu0 %v12635_v0  ;;  %7148 = vmatprep.mubr.f32.mxu1 %v12635_v0 }
0x17e0   :  { %7036 = vmatmul.mubr.f32.gmra.mrb[50].mxu0 %v14084_v9  ;;  %7149 = vmatmul.mubr.f32.gmra.mrb[52].mxu1 %v14084_v9  ;;  %v7233_v9 = vld [vmem:[#allocation8 + $0x628] sm:$0xff] }
0x17e1   :  { %7041 = vmatprep.mubr.f32.mxu0 %v12635_v0  ;;  %7154 = vmatprep.mubr.f32.mxu1 %v12635_v0 }
0x17e4   :  { %7042 = vmatmul.mubr.f32.gmra.mrb[52].mxu0 %v14128_v57  ;;  %7155 = vmatmul.mubr.f32.gmra.mrb[54].mxu1 %v14128_v57  ;;  %v7231_v57 = vld [vmem:[#allocation8 + $0x618] sm:$0xff] }
0x17e5   :  { %7047 = vmatprep.mubr.f32.mxu0 %v12635_v0  ;;  %7160 = vmatprep.mubr.f32.mxu1 %v12635_v0 }
0x17e8   :  { %7048 = vmatmul.mubr.f32.gmra.mrb[54].mxu0 %v14240_v7  ;;  %7161 = vmatmul.mubr.f32.gmra.mrb[56].mxu1 %v14240_v7  ;;  %v14410_v7 = vpack.c.bf16 %v7233_v9, %v7229_v44  ;;  %v7263_v44 = vld [vmem:[#allocation8 + $0x718] sm:$0xff] }
0x17e9   :  { %7053 = vmatprep.mubr.f32.mxu0 %v12635_v0  ;;  %7166 = vmatprep.mubr.f32.mxu1 %v12635_v0  ;;  %v7267_v9 = vld [vmem:[#allocation8 + $0x738] sm:$0xff] }
0x17ea   :  { %11213 = vmatprep.subr.bf16.mxu0 %v14410_v7 }
0x17ec   :  { %7054 = vmatmul.mubr.f32.gmra.mrb[56].mxu0 %v14286_v15  ;;  %7167 = vmatmul.mubr.f32.gmra.mrb[58].mxu1 %v14286_v15  ;;  %v7228_v15 = vld [vmem:[#allocation8 + $0x600] sm:$0xff] }
0x17ed   :  { %7059 = vmatprep.mubr.f32.mxu0 %v12635_v0  ;;  %7172 = vmatprep.mubr.f32.mxu1 %v12635_v0  ;;  %v14412_v46 = vpack.c.bf16 %v7232_v30, %v7228_v15  ;;  %v14462_v15 = vpack.c.bf16 %v7267_v9, %v7263_v44  ;;  %v7266_v30 = vld [vmem:[#allocation8 + $0x730] sm:$0xff]  ;;  %v7288_v44 = vld [vmem:[#allocation8 + $0x7e0] sm:$0xff]  ;;  %v14497_v9 = vpack.c.bf16 %v7291_v42, %v7287_v58 }
0x17ef   :  { %11215 = vmatpush1.bf16.msra.mxu0 %v14412_v46 }
0x17f0   :  { %7060 = vmatmul.mubr.f32.gmra.mrb[58].mxu0 %v14332_v3  ;;  %7173 = vmatmul.mubr.f32.gmra.mrb[60].mxu1 %v14332_v3  ;;  %v7235_v3 = vld [vmem:[#allocation8 + $0x638] sm:$0xff] }
0x17f1   :  { %7065 = vmatprep.mubr.f32.mxu0 %v12635_v0  ;;  %7178 = vmatprep.mubr.f32.mxu1 %v12635_v0  ;;  %v14414_v39 = vpack.c.bf16 %v7235_v3, %v7231_v57  ;;  %v7262_v57 = vld [vmem:[#allocation8 + $0x710] sm:$0xff]  ;;  %v7269_v3 = vld [vmem:[#allocation8 + $0x748] sm:$0xff] }
0x17f2   :  { %11217 = vmatprep.subr.bf16.mxu0 %v14422_v13 }
0x17f3   :  { %11245 = vmatprep.subr.bf16.mxu1 %v14414_v39  ;;  %11219 = vmatpush1.bf16.msra.mxu0 %v14424_v14 }
0x17f4   :  { %7066 = vmatmul.mubr.f32.gmra.mrb[60].mxu0 %v14376_v24  ;;  %7179 = vmatmul.mubr.f32.gmra.mrb[62].mxu1 %v14376_v24  ;;  %v14417_v24 = vpack.c.bf16 %v7234_v50, %v7230_v21  ;;  %v7273_v21 = vld [vmem:[#allocation8 + $0x768] sm:$0xff]  ;;  %v14465_v50 = vpack.c.bf16 %v7266_v30, %v7262_v57  ;;  %v7286_v57 = vld [vmem:[#allocation8 + $0x7d0] sm:$0xff]  ;;  %v14499_v30 = vpack.c.bf16 %v7288_v44, %v7284_v6 }
0x17f5   :  { %7071 = vmatprep.mubr.f32.mxu0 %v12635_v0  ;;  %7184 = vmatprep.mubr.f32.mxu1 %v12635_v0  ;;  %v14467_v25 = vpack.c.bf16 %v7273_v21, %v7269_v3  ;;  %v7290_v3 = vld [vmem:[#allocation8 + $0x7f0] sm:$0xff] }
0x17f6   :  { %11247 = vmatpush1.bf16.msra.mxu1 %v14417_v24  ;;  %11221 = vmatprep.subr.bf16.mxu0 %v14434_v61  ;;  %v14502_v21 = vpack.c.bf16 %v7290_v3, %v7286_v57 }
0x17f7   :  { %11249 = vmatprep.subr.bf16.mxu1 %v14426_v11  ;;  %11223 = vmatpush1.bf16.msra.mxu0 %v14436_v10 }
0x17f8   :  { %11225 = vmatprep.subr.bf16.mxu0 %v14446_v4 }
0x17fa   :  { %11251 = vmatpush1.bf16.msra.mxu1 %v14429_v47 }
0x17fb   :  { %11253 = vmatprep.subr.bf16.mxu1 %v14438_v55  ;;  %11227 = vmatpush1.bf16.msra.mxu0 %v14448_v56 }
0x17fc   :  { %11229 = vmatprep.subr.bf16.mxu0 %v14457_v5 }
0x17fe   :  { %11255 = vmatpush1.bf16.msra.mxu1 %v14441_v20 }
0x17ff   :  { %11257 = vmatprep.subr.bf16.mxu1 %v14450_v23  ;;  %11231 = vmatpush1.bf16.msra.mxu0 %v14459_v34 }
0x1800   :  { %11233 = vmatprep.subr.bf16.mxu0 %v14467_v25 }
0x1802   :  { %11259 = vmatpush1.bf16.msra.mxu1 %v14453_v27 }
0x1803   :  { %11261 = vmatprep.subr.bf16.mxu1 %v14462_v15  ;;  %11235 = vmatpush1.bf16.msra.mxu0 %v14471_v37 }
0x1804   :  { %11237 = vmatprep.subr.bf16.mxu0 %v14479_v32 }
0x1806   :  { %11263 = vmatpush1.bf16.msra.mxu1 %v14465_v50 }
0x1807   :  { %11265 = vmatprep.subr.bf16.mxu1 %v14473_v8  ;;  %11239 = vmatpush1.bf16.msra.mxu0 %v14485_v62 }
0x1808   :  { %11241 = vmatprep.subr.bf16.mxu0 %v14491_v19 }
0x180a   :  { %11267 = vmatpush1.bf16.msra.mxu1 %v14477_v35 }
0x180b   :  { %11269 = vmatprep.subr.bf16.mxu1 %v14482_v60  ;;  %11243 = vmatpush1.bf16.msra.mxu0 %v14499_v30 }
0x180c   :  { %11277 = vmatprep.subr.bf16.mxu0 %v14410_v7 }
0x180e   :  { %11271 = vmatpush1.bf16.msra.mxu1 %v14489_v43 }
0x180f   :  { %11273 = vmatprep.subr.bf16.mxu1 %v14497_v9 }
0x1812   :  { %11275 = vmatpush1.bf16.msra.mxu1 %v14502_v21 }
0x1813   :  { %11309 = vmatprep.subr.bf16.mxu1 %v14414_v39 }
0x188f   :  { %v6764_v28 = vpop.f32.mrb[46].mxu0  ;;  %v6835_v1 = vpop.f32.mrb[48].mxu1 }
0x1890   :  { %v11836_v18 = vadd.f32 %v6764_v28, %v14020_v36  ;;  %v6766_v45 = vpop.f32.mrb[47].mxu0  ;;  %v6837_v22 = vpop.f32.mrb[49].mxu1  ;;  %v11852_v33 = vadd.f32 %v6835_v1, %v14032_v59 }
0x1891   :  { %v11837_v12 = vadd.f32 %v6766_v45, %v14023_v2  ;;  %v11853_v38 = vadd.f32 %v6837_v22, %v14028_v17 }
0x1892   :  { %v9372_v54 = vmul.f32 -1.442695, %v11836_v18 }
0x1893   :  { %v9373_v40 = vmul.f32 -1.442695, %v11837_v12  ;;  %v9374_v52 = vmul.f32 -1.442695, %v11853_v38 }
0x1894   :  { %12389 = vpow2.f32 %v9372_v54 }
0x1895   :  { %12391 = vpow2.f32 %v9373_v40 }
0x1896   :  { %12393 = vpow2.f32 %v9374_v52 }
0x1897   :  { %12395 = vtanh.f32 %v11852_v33 }
0x189e   :  { %v12390_v63 = vpop.eup %12389 }
0x189f   :  { %v12392_v51 = vpop.eup %12391  ;;  %v6847_v29 = vadd.f32 1.0, %v12390_v63 }
0x18a0   :  { %v6853_v16 = vadd.f32 1.0, %v12392_v51  ;;  %v12394_v36 = vpop.eup %12393 }
0x18a1   :  { %12397 = vrcp.f32 %v6847_v29  ;;  %v12396_v41 = vpop.eup %12395  ;;  %v6860_v6 = vadd.f32 1.0, %v12394_v36 }
0x18a2   :  { %12399 = vrcp.f32 %v6853_v16 }
0x18a3   :  { %12401 = vrcp.f32 %v6860_v6 }
0x18ab   :  { %v12398_v2 = vpop.eup %12397 }
0x18ac   :  { %v12400_v58 = vpop.eup %12399  ;;  %v6864_v42 = vmul.f32 %v12398_v2, %v12396_v41 }
0x18ad   :  { %v6863_v44 = vmul.f32 %v12400_v58, %v14373_v48  ;;  %v12402_v59 = vpop.eup %12401  ;;  %v6943_v48 = vld [vmem:[#allocation9 + $0xc] sm:$0xf] }
0x18ae   :  { %v14552_v28 = vrot.slane %v6943_v48, %v12963_v26  ;;  %v14555_v1 = vrot.slane %v6943_v48, %v12965_v31  ;;  %v14560_v33 = vrot.slane %v6943_v48, %v12977_v53  ;;  %v14564_v31 = vrot.slane %v6943_v48, %v12975_v49 }
0x18af   :  { %v6865_v17 = vadd.f32 %v6864_v42, %v6863_v44 }
0x18b1   :  { %12403 = vtanh.f32 %v6865_v17 }
0x18bb   :  { %v12404_v57 = vpop.eup %12403 }
0x18bc   :  { %v6867_v3 = vmul.f32 %v12404_v57, %v12402_v59 }
0x18be   :  { %7072 = vmatmul.mubr.f32.gmra.mrb[62].mxu0 %v6867_v3  ;;  %7185 = vmatmul.mubr.f32.gmra.mrb[64].mxu1 %v6867_v3 }
0x18bf   :  { %7356 = vmatprep.mubr.f32.mxu0 %v12635_v0  ;;  %7427 = vmatprep.mubr.f32.mxu1 %v12635_v0 }
0x18c2   :  { %7357 = vmatmul.mubr.f32.vlgmr.msra.gmra.mrb[48].mxu0 %v12635_v0  ;;  %7428 = vmatmul.mubr.f32.vlgmr.msra.gmra.mrb[50].mxu1 %v12635_v0 }
0x18c3   :  { %11279 = vmatpush1.bf16.msra.mxu0 %v14412_v46  ;;  %11311 = vmatpush1.bf16.msra.mxu1 %v14417_v24 }
0x18c4   :  { %11281 = vmatprep.subr.bf16.mxu0 %v14422_v13  ;;  %11313 = vmatprep.subr.bf16.mxu1 %v14426_v11 }
0x18c5   :  { %7595 = vmatprep.mubr.f32.mxu0 %v12635_v0  ;;  %7666 = vmatprep.mubr.f32.mxu1 %v12635_v0 }
0x18c7   :  { %11283 = vmatpush1.bf16.msra.mxu0 %v14424_v14  ;;  %11315 = vmatpush1.bf16.msra.mxu1 %v14429_v47 }
0x18c8   :  { %11285 = vmatprep.subr.bf16.mxu0 %v14434_v61  ;;  %11317 = vmatprep.subr.bf16.mxu1 %v14438_v55 }
0x18cb   :  { %11287 = vmatpush1.bf16.msra.mxu0 %v14436_v10  ;;  %11319 = vmatpush1.bf16.msra.mxu1 %v14441_v20 }
0x18cc   :  { %11289 = vmatprep.subr.bf16.mxu0 %v14446_v4  ;;  %11321 = vmatprep.subr.bf16.mxu1 %v14450_v23 }
0x18cf   :  { %11291 = vmatpush1.bf16.msra.mxu0 %v14448_v56  ;;  %11323 = vmatpush1.bf16.msra.mxu1 %v14453_v27 }
0x18d0   :  { %11293 = vmatprep.subr.bf16.mxu0 %v14457_v5  ;;  %11325 = vmatprep.subr.bf16.mxu1 %v14462_v15 }
0x18d3   :  { %11295 = vmatpush1.bf16.msra.mxu0 %v14459_v34  ;;  %11327 = vmatpush1.bf16.msra.mxu1 %v14465_v50 }
0x18d4   :  { %11297 = vmatprep.subr.bf16.mxu0 %v14467_v25  ;;  %11329 = vmatprep.subr.bf16.mxu1 %v14473_v8 }
0x18d7   :  { %11299 = vmatpush1.bf16.msra.mxu0 %v14471_v37  ;;  %11331 = vmatpush1.bf16.msra.mxu1 %v14477_v35 }
0x18d8   :  { %11301 = vmatprep.subr.bf16.mxu0 %v14479_v32  ;;  %11333 = vmatprep.subr.bf16.mxu1 %v14482_v60 }
0x18db   :  { %11303 = vmatpush1.bf16.msra.mxu0 %v14485_v62  ;;  %11335 = vmatpush1.bf16.msra.mxu1 %v14489_v43 }
0x18dc   :  { %11305 = vmatprep.subr.bf16.mxu0 %v14491_v19  ;;  %11337 = vmatprep.subr.bf16.mxu1 %v14497_v9 }
0x18df   :  { %11307 = vmatpush1.bf16.msra.mxu0 %v14499_v30  ;;  %11339 = vmatpush1.bf16.msra.mxu1 %v14502_v21 }
0x18e0   :  { %11341 = vmatprep.subr.bf16.mxu0 %v14410_v7  ;;  %11373 = vmatprep.subr.bf16.mxu1 %v14414_v39 }
0x1995   :  { %v7358_v18 = vpop.f32.mrb[48].mxu0  ;;  %v7429_v45 = vpop.f32.mrb[50].mxu1 }
0x1996   :  { %v11854_v22 = vadd.f32 %v7358_v18, %v14552_v28  ;;  %v7360_v12 = vpop.f32.mrb[49].mxu0  ;;  %v7431_v54 = vpop.f32.mrb[51].mxu1  ;;  %v11870_v51 = vadd.f32 %v7429_v45, %v14564_v31 }
0x1997   :  { %v11855_v40 = vadd.f32 %v7360_v12, %v14555_v1  ;;  %v11871_v26 = vadd.f32 %v7431_v54, %v14560_v33 }
0x1998   :  { %v9375_v38 = vmul.f32 -1.442695, %v11854_v22 }
0x1999   :  { %v9376_v52 = vmul.f32 -1.442695, %v11855_v40  ;;  %v9377_v63 = vmul.f32 -1.442695, %v11871_v26 }
0x199a   :  { %12405 = vpow2.f32 %v9375_v38 }
0x199b   :  { %12407 = vpow2.f32 %v9376_v52 }
0x199c   :  { %12409 = vpow2.f32 %v9377_v63 }
0x199d   :  { %12411 = vtanh.f32 %v11870_v51 }
0x19a4   :  { %v12406_v29 = vpop.eup %12405 }
0x19a5   :  { %v12408_v16 = vpop.eup %12407  ;;  %v7441_v36 = vadd.f32 1.0, %v12406_v29 }
0x19a6   :  { %v7447_v41 = vadd.f32 1.0, %v12408_v16  ;;  %v12410_v53 = vpop.eup %12409 }
0x19a7   :  { %12413 = vrcp.f32 %v7441_v36  ;;  %v12412_v2 = vpop.eup %12411  ;;  %v7454_v44 = vadd.f32 1.0, %v12410_v53 }
0x19a8   :  { %12415 = vrcp.f32 %v7447_v41 }
0x19a9   :  { %12417 = vrcp.f32 %v7454_v44 }
0x19b1   :  { %v12414_v58 = vpop.eup %12413 }
0x19b2   :  { %v12416_v42 = vpop.eup %12415  ;;  %v7458_v6 = vmul.f32 %v12414_v58, %v12412_v2 }
0x19b3   :  { %v7457_v17 = vmul.f32 0.0, %v12416_v42  ;;  %v12418_v59 = vpop.eup %12417 }
0x19b5   :  { %v14567_v49 = vadd.f32 %v7458_v6, %v7457_v17 }
0x19b7   :  { %12419 = vtanh.f32 %v14567_v49 }
0x19c1   :  { %v12420_v57 = vpop.eup %12419 }
0x19c2   :  { %v14570_v3 = vmul.f32 %v12420_v57, %v12418_v59  ;;  %v8184_v57 = vld [vmem:[#allocation8 + $0x600] sm:$0xff] }
0x19c4   :  { %7596 = vmatmul.mubr.f32.vlgmr.msra.gmra.mrb[50].mxu0 %v14570_v3  ;;  %7667 = vmatmul.mubr.f32.vlgmr.msra.gmra.mrb[52].mxu1 %v14570_v3 }
0x19c5   :  { %11343 = vmatpush1.bf16.msra.mxu0 %v14412_v46  ;;  %11375 = vmatpush1.bf16.msra.mxu1 %v14417_v24 }
0x19c6   :  { %11345 = vmatprep.subr.bf16.mxu0 %v14422_v13  ;;  %11377 = vmatprep.subr.bf16.mxu1 %v14426_v11 }
0x19c7   :  { %7834 = vmatprep.mubr.f32.mxu0 %v12635_v0  ;;  %7905 = vmatprep.mubr.f32.mxu1 %v12635_v0 }
0x19c9   :  { %11347 = vmatpush1.bf16.msra.mxu0 %v14424_v14  ;;  %11379 = vmatpush1.bf16.msra.mxu1 %v14429_v47 }
0x19ca   :  { %11349 = vmatprep.subr.bf16.mxu0 %v14434_v61  ;;  %11381 = vmatprep.subr.bf16.mxu1 %v14438_v55 }
0x19cd   :  { %11351 = vmatpush1.bf16.msra.mxu0 %v14436_v10  ;;  %11383 = vmatpush1.bf16.msra.mxu1 %v14441_v20 }
0x19ce   :  { %11353 = vmatprep.subr.bf16.mxu0 %v14446_v4  ;;  %11385 = vmatprep.subr.bf16.mxu1 %v14450_v23 }
0x19d1   :  { %11355 = vmatpush1.bf16.msra.mxu0 %v14448_v56  ;;  %11387 = vmatpush1.bf16.msra.mxu1 %v14453_v27 }
0x19d2   :  { %11357 = vmatprep.subr.bf16.mxu0 %v14457_v5  ;;  %11389 = vmatprep.subr.bf16.mxu1 %v14462_v15 }
0x19d5   :  { %11359 = vmatpush1.bf16.msra.mxu0 %v14459_v34  ;;  %11391 = vmatpush1.bf16.msra.mxu1 %v14465_v50 }
0x19d6   :  { %11361 = vmatprep.subr.bf16.mxu0 %v14467_v25  ;;  %11393 = vmatprep.subr.bf16.mxu1 %v14473_v8 }
0x19d9   :  { %11363 = vmatpush1.bf16.msra.mxu0 %v14471_v37  ;;  %11395 = vmatpush1.bf16.msra.mxu1 %v14477_v35 }
0x19da   :  { %11365 = vmatprep.subr.bf16.mxu0 %v14479_v32  ;;  %11397 = vmatprep.subr.bf16.mxu1 %v14482_v60 }
0x19dd   :  { %11367 = vmatpush1.bf16.msra.mxu0 %v14485_v62  ;;  %11399 = vmatpush1.bf16.msra.mxu1 %v14489_v43 }
0x19de   :  { %11369 = vmatprep.subr.bf16.mxu0 %v14491_v19  ;;  %11401 = vmatprep.subr.bf16.mxu1 %v14497_v9 }
0x19e1   :  { %11371 = vmatpush1.bf16.msra.mxu0 %v14499_v30  ;;  %11403 = vmatpush1.bf16.msra.mxu1 %v14502_v21 }
0x19e2   :  { %11405 = vmatprep.subr.bf16.mxu0 %v14410_v7  ;;  %11437 = vmatprep.subr.bf16.mxu1 %v14414_v39 }
0x1a97   :  { %v7597_v48 = vpop.f32.mrb[50].mxu0  ;;  %v7668_v18 = vpop.f32.mrb[52].mxu1 }
0x1a98   :  { %v11856_v45 = vadd.f32 %v7597_v48, %v14552_v28  ;;  %v7599_v22 = vpop.f32.mrb[51].mxu0  ;;  %v7670_v12 = vpop.f32.mrb[53].mxu1  ;;  %v11872_v63 = vadd.f32 %v7668_v18, %v14564_v31  ;;  %v8188_v48 = vld [vmem:[#allocation8 + $0x620] sm:$0xff] }
0x1a99   :  { %v11857_v54 = vadd.f32 %v7599_v22, %v14555_v1  ;;  %v11873_v52 = vadd.f32 %v7670_v12, %v14560_v33  ;;  %v8186_v22 = vld [vmem:[#allocation8 + $0x610] sm:$0xff] }
0x1a9a   :  { %v9378_v40 = vmul.f32 -1.442695, %v11856_v45  ;;  %v14670_v45 = vpack.c.bf16 %v8188_v48, %v8184_v57  ;;  %v8190_v12 = vld [vmem:[#allocation8 + $0x630] sm:$0xff]  ;;  %v8225_v48 = vld [vmem:[#allocation8 + $0x748] sm:$0xff] }
0x1a9b   :  { %v9379_v38 = vmul.f32 -1.442695, %v11857_v54  ;;  %v9380_v26 = vmul.f32 -1.442695, %v11873_v52  ;;  %v14673_v54 = vpack.c.bf16 %v8190_v12, %v8186_v22  ;;  %v8195_v52 = vld [vmem:[#allocation8 + $0x658] sm:$0xff]  ;;  %v8229_v22 = vld [vmem:[#allocation8 + $0x768] sm:$0xff] }
0x1a9c   :  { %12421 = vpow2.f32 %v9378_v40  ;;  %v8193_v40 = vld [vmem:[#allocation8 + $0x648] sm:$0xff]  ;;  %v8227_v12 = vld [vmem:[#allocation8 + $0x758] sm:$0xff] }
0x1a9d   :  { %12423 = vpow2.f32 %v9379_v38  ;;  %v8197_v38 = vld [vmem:[#allocation8 + $0x668] sm:$0xff] }
0x1a9e   :  { %12425 = vpow2.f32 %v9380_v26  ;;  %v14678_v26 = vpack.c.bf16 %v8197_v38, %v8193_v40  ;;  %v14725_v40 = vpack.c.bf16 %v8229_v22, %v8225_v48  ;;  %v8231_v38 = vld [vmem:[#allocation8 + $0x778] sm:$0xff] }
0x1a9f   :  { %12427 = vtanh.f32 %v11872_v63  ;;  %v8199_v63 = vld [vmem:[#allocation8 + $0x678] sm:$0xff] }
0x1aa6   :  { %v12422_v7 = vpop.eup %12421 }
0x1aa7   :  { %v12424_v51 = vpop.eup %12423  ;;  %v7680_v39 = vadd.f32 1.0, %v12422_v7  ;;  %v8192_v7 = vld [vmem:[#allocation8 + $0x640] sm:$0xff] }
0x1aa8   :  { %v7686_v29 = vadd.f32 1.0, %v12424_v51  ;;  %v12426_v16 = vpop.eup %12425  ;;  %v8196_v51 = vld [vmem:[#allocation8 + $0x660] sm:$0xff] }
0x1aa9   :  { %12429 = vrcp.f32 %v7680_v39  ;;  %v12428_v36 = vpop.eup %12427  ;;  %v7693_v58 = vadd.f32 1.0, %v12426_v16  ;;  %v14680_v39 = vpack.c.bf16 %v8199_v63, %v8195_v52  ;;  %v8194_v16 = vld [vmem:[#allocation8 + $0x650] sm:$0xff]  ;;  %v8224_v52 = vld [vmem:[#allocation8 + $0x740] sm:$0xff] }
0x1aaa   :  { %12431 = vrcp.f32 %v7686_v29  ;;  %v14682_v29 = vpack.c.bf16 %v8196_v51, %v8192_v7  ;;  %v8228_v63 = vld [vmem:[#allocation8 + $0x760] sm:$0xff]  ;;  %v14728_v7 = vpack.c.bf16 %v8231_v38, %v8227_v12 }
0x1aab   :  { %12433 = vrcp.f32 %v7693_v58  ;;  %v8203_v58 = vld [vmem:[#allocation8 + $0x698] sm:$0xff]  ;;  %v14730_v51 = vpack.c.bf16 %v8228_v63, %v8224_v52 }
0x1ab3   :  { %v12430_v41 = vpop.eup %12429 }
0x1ab4   :  { %v12432_v53 = vpop.eup %12431  ;;  %v7697_v2 = vmul.f32 %v12430_v41, %v12428_v36  ;;  %v8198_v36 = vld [vmem:[#allocation8 + $0x670] sm:$0xff] }
0x1ab5   :  { %v7696_v42 = vmul.f32 %v12432_v53, %v14567_v49  ;;  %v12434_v44 = vpop.eup %12433  ;;  %v8191_v49 = vld [vmem:[#allocation8 + $0x638] sm:$0xff]  ;;  %v14685_v41 = vpack.c.bf16 %v8198_v36, %v8194_v16  ;;  %v8201_v53 = vld [vmem:[#allocation8 + $0x688] sm:$0xff]  ;;  %v8226_v16 = vld [vmem:[#allocation8 + $0x750] sm:$0xff] }
0x1ab6   :  { %v8230_v36 = vld [vmem:[#allocation8 + $0x770] sm:$0xff] }
0x1ab7   :  { %v14613_v6 = vadd.f32 %v7697_v2, %v7696_v42  ;;  %v8205_v2 = vld [vmem:[#allocation8 + $0x6a8] sm:$0xff] }
0x1ab8   :  { %v14690_v42 = vpack.c.bf16 %v8205_v2, %v8201_v53  ;;  %v8233_v53 = vld [vmem:[#allocation8 + $0x788] sm:$0xff]  ;;  %v14733_v2 = vpack.c.bf16 %v8230_v36, %v8226_v16 }
0x1ab9   :  { %12435 = vtanh.f32 %v14613_v6 }
0x1ac3   :  { %v12436_v17 = vpop.eup %12435 }
0x1ac4   :  { %v14616_v59 = vmul.f32 %v12436_v17, %v12434_v44  ;;  %v8200_v44 = vld [vmem:[#allocation8 + $0x680] sm:$0xff] }
0x1ac5   :  { %v8204_v17 = vld [vmem:[#allocation8 + $0x6a0] sm:$0xff] }
0x1ac6   :  { %7835 = vmatmul.mubr.f32.vlgmr.msra.gmra.mrb[52].mxu0 %v14616_v59  ;;  %7906 = vmatmul.mubr.f32.vlgmr.msra.gmra.mrb[54].mxu1 %v14616_v59 }
0x1ac7   :  { %11407 = vmatpush1.bf16.msra.mxu0 %v14412_v46  ;;  %11439 = vmatpush1.bf16.msra.mxu1 %v14417_v24 }
0x1ac8   :  { %11409 = vmatprep.subr.bf16.mxu0 %v14422_v13  ;;  %11441 = vmatprep.subr.bf16.mxu1 %v14426_v11 }
0x1ac9   :  { %8073 = vmatprep.mubr.f32.mxu0 %v12635_v0  ;;  %8144 = vmatprep.mubr.f32.mxu1 %v12635_v0 }
0x1acb   :  { %11411 = vmatpush1.bf16.msra.mxu0 %v14424_v14  ;;  %11443 = vmatpush1.bf16.msra.mxu1 %v14429_v47 }
0x1acc   :  { %11413 = vmatprep.subr.bf16.mxu0 %v14434_v61  ;;  %11445 = vmatprep.subr.bf16.mxu1 %v14438_v55 }
0x1acf   :  { %11415 = vmatpush1.bf16.msra.mxu0 %v14436_v10  ;;  %11447 = vmatpush1.bf16.msra.mxu1 %v14441_v20 }
0x1ad0   :  { %11417 = vmatprep.subr.bf16.mxu0 %v14446_v4  ;;  %11449 = vmatprep.subr.bf16.mxu1 %v14450_v23 }
0x1ad3   :  { %11419 = vmatpush1.bf16.msra.mxu0 %v14448_v56  ;;  %11451 = vmatpush1.bf16.msra.mxu1 %v14453_v27 }
0x1ad4   :  { %11421 = vmatprep.subr.bf16.mxu0 %v14457_v5  ;;  %11453 = vmatprep.subr.bf16.mxu1 %v14462_v15 }
0x1ad7   :  { %11423 = vmatpush1.bf16.msra.mxu0 %v14459_v34  ;;  %11455 = vmatpush1.bf16.msra.mxu1 %v14465_v50 }
0x1ad8   :  { %11425 = vmatprep.subr.bf16.mxu0 %v14467_v25  ;;  %11457 = vmatprep.subr.bf16.mxu1 %v14473_v8 }
0x1adb   :  { %11427 = vmatpush1.bf16.msra.mxu0 %v14471_v37  ;;  %11459 = vmatpush1.bf16.msra.mxu1 %v14477_v35 }
0x1adc   :  { %11429 = vmatprep.subr.bf16.mxu0 %v14479_v32  ;;  %11461 = vmatprep.subr.bf16.mxu1 %v14482_v60 }
0x1adf   :  { %11431 = vmatpush1.bf16.msra.mxu0 %v14485_v62  ;;  %11463 = vmatpush1.bf16.msra.mxu1 %v14489_v43 }
0x1ae0   :  { %11433 = vmatprep.subr.bf16.mxu0 %v14491_v19  ;;  %11465 = vmatprep.subr.bf16.mxu1 %v14497_v9  ;;  %v8185_v19 = vld [vmem:[#allocation8 + $0x608] sm:$0xff] }
0x1ae1   :  { %v8189_v9 = vld [vmem:[#allocation8 + $0x628] sm:$0xff] }
0x1ae3   :  { %11435 = vmatpush1.bf16.msra.mxu0 %v14499_v30  ;;  %11467 = vmatpush1.bf16.msra.mxu1 %v14502_v21  ;;  %v8187_v30 = vld [vmem:[#allocation8 + $0x618] sm:$0xff]  ;;  %v14666_v21 = vpack.c.bf16 %v8189_v9, %v8185_v19 }
0x1ae4   :  { %v14668_v18 = vpack.c.bf16 %v8191_v49, %v8187_v30  ;;  %v8218_v30 = vld [vmem:[#allocation8 + $0x710] sm:$0xff] }
0x1ae5   :  { %11469 = vmatprep.subr.bf16.mxu0 %v14666_v21  ;;  %v8222_v49 = vld [vmem:[#allocation8 + $0x730] sm:$0xff] }
0x1ae6   :  { %11501 = vmatprep.subr.bf16.mxu1 %v14668_v18  ;;  %v14721_v57 = vpack.c.bf16 %v8222_v49, %v8218_v30  ;;  %v8246_v30 = vld [vmem:[#allocation8 + $0x7f0] sm:$0xff] }
0x1b99   :  { %v7836_v46 = vpop.f32.mrb[52].mxu0  ;;  %v7907_v24 = vpop.f32.mrb[54].mxu1 }
0x1b9a   :  { %v11858_v13 = vadd.f32 %v7836_v46, %v14552_v28  ;;  %v7838_v14 = vpop.f32.mrb[53].mxu0  ;;  %v7909_v11 = vpop.f32.mrb[55].mxu1  ;;  %v11874_v4 = vadd.f32 %v7907_v24, %v14564_v31  ;;  %v14694_v24 = vpack.c.bf16 %v8204_v17, %v8200_v44  ;;  %v8239_v44 = vld [vmem:[#allocation8 + $0x7b8] sm:$0xff] }
0x1b9b   :  { %v11859_v47 = vadd.f32 %v7838_v14, %v14555_v1  ;;  %v11875_v55 = vadd.f32 %v7909_v11, %v14560_v33  ;;  %v8206_v14 = vld [vmem:[#allocation8 + $0x6b0] sm:$0xff] }
0x1b9c   :  { %v9381_v61 = vmul.f32 -1.442695, %v11858_v13  ;;  %v8202_v13 = vld [vmem:[#allocation8 + $0x690] sm:$0xff] }
0x1b9d   :  { %v9382_v10 = vmul.f32 -1.442695, %v11859_v47  ;;  %v9383_v20 = vmul.f32 -1.442695, %v11875_v55  ;;  %v14697_v11 = vpack.c.bf16 %v8206_v14, %v8202_v13  ;;  %v8209_v47 = vld [vmem:[#allocation8 + $0x6c8] sm:$0xff]  ;;  %v8232_v14 = vld [vmem:[#allocation8 + $0x780] sm:$0xff] }
0x1b9e   :  { %12437 = vpow2.f32 %v9381_v61  ;;  %v8213_v61 = vld [vmem:[#allocation8 + $0x6e8] sm:$0xff] }
0x1b9f   :  { %12439 = vpow2.f32 %v9382_v10  ;;  %v8211_v10 = vld [vmem:[#allocation8 + $0x6d8] sm:$0xff]  ;;  %v14702_v55 = vpack.c.bf16 %v8213_v61, %v8209_v47  ;;  %v8236_v47 = vld [vmem:[#allocation8 + $0x7a0] sm:$0xff]  ;;  %v8234_v61 = vld [vmem:[#allocation8 + $0x790] sm:$0xff] }
0x1ba0   :  { %12441 = vpow2.f32 %v9383_v20  ;;  %v8215_v20 = vld [vmem:[#allocation8 + $0x6f8] sm:$0xff] }
0x1ba1   :  { %12443 = vtanh.f32 %v11874_v4  ;;  %v8208_v4 = vld [vmem:[#allocation8 + $0x6c0] sm:$0xff] }
0x1ba8   :  { %v12438_v56 = vpop.eup %12437 }
0x1ba9   :  { %v12440_v23 = vpop.eup %12439  ;;  %v7919_v27 = vadd.f32 1.0, %v12438_v56  ;;  %v8212_v56 = vld [vmem:[#allocation8 + $0x6e0] sm:$0xff] }
0x1baa   :  { %v7925_v5 = vadd.f32 1.0, %v12440_v23  ;;  %v12442_v34 = vpop.eup %12441  ;;  %v14704_v23 = vpack.c.bf16 %v8215_v20, %v8211_v10  ;;  %v14741_v10 = vpack.c.bf16 %v8236_v47, %v8232_v14  ;;  %v8238_v20 = vld [vmem:[#allocation8 + $0x7b0] sm:$0xff] }
0x1bab   :  { %12445 = vrcp.f32 %v7919_v27  ;;  %v12444_v15 = vpop.eup %12443  ;;  %v7932_v8 = vadd.f32 1.0, %v12442_v34  ;;  %v14706_v27 = vpack.c.bf16 %v8212_v56, %v8208_v4  ;;  %v8214_v34 = vld [vmem:[#allocation8 + $0x6f0] sm:$0xff]  ;;  %v8241_v4 = vld [vmem:[#allocation8 + $0x7c8] sm:$0xff] }
0x1bac   :  { %12447 = vrcp.f32 %v7925_v5  ;;  %v8210_v5 = vld [vmem:[#allocation8 + $0x6d0] sm:$0xff]  ;;  %v8245_v56 = vld [vmem:[#allocation8 + $0x7e8] sm:$0xff] }
0x1bad   :  { %12449 = vrcp.f32 %v7932_v8 }
0x1bb5   :  { %v12446_v50 = vpop.eup %12445 }
0x1bb6   :  { %v12448_v25 = vpop.eup %12447  ;;  %v7936_v37 = vmul.f32 %v12446_v50, %v12444_v15  ;;  %v14709_v15 = vpack.c.bf16 %v8214_v34, %v8210_v5  ;;  %v8217_v50 = vld [vmem:[#allocation8 + $0x708] sm:$0xff]  ;;  %v14745_v5 = vpack.c.bf16 %v8238_v20, %v8234_v61  ;;  %v14747_v34 = vpack.c.bf16 %v8245_v56, %v8241_v4 }
0x1bb7   :  { %v7935_v35 = vmul.f32 %v12448_v25, %v14613_v6  ;;  %v12450_v60 = vpop.eup %12449  ;;  %v8207_v6 = vld [vmem:[#allocation8 + $0x6b8] sm:$0xff]  ;;  %v8221_v25 = vld [vmem:[#allocation8 + $0x728] sm:$0xff] }
0x1bb8   :  { %v14692_v46 = vpack.c.bf16 %v8207_v6, %v8203_v58  ;;  %v14714_v8 = vpack.c.bf16 %v8221_v25, %v8217_v50  ;;  %v8237_v58 = vld [vmem:[#allocation8 + $0x7a8] sm:$0xff]  ;;  %v8235_v6 = vld [vmem:[#allocation8 + $0x798] sm:$0xff] }
0x1bb9   :  { %v14657_v32 = vadd.f32 %v7936_v37, %v7935_v35  ;;  %v8219_v37 = vld [vmem:[#allocation8 + $0x718] sm:$0xff]  ;;  %v14736_v17 = vpack.c.bf16 %v8237_v58, %v8233_v53  ;;  %v14738_v13 = vpack.c.bf16 %v8239_v44, %v8235_v6 }
0x1bba   :  { %v8223_v35 = vld [vmem:[#allocation8 + $0x738] sm:$0xff] }
0x1bbb   :  { %12451 = vtanh.f32 %v14657_v32  ;;  %v14716_v19 = vpack.c.bf16 %v8223_v35, %v8219_v37  ;;  %v8243_v50 = vld [vmem:[#allocation8 + $0x7d8] sm:$0xff]  ;;  %v8240_v37 = vld [vmem:[#allocation8 + $0x7c0] sm:$0xff] }
0x1bbc   :  { %v8247_v25 = vld [vmem:[#allocation8 + $0x7f8] sm:$0xff] }
0x1bbd   :  { %v14750_v35 = vpack.c.bf16 %v8247_v25, %v8243_v50 }
0x1bc5   :  { %v12452_v62 = vpop.eup %12451 }
0x1bc6   :  { %v14660_v43 = vmul.f32 %v12452_v62, %v12450_v60  ;;  %v8216_v60 = vld [vmem:[#allocation8 + $0x700] sm:$0xff] }
0x1bc7   :  { %v8220_v62 = vld [vmem:[#allocation8 + $0x720] sm:$0xff] }
0x1bc8   :  { %8074 = vmatmul.mubr.f32.vlgmr.msra.gmra.mrb[54].mxu0 %v14660_v43  ;;  %8145 = vmatmul.mubr.f32.vlgmr.msra.gmra.mrb[56].mxu1 %v14660_v43  ;;  %v14718_v9 = vpack.c.bf16 %v8220_v62, %v8216_v60  ;;  %v8244_v60 = vld [vmem:[#allocation8 + $0x7e0] sm:$0xff]  ;;  %v8242_v62 = vld [vmem:[#allocation8 + $0x7d0] sm:$0xff] }
0x1bc9   :  { %8312 = vmatprep.mubr.f32.mxu0 %v12635_v0  ;;  %8383 = vmatprep.mubr.f32.mxu1 %v12635_v0  ;;  %v14753_v49 = vpack.c.bf16 %v8244_v60, %v8240_v37  ;;  %v14757_v48 = vpack.c.bf16 %v8246_v30, %v8242_v62 }
0x1bca   :  { %11471 = vmatpush1.bf16.msra.mxu0 %v14670_v45  ;;  %11503 = vmatpush1.bf16.msra.mxu1 %v14673_v54 }
0x1bcb   :  { %11473 = vmatprep.subr.bf16.mxu0 %v14678_v26  ;;  %11505 = vmatprep.subr.bf16.mxu1 %v14680_v39 }
0x1bce   :  { %11475 = vmatpush1.bf16.msra.mxu0 %v14682_v29  ;;  %11507 = vmatpush1.bf16.msra.mxu1 %v14685_v41 }
0x1bcf   :  { %11477 = vmatprep.subr.bf16.mxu0 %v14690_v42  ;;  %11509 = vmatprep.subr.bf16.mxu1 %v14692_v46 }
0x1bd2   :  { %11479 = vmatpush1.bf16.msra.mxu0 %v14694_v24  ;;  %11511 = vmatpush1.bf16.msra.mxu1 %v14697_v11 }
0x1bd3   :  { %11481 = vmatprep.subr.bf16.mxu0 %v14702_v55  ;;  %11513 = vmatprep.subr.bf16.mxu1 %v14704_v23 }
0x1bd6   :  { %11483 = vmatpush1.bf16.msra.mxu0 %v14706_v27  ;;  %11515 = vmatpush1.bf16.msra.mxu1 %v14709_v15 }
0x1bd7   :  { %11485 = vmatprep.subr.bf16.mxu0 %v14714_v8  ;;  %11517 = vmatprep.subr.bf16.mxu1 %v14716_v19 }
0x1bda   :  { %11487 = vmatpush1.bf16.msra.mxu0 %v14718_v9  ;;  %11519 = vmatpush1.bf16.msra.mxu1 %v14721_v57 }
0x1bdb   :  { %11489 = vmatprep.subr.bf16.mxu0 %v14725_v40  ;;  %11521 = vmatprep.subr.bf16.mxu1 %v14728_v7 }
0x1bde   :  { %11491 = vmatpush1.bf16.msra.mxu0 %v14730_v51  ;;  %11523 = vmatpush1.bf16.msra.mxu1 %v14733_v2 }
0x1bdf   :  { %11493 = vmatprep.subr.bf16.mxu0 %v14736_v17  ;;  %11525 = vmatprep.subr.bf16.mxu1 %v14738_v13 }
0x1be2   :  { %11495 = vmatpush1.bf16.msra.mxu0 %v14741_v10  ;;  %11527 = vmatpush1.bf16.msra.mxu1 %v14745_v5 }
0x1be3   :  { %11497 = vmatprep.subr.bf16.mxu0 %v14747_v34  ;;  %11529 = vmatprep.subr.bf16.mxu1 %v14750_v35 }
0x1be6   :  { %11499 = vmatpush1.bf16.msra.mxu0 %v14753_v49  ;;  %11531 = vmatpush1.bf16.msra.mxu1 %v14757_v48 }
0x1be7   :  { %11533 = vmatprep.subr.bf16.mxu0 %v14666_v21  ;;  %11565 = vmatprep.subr.bf16.mxu1 %v14668_v18 }
0x1c9b   :  { %v8075_v22 = vpop.f32.mrb[54].mxu0  ;;  %v8146_v12 = vpop.f32.mrb[56].mxu1 }
0x1c9c   :  { %v11860_v38 = vadd.f32 %v8075_v22, %v14552_v28  ;;  %v8077_v52 = vpop.f32.mrb[55].mxu0  ;;  %v8148_v63 = vpop.f32.mrb[57].mxu1  ;;  %v11876_v44 = vadd.f32 %v8146_v12, %v14564_v31 }
0x1c9d   :  { %v11861_v16 = vadd.f32 %v8077_v52, %v14555_v1  ;;  %v11877_v58 = vadd.f32 %v8148_v63, %v14560_v33 }
0x1c9e   :  { %v9384_v36 = vmul.f32 -1.442695, %v11860_v38 }
0x1c9f   :  { %v9385_v53 = vmul.f32 -1.442695, %v11861_v16  ;;  %v9386_v6 = vmul.f32 -1.442695, %v11877_v58 }
0x1ca0   :  { %12453 = vpow2.f32 %v9384_v36 }
0x1ca1   :  { %12455 = vpow2.f32 %v9385_v53 }
0x1ca2   :  { %12457 = vpow2.f32 %v9386_v6 }
0x1ca3   :  { %12459 = vtanh.f32 %v11876_v44 }
0x1caa   :  { %v12454_v14 = vpop.eup %12453 }
0x1cab   :  { %v12456_v47 = vpop.eup %12455  ;;  %v8158_v61 = vadd.f32 1.0, %v12454_v14 }
0x1cac   :  { %v8164_v20 = vadd.f32 1.0, %v12456_v47  ;;  %v12458_v4 = vpop.eup %12457 }
0x1cad   :  { %12461 = vrcp.f32 %v8158_v61  ;;  %v12460_v56 = vpop.eup %12459  ;;  %v8171_v60 = vadd.f32 1.0, %v12458_v4 }
0x1cae   :  { %12463 = vrcp.f32 %v8164_v20 }
0x1caf   :  { %12465 = vrcp.f32 %v8171_v60 }
0x1cb7   :  { %v12462_v50 = vpop.eup %12461 }
0x1cb8   :  { %v12464_v25 = vpop.eup %12463  ;;  %v8175_v37 = vmul.f32 %v12462_v50, %v12460_v56 }
0x1cb9   :  { %v8174_v62 = vmul.f32 %v12464_v25, %v14657_v32  ;;  %v12466_v22 = vpop.eup %12465 }
0x1cbb   :  { %v14769_v30 = vadd.f32 %v8175_v37, %v8174_v62 }
0x1cbd   :  { %12467 = vtanh.f32 %v14769_v30 }
0x1cc7   :  { %v12468_v12 = vpop.eup %12467 }
0x1cc8   :  { %v14772_v38 = vmul.f32 %v12468_v12, %v12466_v22 }
0x1cca   :  { %8313 = vmatmul.mubr.f32.vlgmr.msra.gmra.mrb[56].mxu0 %v14772_v38  ;;  %8384 = vmatmul.mubr.f32.vlgmr.msra.gmra.mrb[58].mxu1 %v14772_v38 }
0x1ccb   :  { %11535 = vmatpush1.bf16.msra.mxu0 %v14670_v45  ;;  %11567 = vmatpush1.bf16.msra.mxu1 %v14673_v54 }
0x1ccc   :  { %11537 = vmatprep.subr.bf16.mxu0 %v14678_v26  ;;  %11569 = vmatprep.subr.bf16.mxu1 %v14680_v39 }
0x1ccd   :  { %8551 = vmatprep.mubr.f32.mxu0 %v12635_v0  ;;  %8622 = vmatprep.mubr.f32.mxu1 %v12635_v0 }
0x1ccf   :  { %11539 = vmatpush1.bf16.msra.mxu0 %v14682_v29  ;;  %11571 = vmatpush1.bf16.msra.mxu1 %v14685_v41 }
0x1cd0   :  { %11541 = vmatprep.subr.bf16.mxu0 %v14690_v42  ;;  %11573 = vmatprep.subr.bf16.mxu1 %v14692_v46 }
0x1cd3   :  { %11543 = vmatpush1.bf16.msra.mxu0 %v14694_v24  ;;  %11575 = vmatpush1.bf16.msra.mxu1 %v14697_v11 }
0x1cd4   :  { %11545 = vmatprep.subr.bf16.mxu0 %v14702_v55  ;;  %11577 = vmatprep.subr.bf16.mxu1 %v14704_v23 }
0x1cd7   :  { %11547 = vmatpush1.bf16.msra.mxu0 %v14706_v27  ;;  %11579 = vmatpush1.bf16.msra.mxu1 %v14709_v15 }
0x1cd8   :  { %11549 = vmatprep.subr.bf16.mxu0 %v14714_v8  ;;  %11581 = vmatprep.subr.bf16.mxu1 %v14716_v19 }
0x1cdb   :  { %11551 = vmatpush1.bf16.msra.mxu0 %v14718_v9  ;;  %11583 = vmatpush1.bf16.msra.mxu1 %v14721_v57 }
0x1cdc   :  { %11553 = vmatprep.subr.bf16.mxu0 %v14725_v40  ;;  %11585 = vmatprep.subr.bf16.mxu1 %v14728_v7 }
0x1cdf   :  { %11555 = vmatpush1.bf16.msra.mxu0 %v14730_v51  ;;  %11587 = vmatpush1.bf16.msra.mxu1 %v14733_v2 }
0x1ce0   :  { %11557 = vmatprep.subr.bf16.mxu0 %v14736_v17  ;;  %11589 = vmatprep.subr.bf16.mxu1 %v14738_v13 }
0x1ce3   :  { %11559 = vmatpush1.bf16.msra.mxu0 %v14741_v10  ;;  %11591 = vmatpush1.bf16.msra.mxu1 %v14745_v5 }
0x1ce4   :  { %11561 = vmatprep.subr.bf16.mxu0 %v14747_v34  ;;  %11593 = vmatprep.subr.bf16.mxu1 %v14750_v35 }
0x1ce7   :  { %11563 = vmatpush1.bf16.msra.mxu0 %v14753_v49  ;;  %11595 = vmatpush1.bf16.msra.mxu1 %v14757_v48 }
0x1ce8   :  { %11597 = vmatprep.subr.bf16.mxu0 %v14666_v21  ;;  %11629 = vmatprep.subr.bf16.mxu1 %v14668_v18 }
0x1d9d   :  { %v8314_v32 = vpop.f32.mrb[56].mxu0  ;;  %v8385_v52 = vpop.f32.mrb[58].mxu1 }
0x1d9e   :  { %v11862_v63 = vadd.f32 %v8314_v32, %v14552_v28  ;;  %v8316_v16 = vpop.f32.mrb[57].mxu0  ;;  %v8387_v36 = vpop.f32.mrb[59].mxu1  ;;  %v11878_v47 = vadd.f32 %v8385_v52, %v14564_v31 }
0x1d9f   :  { %v11863_v53 = vadd.f32 %v8316_v16, %v14555_v1  ;;  %v11879_v44 = vadd.f32 %v8387_v36, %v14560_v33 }
0x1da0   :  { %v9387_v58 = vmul.f32 -1.442695, %v11862_v63 }
0x1da1   :  { %v9388_v6 = vmul.f32 -1.442695, %v11863_v53  ;;  %v9389_v14 = vmul.f32 -1.442695, %v11879_v44 }
0x1da2   :  { %12469 = vpow2.f32 %v9387_v58 }
0x1da3   :  { %12471 = vpow2.f32 %v9388_v6 }
0x1da4   :  { %12473 = vpow2.f32 %v9389_v14 }
0x1da5   :  { %12475 = vtanh.f32 %v11878_v47 }
0x1dac   :  { %v12470_v61 = vpop.eup %12469 }
0x1dad   :  { %v12472_v20 = vpop.eup %12471  ;;  %v8397_v4 = vadd.f32 1.0, %v12470_v61 }
0x1dae   :  { %v8403_v56 = vadd.f32 1.0, %v12472_v20  ;;  %v12474_v50 = vpop.eup %12473 }
0x1daf   :  { %12477 = vrcp.f32 %v8397_v4  ;;  %v12476_v25 = vpop.eup %12475  ;;  %v8410_v22 = vadd.f32 1.0, %v12474_v50 }
0x1db0   :  { %12479 = vrcp.f32 %v8403_v56 }
0x1db1   :  { %12481 = vrcp.f32 %v8410_v22 }
0x1db9   :  { %v12478_v37 = vpop.eup %12477 }
0x1dba   :  { %v12480_v60 = vpop.eup %12479  ;;  %v8414_v62 = vmul.f32 %v12478_v37, %v12476_v25 }
0x1dbb   :  { %v8413_v12 = vmul.f32 %v12480_v60, %v14769_v30  ;;  %v12482_v52 = vpop.eup %12481 }
0x1dbd   :  { %v14815_v32 = vadd.f32 %v8414_v62, %v8413_v12 }
0x1dbf   :  { %12483 = vtanh.f32 %v14815_v32 }
0x1dc9   :  { %v12484_v63 = vpop.eup %12483 }
0x1dca   :  { %v14818_v16 = vmul.f32 %v12484_v63, %v12482_v52 }
0x1dcc   :  { %8552 = vmatmul.mubr.f32.vlgmr.msra.gmra.mrb[58].mxu0 %v14818_v16  ;;  %8623 = vmatmul.mubr.f32.vlgmr.msra.gmra.mrb[60].mxu1 %v14818_v16 }
0x1dcd   :  { %11599 = vmatpush1.bf16.msra.mxu0 %v14670_v45  ;;  %11631 = vmatpush1.bf16.msra.mxu1 %v14673_v54 }
0x1dce   :  { %11601 = vmatprep.subr.bf16.mxu0 %v14678_v26  ;;  %11633 = vmatprep.subr.bf16.mxu1 %v14680_v39 }
0x1dcf   :  { %8790 = vmatprep.mubr.f32.mxu0 %v12635_v0  ;;  %8861 = vmatprep.mubr.f32.mxu1 %v12635_v0 }
0x1dd1   :  { %11603 = vmatpush1.bf16.msra.mxu0 %v14682_v29  ;;  %11635 = vmatpush1.bf16.msra.mxu1 %v14685_v41 }
0x1dd2   :  { %11605 = vmatprep.subr.bf16.mxu0 %v14690_v42  ;;  %11637 = vmatprep.subr.bf16.mxu1 %v14692_v46 }
0x1dd5   :  { %11607 = vmatpush1.bf16.msra.mxu0 %v14694_v24  ;;  %11639 = vmatpush1.bf16.msra.mxu1 %v14697_v11 }
0x1dd6   :  { %11609 = vmatprep.subr.bf16.mxu0 %v14702_v55  ;;  %11641 = vmatprep.subr.bf16.mxu1 %v14704_v23 }
0x1dd9   :  { %11611 = vmatpush1.bf16.msra.mxu0 %v14706_v27  ;;  %11643 = vmatpush1.bf16.msra.mxu1 %v14709_v15 }
0x1dda   :  { %11613 = vmatprep.subr.bf16.mxu0 %v14714_v8  ;;  %11645 = vmatprep.subr.bf16.mxu1 %v14716_v19 }
0x1ddd   :  { %11615 = vmatpush1.bf16.msra.mxu0 %v14718_v9  ;;  %11647 = vmatpush1.bf16.msra.mxu1 %v14721_v57 }
0x1dde   :  { %11617 = vmatprep.subr.bf16.mxu0 %v14725_v40  ;;  %11649 = vmatprep.subr.bf16.mxu1 %v14728_v7 }
0x1de1   :  { %11619 = vmatpush1.bf16.msra.mxu0 %v14730_v51  ;;  %11651 = vmatpush1.bf16.msra.mxu1 %v14733_v2 }
0x1de2   :  { %11621 = vmatprep.subr.bf16.mxu0 %v14736_v17  ;;  %11653 = vmatprep.subr.bf16.mxu1 %v14738_v13 }
0x1de5   :  { %11623 = vmatpush1.bf16.msra.mxu0 %v14741_v10  ;;  %11655 = vmatpush1.bf16.msra.mxu1 %v14745_v5 }
0x1de6   :  { %11625 = vmatprep.subr.bf16.mxu0 %v14747_v34  ;;  %11657 = vmatprep.subr.bf16.mxu1 %v14750_v35 }
0x1de9   :  { %11627 = vmatpush1.bf16.msra.mxu0 %v14753_v49  ;;  %11659 = vmatpush1.bf16.msra.mxu1 %v14757_v48 }
0x1dea   :  { %11661 = vmatprep.subr.bf16.mxu0 %v14666_v21  ;;  %11693 = vmatprep.subr.bf16.mxu1 %v14668_v18 }
0x1e9f   :  { %v8553_v30 = vpop.f32.mrb[58].mxu0  ;;  %v8624_v36 = vpop.f32.mrb[60].mxu1 }
0x1ea0   :  { %v11864_v53 = vadd.f32 %v8553_v30, %v14552_v28  ;;  %v8555_v58 = vpop.f32.mrb[59].mxu0  ;;  %v8626_v6 = vpop.f32.mrb[61].mxu1  ;;  %v11880_v4 = vadd.f32 %v8624_v36, %v14564_v31 }
0x1ea1   :  { %v11865_v44 = vadd.f32 %v8555_v58, %v14555_v1  ;;  %v11881_v61 = vadd.f32 %v8626_v6, %v14560_v33  ;;  %v9148_v58 = vld [vmem:[%s14999_s5 + $0x20] sm:$0xff]  ;;  %v9149_v6 = vld [vmem:[%s14999_s5 + $0x28] sm:$0xff] }
0x1ea2   :  { %v9390_v14 = vmul.f32 -1.442695, %v11864_v53 }
0x1ea3   :  { %v9391_v47 = vmul.f32 -1.442695, %v11865_v44  ;;  %v9392_v20 = vmul.f32 -1.442695, %v11881_v61  ;;  %v11732_v44 = vpack.c.bf16 %v9149_v6, %v9148_v58 }
0x1ea4   :  { %12485 = vpow2.f32 %v9390_v14  ;;  %v9150_v14 = vld [vmem:[%s14999_s5 + $0x30] sm:$0xff] }
0x1ea5   :  { %12487 = vpow2.f32 %v9391_v47  ;;  %v9151_v47 = vld [vmem:[%s14999_s5 + $0x38] sm:$0xff] }
0x1ea6   :  { %12489 = vpow2.f32 %v9392_v20  ;;  %v11736_v61 = vpack.c.bf16 %v9151_v47, %v9150_v14  ;;  %v9152_v20 = vld [vmem:[%s14999_s5 + $0x40] sm:$0xff] }
0x1ea7   :  { %12491 = vtanh.f32 %v11880_v4 }
0x1eae   :  { %v12486_v21 = vpop.eup %12485 }
0x1eaf   :  { %v12488_v56 = vpop.eup %12487  ;;  %v8636_v18 = vadd.f32 1.0, %v12486_v21  ;;  %v9154_v21 = vld [vmem:[%s14999_s5 + $0x50] sm:$0xff] }
0x1eb0   :  { %v8642_v50 = vadd.f32 1.0, %v12488_v56  ;;  %v12490_v25 = vpop.eup %12489  ;;  %v9155_v56 = vld [vmem:[%s14999_s5 + $0x58] sm:$0xff] }
0x1eb1   :  { %12493 = vrcp.f32 %v8636_v18  ;;  %v12492_v37 = vpop.eup %12491  ;;  %v8649_v12 = vadd.f32 1.0, %v12490_v25  ;;  %v11744_v18 = vpack.c.bf16 %v9155_v56, %v9154_v21  ;;  %v9157_v25 = vld [vmem:[%s14999_s5 + $0x68] sm:$0xff] }
0x1eb2   :  { %12495 = vrcp.f32 %v8642_v50  ;;  %v9156_v50 = vld [vmem:[%s14999_s5 + $0x60] sm:$0xff] }
0x1eb3   :  { %12497 = vrcp.f32 %v8649_v12 }
0x1ebb   :  { %v12494_v60 = vpop.eup %12493 }
0x1ebc   :  { %v12496_v62 = vpop.eup %12495  ;;  %v8653_v22 = vmul.f32 %v12494_v60, %v12492_v37  ;;  %v11748_v37 = vpack.c.bf16 %v9157_v25, %v9156_v50  ;;  %v9158_v60 = vld [vmem:[%s14999_s5 + $0x70] sm:$0xff] }
0x1ebd   :  { %v8652_v52 = vmul.f32 %v12496_v62, %v14815_v32  ;;  %v12498_v30 = vpop.eup %12497  ;;  %v9159_v62 = vld [vmem:[%s14999_s5 + $0x78] sm:$0xff] }
0x1ebf   :  { %v14861_v63 = vadd.f32 %v8653_v22, %v8652_v52  ;;  %v11752_v22 = vpack.c.bf16 %v9159_v62, %v9158_v60 }
0x1ec1   :  { %12499 = vtanh.f32 %v14861_v63 }
0x1ecb   :  { %v12500_v36 = vpop.eup %12499 }
0x1ecc   :  { %v14864_v53 = vmul.f32 %v12500_v36, %v12498_v30 }
0x1ece   :  { %8791 = vmatmul.mubr.f32.vlgmr.msra.gmra.mrb[60].mxu0 %v14864_v53  ;;  %8862 = vmatmul.mubr.f32.vlgmr.msra.gmra.mrb[62].mxu1 %v14864_v53 }
0x1ecf   :  { %11663 = vmatpush1.bf16.msra.mxu0 %v14670_v45  ;;  %11695 = vmatpush1.bf16.msra.mxu1 %v14673_v54  ;;  %v9145_v45 = vld [vmem:[%s14999_s5 + $0x8] sm:$0xff] }
0x1ed0   :  { %11665 = vmatprep.subr.bf16.mxu0 %v14678_v26  ;;  %11697 = vmatprep.subr.bf16.mxu1 %v14680_v39 }
0x1ed1   :  { %9029 = vmatprep.mubr.f32.mxu0 %v12635_v0  ;;  %9100 = vmatprep.mubr.f32.mxu1 %v12635_v0  ;;  %v9144_v0 = vld [vmem:[%s14999_s5] sm:$0xff] }
0x1ed2   :  { %v11724_v54 = vpack.c.bf16 %v9145_v45, %v9144_v0 }
0x1ed3   :  { %11667 = vmatpush1.bf16.msra.mxu0 %v14682_v29  ;;  %11699 = vmatpush1.bf16.msra.mxu1 %v14685_v41 }
0x1ed4   :  { %11669 = vmatprep.subr.bf16.mxu0 %v14690_v42  ;;  %11701 = vmatprep.subr.bf16.mxu1 %v14692_v46 }
0x1ed7   :  { %11671 = vmatpush1.bf16.msra.mxu0 %v14694_v24  ;;  %11703 = vmatpush1.bf16.msra.mxu1 %v14697_v11 }
0x1ed8   :  { %11673 = vmatprep.subr.bf16.mxu0 %v14702_v55  ;;  %11705 = vmatprep.subr.bf16.mxu1 %v14704_v23 }
0x1edb   :  { %11675 = vmatpush1.bf16.msra.mxu0 %v14706_v27  ;;  %11707 = vmatpush1.bf16.msra.mxu1 %v14709_v15 }
0x1edc   :  { %11677 = vmatprep.subr.bf16.mxu0 %v14714_v8  ;;  %11709 = vmatprep.subr.bf16.mxu1 %v14716_v19 }
0x1edf   :  { %11679 = vmatpush1.bf16.msra.mxu0 %v14718_v9  ;;  %11711 = vmatpush1.bf16.msra.mxu1 %v14721_v57 }
0x1ee0   :  { %11681 = vmatprep.subr.bf16.mxu0 %v14725_v40  ;;  %11713 = vmatprep.subr.bf16.mxu1 %v14728_v7 }
0x1ee3   :  { %11683 = vmatpush1.bf16.msra.mxu0 %v14730_v51  ;;  %11715 = vmatpush1.bf16.msra.mxu1 %v14733_v2 }
0x1ee4   :  { %11685 = vmatprep.subr.bf16.mxu0 %v14736_v17  ;;  %11717 = vmatprep.subr.bf16.mxu1 %v14738_v13 }
0x1ee7   :  { %11687 = vmatpush1.bf16.msra.mxu0 %v14741_v10  ;;  %11719 = vmatpush1.bf16.msra.mxu1 %v14745_v5  ;;  %v9146_v5 = vld [vmem:[%s14999_s5 + $0x10] sm:$0xff] }
0x1ee8   :  { %11689 = vmatprep.subr.bf16.mxu0 %v14747_v34  ;;  %11721 = vmatprep.subr.bf16.mxu1 %v14750_v35  ;;  %v9147_v34 = vld [vmem:[%s14999_s5 + $0x18] sm:$0xff] }
0x1ee9   :  { %v11728_v32 = vpack.c.bf16 %v9147_v34, %v9146_v5 }
0x1eeb   :  { %11691 = vmatpush1.bf16.msra.mxu0 %v14753_v49  ;;  %11723 = vmatpush1.bf16.msra.mxu1 %v14757_v48 }
0x1eec   :  { %11725 = vmatprep.subr.bf16.mxu0 %v11724_v54 }
0x1fa1   :  { %v8792_v26 = vpop.f32.mrb[60].mxu0  ;;  %v8863_v39 = vpop.f32.mrb[62].mxu1 }
0x1fa2   :  { %v11866_v29 = vadd.f32 %v8792_v26, %v14552_v28  ;;  %v8794_v41 = vpop.f32.mrb[61].mxu0  ;;  %v8865_v42 = vpop.f32.mrb[63].mxu1  ;;  %v11882_v27 = vadd.f32 %v8863_v39, %v14564_v31 }
0x1fa3   :  { %v11867_v46 = vadd.f32 %v8794_v41, %v14555_v1  ;;  %v11883_v55 = vadd.f32 %v8865_v42, %v14560_v33 }
0x1fa4   :  { %v9393_v24 = vmul.f32 -1.442695, %v11866_v29 }
0x1fa5   :  { %v9394_v11 = vmul.f32 -1.442695, %v11867_v46  ;;  %v9395_v23 = vmul.f32 -1.442695, %v11883_v55 }
0x1fa6   :  { %12501 = vpow2.f32 %v9393_v24 }
0x1fa7   :  { %12503 = vpow2.f32 %v9394_v11 }
0x1fa8   :  { %12505 = vpow2.f32 %v9395_v23 }
0x1fa9   :  { %12507 = vtanh.f32 %v11882_v27 }
0x1fb0   :  { %v12502_v15 = vpop.eup %12501 }
0x1fb1   :  { %v12504_v8 = vpop.eup %12503  ;;  %v8875_v19 = vadd.f32 1.0, %v12502_v15 }
0x1fb2   :  { %v8881_v9 = vadd.f32 1.0, %v12504_v8  ;;  %v12506_v57 = vpop.eup %12505 }
0x1fb3   :  { %12509 = vrcp.f32 %v8875_v19  ;;  %v12508_v40 = vpop.eup %12507  ;;  %v8888_v17 = vadd.f32 1.0, %v12506_v57 }
0x1fb4   :  { %12511 = vrcp.f32 %v8881_v9 }
0x1fb5   :  { %12513 = vrcp.f32 %v8888_v17 }
0x1fbd   :  { %v12510_v7 = vpop.eup %12509 }
0x1fbe   :  { %v12512_v51 = vpop.eup %12511  ;;  %v8892_v2 = vmul.f32 %v12510_v7, %v12508_v40 }
0x1fbf   :  { %v8891_v13 = vmul.f32 %v12512_v51, %v14861_v63  ;;  %v12514_v35 = vpop.eup %12513 }
0x1fc1   :  { %v14911_v10 = vadd.f32 %v8892_v2, %v8891_v13 }
0x1fc3   :  { %12515 = vtanh.f32 %v14911_v10 }
0x1fcd   :  { %v12516_v49 = vpop.eup %12515 }
0x1fce   :  { %v8895_v48 = vmul.f32 %v12516_v49, %v12514_v35 }
0x1fd0   :  { %9030 = vmatmul.mubr.f32.vlgmr.msra.gmra.mrb[62].mxu0 %v8895_v48  ;;  %9101 = vmatmul.mubr.f32.vlgmr.msra.gmra.mrb[64].mxu1 %v8895_v48 }
0x1fd1   :  { %11727 = vmatpush3.bf16.msra.mxu0 %v11724_v54  ;;  %9456 = vmatprep.mubr.f32.mxu0 %v14570_v3  ;;  %v9153_v3 = vld [vmem:[%s14999_s5 + $0x48] sm:$0xff] }
0x1fd2   :  { %11729 = vmatprep.subr.bf16.mxu0 %v11728_v32  ;;  %v11740_v4 = vpack.c.bf16 %v9153_v3, %v9152_v20 }
0x1fd5   :  { %11731 = vmatpush3.bf16.msra.mxu0 %v11728_v32 }
0x1fd6   :  { %11733 = vmatprep.subr.bf16.mxu0 %v11732_v44 }
0x1fd9   :  { %11735 = vmatpush3.bf16.msra.mxu0 %v11732_v44 }
0x1fda   :  { %11737 = vmatprep.subr.bf16.mxu0 %v11736_v61 }
0x1fdd   :  { %11739 = vmatpush3.bf16.msra.mxu0 %v11736_v61 }
0x1fde   :  { %11741 = vmatprep.subr.bf16.mxu0 %v11740_v4 }
0x1fe1   :  { %11743 = vmatpush3.bf16.msra.mxu0 %v11740_v4 }
0x1fe2   :  { %11745 = vmatprep.subr.bf16.mxu0 %v11744_v18 }
0x1fe5   :  { %11747 = vmatpush3.bf16.msra.mxu0 %v11744_v18 }
0x1fe6   :  { %11749 = vmatprep.subr.bf16.mxu0 %v11748_v37 }
0x1fe9   :  { %11751 = vmatpush3.bf16.msra.mxu0 %v11748_v37 }
0x1fea   :  { %11753 = vmatprep.subr.bf16.mxu0 %v11752_v22 }
0x1fed   :  { %11755 = vmatpush3.bf16.msra.mxu0 %v11752_v22 }
0x1ff0   :  { %9457 = vmatmul.mubr.f32.vlgmr.msra.gmra.mrb[64].mxu0 %v14616_v59 }
0x1ff1   :  { %9459 = vmatprep.mubr.f32.mxu0 %v14660_v43 }
0x1ff4   :  { %9460 = vmatmul.mubr.f32.gmra.mrb[66].mxu0 %v14772_v38 }
0x1ff5   :  { %9462 = vmatprep.mubr.f32.mxu0 %v14818_v16 }
0x1ff8   :  { %9463 = vmatmul.mubr.f32.gmra.mrb[68].mxu0 %v14864_v53 }
0x1ff9   :  { %9465 = vmatprep.mubr.f32.mxu0 %v8895_v48 }
0x20a3   :  { %v9031_v12 = vpop.f32.mrb[62].mxu0  ;;  %v9102_v52 = vpop.f32.mrb[64].mxu1 }
0x20a4   :  { %v11868_v63 = vadd.f32 %v9031_v12, %v14552_v28  ;;  %v9033_v30 = vpop.f32.mrb[63].mxu0  ;;  %v9104_v36 = vpop.f32.mrb[65].mxu1  ;;  %v11884_v38 = vadd.f32 %v9102_v52, %v14564_v31 }
0x20a5   :  { %v11869_v0 = vadd.f32 %v9033_v30, %v14555_v1  ;;  %v11885_v59 = vadd.f32 %v9104_v36, %v14560_v33  ;;  %v9399_v33 = vld [vmem:[%s15000_s6] ss:$0 sm:$0xff] }
0x20a6   :  { %v9396_v45 = vmul.f32 -1.442695, %v11868_v63 }
0x20a7   :  { %v9397_v54 = vmul.f32 -1.442695, %v11869_v0  ;;  %v9398_v43 = vmul.f32 -1.442695, %v11885_v59 }
0x20a8   :  { %12517 = vpow2.f32 %v9396_v45 }
0x20a9   :  { %12519 = vpow2.f32 %v9397_v54 }
0x20aa   :  { %12521 = vpow2.f32 %v9398_v43 }
0x20ab   :  { %12523 = vtanh.f32 %v11884_v38 }
0x20b2   :  { %v12518_v16 = vpop.eup %12517 }
0x20b3   :  { %v12520_v53 = vpop.eup %12519  ;;  %v9114_v26 = vadd.f32 1.0, %v12518_v16 }
0x20b4   :  { %v9120_v39 = vadd.f32 1.0, %v12520_v53  ;;  %v12522_v28 = vpop.eup %12521 }
0x20b5   :  { %12525 = vrcp.f32 %v9114_v26  ;;  %v12524_v29 = vpop.eup %12523  ;;  %v9127_v46 = vadd.f32 1.0, %v12522_v28 }
0x20b6   :  { %12527 = vrcp.f32 %v9120_v39 }
0x20b7   :  { %12529 = vrcp.f32 %v9127_v46 }
0x20bf   :  { %v12526_v1 = vpop.eup %12525 }
0x20c0   :  { %v12528_v41 = vpop.eup %12527  ;;  %v9131_v42 = vmul.f32 %v12526_v1, %v12524_v29 }
0x20c1   :  { %v9130_v24 = vmul.f32 %v12528_v41, %v14911_v10  ;;  %v12530_v2 = vpop.eup %12529 }
0x20c3   :  { %v9458_v31 = vpop.f32.mrb[64].mxu0  ;;  %v9132_v11 = vadd.f32 %v9131_v42, %v9130_v24 }
0x20c4   :  { %v9239_v55 = vadd.f32 %v9458_v31, %v9399_v33  ;;  %v9233_v23 = vpop.f32.mrb[65].mxu0 }
0x20c5   :  { %v9234_v27 = vadd.f32 %v9399_v33, %v9233_v23  ;;  %12531 = vtanh.f32 %v9132_v11 }
0x20c6   :  { %9273 = vst [vmem:[%s15001_s7 + $0x8] sm:$0xff] %v9239_v55 }
0x20c7   :  { %9272 = vst [vmem:[%s15001_s7] sm:$0xff] %v9234_v27  ;;  %v9461_v15 = vpop.f32.mrb[66].mxu0 }
0x20c8   :  { %v9249_v8 = vadd.f32 %v9461_v15, %v9399_v33  ;;  %v9243_v19 = vpop.f32.mrb[67].mxu0 }
0x20c9   :  { %v9244_v9 = vadd.f32 %v9399_v33, %v9243_v19 }
0x20ca   :  { %9275 = vst [vmem:[%s15001_s7 + $0x18] sm:$0xff] %v9249_v8 }
0x20cb   :  { %9274 = vst [vmem:[%s15001_s7 + $0x10] sm:$0xff] %v9244_v9  ;;  %v9464_v57 = vpop.f32.mrb[68].mxu0 }
0x20cc   :  { %v9259_v40 = vadd.f32 %v9464_v57, %v9399_v33  ;;  %v9253_v7 = vpop.f32.mrb[69].mxu0 }
0x20cd   :  { %v9254_v51 = vadd.f32 %v9399_v33, %v9253_v7 }
0x20ce   :  { %9277 = vst [vmem:[%s15001_s7 + $0x28] sm:$0xff] %v9259_v40 }
0x20cf   :  { %v12532_v17 = vpop.eup %12531  ;;  %9276 = vst [vmem:[%s15001_s7 + $0x20] sm:$0xff] %v9254_v51 }
0x20d0   :  { %v9134_v13 = vmul.f32 %v12532_v17, %v12530_v2 }
0x20d2   :  { %9466 = vmatmul.mubr.f32.gmra.mrb[70].mxu0 %v9134_v13 }
0x21a5   :  { %v9467_v10 = vpop.f32.mrb[70].mxu0 }
0x21a6   :  { %v9269_v5 = vadd.f32 %v9467_v10, %v9399_v33  ;;  %v9263_v34 = vpop.f32.mrb[71].mxu0 }
0x21a7   :  { %v9264_v35 = vadd.f32 %v9399_v33, %v9263_v34 }
0x21a8   :  { %9279 = vst [vmem:[%s15001_s7 + $0x38] sm:$0xff] %v9269_v5 }
0x21a9   :  { %9278 = vst [vmem:[%s15001_s7 + $0x30] sm:$0xff] %v9264_v35 }
0x21aa   :  { %9284 = vsyncpa [#allocation5], 1 }
0x21ab   :  { %9285 = vsyncpa [#allocation7], 1 }
0x21ac   :  { %9286 = vsyncpa [#allocation10], 1 }

</bundles_post_ra>
